<compile_context>
chip_gen: v7x
topology: tpu7x:2x2x1
jax: 0.10.0
libtpu: 0.0.40
codegen_flags: <defaults>
</compile_context>

<pallas_src>
import jax
import jax.numpy as jnp
from jax.experimental import pallas as pl
from jax.experimental.pallas import tpu as pltpu

DIMS = [64, 128, 256, 512, 512, 512, 512]
KERNELS = [5, 3, 3, 3, 3, 3, 3]
STRIDES = [1, 2, 2, 2, 2, 2, 2]
BN_EPS = 1e-5
VMEM_LIMIT_BYTES = 32 * 1024 * 1024


def _round_up(x, m):
    return (x + m - 1) // m * m


# ---------------------------------------------------------------------------
# Static per-layer geometry (incl. pruning of taps that only read padding and
# the "carried" channel padding of the previous layer)
# ---------------------------------------------------------------------------
def _layer_geometry(c_in_carry, h, w, layer_idx):
    c_out, k, s = DIMS[layer_idx], KERNELS[layer_idx], STRIDES[layer_idx]
    p = k // 2
    ho = (h + 2 * p - k) // s + 1
    wo = (w + 2 * p - k) // s + 1
    rows_valid = [i for i in range(k)
                  if any(0 <= o * s + i - p < h for o in range(ho))]
    cols_valid = [j for j in range(k)
                  if any(0 <= o * s + j - p < w for o in range(wo))]
    taps = [(i, j) for i in rows_valid for j in cols_valid]
    K_raw = len(taps) * c_in_carry
    Kp = _round_up(K_raw, 128)
    Np = _round_up(c_out, 128)
    return dict(c_in=c_in_carry, c_out=c_out, k=k, s=s, p=p, ho=ho, wo=wo,
                taps=taps, K_raw=K_raw, Kp=Kp, Np=Np)


def _network_plan(channels, height, width):
    """Geometry of every layer + index of the first 1x1-spatial (fused) layer."""
    geos = []
    c, h, w = channels, height, width
    for li in range(7):
        g = _layer_geometry(c, h, w, li)
        geos.append(g)
        c, h, w = g["Np"], g["ho"], g["wo"]          # carry Np-padded channels
    fuse_start = 7
    for li in range(7):
        if geos[li]["ho"] == 1 and geos[li]["wo"] == 1:
            fuse_start = li
            break
    return geos, fuse_start


def _im2col(x_nhwc, geo):
    """Builds patches directly at the padded (M, Kp) width, bf16, one concat."""
    n = x_nhwc.shape[0]
    s, p, ho, wo = geo["s"], geo["p"], geo["ho"], geo["wo"]
    xp = jnp.pad(x_nhwc, ((0, 0), (p, p), (p, p), (0, 0)))
    cols = [xp[:, i:i + (ho - 1) * s + 1:s, j:j + (wo - 1) * s + 1:s, :]
            for (i, j) in geo["taps"]]
    if geo["Kp"] > geo["K_raw"]:                      # fold K-pad into concat
        cols.append(jnp.zeros((n, ho, wo, geo["Kp"] - geo["K_raw"]),
                              x_nhwc.dtype))
    patches = cols[0] if len(cols) == 1 else jnp.concatenate(cols, axis=-1)
    return patches.reshape(n * ho * wo, geo["Kp"])


def _choose_tiles(M):
    """Returns (TM, Mp). Prefers big divisible tiles; small M uses full-dim tile."""
    for tm in (512, 256, 128):
        if M >= tm and M % tm == 0:
            return tm, M
    if M < 128:
        mp = _round_up(max(M, 16), 16)                # bf16 sublane packing
        return mp, mp
    mp = _round_up(M, 256)                            # large ragged M
    return 256, mp


# ---------------------------------------------------------------------------
# Pallas kernels
# ---------------------------------------------------------------------------
def _matmul_bias_relu_kernel(a_ref, w_ref, s_ref, o_ref):
    acc = jnp.dot(a_ref[...], w_ref[...], preferred_element_type=jnp.float32)
    y = acc + s_ref[...]                              # f32 epilogue (v5e-safe)
    o_ref[...] = jnp.maximum(y, 0.0).astype(o_ref.dtype)


def _make_tail_kernel(n_layers):
    """Chains n_layers of (matmul + shift + ReLU) with the activation in VMEM."""
    def kernel(*refs):
        a_ref = refs[0]
        o_ref = refs[-1]
        x = a_ref[...]
        for li in range(n_layers):
            w_ref = refs[1 + 2 * li]
            s_ref = refs[2 + 2 * li]
            y = jnp.dot(x, w_ref[...],
                        preferred_element_type=jnp.float32) + s_ref[...]
            x = jnp.maximum(y, 0.0).astype(jnp.bfloat16)
        o_ref[...] = x.astype(o_ref.dtype)
    return kernel


# ---------------------------------------------------------------------------
# Pallas call wrappers
# ---------------------------------------------------------------------------
def _conv_layer(patches, w_pad, shift_pad, M, geo):
    """patches: (M, Kp) bf16, w_pad: (Kp, Np) bf16, shift_pad: (1, Np) f32."""
    Kp, Np = geo["Kp"], geo["Np"]
    TM, Mp = _choose_tiles(M)
    if Mp != M:
        patches = jnp.pad(patches, ((0, Mp - M), (0, 0)))

    grid = (Mp // TM,)
    cost = pl.CostEstimate(
        flops=2 * Mp * Kp * Np,
        transcendentals=0,
        bytes_accessed=(Mp * Kp + Kp * Np + Mp * Np) * 2 + Np * 4)

    out = pl.pallas_call(
        _matmul_bias_relu_kernel,
        out_shape=jax.ShapeDtypeStruct((Mp, Np), jnp.bfloat16),
        grid_spec=pltpu.PrefetchScalarGridSpec(
            num_scalar_prefetch=0,
            grid=grid,
            in_specs=[
                pl.BlockSpec((TM, Kp), lambda i: (i, 0)),
                pl.BlockSpec((Kp, Np), lambda i: (0, 0)),   # weight resident
                pl.BlockSpec((1, Np), lambda i: (0, 0)),
            ],
            out_specs=pl.BlockSpec((TM, Np), lambda i: (i, 0)),
        ),
        compiler_params=pltpu.CompilerParams(
            dimension_semantics=("parallel",),
            vmem_limit_bytes=VMEM_LIMIT_BYTES),
        cost_estimate=cost,
    )(patches, w_pad, shift_pad)
    if Mp != M:
        out = out[:M]
    return out


def _fused_tail(patches, prepared, geos, fuse_start, M):
    """Single pallas_call chaining all 1x1-spatial layers; activation stays in VMEM."""
    n_layers = 7 - fuse_start
    Np_out = geos[6]["Np"]
    Mp = _round_up(max(M, 16), 16)
    if Mp != M:
        patches = jnp.pad(patches, ((0, Mp - M), (0, 0)))

    args = [patches]
    flops = 0
    bytes_acc = patches.size * 2 + Mp * Np_out * 2
    for li in range(fuse_start, 7):
        args.append(prepared[li]["w"])
        args.append(prepared[li]["shift"])
        flops += 2 * Mp * geos[li]["Kp"] * geos[li]["Np"]
        bytes_acc += prepared[li]["w"].size * 2 + prepared[li]["shift"].size * 4

    out = pl.pallas_call(
        _make_tail_kernel(n_layers),
        out_shape=jax.ShapeDtypeStruct((Mp, Np_out), jnp.bfloat16),
        compiler_params=pltpu.CompilerParams(
            vmem_limit_bytes=VMEM_LIMIT_BYTES),
        cost_estimate=pl.CostEstimate(flops=flops, transcendentals=0,
                                      bytes_accessed=bytes_acc),
    )(*args)
    return out[:M]


# ---------------------------------------------------------------------------
# Parameters: raw (PyTorch-like) init + one-time fold/pack for the kernels
# ---------------------------------------------------------------------------
def init_params(channels, key):
    params = []
    c_in = channels
    for i in range(7):
        c_out, k = DIMS[i], KERNELS[i]
        key, kw, kb, kg, kbt, km, kv = jax.random.split(key, 7)
        params.append(dict(
            w=jax.random.normal(kw, (c_out, c_in, k, k), jnp.float32) * 0.05,
            b=jax.random.normal(kb, (c_out,), jnp.float32) * 0.05,
            gamma=1.0 + 0.1 * jax.random.normal(kg, (c_out,), jnp.float32),
            beta=0.1 * jax.random.normal(kbt, (c_out,), jnp.float32),
            running_mean=0.1 * jax.random.normal(km, (c_out,), jnp.float32),
            running_var=1.0 + 0.1 * jax.random.uniform(kv, (c_out,), jnp.float32),
        ))
        c_in = c_out
    return params


def prepare_params(params, channels, height, width):
    """One-time: BN fold, tap pruning, carried-Cin / K / N padding, bf16 cast."""
    geos, _ = _network_plan(channels, height, width)
    prepared = []
    c_in_real = channels
    c_in_carry = channels
    for li in range(7):
        g = geos[li]
        p = params[li]
        scale = p["gamma"] / jnp.sqrt(p["running_var"] + BN_EPS)
        shift = (p["b"] - p["running_mean"]) * scale + p["beta"]
        # (Cout, Cin, kh, kw) -> (kh, kw, Cin, Cout)
        w_t = jnp.transpose(p["w"], (2, 3, 1, 0))
        if c_in_carry > c_in_real:                    # absorb carried channel pad
            w_t = jnp.pad(w_t, ((0, 0), (0, 0),
                                (0, c_in_carry - c_in_real), (0, 0)))
        w_sel = jnp.concatenate([w_t[i, j] for (i, j) in g["taps"]], axis=0)
        w_fold = w_sel * scale[None, :]               # fold BN scale into weights
        w_pad = jnp.pad(w_fold, ((0, g["Kp"] - g["K_raw"]),
                                 (0, g["Np"] - g["c_out"])))
        shift_pad = jnp.pad(shift, (0, g["Np"] - g["c_out"])).reshape(1, -1)
        prepared.append(dict(w=w_pad.astype(jnp.bfloat16),
                             shift=shift_pad.astype(jnp.float32)))
        c_in_real = g["c_out"]
        c_in_carry = g["Np"]
    return jax.tree_util.tree_map(jax.device_put, prepared)


# ---------------------------------------------------------------------------
# Forward
# ---------------------------------------------------------------------------
@jax.jit
def style_encoder_forward(x_nchw, prepared):
    """x_nchw: (N, C, H, W) f32 -> (N, 512, H', W') f32."""
    n, c0, h0, w0 = x_nchw.shape
    geos, fuse_start = _network_plan(c0, h0, w0)

    x = jnp.transpose(x_nchw, (0, 2, 3, 1)).astype(jnp.bfloat16)   # NHWC bf16

    for li in range(fuse_start):                      # per-layer fused matmuls
        g = geos[li]
        patches = _im2col(x, g)
        M = n * g["ho"] * g["wo"]
        y = _conv_layer(patches, prepared[li]["w"], prepared[li]["shift"], M, g)
        x = y.reshape(n, g["ho"], g["wo"], g["Np"])   # carry padded channels

    if fuse_start < 7:                                # fused 1x1-spatial tail
        g0 = geos[fuse_start]
        patches = _im2col(x, g0)
        y = _fused_tail(patches, prepared, geos, fuse_start, n)
        x = y.reshape(n, 1, 1, geos[6]["Np"])

    x = x[..., :DIMS[6]]                              # no-op (512 == Np)
    return jnp.transpose(x, (0, 3, 1, 2)).astype(jnp.float32)      # NCHW f32


# ---------------------------------------------------------------------------
# Reference (pure JAX, f32) for a sanity check
# ---------------------------------------------------------------------------
def _reference_forward(x_nchw, params):
    x = x_nchw
    for i in range(7):
        p = params[i]
        k, s = KERNELS[i], STRIDES[i]
        pad = k // 2
        y = jax.lax.conv_general_dilated(
            x, p["w"], window_strides=(s, s),
            padding=((pad, pad), (pad, pad)),
            dimension_numbers=("NCHW", "OIHW", "NCHW"))
        y = y + p["b"][None, :, None, None]
        scale = p["gamma"] / jnp.sqrt(p["running_var"] + BN_EPS)
        y = ((y - p["running_mean"][None, :, None, None])
             * scale[None, :, None, None] + p["beta"][None, :, None, None])
        x = jnp.maximum(y, 0.0)
    return x


if __name__ == "__main__":
    key = jax.random.PRNGKey(0)
    k_x, k_p = jax.random.split(key)

    batch, channels, spatial = 2, 4, 16               # 16 -> 16,8,4,2,1,1,1
    x = jax.random.normal(k_x, (batch, channels, spatial, spatial), jnp.float32)
    params = init_params(channels, k_p)
    prepared = prepare_params(params, channels, spatial, spatial)

    out = style_encoder_forward(x, prepared)
    out = jax.block_until_ready(out)

    ref = _reference_forward(x, params)
    assert out.shape == ref.shape, (out.shape, ref.shape)
    max_err = float(jnp.max(jnp.abs(out - ref)))
    # bf16 matmul operands / activations across 7 chained layers -> loose tol.
    assert jnp.allclose(out, ref, atol=1e-1, rtol=1e-1), max_err

    print("KERNEL_OK")
</pallas_src>

<mosaic_0001>
module attributes {stable_mosaic.version = 11 : i64} {
  func.func @_matmul_bias_relu_kernel(%arg0: i32, %arg1: memref<512x128xbf16, #tpu.memory_space<vmem>>, %arg2: memref<128x128xbf16, #tpu.memory_space<vmem>>, %arg3: memref<1x128xf32, #tpu.memory_space<vmem>>, %arg4: memref<512x128xbf16, #tpu.memory_space<vmem>>) attributes {dimension_semantics = [#tpu.dimension_semantics<parallel>], iteration_bounds = array<i64: 1>, scalar_prefetch = 0 : i64, scratch_operands = 0 : i64, tpu.core_type = #tpu.core_type<tc>, window_params = [{transform_indices = @transform_0, window_bounds = array<i64: 512, 128>}, {pipeline_mode = #tpu.pipeline_mode<synchronous>, transform_indices = @transform_1, window_bounds = array<i64: 128, 128>}, {pipeline_mode = #tpu.pipeline_mode<synchronous>, transform_indices = @transform_2, window_bounds = array<i64: 1, 128>}, {transform_indices = @transform_3, window_bounds = array<i64: 512, 128>}]} {
    %c0 = arith.constant 0 : index
    %c0_0 = arith.constant 0 : index
    %0 = vector.load %arg1[%c0, %c0_0] : memref<512x128xbf16, #tpu.memory_space<vmem>>, vector<512x128xbf16>
    %c0_1 = arith.constant 0 : index
    %c0_2 = arith.constant 0 : index
    %1 = vector.load %arg2[%c0_1, %c0_2] : memref<128x128xbf16, #tpu.memory_space<vmem>>, vector<128x128xbf16>
    %cst = arith.constant dense<0.000000e+00> : vector<512x128xf32>
    %2 = tpu.matmul %0, %1, %cst {dimension_numbers = #tpu.dot_dimension_numbers<[1], [0], [0], [1], [0, 0, 1, 1], [], []>} : vector<512x128xbf16>, vector<128x128xbf16>, vector<512x128xf32> -> vector<512x128xf32>
    %c0_3 = arith.constant 0 : index
    %c0_4 = arith.constant 0 : index
    %3 = vector.load %arg3[%c0_3, %c0_4] : memref<1x128xf32, #tpu.memory_space<vmem>>, vector<1x128xf32>
    %4 = vector.broadcast %3 : vector<1x128xf32> to vector<512x128xf32>
    %5 = arith.addf %2, %4 : vector<512x128xf32>
    %cst_5 = arith.constant 0.000000e+00 : f32
    %6 = vector.broadcast %cst_5 : f32 to vector<512x128xf32>
    %7 = arith.maximumf %5, %6 : vector<512x128xf32>
    %8 = arith.truncf %7 : vector<512x128xf32> to vector<512x128xbf16>
    %c0_6 = arith.constant 0 : index
    %c0_7 = arith.constant 0 : index
    %9 = vector.load %arg4[%c0_6, %c0_7] : memref<512x128xbf16, #tpu.memory_space<vmem>>, vector<512x128xbf16>
    tpu.vector_store %arg4[%c0_6, %c0_7], %8 {strides = array<i32>} : memref<512x128xbf16, #tpu.memory_space<vmem>>, vector<512x128xbf16>,
    return
  }
  func.func @transform_0(%arg0: i32) -> (i32, i32) {
    %c0_i32 = arith.constant 0 : i32
    %c0_i32_0 = arith.constant 0 : i32
    return %arg0, %c0_i32 : i32, i32
  }
  func.func @transform_1(%arg0: i32) -> (i32, i32) {
    %c0_i32 = arith.constant 0 : i32
    %c0_i32_0 = arith.constant 0 : i32
    %c0_i32_1 = arith.constant 0 : i32
    return %c0_i32, %c0_i32_0 : i32, i32
  }
  func.func @transform_2(%arg0: i32) -> (i32, i32) {
    %c0_i32 = arith.constant 0 : i32
    %c0_i32_0 = arith.constant 0 : i32
    %c0_i32_1 = arith.constant 0 : i32
    return %c0_i32, %c0_i32_0 : i32, i32
  }
  func.func @transform_3(%arg0: i32) -> (i32, i32) {
    %c0_i32 = arith.constant 0 : i32
    %c0_i32_0 = arith.constant 0 : i32
    return %arg0, %c0_i32 : i32, i32
  }
}

module attributes {stable_mosaic.version = 11 : i64} {
  func.func @_matmul_bias_relu_kernel(%arg0: i32, %arg1: memref<128x1152xbf16, #tpu.memory_space<vmem>>, %arg2: memref<1152x128xbf16, #tpu.memory_space<vmem>>, %arg3: memref<1x128xf32, #tpu.memory_space<vmem>>, %arg4: memref<128x128xbf16, #tpu.memory_space<vmem>>) attributes {dimension_semantics = [#tpu.dimension_semantics<parallel>], iteration_bounds = array<i64: 1>, scalar_prefetch = 0 : i64, scratch_operands = 0 : i64, tpu.core_type = #tpu.core_type<tc>, window_params = [{transform_indices = @transform_0, window_bounds = array<i64: 128, 1152>}, {pipeline_mode = #tpu.pipeline_mode<synchronous>, transform_indices = @transform_1, window_bounds = array<i64: 1152, 128>}, {pipeline_mode = #tpu.pipeline_mode<synchronous>, transform_indices = @transform_2, window_bounds = array<i64: 1, 128>}, {transform_indices = @transform_3, window_bounds = array<i64: 128, 128>}]} {
    %c0 = arith.constant 0 : index
    %c0_0 = arith.constant 0 : index
    %0 = vector.load %arg1[%c0, %c0_0] : memref<128x1152xbf16, #tpu.memory_space<vmem>>, vector<128x1152xbf16>
    %c0_1 = arith.constant 0 : index
    %c0_2 = arith.constant 0 : index
    %1 = vector.load %arg2[%c0_1, %c0_2] : memref<1152x128xbf16, #tpu.memory_space<vmem>>, vector<1152x128xbf16>
    %cst = arith.constant dense<0.000000e+00> : vector<128x128xf32>
    %2 = tpu.matmul %0, %1, %cst {dimension_numbers = #tpu.dot_dimension_numbers<[1], [0], [0], [1], [0, 0, 1, 1], [], []>} : vector<128x1152xbf16>, vector<1152x128xbf16>, vector<128x128xf32> -> vector<128x128xf32>
    %c0_3 = arith.constant 0 : index
    %c0_4 = arith.constant 0 : index
    %3 = vector.load %arg3[%c0_3, %c0_4] : memref<1x128xf32, #tpu.memory_space<vmem>>, vector<1x128xf32>
    %4 = vector.broadcast %3 : vector<1x128xf32> to vector<128x128xf32>
    %5 = arith.addf %2, %4 : vector<128x128xf32>
    %cst_5 = arith.constant 0.000000e+00 : f32
    %6 = vector.broadcast %cst_5 : f32 to vector<128x128xf32>
    %7 = arith.maximumf %5, %6 : vector<128x128xf32>
    %8 = arith.truncf %7 : vector<128x128xf32> to vector<128x128xbf16>
    %c0_6 = arith.constant 0 : index
    %c0_7 = arith.constant 0 : index
    %9 = vector.load %arg4[%c0_6, %c0_7] : memref<128x128xbf16, #tpu.memory_space<vmem>>, vector<128x128xbf16>
    tpu.vector_store %arg4[%c0_6, %c0_7], %8 {strides = array<i32>} : memref<128x128xbf16, #tpu.memory_space<vmem>>, vector<128x128xbf16>,
    return
  }
  func.func @transform_0(%arg0: i32) -> (i32, i32) {
    %c0_i32 = arith.constant 0 : i32
    %c0_i32_0 = arith.constant 0 : i32
    return %arg0, %c0_i32 : i32, i32
  }
  func.func @transform_1(%arg0: i32) -> (i32, i32) {
    %c0_i32 = arith.constant 0 : i32
    %c0_i32_0 = arith.constant 0 : i32
    %c0_i32_1 = arith.constant 0 : i32
    return %c0_i32, %c0_i32_0 : i32, i32
  }
  func.func @transform_2(%arg0: i32) -> (i32, i32) {
    %c0_i32 = arith.constant 0 : i32
    %c0_i32_0 = arith.constant 0 : i32
    %c0_i32_1 = arith.constant 0 : i32
    return %c0_i32, %c0_i32_0 : i32, i32
  }
  func.func @transform_3(%arg0: i32) -> (i32, i32) {
    %c0_i32 = arith.constant 0 : i32
    %c0_i32_0 = arith.constant 0 : i32
    return %arg0, %c0_i32 : i32, i32
  }
}

module attributes {stable_mosaic.version = 11 : i64} {
  func.func @_matmul_bias_relu_kernel(%arg0: i32, %arg1: memref<32x1152xbf16, #tpu.memory_space<vmem>>, %arg2: memref<1152x256xbf16, #tpu.memory_space<vmem>>, %arg3: memref<1x256xf32, #tpu.memory_space<vmem>>, %arg4: memref<32x256xbf16, #tpu.memory_space<vmem>>) attributes {dimension_semantics = [#tpu.dimension_semantics<parallel>], iteration_bounds = array<i64: 1>, scalar_prefetch = 0 : i64, scratch_operands = 0 : i64, tpu.core_type = #tpu.core_type<tc>, window_params = [{transform_indices = @transform_0, window_bounds = array<i64: 32, 1152>}, {pipeline_mode = #tpu.pipeline_mode<synchronous>, transform_indices = @transform_1, window_bounds = array<i64: 1152, 256>}, {pipeline_mode = #tpu.pipeline_mode<synchronous>, transform_indices = @transform_2, window_bounds = array<i64: 1, 256>}, {transform_indices = @transform_3, window_bounds = array<i64: 32, 256>}]} {
    %c0 = arith.constant 0 : index
    %c0_0 = arith.constant 0 : index
    %0 = vector.load %arg1[%c0, %c0_0] : memref<32x1152xbf16, #tpu.memory_space<vmem>>, vector<32x1152xbf16>
    %c0_1 = arith.constant 0 : index
    %c0_2 = arith.constant 0 : index
    %1 = vector.load %arg2[%c0_1, %c0_2] : memref<1152x256xbf16, #tpu.memory_space<vmem>>, vector<1152x256xbf16>
    %cst = arith.constant dense<0.000000e+00> : vector<32x256xf32>
    %2 = tpu.matmul %0, %1, %cst {dimension_numbers = #tpu.dot_dimension_numbers<[1], [0], [0], [1], [0, 0, 1, 1], [], []>} : vector<32x1152xbf16>, vector<1152x256xbf16>, vector<32x256xf32> -> vector<32x256xf32>
    %c0_3 = arith.constant 0 : index
    %c0_4 = arith.constant 0 : index
    %3 = vector.load %arg3[%c0_3, %c0_4] : memref<1x256xf32, #tpu.memory_space<vmem>>, vector<1x256xf32>
    %4 = vector.broadcast %3 : vector<1x256xf32> to vector<32x256xf32>
    %5 = arith.addf %2, %4 : vector<32x256xf32>
    %cst_5 = arith.constant 0.000000e+00 : f32
    %6 = vector.broadcast %cst_5 : f32 to vector<32x256xf32>
    %7 = arith.maximumf %5, %6 : vector<32x256xf32>
    %8 = arith.truncf %7 : vector<32x256xf32> to vector<32x256xbf16>
    %c0_6 = arith.constant 0 : index
    %c0_7 = arith.constant 0 : index
    %9 = vector.load %arg4[%c0_6, %c0_7] : memref<32x256xbf16, #tpu.memory_space<vmem>>, vector<32x256xbf16>
    tpu.vector_store %arg4[%c0_6, %c0_7], %8 {strides = array<i32>} : memref<32x256xbf16, #tpu.memory_space<vmem>>, vector<32x256xbf16>,
    return
  }
  func.func @transform_0(%arg0: i32) -> (i32, i32) {
    %c0_i32 = arith.constant 0 : i32
    %c0_i32_0 = arith.constant 0 : i32
    return %arg0, %c0_i32 : i32, i32
  }
  func.func @transform_1(%arg0: i32) -> (i32, i32) {
    %c0_i32 = arith.constant 0 : i32
    %c0_i32_0 = arith.constant 0 : i32
    %c0_i32_1 = arith.constant 0 : i32
    return %c0_i32, %c0_i32_0 : i32, i32
  }
  func.func @transform_2(%arg0: i32) -> (i32, i32) {
    %c0_i32 = arith.constant 0 : i32
    %c0_i32_0 = arith.constant 0 : i32
    %c0_i32_1 = arith.constant 0 : i32
    return %c0_i32, %c0_i32_0 : i32, i32
  }
  func.func @transform_3(%arg0: i32) -> (i32, i32) {
    %c0_i32 = arith.constant 0 : i32
    %c0_i32_0 = arith.constant 0 : i32
    return %arg0, %c0_i32 : i32, i32
  }
}

module attributes {stable_mosaic.version = 11 : i64} {
  func.func @_matmul_bias_relu_kernel(%arg0: i32, %arg1: memref<16x2304xbf16, #tpu.memory_space<vmem>>, %arg2: memref<2304x512xbf16, #tpu.memory_space<vmem>>, %arg3: memref<1x512xf32, #tpu.memory_space<vmem>>, %arg4: memref<16x512xbf16, #tpu.memory_space<vmem>>) attributes {dimension_semantics = [#tpu.dimension_semantics<parallel>], iteration_bounds = array<i64: 1>, scalar_prefetch = 0 : i64, scratch_operands = 0 : i64, tpu.core_type = #tpu.core_type<tc>, window_params = [{transform_indices = @transform_0, window_bounds = array<i64: 16, 2304>}, {pipeline_mode = #tpu.pipeline_mode<synchronous>, transform_indices = @transform_1, window_bounds = array<i64: 2304, 512>}, {pipeline_mode = #tpu.pipeline_mode<synchronous>, transform_indices = @transform_2, window_bounds = array<i64: 1, 512>}, {transform_indices = @transform_3, window_bounds = array<i64: 16, 512>}]} {
    %c0 = arith.constant 0 : index
    %c0_0 = arith.constant 0 : index
    %0 = vector.load %arg1[%c0, %c0_0] : memref<16x2304xbf16, #tpu.memory_space<vmem>>, vector<16x2304xbf16>
    %c0_1 = arith.constant 0 : index
    %c0_2 = arith.constant 0 : index
    %1 = vector.load %arg2[%c0_1, %c0_2] : memref<2304x512xbf16, #tpu.memory_space<vmem>>, vector<2304x512xbf16>
    %cst = arith.constant dense<0.000000e+00> : vector<16x512xf32>
    %2 = tpu.matmul %0, %1, %cst {dimension_numbers = #tpu.dot_dimension_numbers<[1], [0], [0], [1], [0, 0, 1, 1], [], []>} : vector<16x2304xbf16>, vector<2304x512xbf16>, vector<16x512xf32> -> vector<16x512xf32>
    %c0_3 = arith.constant 0 : index
    %c0_4 = arith.constant 0 : index
    %3 = vector.load %arg3[%c0_3, %c0_4] : memref<1x512xf32, #tpu.memory_space<vmem>>, vector<1x512xf32>
    %4 = vector.broadcast %3 : vector<1x512xf32> to vector<16x512xf32>
    %5 = arith.addf %2, %4 : vector<16x512xf32>
    %cst_5 = arith.constant 0.000000e+00 : f32
    %6 = vector.broadcast %cst_5 : f32 to vector<16x512xf32>
    %7 = arith.maximumf %5, %6 : vector<16x512xf32>
    %8 = arith.truncf %7 : vector<16x512xf32> to vector<16x512xbf16>
    %c0_6 = arith.constant 0 : index
    %c0_7 = arith.constant 0 : index
    %9 = vector.load %arg4[%c0_6, %c0_7] : memref<16x512xbf16, #tpu.memory_space<vmem>>, vector<16x512xbf16>
    tpu.vector_store %arg4[%c0_6, %c0_7], %8 {strides = array<i32>} : memref<16x512xbf16, #tpu.memory_space<vmem>>, vector<16x512xbf16>,
    return
  }
  func.func @transform_0(%arg0: i32) -> (i32, i32) {
    %c0_i32 = arith.constant 0 : i32
    %c0_i32_0 = arith.constant 0 : i32
    return %arg0, %c0_i32 : i32, i32
  }
  func.func @transform_1(%arg0: i32) -> (i32, i32) {
    %c0_i32 = arith.constant 0 : i32
    %c0_i32_0 = arith.constant 0 : i32
    %c0_i32_1 = arith.constant 0 : i32
    return %c0_i32, %c0_i32_0 : i32, i32
  }
  func.func @transform_2(%arg0: i32) -> (i32, i32) {
    %c0_i32 = arith.constant 0 : i32
    %c0_i32_0 = arith.constant 0 : i32
    %c0_i32_1 = arith.constant 0 : i32
    return %c0_i32, %c0_i32_0 : i32, i32
  }
  func.func @transform_3(%arg0: i32) -> (i32, i32) {
    %c0_i32 = arith.constant 0 : i32
    %c0_i32_0 = arith.constant 0 : i32
    return %arg0, %c0_i32 : i32, i32
  }
}

module attributes {stable_mosaic.version = 11 : i64} {
  func.func @kernel(%arg0: memref<16x2048xbf16, #tpu.memory_space<vmem>>, %arg1: memref<2048x512xbf16, #tpu.memory_space<vmem>>, %arg2: memref<1x512xf32, #tpu.memory_space<vmem>>, %arg3: memref<512x512xbf16, #tpu.memory_space<vmem>>, %arg4: memref<1x512xf32, #tpu.memory_space<vmem>>, %arg5: memref<512x512xbf16, #tpu.memory_space<vmem>>, %arg6: memref<1x512xf32, #tpu.memory_space<vmem>>, %arg7: memref<16x512xbf16, #tpu.memory_space<vmem>>) attributes {dimension_semantics = [], scalar_prefetch = 0 : i64, scratch_operands = 0 : i64, tpu.core_type = #tpu.core_type<tc>} {
    %c0 = arith.constant 0 : index
    %c0_0 = arith.constant 0 : index
    %0 = vector.load %arg0[%c0, %c0_0] : memref<16x2048xbf16, #tpu.memory_space<vmem>>, vector<16x2048xbf16>
    %c0_1 = arith.constant 0 : index
    %c0_2 = arith.constant 0 : index
    %1 = vector.load %arg1[%c0_1, %c0_2] : memref<2048x512xbf16, #tpu.memory_space<vmem>>, vector<2048x512xbf16>
    %cst = arith.constant dense<0.000000e+00> : vector<16x512xf32>
    %2 = tpu.matmul %0, %1, %cst {dimension_numbers = #tpu.dot_dimension_numbers<[1], [0], [0], [1], [0, 0, 1, 1], [], []>} : vector<16x2048xbf16>, vector<2048x512xbf16>, vector<16x512xf32> -> vector<16x512xf32>
    %c0_3 = arith.constant 0 : index
    %c0_4 = arith.constant 0 : index
    %3 = vector.load %arg2[%c0_3, %c0_4] : memref<1x512xf32, #tpu.memory_space<vmem>>, vector<1x512xf32>
    %4 = vector.broadcast %3 : vector<1x512xf32> to vector<16x512xf32>
    %5 = arith.addf %2, %4 : vector<16x512xf32>
    %cst_5 = arith.constant 0.000000e+00 : f32
    %6 = vector.broadcast %cst_5 : f32 to vector<16x512xf32>
    %7 = arith.maximumf %5, %6 : vector<16x512xf32>
    %8 = arith.truncf %7 : vector<16x512xf32> to vector<16x512xbf16>
    %c0_6 = arith.constant 0 : index
    %c0_7 = arith.constant 0 : index
    %9 = vector.load %arg3[%c0_6, %c0_7] : memref<512x512xbf16, #tpu.memory_space<vmem>>, vector<512x512xbf16>
    %cst_8 = arith.constant dense<0.000000e+00> : vector<16x512xf32>
    %10 = tpu.matmul %8, %9, %cst_8 {dimension_numbers = #tpu.dot_dimension_numbers<[1], [0], [0], [1], [0, 0, 1, 1], [], []>} : vector<16x512xbf16>, vector<512x512xbf16>, vector<16x512xf32> -> vector<16x512xf32>
    %c0_9 = arith.constant 0 : index
    %c0_10 = arith.constant 0 : index
    %11 = vector.load %arg4[%c0_9, %c0_10] : memref<1x512xf32, #tpu.memory_space<vmem>>, vector<1x512xf32>
    %12 = vector.broadcast %11 : vector<1x512xf32> to vector<16x512xf32>
    %13 = arith.addf %10, %12 : vector<16x512xf32>
    %cst_11 = arith.constant 0.000000e+00 : f32
    %14 = vector.broadcast %cst_11 : f32 to vector<16x512xf32>
    %15 = arith.maximumf %13, %14 : vector<16x512xf32>
    %16 = arith.truncf %15 : vector<16x512xf32> to vector<16x512xbf16>
    %c0_12 = arith.constant 0 : index
    %c0_13 = arith.constant 0 : index
    %17 = vector.load %arg5[%c0_12, %c0_13] : memref<512x512xbf16, #tpu.memory_space<vmem>>, vector<512x512xbf16>
    %cst_14 = arith.constant dense<0.000000e+00> : vector<16x512xf32>
    %18 = tpu.matmul %16, %17, %cst_14 {dimension_numbers = #tpu.dot_dimension_numbers<[1], [0], [0], [1], [0, 0, 1, 1], [], []>} : vector<16x512xbf16>, vector<512x512xbf16>, vector<16x512xf32> -> vector<16x512xf32>
    %c0_15 = arith.constant 0 : index
    %c0_16 = arith.constant 0 : index
    %19 = vector.load %arg6[%c0_15, %c0_16] : memref<1x512xf32, #tpu.memory_space<vmem>>, vector<1x512xf32>
    %20 = vector.broadcast %19 : vector<1x512xf32> to vector<16x512xf32>
    %21 = arith.addf %18, %20 : vector<16x512xf32>
    %cst_17 = arith.constant 0.000000e+00 : f32
    %22 = vector.broadcast %cst_17 : f32 to vector<16x512xf32>
    %23 = arith.maximumf %21, %22 : vector<16x512xf32>
    %24 = arith.truncf %23 : vector<16x512xf32> to vector<16x512xbf16>
    %c0_18 = arith.constant 0 : index
    %c0_19 = arith.constant 0 : index
    %25 = vector.load %arg7[%c0_18, %c0_19] : memref<16x512xbf16, #tpu.memory_space<vmem>>, vector<16x512xbf16>
    tpu.vector_store %arg7[%c0_18, %c0_19], %24 {strides = array<i32>} : memref<16x512xbf16, #tpu.memory_space<vmem>>, vector<16x512xbf16>,
    return
  }
}

</mosaic_0001>

<bundles_post_ra>
// kernel: style_encoder_forward.5
= control target key start
LH: loop header
LB: loop body
LE: loop exit
PB: predicated region body
PF: predicated region fallthrough
CT: control target
= control target key end

     0   :  { %s1860_s1 = inlined_call_operand.vmem [shape: bf16[128,128], index: 1, kind: input, shape index: {}]   ;;  %s1861_s0 = inlined_call_operand.vmem [shape: bf16[512,128], index: 0, kind: input, shape index: {}]   ;;  %s1862_s2 = inlined_call_operand.vmem [shape: f32[1,128], index: 2, kind: input, shape index: {}]   ;;  %s1863_s3 = inlined_call_operand.vmem [shape: bf16[512,128], index: 3, kind: output, shape index: {}]  }
   0x1   :  { %v1515_v0 = vld [vmem:[%s1860_s1] sm:$0xff]   ;;  %v1516_v1 = vld [vmem:[%s1860_s1 + $0x8] sm:$0xff]   ;;  %v1517_v2 = vld [vmem:[%s1860_s1 + $0x10] sm:$0xff]  }
   0x2   :  { %1419 = vmatprep.subr.bf16.mxu0 %v1515_v0  ;;  %1499 = vmatprep.subr.bf16.mxu1 %v1515_v0  ;;  %v1518_v3 = vld [vmem:[%s1860_s1 + $0x18] sm:$0xff]   ;;  %v1523_v4 = vld [vmem:[%s1861_s0] sm:$0xff]   ;;  %v1520_v7 = vld [vmem:[%s1860_s1 + $0x28] sm:$0xff]  }
   0x3   :  { %1420 = vmatpush3.bf16.msra.mxu0 %v1515_v0  ;;  %1507 = vmatpush3.bf16.msra.mxu1 %v1515_v0  ;;  %v1524_v5 = vld [vmem:[%s1861_s0 + $0x80] sm:$0xff]   ;;  %v1521_v8 = vld [vmem:[%s1860_s1 + $0x30] sm:$0xff]   ;;  %v1522_v9 = vld [vmem:[%s1860_s1 + $0x38] sm:$0xff]  }
   0x4   :  { %1421 = vmatprep.subr.bf16.mxu0 %v1516_v1  ;;  %1500 = vmatprep.subr.bf16.mxu1 %v1516_v1  ;;  %v1519_v6 = vld [vmem:[%s1860_s1 + $0x20] sm:$0xff]   ;;  %v1525_v10 = vld [vmem:[%s1861_s0 + $0x8] sm:$0xff]   ;;  %v1527_v12 = vld [vmem:[%s1861_s0 + $0x10] sm:$0xff]  }
   0x5   :  { %1435 = vmatprep.mubr.bf16.mxu0 %v1523_v4  ;;  %1467 = vmatprep.mubr.bf16.mxu1 %v1524_v5  ;;  %v1526_v11 = vld [vmem:[%s1861_s0 + $0x88] sm:$0xff]   ;;  %v1528_v13 = vld [vmem:[%s1861_s0 + $0x90] sm:$0xff]   ;;  %v1529_v14 = vld [vmem:[%s1861_s0 + $0x18] sm:$0xff]  }
   0x6   :  { %v1530_v15 = vld [vmem:[%s1861_s0 + $0x98] sm:$0xff]   ;;  %v1531_v16 = vld [vmem:[%s1861_s0 + $0x20] sm:$0xff]   ;;  %v1533_v18 = vld [vmem:[%s1861_s0 + $0x28] sm:$0xff]  }
   0x7   :  { %1422 = vmatpush3.bf16.msra.mxu0 %v1516_v1  ;;  %1508 = vmatpush3.bf16.msra.mxu1 %v1516_v1  ;;  %v1532_v17 = vld [vmem:[%s1861_s0 + $0xa0] sm:$0xff]   ;;  %v1534_v19 = vld [vmem:[%s1861_s0 + $0xa8] sm:$0xff]   ;;  %v1535_v20 = vld [vmem:[%s1861_s0 + $0x30] sm:$0xff]  }
   0x8   :  { %1423 = vmatprep.subr.bf16.mxu0 %v1517_v2  ;;  %1501 = vmatprep.subr.bf16.mxu1 %v1517_v2  ;;  %v1536_v21 = vld [vmem:[%s1861_s0 + $0xb0] sm:$0xff]   ;;  %v1537_v22 = vld [vmem:[%s1861_s0 + $0x38] sm:$0xff]   ;;  %v1539_v24 = vld [vmem:[%s1861_s0 + $0x40] sm:$0xff]  }
   0x9   :  { %v1538_v23 = vld [vmem:[%s1861_s0 + $0xb8] sm:$0xff]   ;;  %v1540_v25 = vld [vmem:[%s1861_s0 + $0xc0] sm:$0xff]   ;;  %v1541_v26 = vld [vmem:[%s1861_s0 + $0x48] sm:$0xff]  }
   0xa   :  { %v1542_v27 = vld [vmem:[%s1861_s0 + $0xc8] sm:$0xff]   ;;  %v1543_v28 = vld [vmem:[%s1861_s0 + $0x50] sm:$0xff]   ;;  %v1545_v30 = vld [vmem:[%s1861_s0 + $0x58] sm:$0xff]  }
   0xb   :  { %1424 = vmatpush3.bf16.msra.mxu0 %v1517_v2  ;;  %1509 = vmatpush3.bf16.msra.mxu1 %v1517_v2  ;;  %v1544_v29 = vld [vmem:[%s1861_s0 + $0xd0] sm:$0xff]   ;;  %v1546_v31 = vld [vmem:[%s1861_s0 + $0xd8] sm:$0xff]   ;;  %v1547_v32 = vld [vmem:[%s1861_s0 + $0x60] sm:$0xff]  }
   0xc   :  { %1425 = vmatprep.subr.bf16.mxu0 %v1518_v3  ;;  %1502 = vmatprep.subr.bf16.mxu1 %v1518_v3  ;;  %v1548_v33 = vld [vmem:[%s1861_s0 + $0xe0] sm:$0xff]   ;;  %v1549_v34 = vld [vmem:[%s1861_s0 + $0x68] sm:$0xff]   ;;  %v1551_v36 = vld [vmem:[%s1861_s0 + $0x70] sm:$0xff]  }
   0xd   :  { %v1550_v35 = vld [vmem:[%s1861_s0 + $0xe8] sm:$0xff]   ;;  %v1552_v37 = vld [vmem:[%s1861_s0 + $0xf0] sm:$0xff]   ;;  %v1553_v38 = vld [vmem:[%s1861_s0 + $0x78] sm:$0xff]  }
   0xe   :  { %v1554_v39 = vld [vmem:[%s1861_s0 + $0xf8] sm:$0xff]   ;;  %v1698_v40 = vld [vmem:[%s1862_s2] ss:$0 sm:$0xff] }
   0xf   :  { %1426 = vmatpush3.bf16.msra.mxu0 %v1518_v3  ;;  %1510 = vmatpush3.bf16.msra.mxu1 %v1518_v3 }
  0x10   :  { %1427 = vmatprep.subr.bf16.mxu0 %v1519_v6  ;;  %1503 = vmatprep.subr.bf16.mxu1 %v1519_v6 }
  0x13   :  { %1428 = vmatpush3.bf16.msra.mxu0 %v1519_v6  ;;  %1511 = vmatpush3.bf16.msra.mxu1 %v1519_v6 }
  0x14   :  { %1429 = vmatprep.subr.bf16.mxu0 %v1520_v7  ;;  %1504 = vmatprep.subr.bf16.mxu1 %v1520_v7 }
  0x17   :  { %1430 = vmatpush3.bf16.msra.mxu0 %v1520_v7  ;;  %1512 = vmatpush3.bf16.msra.mxu1 %v1520_v7 }
  0x18   :  { %1431 = vmatprep.subr.bf16.mxu0 %v1521_v8  ;;  %1505 = vmatprep.subr.bf16.mxu1 %v1521_v8 }
  0x1b   :  { %1432 = vmatpush3.bf16.msra.mxu0 %v1521_v8  ;;  %1513 = vmatpush3.bf16.msra.mxu1 %v1521_v8 }
  0x1c   :  { %1433 = vmatprep.subr.bf16.mxu0 %v1522_v9  ;;  %1506 = vmatprep.subr.bf16.mxu1 %v1522_v9 }
  0x1f   :  { %1434 = vmatpush3.bf16.msra.mxu0 %v1522_v9  ;;  %1514 = vmatpush3.bf16.msra.mxu1 %v1522_v9 }
  0x22   :  { %1436 = vmatmul.mubr.bf16.vlgmr.msra.gmra.mrb[0].mxu0 %v1525_v10  ;;  %1468 = vmatmul.mubr.bf16.vlgmr.msra.gmra.mrb[0].mxu1 %v1526_v11 }
  0x23   :  { %1439 = vmatprep.mubr.bf16.mxu0 %v1527_v12  ;;  %1471 = vmatprep.mubr.bf16.mxu1 %v1528_v13 }
  0x2a   :  { %1440 = vmatmul.mubr.bf16.gmra.mrb[4].mxu0 %v1529_v14  ;;  %1472 = vmatmul.mubr.bf16.gmra.mrb[4].mxu1 %v1530_v15 }
  0x2b   :  { %1443 = vmatprep.mubr.bf16.mxu0 %v1531_v16  ;;  %1475 = vmatprep.mubr.bf16.mxu1 %v1532_v17 }
  0x32   :  { %1444 = vmatmul.mubr.bf16.gmra.mrb[8].mxu0 %v1533_v18  ;;  %1476 = vmatmul.mubr.bf16.gmra.mrb[8].mxu1 %v1534_v19 }
  0x33   :  { %1447 = vmatprep.mubr.bf16.mxu0 %v1535_v20  ;;  %1479 = vmatprep.mubr.bf16.mxu1 %v1536_v21 }
  0x3a   :  { %1448 = vmatmul.mubr.bf16.gmra.mrb[12].mxu0 %v1537_v22  ;;  %1480 = vmatmul.mubr.bf16.gmra.mrb[12].mxu1 %v1538_v23 }
  0x3b   :  { %1451 = vmatprep.mubr.bf16.mxu0 %v1539_v24  ;;  %1483 = vmatprep.mubr.bf16.mxu1 %v1540_v25 }
  0x42   :  { %1452 = vmatmul.mubr.bf16.gmra.mrb[16].mxu0 %v1541_v26  ;;  %1484 = vmatmul.mubr.bf16.gmra.mrb[16].mxu1 %v1542_v27 }
  0x43   :  { %1455 = vmatprep.mubr.bf16.mxu0 %v1543_v28  ;;  %1487 = vmatprep.mubr.bf16.mxu1 %v1544_v29 }
  0x4a   :  { %1456 = vmatmul.mubr.bf16.gmra.mrb[20].mxu0 %v1545_v30  ;;  %1488 = vmatmul.mubr.bf16.gmra.mrb[20].mxu1 %v1546_v31 }
  0x4b   :  { %1459 = vmatprep.mubr.bf16.mxu0 %v1547_v32  ;;  %1491 = vmatprep.mubr.bf16.mxu1 %v1548_v33 }
  0x52   :  { %1460 = vmatmul.mubr.bf16.gmra.mrb[24].mxu0 %v1549_v34  ;;  %1492 = vmatmul.mubr.bf16.gmra.mrb[24].mxu1 %v1550_v35 }
  0x53   :  { %1463 = vmatprep.mubr.bf16.mxu0 %v1551_v36  ;;  %1495 = vmatprep.mubr.bf16.mxu1 %v1552_v37 }
  0x5a   :  { %1464 = vmatmul.mubr.bf16.gmra.mrb[28].mxu0 %v1553_v38  ;;  %1496 = vmatmul.mubr.bf16.gmra.mrb[28].mxu1 %v1554_v39 }
  0xf5   :  { %v1437_v41 = vpop.f32.mrb[0].mxu0  ;;  %v1469_v42 = vpop.f32.mrb[0].mxu1 }
  0xf6   :  { %v385_v43 = vadd.f32 %v1437_v41, %v1698_v40  ;;  %v513_v44 = vadd.f32 %v1469_v42, %v1698_v40  ;;  %v376_v45 = vpop.f32.mrb[1].mxu0  ;;  %v504_v46 = vpop.f32.mrb[1].mxu1 }
  0xf7   :  { %v377_v47 = vadd.f32 %v1698_v40, %v376_v45  ;;  %v505_v48 = vadd.f32 %v1698_v40, %v504_v46  ;;  %v1438_v49 = vpop.f32.mrb[2].mxu0  ;;  %v1470_v50 = vpop.f32.mrb[2].mxu1 }
  0xf8   :  { %v388_v51 = vadd.f32 %v1438_v49, %v1698_v40  ;;  %v516_v52 = vadd.f32 %v1470_v50, %v1698_v40  ;;  %v379_v53 = vpop.f32.mrb[3].mxu0  ;;  %v507_v54 = vpop.f32.mrb[3].mxu1  ;;  %v633_v57 = vmax.f32 %v385_v43, 0.0  ;;  %v665_v58 = vmax.f32 %v513_v44, 0.0 }
  0xf9   :  { %v380_v55 = vadd.f32 %v1698_v40, %v379_v53  ;;  %v508_v56 = vadd.f32 %v1698_v40, %v507_v54  ;;  %v631_v61 = vmax.f32 %v377_v47, 0.0  ;;  %v663_v62 = vmax.f32 %v505_v48, 0.0 }
  0xfa   :  { %v634_v59 = vmax.f32 %v388_v51, 0.0  ;;  %v666_v60 = vmax.f32 %v516_v52, 0.0 }
  0xfb   :  { %v632_v63 = vmax.f32 %v380_v55, 0.0  ;;  %v664_v0 = vmax.f32 %v508_v56, 0.0 }
  0xfc   :  { %v1196_v1 = vpack.c.bf16 %v634_v59, %v633_v57  ;;  %v1276_v2 = vpack.c.bf16 %v666_v60, %v665_v58 }
  0xfd   :  { %v1191_v3 = vpack.c.bf16 %v632_v63, %v631_v61  ;;  %v1271_v4 = vpack.c.bf16 %v664_v0, %v663_v62  ;;  %v1441_v5 = vpop.f32.mrb[4].mxu0  ;;  %v1473_v6 = vpop.f32.mrb[4].mxu1 }
  0xfe   :  { %1348 = vst [vmem:[%s1863_s3 + $0x8] sm:$0xff] %v1196_v1   ;;  %1364 = vst [vmem:[%s1863_s3 + $0x88] sm:$0xff] %v1276_v2   ;;  %v401_v7 = vadd.f32 %v1441_v5, %v1698_v40  ;;  %v529_v8 = vadd.f32 %v1473_v6, %v1698_v40  ;;  %v392_v9 = vpop.f32.mrb[5].mxu0  ;;  %v520_v10 = vpop.f32.mrb[5].mxu1 }
  0xff   :  { %1192 = vst [vmem:[%s1863_s3] sm:$0xff] %v1191_v3   ;;  %1363 = vst [vmem:[%s1863_s3 + $0x80] sm:$0xff] %v1271_v4   ;;  %v393_v11 = vadd.f32 %v1698_v40, %v392_v9  ;;  %v521_v12 = vadd.f32 %v1698_v40, %v520_v10  ;;  %v1442_v13 = vpop.f32.mrb[6].mxu0  ;;  %v1474_v14 = vpop.f32.mrb[6].mxu1 }
 0x100   :  { %v404_v15 = vadd.f32 %v1442_v13, %v1698_v40  ;;  %v532_v16 = vadd.f32 %v1474_v14, %v1698_v40  ;;  %v395_v17 = vpop.f32.mrb[7].mxu0  ;;  %v523_v18 = vpop.f32.mrb[7].mxu1  ;;  %v637_v21 = vmax.f32 %v401_v7, 0.0  ;;  %v669_v22 = vmax.f32 %v529_v8, 0.0 }
 0x101   :  { %v396_v19 = vadd.f32 %v1698_v40, %v395_v17  ;;  %v524_v20 = vadd.f32 %v1698_v40, %v523_v18  ;;  %v635_v25 = vmax.f32 %v393_v11, 0.0  ;;  %v667_v26 = vmax.f32 %v521_v12, 0.0 }
 0x102   :  { %v638_v23 = vmax.f32 %v404_v15, 0.0  ;;  %v670_v24 = vmax.f32 %v532_v16, 0.0 }
 0x103   :  { %v636_v27 = vmax.f32 %v396_v19, 0.0  ;;  %v668_v28 = vmax.f32 %v524_v20, 0.0 }
 0x104   :  { %v1206_v29 = vpack.c.bf16 %v638_v23, %v637_v21  ;;  %v1286_v30 = vpack.c.bf16 %v670_v24, %v669_v22 }
 0x105   :  { %v1201_v31 = vpack.c.bf16 %v636_v27, %v635_v25  ;;  %v1281_v32 = vpack.c.bf16 %v668_v28, %v667_v26  ;;  %v1445_v33 = vpop.f32.mrb[8].mxu0  ;;  %v1477_v34 = vpop.f32.mrb[8].mxu1 }
 0x106   :  { %1350 = vst [vmem:[%s1863_s3 + $0x18] sm:$0xff] %v1206_v29   ;;  %1366 = vst [vmem:[%s1863_s3 + $0x98] sm:$0xff] %v1286_v30   ;;  %v417_v35 = vadd.f32 %v1445_v33, %v1698_v40  ;;  %v545_v36 = vadd.f32 %v1477_v34, %v1698_v40  ;;  %v408_v37 = vpop.f32.mrb[9].mxu0  ;;  %v536_v38 = vpop.f32.mrb[9].mxu1 }
 0x107   :  { %1349 = vst [vmem:[%s1863_s3 + $0x10] sm:$0xff] %v1201_v31   ;;  %1365 = vst [vmem:[%s1863_s3 + $0x90] sm:$0xff] %v1281_v32   ;;  %v409_v39 = vadd.f32 %v1698_v40, %v408_v37  ;;  %v537_v41 = vadd.f32 %v1698_v40, %v536_v38  ;;  %v1446_v42 = vpop.f32.mrb[10].mxu0  ;;  %v1478_v43 = vpop.f32.mrb[10].mxu1 }
 0x108   :  { %v420_v44 = vadd.f32 %v1446_v42, %v1698_v40  ;;  %v548_v45 = vadd.f32 %v1478_v43, %v1698_v40  ;;  %v411_v46 = vpop.f32.mrb[11].mxu0  ;;  %v539_v47 = vpop.f32.mrb[11].mxu1  ;;  %v641_v50 = vmax.f32 %v417_v35, 0.0  ;;  %v673_v51 = vmax.f32 %v545_v36, 0.0 }
 0x109   :  { %v412_v48 = vadd.f32 %v1698_v40, %v411_v46  ;;  %v540_v49 = vadd.f32 %v1698_v40, %v539_v47  ;;  %v639_v54 = vmax.f32 %v409_v39, 0.0  ;;  %v671_v55 = vmax.f32 %v537_v41, 0.0 }
 0x10a   :  { %v642_v52 = vmax.f32 %v420_v44, 0.0  ;;  %v674_v53 = vmax.f32 %v548_v45, 0.0 }
 0x10b   :  { %v640_v56 = vmax.f32 %v412_v48, 0.0  ;;  %v672_v57 = vmax.f32 %v540_v49, 0.0 }
 0x10c   :  { %v1216_v58 = vpack.c.bf16 %v642_v52, %v641_v50  ;;  %v1296_v59 = vpack.c.bf16 %v674_v53, %v673_v51 }
 0x10d   :  { %v1211_v60 = vpack.c.bf16 %v640_v56, %v639_v54  ;;  %v1291_v61 = vpack.c.bf16 %v672_v57, %v671_v55  ;;  %v1449_v62 = vpop.f32.mrb[12].mxu0  ;;  %v1481_v63 = vpop.f32.mrb[12].mxu1 }
 0x10e   :  { %1352 = vst [vmem:[%s1863_s3 + $0x28] sm:$0xff] %v1216_v58   ;;  %1368 = vst [vmem:[%s1863_s3 + $0xa8] sm:$0xff] %v1296_v59   ;;  %v433_v0 = vadd.f32 %v1449_v62, %v1698_v40  ;;  %v561_v1 = vadd.f32 %v1481_v63, %v1698_v40  ;;  %v424_v2 = vpop.f32.mrb[13].mxu0  ;;  %v552_v3 = vpop.f32.mrb[13].mxu1 }
 0x10f   :  { %1351 = vst [vmem:[%s1863_s3 + $0x20] sm:$0xff] %v1211_v60   ;;  %1367 = vst [vmem:[%s1863_s3 + $0xa0] sm:$0xff] %v1291_v61   ;;  %v425_v4 = vadd.f32 %v1698_v40, %v424_v2  ;;  %v553_v5 = vadd.f32 %v1698_v40, %v552_v3  ;;  %v1450_v6 = vpop.f32.mrb[14].mxu0  ;;  %v1482_v7 = vpop.f32.mrb[14].mxu1 }
 0x110   :  { %v436_v8 = vadd.f32 %v1450_v6, %v1698_v40  ;;  %v564_v9 = vadd.f32 %v1482_v7, %v1698_v40  ;;  %v427_v10 = vpop.f32.mrb[15].mxu0  ;;  %v555_v11 = vpop.f32.mrb[15].mxu1  ;;  %v645_v14 = vmax.f32 %v433_v0, 0.0  ;;  %v677_v15 = vmax.f32 %v561_v1, 0.0 }
 0x111   :  { %v428_v12 = vadd.f32 %v1698_v40, %v427_v10  ;;  %v556_v13 = vadd.f32 %v1698_v40, %v555_v11  ;;  %v643_v18 = vmax.f32 %v425_v4, 0.0  ;;  %v675_v19 = vmax.f32 %v553_v5, 0.0 }
 0x112   :  { %v646_v16 = vmax.f32 %v436_v8, 0.0  ;;  %v678_v17 = vmax.f32 %v564_v9, 0.0 }
 0x113   :  { %v644_v20 = vmax.f32 %v428_v12, 0.0  ;;  %v676_v21 = vmax.f32 %v556_v13, 0.0 }
 0x114   :  { %v1226_v22 = vpack.c.bf16 %v646_v16, %v645_v14  ;;  %v1306_v23 = vpack.c.bf16 %v678_v17, %v677_v15 }
 0x115   :  { %v1221_v24 = vpack.c.bf16 %v644_v20, %v643_v18  ;;  %v1301_v25 = vpack.c.bf16 %v676_v21, %v675_v19  ;;  %v1453_v26 = vpop.f32.mrb[16].mxu0  ;;  %v1485_v27 = vpop.f32.mrb[16].mxu1 }
 0x116   :  { %1354 = vst [vmem:[%s1863_s3 + $0x38] sm:$0xff] %v1226_v22   ;;  %1370 = vst [vmem:[%s1863_s3 + $0xb8] sm:$0xff] %v1306_v23   ;;  %v449_v28 = vadd.f32 %v1453_v26, %v1698_v40  ;;  %v577_v29 = vadd.f32 %v1485_v27, %v1698_v40  ;;  %v440_v30 = vpop.f32.mrb[17].mxu0  ;;  %v568_v31 = vpop.f32.mrb[17].mxu1 }
 0x117   :  { %1353 = vst [vmem:[%s1863_s3 + $0x30] sm:$0xff] %v1221_v24   ;;  %1369 = vst [vmem:[%s1863_s3 + $0xb0] sm:$0xff] %v1301_v25   ;;  %v441_v32 = vadd.f32 %v1698_v40, %v440_v30  ;;  %v569_v33 = vadd.f32 %v1698_v40, %v568_v31  ;;  %v1454_v34 = vpop.f32.mrb[18].mxu0  ;;  %v1486_v35 = vpop.f32.mrb[18].mxu1 }
 0x118   :  { %v452_v36 = vadd.f32 %v1454_v34, %v1698_v40  ;;  %v580_v37 = vadd.f32 %v1486_v35, %v1698_v40  ;;  %v443_v38 = vpop.f32.mrb[19].mxu0  ;;  %v571_v39 = vpop.f32.mrb[19].mxu1  ;;  %v649_v43 = vmax.f32 %v449_v28, 0.0  ;;  %v681_v44 = vmax.f32 %v577_v29, 0.0 }
 0x119   :  { %v444_v41 = vadd.f32 %v1698_v40, %v443_v38  ;;  %v572_v42 = vadd.f32 %v1698_v40, %v571_v39  ;;  %v647_v47 = vmax.f32 %v441_v32, 0.0  ;;  %v679_v48 = vmax.f32 %v569_v33, 0.0 }
 0x11a   :  { %v650_v45 = vmax.f32 %v452_v36, 0.0  ;;  %v682_v46 = vmax.f32 %v580_v37, 0.0 }
 0x11b   :  { %v648_v49 = vmax.f32 %v444_v41, 0.0  ;;  %v680_v50 = vmax.f32 %v572_v42, 0.0 }
 0x11c   :  { %v1236_v51 = vpack.c.bf16 %v650_v45, %v649_v43  ;;  %v1316_v52 = vpack.c.bf16 %v682_v46, %v681_v44 }
 0x11d   :  { %v1231_v53 = vpack.c.bf16 %v648_v49, %v647_v47  ;;  %v1311_v54 = vpack.c.bf16 %v680_v50, %v679_v48  ;;  %v1457_v55 = vpop.f32.mrb[20].mxu0  ;;  %v1489_v56 = vpop.f32.mrb[20].mxu1 }
 0x11e   :  { %1356 = vst [vmem:[%s1863_s3 + $0x48] sm:$0xff] %v1236_v51   ;;  %1372 = vst [vmem:[%s1863_s3 + $0xc8] sm:$0xff] %v1316_v52   ;;  %v465_v57 = vadd.f32 %v1457_v55, %v1698_v40  ;;  %v593_v58 = vadd.f32 %v1489_v56, %v1698_v40  ;;  %v456_v59 = vpop.f32.mrb[21].mxu0  ;;  %v584_v60 = vpop.f32.mrb[21].mxu1 }
 0x11f   :  { %1355 = vst [vmem:[%s1863_s3 + $0x40] sm:$0xff] %v1231_v53   ;;  %1371 = vst [vmem:[%s1863_s3 + $0xc0] sm:$0xff] %v1311_v54   ;;  %v457_v61 = vadd.f32 %v1698_v40, %v456_v59  ;;  %v585_v62 = vadd.f32 %v1698_v40, %v584_v60  ;;  %v1458_v63 = vpop.f32.mrb[22].mxu0  ;;  %v1490_v0 = vpop.f32.mrb[22].mxu1 }
 0x120   :  { %v468_v1 = vadd.f32 %v1458_v63, %v1698_v40  ;;  %v596_v2 = vadd.f32 %v1490_v0, %v1698_v40  ;;  %v459_v3 = vpop.f32.mrb[23].mxu0  ;;  %v587_v4 = vpop.f32.mrb[23].mxu1  ;;  %v653_v7 = vmax.f32 %v465_v57, 0.0  ;;  %v685_v8 = vmax.f32 %v593_v58, 0.0 }
 0x121   :  { %v460_v5 = vadd.f32 %v1698_v40, %v459_v3  ;;  %v588_v6 = vadd.f32 %v1698_v40, %v587_v4  ;;  %v651_v11 = vmax.f32 %v457_v61, 0.0  ;;  %v683_v12 = vmax.f32 %v585_v62, 0.0 }
 0x122   :  { %v654_v9 = vmax.f32 %v468_v1, 0.0  ;;  %v686_v10 = vmax.f32 %v596_v2, 0.0 }
 0x123   :  { %v652_v13 = vmax.f32 %v460_v5, 0.0  ;;  %v684_v14 = vmax.f32 %v588_v6, 0.0 }
 0x124   :  { %v1246_v15 = vpack.c.bf16 %v654_v9, %v653_v7  ;;  %v1326_v16 = vpack.c.bf16 %v686_v10, %v685_v8 }
 0x125   :  { %v1241_v17 = vpack.c.bf16 %v652_v13, %v651_v11  ;;  %v1321_v18 = vpack.c.bf16 %v684_v14, %v683_v12  ;;  %v1461_v19 = vpop.f32.mrb[24].mxu0  ;;  %v1493_v20 = vpop.f32.mrb[24].mxu1 }
 0x126   :  { %1358 = vst [vmem:[%s1863_s3 + $0x58] sm:$0xff] %v1246_v15   ;;  %1374 = vst [vmem:[%s1863_s3 + $0xd8] sm:$0xff] %v1326_v16   ;;  %v481_v21 = vadd.f32 %v1461_v19, %v1698_v40  ;;  %v609_v22 = vadd.f32 %v1493_v20, %v1698_v40  ;;  %v472_v23 = vpop.f32.mrb[25].mxu0  ;;  %v600_v24 = vpop.f32.mrb[25].mxu1 }
 0x127   :  { %1357 = vst [vmem:[%s1863_s3 + $0x50] sm:$0xff] %v1241_v17   ;;  %1373 = vst [vmem:[%s1863_s3 + $0xd0] sm:$0xff] %v1321_v18   ;;  %v473_v25 = vadd.f32 %v1698_v40, %v472_v23  ;;  %v601_v26 = vadd.f32 %v1698_v40, %v600_v24  ;;  %v1462_v27 = vpop.f32.mrb[26].mxu0  ;;  %v1494_v28 = vpop.f32.mrb[26].mxu1 }
 0x128   :  { %v484_v29 = vadd.f32 %v1462_v27, %v1698_v40  ;;  %v612_v30 = vadd.f32 %v1494_v28, %v1698_v40  ;;  %v475_v31 = vpop.f32.mrb[27].mxu0  ;;  %v603_v32 = vpop.f32.mrb[27].mxu1  ;;  %v657_v35 = vmax.f32 %v481_v21, 0.0  ;;  %v689_v36 = vmax.f32 %v609_v22, 0.0 }
 0x129   :  { %v476_v33 = vadd.f32 %v1698_v40, %v475_v31  ;;  %v604_v34 = vadd.f32 %v1698_v40, %v603_v32  ;;  %v655_v39 = vmax.f32 %v473_v25, 0.0  ;;  %v687_v41 = vmax.f32 %v601_v26, 0.0 }
 0x12a   :  { %v658_v37 = vmax.f32 %v484_v29, 0.0  ;;  %v690_v38 = vmax.f32 %v612_v30, 0.0 }
 0x12b   :  { %v656_v42 = vmax.f32 %v476_v33, 0.0  ;;  %v688_v43 = vmax.f32 %v604_v34, 0.0 }
 0x12c   :  { %v1256_v44 = vpack.c.bf16 %v658_v37, %v657_v35  ;;  %v1336_v45 = vpack.c.bf16 %v690_v38, %v689_v36 }
 0x12d   :  { %v1251_v46 = vpack.c.bf16 %v656_v42, %v655_v39  ;;  %v1331_v47 = vpack.c.bf16 %v688_v43, %v687_v41  ;;  %v1465_v48 = vpop.f32.mrb[28].mxu0  ;;  %v1497_v49 = vpop.f32.mrb[28].mxu1 }
 0x12e   :  { %1360 = vst [vmem:[%s1863_s3 + $0x68] sm:$0xff] %v1256_v44   ;;  %1376 = vst [vmem:[%s1863_s3 + $0xe8] sm:$0xff] %v1336_v45   ;;  %v497_v50 = vadd.f32 %v1465_v48, %v1698_v40  ;;  %v625_v51 = vadd.f32 %v1497_v49, %v1698_v40  ;;  %v488_v52 = vpop.f32.mrb[29].mxu0  ;;  %v616_v53 = vpop.f32.mrb[29].mxu1 }
 0x12f   :  { %1359 = vst [vmem:[%s1863_s3 + $0x60] sm:$0xff] %v1251_v46   ;;  %1375 = vst [vmem:[%s1863_s3 + $0xe0] sm:$0xff] %v1331_v47   ;;  %v489_v54 = vadd.f32 %v1698_v40, %v488_v52  ;;  %v617_v55 = vadd.f32 %v1698_v40, %v616_v53  ;;  %v1466_v56 = vpop.f32.mrb[30].mxu0  ;;  %v1498_v57 = vpop.f32.mrb[30].mxu1 }
 0x130   :  { %v500_v58 = vadd.f32 %v1466_v56, %v1698_v40  ;;  %v628_v59 = vadd.f32 %v1498_v57, %v1698_v40  ;;  %v491_v60 = vpop.f32.mrb[31].mxu0  ;;  %v619_v61 = vpop.f32.mrb[31].mxu1  ;;  %v661_v0 = vmax.f32 %v497_v50, 0.0  ;;  %v693_v1 = vmax.f32 %v625_v51, 0.0 }
 0x131   :  { %v492_v62 = vadd.f32 %v1698_v40, %v491_v60  ;;  %v620_v63 = vadd.f32 %v1698_v40, %v619_v61  ;;  %v659_v4 = vmax.f32 %v489_v54, 0.0  ;;  %v691_v5 = vmax.f32 %v617_v55, 0.0 }
 0x132   :  { %v662_v2 = vmax.f32 %v500_v58, 0.0  ;;  %v694_v3 = vmax.f32 %v628_v59, 0.0 }
 0x133   :  { %v660_v6 = vmax.f32 %v492_v62, 0.0  ;;  %v692_v7 = vmax.f32 %v620_v63, 0.0 }
 0x134   :  { %v1266_v8 = vpack.c.bf16 %v662_v2, %v661_v0  ;;  %v1346_v9 = vpack.c.bf16 %v694_v3, %v693_v1 }
 0x135   :  { %v1261_v10 = vpack.c.bf16 %v660_v6, %v659_v4  ;;  %v1341_v11 = vpack.c.bf16 %v692_v7, %v691_v5 }
 0x136   :  { %1362 = vst [vmem:[%s1863_s3 + $0x78] sm:$0xff] %v1266_v8   ;;  %1378 = vst [vmem:[%s1863_s3 + $0xf8] sm:$0xff] %v1346_v9  }
 0x137   :  { %1361 = vst [vmem:[%s1863_s3 + $0x70] sm:$0xff] %v1261_v10   ;;  %1377 = vst [vmem:[%s1863_s3 + $0xf0] sm:$0xff] %v1341_v11  }

// kernel: style_encoder_forward.6
= control target key start
LH: loop header
LB: loop body
LE: loop exit
PB: predicated region body
PF: predicated region fallthrough
CT: control target
= control target key end

     0   :  { %s2926_s1 = inlined_call_operand.vmem [shape: bf16[1152,128], index: 1, kind: input, shape index: {}]   ;;  %s2927_s0 = inlined_call_operand.vmem [shape: bf16[128,1152], index: 0, kind: input, shape index: {}]   ;;  %s2928_s2 = inlined_call_operand.vmem [shape: f32[1,128], index: 2, kind: input, shape index: {}]   ;;  %s2929_s3 = inlined_call_operand.vmem [shape: bf16[128,128], index: 3, kind: output, shape index: {}]  }
   0x1   :  { %v2175_v0 = vld [vmem:[%s2926_s1 + $0x40] sm:$0xff]   ;;  %v2179_v4 = vld [vmem:[%s2926_s1 + $0x48] sm:$0xff]   ;;  %v2183_v8 = vld [vmem:[%s2926_s1 + $0x50] sm:$0xff]  }
   0x2   :  { %v2176_v1 = vld [vmem:[%s2926_s1 + $0xc0] sm:$0xff]   ;;  %1855 = vmatprep.subr.bf16.mxu0 %v2175_v0  ;;  %v2180_v5 = vld [vmem:[%s2926_s1 + $0xc8] sm:$0xff]   ;;  %v2184_v9 = vld [vmem:[%s2926_s1 + $0xd0] sm:$0xff]  }
   0x3   :  { %v2177_v2 = vld [vmem:[%s2926_s1] sm:$0xff]   ;;  %1919 = vmatprep.subr.bf16.mxu1 %v2176_v1  ;;  %v2181_v6 = vld [vmem:[%s2926_s1 + $0x8] sm:$0xff]   ;;  %v2185_v10 = vld [vmem:[%s2926_s1 + $0x10] sm:$0xff]  }
   0x4   :  { %v2178_v3 = vld [vmem:[%s2926_s1 + $0x80] sm:$0xff]   ;;  %1856 = vmatpush3.bf16.msra.mxu0 %v2177_v2  ;;  %v2182_v7 = vld [vmem:[%s2926_s1 + $0x88] sm:$0xff]   ;;  %v2186_v11 = vld [vmem:[%s2926_s1 + $0x90] sm:$0xff]  }
   0x5   :  { %1920 = vmatpush3.bf16.msra.mxu1 %v2178_v3  ;;  %1857 = vmatprep.subr.bf16.mxu0 %v2179_v4  ;;  %v2187_v12 = vld [vmem:[%s2926_s1 + $0x58] sm:$0xff]   ;;  %v2191_v16 = vld [vmem:[%s2926_s1 + $0x60] sm:$0xff]   ;;  %v2195_v20 = vld [vmem:[%s2926_s1 + $0x68] sm:$0xff]  }
   0x6   :  { %1921 = vmatprep.subr.bf16.mxu1 %v2180_v5  ;;  %v2188_v13 = vld [vmem:[%s2926_s1 + $0xd8] sm:$0xff]   ;;  %v2192_v17 = vld [vmem:[%s2926_s1 + $0xe0] sm:$0xff]   ;;  %v2196_v21 = vld [vmem:[%s2926_s1 + $0xe8] sm:$0xff]  }
   0x7   :  { %v2189_v14 = vld [vmem:[%s2926_s1 + $0x18] sm:$0xff]   ;;  %v2193_v18 = vld [vmem:[%s2926_s1 + $0x20] sm:$0xff]   ;;  %v2197_v22 = vld [vmem:[%s2926_s1 + $0x28] sm:$0xff]  }
   0x8   :  { %1858 = vmatpush3.bf16.msra.mxu0 %v2181_v6  ;;  %v2190_v15 = vld [vmem:[%s2926_s1 + $0x98] sm:$0xff]   ;;  %v2194_v19 = vld [vmem:[%s2926_s1 + $0xa0] sm:$0xff]   ;;  %v2198_v23 = vld [vmem:[%s2926_s1 + $0xa8] sm:$0xff]  }
   0x9   :  { %1922 = vmatpush3.bf16.msra.mxu1 %v2182_v7  ;;  %1859 = vmatprep.subr.bf16.mxu0 %v2183_v8  ;;  %v2199_v24 = vld [vmem:[%s2926_s1 + $0x70] sm:$0xff]   ;;  %v2203_v28 = vld [vmem:[%s2926_s1 + $0x78] sm:$0xff]   ;;  %v2207_v32 = vld [vmem:[%s2927_s0] ss:$36 sps:$4 sm:$0xff]  }
   0xa   :  { %1923 = vmatprep.subr.bf16.mxu1 %v2184_v9  ;;  %v2200_v25 = vld [vmem:[%s2926_s1 + $0xf0] sm:$0xff]   ;;  %v2204_v29 = vld [vmem:[%s2926_s1 + $0xf8] sm:$0xff]   ;;  %v2209_v33 = vld [vmem:[%s2927_s0 + $0x4] ss:$36 sps:$4 sm:$0xff]  }
   0xb   :  { %v2201_v26 = vld [vmem:[%s2926_s1 + $0x30] sm:$0xff]   ;;  %v2205_v30 = vld [vmem:[%s2926_s1 + $0x38] sm:$0xff]   ;;  %v2210_v34 = vld [vmem:[%s2927_s0 + $0x8] ss:$36 sps:$4 sm:$0xff]   ;;  %1078 = vmatprep.mubr.bf16.mxu0 %v2209_v33 }
   0xc   :  { %1860 = vmatpush3.bf16.msra.mxu0 %v2185_v10  ;;  %v2202_v27 = vld [vmem:[%s2926_s1 + $0xb0] sm:$0xff]   ;;  %v2206_v31 = vld [vmem:[%s2926_s1 + $0xb8] sm:$0xff]   ;;  %v2213_v36 = vld [vmem:[%s2926_s1 + $0x140] sm:$0xff]  }
   0xd   :  { %1924 = vmatpush3.bf16.msra.mxu1 %v2186_v11  ;;  %1861 = vmatprep.subr.bf16.mxu0 %v2187_v12  ;;  %v2212_v35 = vld [vmem:[%s2927_s0 + $0xc] ss:$36 sps:$4 sm:$0xff]   ;;  %v2214_v37 = vld [vmem:[%s2926_s1 + $0x1c0] sm:$0xff]   ;;  %v2219_v41 = vld [vmem:[%s2927_s0 + $0x54] ss:$36 sps:$4 sm:$0xff]  }
   0xe   :  { %1925 = vmatprep.subr.bf16.mxu1 %v2188_v13  ;;  %1175 = vmatprep.mubr.bf16.mxu1 %v2212_v35  ;;  %v2215_v38 = vld [vmem:[%s2926_s1 + $0x100] sm:$0xff]   ;;  %v2217_v40 = vld [vmem:[%s2927_s0 + $0x4c] ss:$36 sps:$4 sm:$0xff]   ;;  %v2227_v48 = vld [vmem:[%s2927_s0 + $0x94] ss:$36 sps:$4 sm:$0xff]  }
   0xf   :  { %v2216_v39 = vld [vmem:[%s2926_s1 + $0x180] sm:$0xff]   ;;  %v2221_v42 = vld [vmem:[%s2927_s0 + $0x48] ss:$36 sps:$4 sm:$0xff]   ;;  %v2222_v43 = vld [vmem:[%s2927_s0 + $0x50] ss:$36 sps:$4 sm:$0xff]  }
  0x10   :  { %1862 = vmatpush3.bf16.msra.mxu0 %v2189_v14  ;;  %v2223_v44 = vld [vmem:[%s2926_s1 + $0x148] sm:$0xff]   ;;  %v2229_v49 = vld [vmem:[%s2927_s0 + $0x9c] ss:$36 sps:$4 sm:$0xff]   ;;  %v2231_v50 = vld [vmem:[%s2927_s0 + $0x90] ss:$36 sps:$4 sm:$0xff]  }
  0x11   :  { %1926 = vmatpush3.bf16.msra.mxu1 %v2190_v15  ;;  %1863 = vmatprep.subr.bf16.mxu0 %v2191_v16  ;;  %v2224_v45 = vld [vmem:[%s2926_s1 + $0x1c8] sm:$0xff]   ;;  %v2232_v51 = vld [vmem:[%s2927_s0 + $0x98] ss:$36 sps:$4 sm:$0xff]   ;;  %v2233_v52 = vld [vmem:[%s2926_s1 + $0x150] sm:$0xff]  }
  0x12   :  { %1927 = vmatprep.subr.bf16.mxu1 %v2192_v17  ;;  %v2225_v46 = vld [vmem:[%s2926_s1 + $0x108] sm:$0xff]   ;;  %v2234_v53 = vld [vmem:[%s2926_s1 + $0x1d0] sm:$0xff]   ;;  %v2237_v56 = vld [vmem:[%s2927_s0 + $0xdc] ss:$36 sps:$4 sm:$0xff]  }
  0x13   :  { %v2226_v47 = vld [vmem:[%s2926_s1 + $0x188] sm:$0xff]   ;;  %v2235_v54 = vld [vmem:[%s2926_s1 + $0x110] sm:$0xff]   ;;  %v2241_v58 = vld [vmem:[%s2927_s0 + $0xd8] ss:$36 sps:$4 sm:$0xff]  }
  0x14   :  { %1864 = vmatpush3.bf16.msra.mxu0 %v2193_v18  ;;  %v2236_v55 = vld [vmem:[%s2926_s1 + $0x190] sm:$0xff]   ;;  %v2239_v57 = vld [vmem:[%s2927_s0 + $0xe4] ss:$36 sps:$4 sm:$0xff]   ;;  %v2243_v60 = vld [vmem:[%s2926_s1 + $0x158] sm:$0xff]  }
  0x15   :  { %1928 = vmatpush3.bf16.msra.mxu1 %v2194_v19  ;;  %1865 = vmatprep.subr.bf16.mxu0 %v2195_v20  ;;  %v2242_v59 = vld [vmem:[%s2927_s0 + $0xe0] ss:$36 sps:$4 sm:$0xff]   ;;  %v2244_v61 = vld [vmem:[%s2926_s1 + $0x1d8] sm:$0xff]   ;;  %v2249_v1 = vld [vmem:[%s2927_s0 + $0x12c] ss:$36 sps:$4 sm:$0xff]  }
  0x16   :  { %1929 = vmatprep.subr.bf16.mxu1 %v2196_v21  ;;  %v2245_v62 = vld [vmem:[%s2926_s1 + $0x118] sm:$0xff]   ;;  %v2247_v0 = vld [vmem:[%s2927_s0 + $0x124] ss:$36 sps:$4 sm:$0xff]   ;;  %v2257_v8 = vld [vmem:[%s2927_s0 + $0x16c] ss:$36 sps:$4 sm:$0xff]  }
  0x17   :  { %v2246_v63 = vld [vmem:[%s2926_s1 + $0x198] sm:$0xff]   ;;  %v2251_v2 = vld [vmem:[%s2927_s0 + $0x120] ss:$36 sps:$4 sm:$0xff]   ;;  %v2252_v4 = vld [vmem:[%s2927_s0 + $0x128] ss:$36 sps:$4 sm:$0xff]  }
  0x18   :  { %1866 = vmatpush3.bf16.msra.mxu0 %v2197_v22  ;;  %v2253_v3 = vld [vmem:[%s2926_s1 + $0x160] sm:$0xff]   ;;  %v2259_v9 = vld [vmem:[%s2927_s0 + $0x174] ss:$36 sps:$4 sm:$0xff]   ;;  %v2263_v10 = vld [vmem:[%s2926_s1 + $0x168] sm:$0xff]  }
  0x19   :  { %1930 = vmatpush3.bf16.msra.mxu1 %v2198_v23  ;;  %1867 = vmatprep.subr.bf16.mxu0 %v2199_v24  ;;  %v2254_v5 = vld [vmem:[%s2926_s1 + $0x1e0] sm:$0xff]   ;;  %v2264_v11 = vld [vmem:[%s2926_s1 + $0x1e8] sm:$0xff]   ;;  %v2262_v15 = vld [vmem:[%s2927_s0 + $0x170] ss:$36 sps:$4 sm:$0xff]  }
  0x1a   :  { %1931 = vmatprep.subr.bf16.mxu1 %v2200_v25  ;;  %v2255_v6 = vld [vmem:[%s2926_s1 + $0x120] sm:$0xff]   ;;  %v2261_v12 = vld [vmem:[%s2927_s0 + $0x168] ss:$36 sps:$4 sm:$0xff]   ;;  %v2267_v16 = vld [vmem:[%s2927_s0 + $0x1b4] ss:$36 sps:$4 sm:$0xff]  }
  0x1b   :  { %v2256_v7 = vld [vmem:[%s2926_s1 + $0x1a0] sm:$0xff]   ;;  %v2265_v13 = vld [vmem:[%s2926_s1 + $0x128] sm:$0xff]   ;;  %v2273_v18 = vld [vmem:[%s2926_s1 + $0x170] sm:$0xff]  }
  0x1c   :  { %1868 = vmatpush3.bf16.msra.mxu0 %v2201_v26  ;;  %v2266_v14 = vld [vmem:[%s2926_s1 + $0x1a8] sm:$0xff]   ;;  %v2269_v17 = vld [vmem:[%s2927_s0 + $0x1bc] ss:$36 sps:$4 sm:$0xff]   ;;  %v2274_v19 = vld [vmem:[%s2926_s1 + $0x1f0] sm:$0xff]  }
  0x1d   :  { %1932 = vmatpush3.bf16.msra.mxu1 %v2202_v27  ;;  %1869 = vmatprep.subr.bf16.mxu0 %v2203_v28  ;;  %v2275_v20 = vld [vmem:[%s2926_s1 + $0x130] sm:$0xff]   ;;  %v2272_v23 = vld [vmem:[%s2927_s0 + $0x1b8] ss:$36 sps:$4 sm:$0xff]   ;;  %v2279_v25 = vld [vmem:[%s2927_s0 + $0x204] ss:$36 sps:$4 sm:$0xff]  }
  0x1e   :  { %1933 = vmatprep.subr.bf16.mxu1 %v2204_v29  ;;  %v2276_v21 = vld [vmem:[%s2926_s1 + $0x1b0] sm:$0xff]   ;;  %v2277_v24 = vld [vmem:[%s2927_s0 + $0x1fc] ss:$36 sps:$4 sm:$0xff]  }
  0x1f   :  { %v2271_v22 = vld [vmem:[%s2927_s0 + $0x1b0] ss:$36 sps:$4 sm:$0xff]   ;;  %v2283_v26 = vld [vmem:[%s2926_s1 + $0x178] sm:$0xff]  }
  0x20   :  { %1870 = vmatpush3.bf16.msra.mxu0 %v2205_v30  ;;  %v2284_v27 = vld [vmem:[%s2926_s1 + $0x1f8] sm:$0xff]   ;;  %v2287_v35 = vld [vmem:[%s2927_s0 + $0x10] ss:$36 sps:$4 sm:$0xff]  }
  0x21   :  { %1934 = vmatpush3.bf16.msra.mxu1 %v2206_v31  ;;  %1983 = vmatprep.subr.bf16.mxu0 %v2213_v36  ;;  %v2285_v28 = vld [vmem:[%s2926_s1 + $0x138] sm:$0xff]   ;;  %v2282_v31 = vld [vmem:[%s2927_s0 + $0x200] ss:$36 sps:$4 sm:$0xff]  }
  0x22   :  { %2047 = vmatprep.subr.bf16.mxu1 %v2214_v37  ;;  %v2286_v29 = vld [vmem:[%s2926_s1 + $0x1b8] sm:$0xff]  }
  0x23   :  { %1079 = vmatmul.mubr.bf16.vlgmr.msra.gmra.mrb[0].mxu0 %v2207_v32  ;;  %v2281_v30 = vld [vmem:[%s2927_s0 + $0x1f8] ss:$36 sps:$4 sm:$0xff]   ;;  %v2293_v32 = vld [vmem:[%s2926_s1 + $0x200] sm:$0xff]  }
  0x24   :  { %1176 = vmatmul.mubr.bf16.vlgmr.msra.gmra.mrb[0].mxu1 %v2210_v34  ;;  %1984 = vmatpush3.bf16.msra.mxu0 %v2215_v38  ;;  %v2289_v33 = vld [vmem:[%s2927_s0 + $0x14] ss:$36 sps:$4 sm:$0xff]   ;;  %v2292_v34 = vld [vmem:[%s2927_s0 + $0x1c] ss:$36 sps:$4 sm:$0xff]   ;;  %v2296_v38 = vld [vmem:[%s2927_s0 + $0x64] ss:$36 sps:$4 sm:$0xff]  }
  0x25   :  { %2048 = vmatpush3.bf16.msra.mxu1 %v2216_v39  ;;  %1086 = vmatprep.mubr.bf16.mxu0 %v2217_v40  ;;  %v2290_v36 = vld [vmem:[%s2927_s0 + $0x18] ss:$36 sps:$4 sm:$0xff]   ;;  %v2300_v39 = vld [vmem:[%s2926_s1 + $0x208] sm:$0xff]   ;;  %v2307_v40 = vld [vmem:[%s2926_s1 + $0x210] sm:$0xff]  }
  0x26   :  { %1183 = vmatprep.mubr.bf16.mxu1 %v2219_v41  ;;  %1985 = vmatprep.subr.bf16.mxu0 %v2223_v44  ;;  %v2294_v37 = vld [vmem:[%s2927_s0 + $0x5c] ss:$36 sps:$4 sm:$0xff]   ;;  %v2303_v44 = vld [vmem:[%s2927_s0 + $0xac] ss:$36 sps:$4 sm:$0xff]  }
  0x27   :  { %2049 = vmatprep.subr.bf16.mxu1 %v2224_v45  ;;  %v2298_v41 = vld [vmem:[%s2927_s0 + $0x58] ss:$36 sps:$4 sm:$0xff]  }
  0x28   :  { %1986 = vmatpush3.bf16.msra.mxu0 %v2225_v46  ;;  %v2314_v45 = vld [vmem:[%s2926_s1 + $0x218] sm:$0xff]   ;;  %v2321_v46 = vld [vmem:[%s2926_s1 + $0x220] sm:$0xff]  }
  0x29   :  { %2050 = vmatpush3.bf16.msra.mxu1 %v2226_v47  ;;  %1987 = vmatprep.subr.bf16.mxu0 %v2233_v52  ;;  %v2305_v47 = vld [vmem:[%s2927_s0 + $0xa0] ss:$36 sps:$4 sm:$0xff]   ;;  %v2312_v52 = vld [vmem:[%s2927_s0 + $0xe8] ss:$36 sps:$4 sm:$0xff]  }
  0x2a   :  { %2051 = vmatprep.subr.bf16.mxu1 %v2234_v53  ;;  %v2335_v53 = vld [vmem:[%s2926_s1 + $0x230] sm:$0xff]  }
  0x2b   :  { %1087 = vmatmul.mubr.bf16.gmra.mrb[4].mxu0 %v2221_v42  ;;  %v2299_v42 = vld [vmem:[%s2927_s0 + $0x60] ss:$36 sps:$4 sm:$0xff]  }
  0x2c   :  { %1184 = vmatmul.mubr.bf16.gmra.mrb[4].mxu1 %v2222_v43  ;;  %1094 = vmatprep.mubr.bf16.mxu0 %v2227_v48  ;;  %v2301_v43 = vld [vmem:[%s2927_s0 + $0xa4] ss:$36 sps:$4 sm:$0xff]  }
  0x2d   :  { %1191 = vmatprep.mubr.bf16.mxu1 %v2229_v49  ;;  %1988 = vmatpush3.bf16.msra.mxu0 %v2235_v54  ;;  %v2306_v48 = vld [vmem:[%s2927_s0 + $0xa8] ss:$36 sps:$4 sm:$0xff]   ;;  %v2313_v54 = vld [vmem:[%s2927_s0 + $0xf0] ss:$36 sps:$4 sm:$0xff]  }
  0x2e   :  { %2052 = vmatpush3.bf16.msra.mxu1 %v2236_v55  ;;  %1989 = vmatprep.subr.bf16.mxu0 %v2243_v60  ;;  %v2308_v49 = vld [vmem:[%s2927_s0 + $0xec] ss:$36 sps:$4 sm:$0xff]   ;;  %v2315_v55 = vld [vmem:[%s2927_s0 + $0x134] ss:$36 sps:$4 sm:$0xff]   ;;  %v2322_v60 = vld [vmem:[%s2927_s0 + $0x17c] ss:$36 sps:$4 sm:$0xff]  }
  0x2f   :  { %2053 = vmatprep.subr.bf16.mxu1 %v2244_v61  ;;  %v2324_v61 = vld [vmem:[%s2927_s0 + $0x184] ss:$36 sps:$4 sm:$0xff]  }
  0x31   :  { %1990 = vmatpush3.bf16.msra.mxu0 %v2245_v62  ;;  %v2326_v62 = vld [vmem:[%s2927_s0 + $0x178] ss:$36 sps:$4 sm:$0xff]  }
  0x32   :  { %2054 = vmatpush3.bf16.msra.mxu1 %v2246_v63  ;;  %1991 = vmatprep.subr.bf16.mxu0 %v2253_v3  ;;  %v2327_v63 = vld [vmem:[%s2927_s0 + $0x180] ss:$36 sps:$4 sm:$0xff]   ;;  %v2334_v3 = vld [vmem:[%s2927_s0 + $0x1c8] ss:$36 sps:$4 sm:$0xff]  }
  0x33   :  { %1095 = vmatmul.mubr.bf16.gmra.mrb[8].mxu0 %v2231_v50  ;;  %2055 = vmatprep.subr.bf16.mxu1 %v2254_v5  ;;  %v2310_v50 = vld [vmem:[%s2927_s0 + $0xf4] ss:$36 sps:$4 sm:$0xff]  }
  0x34   :  { %1192 = vmatmul.mubr.bf16.gmra.mrb[8].mxu1 %v2232_v51  ;;  %1102 = vmatprep.mubr.bf16.mxu0 %v2237_v56  ;;  %v2328_v51 = vld [vmem:[%s2926_s1 + $0x228] sm:$0xff]   ;;  %v2317_v56 = vld [vmem:[%s2927_s0 + $0x13c] ss:$36 sps:$4 sm:$0xff]   ;;  %v2338_v5 = vld [vmem:[%s2927_s0 + $0x214] ss:$36 sps:$4 sm:$0xff]  }
  0x35   :  { %1199 = vmatprep.mubr.bf16.mxu1 %v2239_v57  ;;  %1992 = vmatpush3.bf16.msra.mxu0 %v2255_v6  ;;  %v2342_v57 = vld [vmem:[%s2926_s1 + $0x238] sm:$0xff]   ;;  %v2340_v6 = vld [vmem:[%s2927_s0 + $0x208] ss:$36 sps:$4 sm:$0xff]  }
  0x36   :  { %2056 = vmatpush3.bf16.msra.mxu1 %v2256_v7  ;;  %1993 = vmatprep.subr.bf16.mxu0 %v2263_v10  ;;  %v2341_v7 = vld [vmem:[%s2927_s0 + $0x210] ss:$36 sps:$4 sm:$0xff]   ;;  %v2345_v10 = vld [vmem:[%s2927_s0 + $0x68] ss:$36 sps:$4 sm:$0xff]  }
  0x37   :  { %2057 = vmatprep.subr.bf16.mxu1 %v2264_v11  ;;  %v2346_v11 = vld [vmem:[%s2927_s0 + $0x188] ss:$36 sps:$4 sm:$0xff]  }
  0x39   :  { %1994 = vmatpush3.bf16.msra.mxu0 %v2265_v13  ;;  %v2348_v13 = vld [vmem:[%s2927_s0 + $0x1d0] ss:$36 sps:$4 sm:$0xff]  }
  0x3a   :  { %2058 = vmatpush3.bf16.msra.mxu1 %v2266_v14  ;;  %1995 = vmatprep.subr.bf16.mxu0 %v2273_v18  ;;  %v2349_v14 = vld [vmem:[%s2927_s0 + $0xf8] ss:$36 sps:$4 sm:$0xff]   ;;  %v2806_v18 = vld [vmem:[%s2928_s2] ss:$0 sm:$0xff] }
  0x3b   :  { %1103 = vmatmul.mubr.bf16.gmra.mrb[12].mxu0 %v2241_v58  ;;  %2059 = vmatprep.subr.bf16.mxu1 %v2274_v19  ;;  %v2319_v58 = vld [vmem:[%s2927_s0 + $0x130] ss:$36 sps:$4 sm:$0xff]  }
  0x3c   :  { %1200 = vmatmul.mubr.bf16.gmra.mrb[12].mxu1 %v2242_v59  ;;  %1110 = vmatprep.mubr.bf16.mxu0 %v2247_v0  ;;  %v2320_v59 = vld [vmem:[%s2927_s0 + $0x138] ss:$36 sps:$4 sm:$0xff]   ;;  %v2329_v0 = vld [vmem:[%s2927_s0 + $0x1c4] ss:$36 sps:$4 sm:$0xff]  }
  0x3d   :  { %1207 = vmatprep.mubr.bf16.mxu1 %v2249_v1  ;;  %1996 = vmatpush3.bf16.msra.mxu0 %v2275_v20  ;;  %v2331_v1 = vld [vmem:[%s2927_s0 + $0x1cc] ss:$36 sps:$4 sm:$0xff]  }
  0x3e   :  { %2060 = vmatpush3.bf16.msra.mxu1 %v2276_v21  ;;  %1997 = vmatprep.subr.bf16.mxu0 %v2283_v26 }
  0x3f   :  { %2061 = vmatprep.subr.bf16.mxu1 %v2284_v27 }
  0x41   :  { %1998 = vmatpush3.bf16.msra.mxu0 %v2285_v28 }
  0x42   :  { %2062 = vmatpush3.bf16.msra.mxu1 %v2286_v29  ;;  %2127 = vmatprep.subr.bf16.mxu0 %v2293_v32 }
  0x43   :  { %1111 = vmatmul.mubr.bf16.gmra.mrb[16].mxu0 %v2251_v2  ;;  %2159 = vmatprep.subr.bf16.mxu1 %v2293_v32  ;;  %v2333_v2 = vld [vmem:[%s2927_s0 + $0x1c0] ss:$36 sps:$4 sm:$0xff]  }
  0x44   :  { %1208 = vmatmul.mubr.bf16.gmra.mrb[16].mxu1 %v2252_v4  ;;  %1118 = vmatprep.mubr.bf16.mxu0 %v2257_v8  ;;  %v2336_v4 = vld [vmem:[%s2927_s0 + $0x20c] ss:$36 sps:$4 sm:$0xff]   ;;  %v2343_v8 = vld [vmem:[%s2927_s0 + $0x20] ss:$36 sps:$4 sm:$0xff]  }
  0x45   :  { %1215 = vmatprep.mubr.bf16.mxu1 %v2259_v9  ;;  %v2344_v9 = vld [vmem:[%s2927_s0 + $0x140] ss:$36 sps:$4 sm:$0xff]  }
  0x4b   :  { %1119 = vmatmul.mubr.bf16.gmra.mrb[20].mxu0 %v2261_v12  ;;  %v2347_v12 = vld [vmem:[%s2927_s0 + $0xb0] ss:$36 sps:$4 sm:$0xff]  }
  0x4c   :  { %1216 = vmatmul.mubr.bf16.gmra.mrb[20].mxu1 %v2262_v15  ;;  %1126 = vmatprep.mubr.bf16.mxu0 %v2267_v16  ;;  %v2350_v15 = vld [vmem:[%s2927_s0 + $0x218] ss:$36 sps:$4 sm:$0xff]  }
  0x4d   :  { %1223 = vmatprep.mubr.bf16.mxu1 %v2269_v17 }
  0x53   :  { %1127 = vmatmul.mubr.bf16.gmra.mrb[24].mxu0 %v2271_v22 }
  0x54   :  { %1224 = vmatmul.mubr.bf16.gmra.mrb[24].mxu1 %v2272_v23  ;;  %1134 = vmatprep.mubr.bf16.mxu0 %v2277_v24 }
  0x55   :  { %1231 = vmatprep.mubr.bf16.mxu1 %v2279_v25 }
  0x5b   :  { %1135 = vmatmul.mubr.bf16.gmra.mrb[28].mxu0 %v2281_v30 }
  0x5c   :  { %1232 = vmatmul.mubr.bf16.gmra.mrb[28].mxu1 %v2282_v31  ;;  %1272 = vmatprep.mubr.bf16.mxu0 %v2289_v33 }
  0x5d   :  { %1369 = vmatprep.mubr.bf16.mxu1 %v2292_v34 }
  0x63   :  { %1273 = vmatmul.mubr.bf16.vlgmr.msra.gmra.mrb[32].mxu0 %v2287_v35 }
  0x64   :  { %1370 = vmatmul.mubr.bf16.vlgmr.msra.gmra.mrb[32].mxu1 %v2290_v36  ;;  %2128 = vmatpush3.bf16.msra.mxu0 %v2293_v32 }
  0x65   :  { %2167 = vmatpush3.bf16.msra.mxu1 %v2293_v32  ;;  %1280 = vmatprep.mubr.bf16.mxu0 %v2294_v37 }
  0x66   :  { %1377 = vmatprep.mubr.bf16.mxu1 %v2296_v38  ;;  %2129 = vmatprep.subr.bf16.mxu0 %v2300_v39 }
  0x67   :  { %2160 = vmatprep.subr.bf16.mxu1 %v2300_v39 }
  0x68   :  { %2130 = vmatpush3.bf16.msra.mxu0 %v2300_v39 }
  0x69   :  { %2168 = vmatpush3.bf16.msra.mxu1 %v2300_v39  ;;  %2131 = vmatprep.subr.bf16.mxu0 %v2307_v40 }
  0x6a   :  { %2161 = vmatprep.subr.bf16.mxu1 %v2307_v40 }
  0x6b   :  { %1281 = vmatmul.mubr.bf16.gmra.mrb[36].mxu0 %v2298_v41 }
  0x6c   :  { %1378 = vmatmul.mubr.bf16.gmra.mrb[36].mxu1 %v2299_v42  ;;  %1288 = vmatprep.mubr.bf16.mxu0 %v2301_v43 }
  0x6d   :  { %1385 = vmatprep.mubr.bf16.mxu1 %v2303_v44  ;;  %2132 = vmatpush3.bf16.msra.mxu0 %v2307_v40 }
  0x6e   :  { %2169 = vmatpush3.bf16.msra.mxu1 %v2307_v40  ;;  %2133 = vmatprep.subr.bf16.mxu0 %v2314_v45 }
  0x6f   :  { %2162 = vmatprep.subr.bf16.mxu1 %v2314_v45 }
  0x71   :  { %2134 = vmatpush3.bf16.msra.mxu0 %v2314_v45 }
  0x72   :  { %2170 = vmatpush3.bf16.msra.mxu1 %v2314_v45  ;;  %2135 = vmatprep.subr.bf16.mxu0 %v2321_v46 }
  0x73   :  { %1289 = vmatmul.mubr.bf16.gmra.mrb[40].mxu0 %v2305_v47  ;;  %2163 = vmatprep.subr.bf16.mxu1 %v2321_v46 }
  0x74   :  { %1386 = vmatmul.mubr.bf16.gmra.mrb[40].mxu1 %v2306_v48  ;;  %1296 = vmatprep.mubr.bf16.mxu0 %v2308_v49 }
  0x75   :  { %1393 = vmatprep.mubr.bf16.mxu1 %v2310_v50  ;;  %2136 = vmatpush3.bf16.msra.mxu0 %v2321_v46 }
  0x76   :  { %2171 = vmatpush3.bf16.msra.mxu1 %v2321_v46  ;;  %2137 = vmatprep.subr.bf16.mxu0 %v2328_v51 }
  0x77   :  { %2164 = vmatprep.subr.bf16.mxu1 %v2328_v51 }
  0x79   :  { %2138 = vmatpush3.bf16.msra.mxu0 %v2328_v51 }
  0x7a   :  { %2172 = vmatpush3.bf16.msra.mxu1 %v2328_v51  ;;  %2139 = vmatprep.subr.bf16.mxu0 %v2335_v53 }
  0x7b   :  { %1297 = vmatmul.mubr.bf16.gmra.mrb[44].mxu0 %v2312_v52  ;;  %2165 = vmatprep.subr.bf16.mxu1 %v2335_v53 }
  0x7c   :  { %1394 = vmatmul.mubr.bf16.gmra.mrb[44].mxu1 %v2313_v54  ;;  %1304 = vmatprep.mubr.bf16.mxu0 %v2315_v55 }
  0x7d   :  { %1401 = vmatprep.mubr.bf16.mxu1 %v2317_v56  ;;  %2140 = vmatpush3.bf16.msra.mxu0 %v2335_v53 }
  0x7e   :  { %2173 = vmatpush3.bf16.msra.mxu1 %v2335_v53  ;;  %2141 = vmatprep.subr.bf16.mxu0 %v2342_v57 }
  0x7f   :  { %2166 = vmatprep.subr.bf16.mxu1 %v2342_v57 }
  0x81   :  { %2142 = vmatpush3.bf16.msra.mxu0 %v2342_v57 }
  0x82   :  { %2174 = vmatpush3.bf16.msra.mxu1 %v2342_v57 }
  0x83   :  { %1305 = vmatmul.mubr.bf16.gmra.mrb[48].mxu0 %v2319_v58 }
  0x84   :  { %1402 = vmatmul.mubr.bf16.gmra.mrb[48].mxu1 %v2320_v59  ;;  %1312 = vmatprep.mubr.bf16.mxu0 %v2322_v60 }
  0x85   :  { %1409 = vmatprep.mubr.bf16.mxu1 %v2324_v61 }
  0x8b   :  { %1313 = vmatmul.mubr.bf16.gmra.mrb[52].mxu0 %v2326_v62 }
  0x8c   :  { %1410 = vmatmul.mubr.bf16.gmra.mrb[52].mxu1 %v2327_v63  ;;  %1320 = vmatprep.mubr.bf16.mxu0 %v2329_v0 }
  0x8d   :  { %1417 = vmatprep.mubr.bf16.mxu1 %v2331_v1 }
  0x93   :  { %1321 = vmatmul.mubr.bf16.gmra.mrb[56].mxu0 %v2333_v2 }
  0x94   :  { %1418 = vmatmul.mubr.bf16.gmra.mrb[56].mxu1 %v2334_v3  ;;  %1328 = vmatprep.mubr.bf16.mxu0 %v2336_v4 }
  0x95   :  { %1425 = vmatprep.mubr.bf16.mxu1 %v2338_v5 }
  0x9b   :  { %1329 = vmatmul.mubr.bf16.gmra.mrb[60].mxu0 %v2340_v6 }
  0x9c   :  { %1426 = vmatmul.mubr.bf16.gmra.mrb[60].mxu1 %v2341_v7  ;;  %2143 = vmatprep.mubr.bf16.mxu0 %v2343_v8 }
  0x9d   :  { %2151 = vmatprep.mubr.bf16.mxu1 %v2344_v9 }
  0xa3   :  { %2144 = vmatmul.mubr.bf16.vlgmr.msra.gmra.mrb[64].mxu0 %v2345_v10 }
  0xa4   :  { %2152 = vmatmul.mubr.bf16.vlgmr.msra.gmra.mrb[64].mxu1 %v2346_v11  ;;  %2147 = vmatprep.mubr.bf16.mxu0 %v2347_v12 }
  0xa5   :  { %2155 = vmatprep.mubr.bf16.mxu1 %v2348_v13 }
  0xab   :  { %2148 = vmatmul.mubr.bf16.gmra.mrb[68].mxu0 %v2349_v14 }
  0xac   :  { %2156 = vmatmul.mubr.bf16.gmra.mrb[68].mxu1 %v2350_v15 }
  0xf6   :  { %v1871_v16 = vpop.f32.mrb[0].mxu0 }
  0xf7   :  { %v1935_v17 = vpop.f32.mrb[0].mxu1  ;;  %v1872_v19 = vpop.f32.mrb[1].mxu0 }
  0xf8   :  { %v1873_v20 = vadd.f32 %v1872_v19, %v1871_v16  ;;  %v1936_v21 = vpop.f32.mrb[1].mxu1  ;;  %v1874_v22 = vpop.f32.mrb[2].mxu0 }
  0xf9   :  { %v1937_v23 = vadd.f32 %v1936_v21, %v1935_v17  ;;  %v1938_v24 = vpop.f32.mrb[2].mxu1  ;;  %v1875_v25 = vpop.f32.mrb[3].mxu0 }
  0xfa   :  { %v1081_v26 = vadd.f32 %v1873_v20, %v2806_v18  ;;  %v1876_v27 = vadd.f32 %v1875_v25, %v1874_v22  ;;  %v1939_v28 = vpop.f32.mrb[3].mxu1 }
  0xfb   :  { %v1940_v29 = vadd.f32 %v1939_v28, %v1938_v24 }
  0xfc   :  { %v2809_v30 = vadd.f32 %v1937_v23, %v1081_v26  ;;  %v1084_v31 = vadd.f32 %v1876_v27, %v2806_v18 }
  0xfe   :  { %v2812_v32 = vadd.f32 %v1940_v29, %v1084_v31  ;;  %v1877_v33 = vpop.f32.mrb[4].mxu0 }
  0xff   :  { %v1941_v34 = vpop.f32.mrb[4].mxu1  ;;  %v1878_v35 = vpop.f32.mrb[5].mxu0 }
 0x100   :  { %v1879_v36 = vadd.f32 %v1878_v35, %v1877_v33  ;;  %v1942_v37 = vpop.f32.mrb[5].mxu1  ;;  %v1880_v38 = vpop.f32.mrb[6].mxu0 }
 0x101   :  { %v1943_v39 = vadd.f32 %v1942_v37, %v1941_v34  ;;  %v1944_v40 = vpop.f32.mrb[6].mxu1  ;;  %v1881_v41 = vpop.f32.mrb[7].mxu0 }
 0x102   :  { %v1089_v42 = vadd.f32 %v1879_v36, %v2806_v18  ;;  %v1882_v43 = vadd.f32 %v1881_v41, %v1880_v38  ;;  %v1945_v44 = vpop.f32.mrb[7].mxu1 }
 0x103   :  { %v1946_v45 = vadd.f32 %v1945_v44, %v1944_v40 }
 0x104   :  { %v2815_v46 = vadd.f32 %v1943_v39, %v1089_v42  ;;  %v1092_v47 = vadd.f32 %v1882_v43, %v2806_v18 }
 0x106   :  { %v2818_v48 = vadd.f32 %v1946_v45, %v1092_v47  ;;  %v1883_v49 = vpop.f32.mrb[8].mxu0 }
 0x107   :  { %v1947_v50 = vpop.f32.mrb[8].mxu1  ;;  %v1884_v51 = vpop.f32.mrb[9].mxu0 }
 0x108   :  { %v1885_v52 = vadd.f32 %v1884_v51, %v1883_v49  ;;  %v1948_v53 = vpop.f32.mrb[9].mxu1  ;;  %v1886_v54 = vpop.f32.mrb[10].mxu0 }
 0x109   :  { %v1949_v55 = vadd.f32 %v1948_v53, %v1947_v50  ;;  %v1950_v56 = vpop.f32.mrb[10].mxu1  ;;  %v1887_v57 = vpop.f32.mrb[11].mxu0 }
 0x10a   :  { %v1097_v58 = vadd.f32 %v1885_v52, %v2806_v18  ;;  %v1888_v59 = vadd.f32 %v1887_v57, %v1886_v54  ;;  %v1951_v60 = vpop.f32.mrb[11].mxu1 }
 0x10b   :  { %v1952_v61 = vadd.f32 %v1951_v60, %v1950_v56 }
 0x10c   :  { %v2821_v62 = vadd.f32 %v1949_v55, %v1097_v58  ;;  %v1100_v63 = vadd.f32 %v1888_v59, %v2806_v18 }
 0x10e   :  { %v2824_v0 = vadd.f32 %v1952_v61, %v1100_v63  ;;  %v1889_v1 = vpop.f32.mrb[12].mxu0 }
 0x10f   :  { %v1953_v2 = vpop.f32.mrb[12].mxu1  ;;  %v1890_v3 = vpop.f32.mrb[13].mxu0 }
 0x110   :  { %v1891_v4 = vadd.f32 %v1890_v3, %v1889_v1  ;;  %v1954_v5 = vpop.f32.mrb[13].mxu1  ;;  %v1892_v6 = vpop.f32.mrb[14].mxu0 }
 0x111   :  { %v1955_v7 = vadd.f32 %v1954_v5, %v1953_v2  ;;  %v1956_v8 = vpop.f32.mrb[14].mxu1  ;;  %v1893_v9 = vpop.f32.mrb[15].mxu0 }
 0x112   :  { %v1105_v10 = vadd.f32 %v1891_v4, %v2806_v18  ;;  %v1894_v11 = vadd.f32 %v1893_v9, %v1892_v6  ;;  %v1957_v12 = vpop.f32.mrb[15].mxu1 }
 0x113   :  { %v1958_v13 = vadd.f32 %v1957_v12, %v1956_v8 }
 0x114   :  { %v2827_v14 = vadd.f32 %v1955_v7, %v1105_v10  ;;  %v1108_v15 = vadd.f32 %v1894_v11, %v2806_v18 }
 0x116   :  { %v2830_v16 = vadd.f32 %v1958_v13, %v1108_v15  ;;  %v1895_v17 = vpop.f32.mrb[16].mxu0 }
 0x117   :  { %v1959_v19 = vpop.f32.mrb[16].mxu1  ;;  %v1896_v20 = vpop.f32.mrb[17].mxu0 }
 0x118   :  { %v1897_v21 = vadd.f32 %v1896_v20, %v1895_v17  ;;  %v1960_v22 = vpop.f32.mrb[17].mxu1  ;;  %v1898_v23 = vpop.f32.mrb[18].mxu0 }
 0x119   :  { %v1961_v24 = vadd.f32 %v1960_v22, %v1959_v19  ;;  %v1962_v25 = vpop.f32.mrb[18].mxu1  ;;  %v1899_v26 = vpop.f32.mrb[19].mxu0 }
 0x11a   :  { %v1113_v27 = vadd.f32 %v1897_v21, %v2806_v18  ;;  %v1900_v28 = vadd.f32 %v1899_v26, %v1898_v23  ;;  %v1963_v29 = vpop.f32.mrb[19].mxu1 }
 0x11b   :  { %v1964_v31 = vadd.f32 %v1963_v29, %v1962_v25 }
 0x11c   :  { %v2833_v33 = vadd.f32 %v1961_v24, %v1113_v27  ;;  %v1116_v34 = vadd.f32 %v1900_v28, %v2806_v18 }
 0x11e   :  { %v2836_v35 = vadd.f32 %v1964_v31, %v1116_v34  ;;  %v1901_v36 = vpop.f32.mrb[20].mxu0 }
 0x11f   :  { %v1965_v37 = vpop.f32.mrb[20].mxu1  ;;  %v1902_v38 = vpop.f32.mrb[21].mxu0 }
 0x120   :  { %v1903_v39 = vadd.f32 %v1902_v38, %v1901_v36  ;;  %v1966_v40 = vpop.f32.mrb[21].mxu1  ;;  %v1904_v41 = vpop.f32.mrb[22].mxu0 }
 0x121   :  { %v1967_v42 = vadd.f32 %v1966_v40, %v1965_v37  ;;  %v1968_v43 = vpop.f32.mrb[22].mxu1  ;;  %v1905_v44 = vpop.f32.mrb[23].mxu0 }
 0x122   :  { %v1121_v45 = vadd.f32 %v1903_v39, %v2806_v18  ;;  %v1906_v47 = vadd.f32 %v1905_v44, %v1904_v41  ;;  %v1969_v49 = vpop.f32.mrb[23].mxu1 }
 0x123   :  { %v1970_v50 = vadd.f32 %v1969_v49, %v1968_v43 }
 0x124   :  { %v2839_v51 = vadd.f32 %v1967_v42, %v1121_v45  ;;  %v1124_v52 = vadd.f32 %v1906_v47, %v2806_v18 }
 0x126   :  { %v2842_v53 = vadd.f32 %v1970_v50, %v1124_v52  ;;  %v1907_v54 = vpop.f32.mrb[24].mxu0 }
 0x127   :  { %v1971_v55 = vpop.f32.mrb[24].mxu1  ;;  %v1908_v56 = vpop.f32.mrb[25].mxu0 }
 0x128   :  { %v1909_v57 = vadd.f32 %v1908_v56, %v1907_v54  ;;  %v1972_v58 = vpop.f32.mrb[25].mxu1  ;;  %v1910_v59 = vpop.f32.mrb[26].mxu0 }
 0x129   :  { %v1973_v60 = vadd.f32 %v1972_v58, %v1971_v55  ;;  %v1974_v61 = vpop.f32.mrb[26].mxu1  ;;  %v1911_v63 = vpop.f32.mrb[27].mxu0 }
 0x12a   :  { %v1129_v1 = vadd.f32 %v1909_v57, %v2806_v18  ;;  %v1912_v2 = vadd.f32 %v1911_v63, %v1910_v59  ;;  %v1975_v3 = vpop.f32.mrb[27].mxu1 }
 0x12b   :  { %v1976_v4 = vadd.f32 %v1975_v3, %v1974_v61 }
 0x12c   :  { %v2845_v5 = vadd.f32 %v1973_v60, %v1129_v1  ;;  %v1132_v6 = vadd.f32 %v1912_v2, %v2806_v18 }
 0x12e   :  { %v2848_v7 = vadd.f32 %v1976_v4, %v1132_v6  ;;  %v1913_v8 = vpop.f32.mrb[28].mxu0 }
 0x12f   :  { %v1977_v9 = vpop.f32.mrb[28].mxu1  ;;  %v1914_v10 = vpop.f32.mrb[29].mxu0 }
 0x130   :  { %v1915_v11 = vadd.f32 %v1914_v10, %v1913_v8  ;;  %v1978_v12 = vpop.f32.mrb[29].mxu1  ;;  %v1916_v13 = vpop.f32.mrb[30].mxu0 }
 0x131   :  { %v1979_v15 = vadd.f32 %v1978_v12, %v1977_v9  ;;  %v1980_v17 = vpop.f32.mrb[30].mxu1  ;;  %v1917_v19 = vpop.f32.mrb[31].mxu0 }
 0x132   :  { %v1137_v20 = vadd.f32 %v1915_v11, %v2806_v18  ;;  %v1918_v21 = vadd.f32 %v1917_v19, %v1916_v13  ;;  %v1981_v22 = vpop.f32.mrb[31].mxu1 }
 0x133   :  { %v1982_v23 = vadd.f32 %v1981_v22, %v1980_v17 }
 0x134   :  { %v2851_v24 = vadd.f32 %v1979_v15, %v1137_v20  ;;  %v1140_v25 = vadd.f32 %v1918_v21, %v2806_v18 }
 0x136   :  { %v2854_v26 = vadd.f32 %v1982_v23, %v1140_v25  ;;  %v1999_v27 = vpop.f32.mrb[32].mxu0 }
 0x137   :  { %v2063_v28 = vpop.f32.mrb[32].mxu1  ;;  %v2000_v29 = vpop.f32.mrb[33].mxu0 }
 0x138   :  { %v2001_v31 = vadd.f32 %v2000_v29, %v1999_v27  ;;  %v2064_v34 = vpop.f32.mrb[33].mxu1  ;;  %v2002_v36 = vpop.f32.mrb[34].mxu0 }
 0x139   :  { %v2065_v37 = vadd.f32 %v2064_v34, %v2063_v28  ;;  %v2066_v38 = vpop.f32.mrb[34].mxu1  ;;  %v2003_v39 = vpop.f32.mrb[35].mxu0 }
 0x13a   :  { %v1275_v40 = vadd.f32 %v2001_v31, %v2809_v30  ;;  %v2004_v41 = vadd.f32 %v2003_v39, %v2002_v36  ;;  %v2067_v42 = vpop.f32.mrb[35].mxu1 }
 0x13b   :  { %v2068_v43 = vadd.f32 %v2067_v42, %v2066_v38 }
 0x13c   :  { %v1278_v44 = vadd.f32 %v2004_v41, %v2812_v32  ;;  %v2858_v45 = vadd.f32 %v2065_v37, %v1275_v40 }
 0x13e   :  { %v2005_v18 = vpop.f32.mrb[36].mxu0  ;;  %v2860_v47 = vadd.f32 %v2068_v43, %v1278_v44 }
 0x13f   :  { %v2069_v49 = vpop.f32.mrb[36].mxu1  ;;  %v2006_v50 = vpop.f32.mrb[37].mxu0 }
 0x140   :  { %v2007_v52 = vadd.f32 %v2006_v50, %v2005_v18  ;;  %v2070_v54 = vpop.f32.mrb[37].mxu1  ;;  %v2008_v55 = vpop.f32.mrb[38].mxu0 }
 0x141   :  { %v2071_v56 = vadd.f32 %v2070_v54, %v2069_v49  ;;  %v2072_v57 = vpop.f32.mrb[38].mxu1  ;;  %v2009_v58 = vpop.f32.mrb[39].mxu0 }
 0x142   :  { %v1283_v30 = vadd.f32 %v2007_v52, %v2815_v46  ;;  %v2010_v59 = vadd.f32 %v2009_v58, %v2008_v55  ;;  %v2073_v60 = vpop.f32.mrb[39].mxu1 }
 0x143   :  { %v2074_v61 = vadd.f32 %v2073_v60, %v2072_v57 }
 0x144   :  { %v1286_v32 = vadd.f32 %v2010_v59, %v2818_v48  ;;  %v2864_v63 = vadd.f32 %v2071_v56, %v1283_v30 }
 0x146   :  { %v2011_v1 = vpop.f32.mrb[40].mxu0  ;;  %v2866_v2 = vadd.f32 %v2074_v61, %v1286_v32 }
 0x147   :  { %v2075_v3 = vpop.f32.mrb[40].mxu1  ;;  %v2012_v4 = vpop.f32.mrb[41].mxu0 }
 0x148   :  { %v2013_v6 = vadd.f32 %v2012_v4, %v2011_v1  ;;  %v2076_v8 = vpop.f32.mrb[41].mxu1  ;;  %v2014_v9 = vpop.f32.mrb[42].mxu0 }
 0x149   :  { %v2077_v10 = vadd.f32 %v2076_v8, %v2075_v3  ;;  %v2078_v11 = vpop.f32.mrb[42].mxu1  ;;  %v2015_v12 = vpop.f32.mrb[43].mxu0 }
 0x14a   :  { %v1291_v46 = vadd.f32 %v2013_v6, %v2821_v62  ;;  %v2016_v13 = vadd.f32 %v2015_v12, %v2014_v9  ;;  %v2079_v15 = vpop.f32.mrb[43].mxu1 }
 0x14b   :  { %v2080_v17 = vadd.f32 %v2079_v15, %v2078_v11 }
 0x14c   :  { %v1294_v48 = vadd.f32 %v2016_v13, %v2824_v0  ;;  %v2870_v19 = vadd.f32 %v2077_v10, %v1291_v46 }
 0x14e   :  { %v2017_v20 = vpop.f32.mrb[44].mxu0  ;;  %v2872_v21 = vadd.f32 %v2080_v17, %v1294_v48 }
 0x14f   :  { %v2081_v22 = vpop.f32.mrb[44].mxu1  ;;  %v2018_v23 = vpop.f32.mrb[45].mxu0 }
 0x150   :  { %v2019_v25 = vadd.f32 %v2018_v23, %v2017_v20  ;;  %v2082_v27 = vpop.f32.mrb[45].mxu1  ;;  %v2020_v28 = vpop.f32.mrb[46].mxu0 }
 0x151   :  { %v2083_v29 = vadd.f32 %v2082_v27, %v2081_v22  ;;  %v2084_v31 = vpop.f32.mrb[46].mxu1  ;;  %v2021_v34 = vpop.f32.mrb[47].mxu0 }
 0x152   :  { %v1299_v62 = vadd.f32 %v2019_v25, %v2827_v14  ;;  %v2022_v36 = vadd.f32 %v2021_v34, %v2020_v28  ;;  %v2085_v37 = vpop.f32.mrb[47].mxu1 }
 0x153   :  { %v2086_v38 = vadd.f32 %v2085_v37, %v2084_v31 }
 0x154   :  { %v1302_v0 = vadd.f32 %v2022_v36, %v2830_v16  ;;  %v2876_v39 = vadd.f32 %v2083_v29, %v1299_v62 }
 0x156   :  { %v2023_v40 = vpop.f32.mrb[48].mxu0  ;;  %v2878_v41 = vadd.f32 %v2086_v38, %v1302_v0 }
 0x157   :  { %v2087_v42 = vpop.f32.mrb[48].mxu1  ;;  %v2024_v43 = vpop.f32.mrb[49].mxu0 }
 0x158   :  { %v2025_v44 = vadd.f32 %v2024_v43, %v2023_v40  ;;  %v2088_v18 = vpop.f32.mrb[49].mxu1  ;;  %v2026_v49 = vpop.f32.mrb[50].mxu0 }
 0x159   :  { %v2089_v50 = vadd.f32 %v2088_v18, %v2087_v42  ;;  %v2090_v52 = vpop.f32.mrb[50].mxu1  ;;  %v2027_v54 = vpop.f32.mrb[51].mxu0 }
 0x15a   :  { %v1307_v14 = vadd.f32 %v2025_v44, %v2833_v33  ;;  %v2028_v55 = vadd.f32 %v2027_v54, %v2026_v49  ;;  %v2091_v56 = vpop.f32.mrb[51].mxu1 }
 0x15b   :  { %v2092_v57 = vadd.f32 %v2091_v56, %v2090_v52 }
 0x15c   :  { %v1310_v16 = vadd.f32 %v2028_v55, %v2836_v35  ;;  %v1404_v58 = vadd.f32 %v2089_v50, %v1307_v14 }
 0x15e   :  { %v2029_v30 = vpop.f32.mrb[52].mxu0  ;;  %v2882_v59 = vadd.f32 %v2092_v57, %v1310_v16 }
 0x15f   :  { %v2093_v60 = vpop.f32.mrb[52].mxu1  ;;  %v2030_v61 = vpop.f32.mrb[53].mxu0 }
 0x160   :  { %v2031_v32 = vadd.f32 %v2030_v61, %v2029_v30  ;;  %v2094_v1 = vpop.f32.mrb[53].mxu1  ;;  %v2032_v3 = vpop.f32.mrb[54].mxu0 }
 0x161   :  { %v2095_v4 = vadd.f32 %v2094_v1, %v2093_v60  ;;  %v2096_v6 = vpop.f32.mrb[54].mxu1  ;;  %v2033_v8 = vpop.f32.mrb[55].mxu0 }
 0x162   :  { %v1315_v9 = vadd.f32 %v2031_v32, %v2839_v51  ;;  %v2034_v33 = vadd.f32 %v2033_v8, %v2032_v3  ;;  %v2097_v10 = vpop.f32.mrb[55].mxu1 }
 0x163   :  { %v2098_v11 = vadd.f32 %v2097_v10, %v2096_v6 }
 0x164   :  { %v1318_v12 = vadd.f32 %v2034_v33, %v2842_v53  ;;  %v1412_v35 = vadd.f32 %v2095_v4, %v1315_v9 }
 0x166   :  { %v2035_v46 = vpop.f32.mrb[56].mxu0  ;;  %v1415_v13 = vadd.f32 %v2098_v11, %v1318_v12 }
 0x167   :  { %v2099_v15 = vpop.f32.mrb[56].mxu1  ;;  %v2036_v17 = vpop.f32.mrb[57].mxu0 }
 0x168   :  { %v2037_v48 = vadd.f32 %v2036_v17, %v2035_v46  ;;  %v2100_v20 = vpop.f32.mrb[57].mxu1  ;;  %v2038_v22 = vpop.f32.mrb[58].mxu0 }
 0x169   :  { %v2101_v23 = vadd.f32 %v2100_v20, %v2099_v15  ;;  %v2102_v25 = vpop.f32.mrb[58].mxu1  ;;  %v2039_v27 = vpop.f32.mrb[59].mxu0 }
 0x16a   :  { %v1323_v28 = vadd.f32 %v2037_v48, %v2845_v5  ;;  %v2040_v29 = vadd.f32 %v2039_v27, %v2038_v22  ;;  %v2103_v51 = vpop.f32.mrb[59].mxu1 }
 0x16b   :  { %v2104_v31 = vadd.f32 %v2103_v51, %v2102_v25 }
 0x16c   :  { %v1326_v34 = vadd.f32 %v2040_v29, %v2848_v7  ;;  %v1420_v62 = vadd.f32 %v2101_v23, %v1323_v28 }
 0x16e   :  { %v2041_v53 = vpop.f32.mrb[60].mxu0  ;;  %v2888_v36 = vadd.f32 %v2104_v31, %v1326_v34 }
 0x16f   :  { %v2105_v37 = vpop.f32.mrb[60].mxu1  ;;  %v2042_v38 = vpop.f32.mrb[61].mxu0 }
 0x170   :  { %v2043_v0 = vadd.f32 %v2042_v38, %v2041_v53  ;;  %v2106_v40 = vpop.f32.mrb[61].mxu1  ;;  %v2044_v42 = vpop.f32.mrb[62].mxu0 }
 0x171   :  { %v2107_v43 = vadd.f32 %v2106_v40, %v2105_v37  ;;  %v2108_v44 = vpop.f32.mrb[62].mxu1  ;;  %v2045_v18 = vpop.f32.mrb[63].mxu0 }
 0x172   :  { %v1331_v49 = vadd.f32 %v2043_v0, %v2851_v24  ;;  %v2046_v5 = vadd.f32 %v2045_v18, %v2044_v42  ;;  %v2109_v50 = vpop.f32.mrb[63].mxu1 }
 0x173   :  { %v2110_v52 = vadd.f32 %v2109_v50, %v2108_v44 }
 0x174   :  { %v1334_v54 = vadd.f32 %v2046_v5, %v2854_v26  ;;  %v1428_v7 = vadd.f32 %v2107_v43, %v1331_v49 }
 0x176   :  { %v2145_v14 = vpop.f32.mrb[64].mxu0  ;;  %v1431_v55 = vadd.f32 %v2110_v52, %v1334_v54 }
 0x177   :  { %v1477_v56 = vadd.f32 %v2145_v14, %v2864_v63  ;;  %v2153_v57 = vpop.f32.mrb[64].mxu1  ;;  %v1468_v16 = vpop.f32.mrb[65].mxu0 }
 0x178   :  { %v1509_v30 = vadd.f32 %v2153_v57, %v1412_v35  ;;  %v1469_v60 = vadd.f32 %v1468_v16, %v2858_v45  ;;  %v1500_v61 = vpop.f32.mrb[65].mxu1  ;;  %v2146_v32 = vpop.f32.mrb[66].mxu0 }
 0x179   :  { %v1501_v1 = vadd.f32 %v1500_v61, %v1404_v58  ;;  %v1480_v24 = vadd.f32 %v2146_v32, %v2866_v2  ;;  %v2154_v3 = vpop.f32.mrb[66].mxu1  ;;  %v1471_v4 = vpop.f32.mrb[67].mxu0  ;;  %v1533_v9 = vmax.f32 %v1477_v56, 0.0 }
 0x17a   :  { %v1512_v6 = vadd.f32 %v2154_v3, %v1415_v13  ;;  %v1472_v26 = vadd.f32 %v1471_v4, %v2860_v47  ;;  %v1503_v8 = vpop.f32.mrb[67].mxu1  ;;  %v1541_v10 = vmax.f32 %v1509_v30, 0.0  ;;  %v1531_v11 = vmax.f32 %v1469_v60, 0.0 }
 0x17b   :  { %v1534_v33 = vmax.f32 %v1480_v24, 0.0  ;;  %v1504_v63 = vadd.f32 %v1503_v8, %v2882_v59  ;;  %v1539_v45 = vmax.f32 %v1501_v1, 0.0 }
 0x17c   :  { %v1542_v12 = vmax.f32 %v1512_v6, 0.0  ;;  %v1532_v35 = vmax.f32 %v1472_v26, 0.0 }
 0x17d   :  { %v1816_v46 = vpack.c.bf16 %v1534_v33, %v1533_v9  ;;  %v1540_v15 = vmax.f32 %v1504_v63, 0.0 }
 0x17e   :  { %v1836_v58 = vpack.c.bf16 %v1542_v12, %v1541_v10  ;;  %v1811_v17 = vpack.c.bf16 %v1532_v35, %v1531_v11  ;;  %v2149_v2 = vpop.f32.mrb[68].mxu0 }
 0x17f   :  { %1848 = vst [vmem:[%s2929_s3 + $0x8] sm:$0xff] %v1816_v46   ;;  %v1831_v47 = vpack.c.bf16 %v1540_v15, %v1539_v45  ;;  %v1493_v13 = vadd.f32 %v2149_v2, %v2876_v39  ;;  %v2157_v48 = vpop.f32.mrb[68].mxu1  ;;  %v1484_v20 = vpop.f32.mrb[69].mxu0 }
 0x180   :  { %1852 = vst [vmem:[%s2929_s3 + $0x28] sm:$0xff] %v1836_v58   ;;  %1812 = vst [vmem:[%s2929_s3] sm:$0xff] %v1811_v17   ;;  %v1525_v59 = vadd.f32 %v2157_v48, %v1428_v7  ;;  %v1485_v22 = vadd.f32 %v1484_v20, %v2870_v19  ;;  %v1516_v23 = vpop.f32.mrb[69].mxu1  ;;  %v2150_v25 = vpop.f32.mrb[70].mxu0 }
 0x181   :  { %1851 = vst [vmem:[%s2929_s3 + $0x20] sm:$0xff] %v1831_v47   ;;  %v1517_v39 = vadd.f32 %v1516_v23, %v1420_v62  ;;  %v1496_v27 = vadd.f32 %v2150_v25, %v2878_v41  ;;  %v2158_v28 = vpop.f32.mrb[70].mxu1  ;;  %v1487_v29 = vpop.f32.mrb[71].mxu0  ;;  %v1537_v53 = vmax.f32 %v1493_v13, 0.0 }
 0x182   :  { %v1528_v51 = vadd.f32 %v2158_v28, %v1431_v55  ;;  %v1488_v31 = vadd.f32 %v1487_v29, %v2872_v21  ;;  %v1519_v34 = vpop.f32.mrb[71].mxu1  ;;  %v1545_v19 = vmax.f32 %v1525_v59, 0.0  ;;  %v1535_v0 = vmax.f32 %v1485_v22, 0.0 }
 0x183   :  { %v1538_v37 = vmax.f32 %v1496_v27, 0.0  ;;  %v1520_v38 = vadd.f32 %v1519_v34, %v2888_v36  ;;  %v1543_v43 = vmax.f32 %v1517_v39, 0.0 }
 0x184   :  { %v1546_v40 = vmax.f32 %v1528_v51, 0.0  ;;  %v1536_v42 = vmax.f32 %v1488_v31, 0.0 }
 0x185   :  { %v1826_v44 = vpack.c.bf16 %v1538_v37, %v1537_v53  ;;  %v1544_v18 = vmax.f32 %v1520_v38, 0.0 }
 0x186   :  { %v1846_v62 = vpack.c.bf16 %v1546_v40, %v1545_v19  ;;  %v1821_v49 = vpack.c.bf16 %v1536_v42, %v1535_v0 }
 0x187   :  { %1850 = vst [vmem:[%s2929_s3 + $0x18] sm:$0xff] %v1826_v44   ;;  %v1841_v41 = vpack.c.bf16 %v1544_v18, %v1543_v43 }
 0x188   :  { %1854 = vst [vmem:[%s2929_s3 + $0x38] sm:$0xff] %v1846_v62   ;;  %1849 = vst [vmem:[%s2929_s3 + $0x10] sm:$0xff] %v1821_v49  }
 0x189   :  { %1853 = vst [vmem:[%s2929_s3 + $0x30] sm:$0xff] %v1841_v41  }

// kernel: style_encoder_forward.7
= control target key start
LH: loop header
LB: loop body
LE: loop exit
PB: predicated region body
PF: predicated region fallthrough
CT: control target
= control target key end

     0   :  { %s2299_s1 = inlined_call_operand.vmem [shape: bf16[1152,256], index: 1, kind: input, shape index: {}]   ;;  %s2300_s0 = inlined_call_operand.vmem [shape: bf16[32,1152], index: 0, kind: input, shape index: {}]   ;;  %s2301_s2 = inlined_call_operand.vmem [shape: f32[1,256], index: 2, kind: input, shape index: {}]   ;;  %s2302_s3 = inlined_call_operand.vmem [shape: bf16[32,256], index: 3, kind: output, shape index: {}]  }
   0x1   :  { %v1535_v0 = vld [vmem:[%s2299_s1 + $0x4] ss:$8 sps:$4 sm:$0xff]   ;;  %v1539_v2 = vld [vmem:[%s2299_s1] ss:$8 sps:$4 sm:$0xff]   ;;  %v1541_v4 = vld [vmem:[%s2299_s1 + $0x14] ss:$8 sps:$4 sm:$0xff]  }
   0x2   :  { %v1537_v1 = vld [vmem:[%s2299_s1 + $0x204] ss:$8 sps:$4 sm:$0xff]   ;;  %1003 = vmatprep.subr.bf16.mxu1 %v1535_v0  ;;  %v1540_v3 = vld [vmem:[%s2299_s1 + $0x200] ss:$8 sps:$4 sm:$0xff]   ;;  %v1543_v5 = vld [vmem:[%s2299_s1 + $0x214] ss:$8 sps:$4 sm:$0xff]  }
   0x3   :  { %1109 = vmatprep.subr.bf16.mxu0 %v1537_v1  ;;  %1004 = vmatpush1.bf16.msra.mxu1 %v1539_v2  ;;  %v1545_v6 = vld [vmem:[%s2299_s1 + $0x10] ss:$8 sps:$4 sm:$0xff]   ;;  %v1547_v8 = vld [vmem:[%s2299_s1 + $0x24] ss:$8 sps:$4 sm:$0xff]   ;;  %v1551_v10 = vld [vmem:[%s2299_s1 + $0x20] ss:$8 sps:$4 sm:$0xff]  }
   0x4   :  { %1110 = vmatpush1.bf16.msra.mxu0 %v1540_v3  ;;  %1005 = vmatprep.subr.bf16.mxu1 %v1541_v4  ;;  %v1546_v7 = vld [vmem:[%s2299_s1 + $0x210] ss:$8 sps:$4 sm:$0xff]   ;;  %v1549_v9 = vld [vmem:[%s2299_s1 + $0x224] ss:$8 sps:$4 sm:$0xff]   ;;  %v1552_v11 = vld [vmem:[%s2299_s1 + $0x220] ss:$8 sps:$4 sm:$0xff]  }
   0x5   :  { %1111 = vmatprep.subr.bf16.mxu0 %v1543_v5  ;;  %v1553_v12 = vld [vmem:[%s2299_s1 + $0x34] ss:$8 sps:$4 sm:$0xff]   ;;  %v1557_v14 = vld [vmem:[%s2299_s1 + $0x30] ss:$8 sps:$4 sm:$0xff]   ;;  %v1559_v16 = vld [vmem:[%s2299_s1 + $0x44] ss:$8 sps:$4 sm:$0xff]  }
   0x6   :  { %v1555_v13 = vld [vmem:[%s2299_s1 + $0x234] ss:$8 sps:$4 sm:$0xff]   ;;  %v1558_v15 = vld [vmem:[%s2299_s1 + $0x230] ss:$8 sps:$4 sm:$0xff]   ;;  %v1561_v17 = vld [vmem:[%s2299_s1 + $0x244] ss:$8 sps:$4 sm:$0xff]  }
   0x7   :  { %1006 = vmatpush1.bf16.msra.mxu1 %v1545_v6  ;;  %v1563_v18 = vld [vmem:[%s2299_s1 + $0x40] ss:$8 sps:$4 sm:$0xff]   ;;  %v1565_v20 = vld [vmem:[%s2299_s1 + $0x54] ss:$8 sps:$4 sm:$0xff]   ;;  %v1569_v22 = vld [vmem:[%s2299_s1 + $0x50] ss:$8 sps:$4 sm:$0xff]  }
   0x8   :  { %1112 = vmatpush1.bf16.msra.mxu0 %v1546_v7  ;;  %1007 = vmatprep.subr.bf16.mxu1 %v1547_v8  ;;  %v1564_v19 = vld [vmem:[%s2299_s1 + $0x240] ss:$8 sps:$4 sm:$0xff]   ;;  %v1567_v21 = vld [vmem:[%s2299_s1 + $0x254] ss:$8 sps:$4 sm:$0xff]   ;;  %v1570_v23 = vld [vmem:[%s2299_s1 + $0x250] ss:$8 sps:$4 sm:$0xff]  }
   0x9   :  { %1113 = vmatprep.subr.bf16.mxu0 %v1549_v9  ;;  %v1571_v24 = vld [vmem:[%s2299_s1 + $0x64] ss:$8 sps:$4 sm:$0xff]   ;;  %v1575_v26 = vld [vmem:[%s2299_s1 + $0x60] ss:$8 sps:$4 sm:$0xff]   ;;  %v1577_v28 = vld [vmem:[%s2299_s1 + $0x74] ss:$8 sps:$4 sm:$0xff]  }
   0xa   :  { %v1573_v25 = vld [vmem:[%s2299_s1 + $0x264] ss:$8 sps:$4 sm:$0xff]   ;;  %v1576_v27 = vld [vmem:[%s2299_s1 + $0x260] ss:$8 sps:$4 sm:$0xff]   ;;  %v1579_v29 = vld [vmem:[%s2299_s1 + $0x274] ss:$8 sps:$4 sm:$0xff]  }
   0xb   :  { %1008 = vmatpush1.bf16.msra.mxu1 %v1551_v10  ;;  %v1581_v30 = vld [vmem:[%s2299_s1 + $0x70] ss:$8 sps:$4 sm:$0xff]   ;;  %v1583_v32 = vld [vmem:[%s2299_s1 + $0x84] ss:$8 sps:$4 sm:$0xff]   ;;  %v1587_v34 = vld [vmem:[%s2299_s1 + $0x80] ss:$8 sps:$4 sm:$0xff]  }
   0xc   :  { %1114 = vmatpush1.bf16.msra.mxu0 %v1552_v11  ;;  %1009 = vmatprep.subr.bf16.mxu1 %v1553_v12  ;;  %v1582_v31 = vld [vmem:[%s2299_s1 + $0x270] ss:$8 sps:$4 sm:$0xff]   ;;  %v1585_v33 = vld [vmem:[%s2299_s1 + $0x284] ss:$8 sps:$4 sm:$0xff]   ;;  %v1588_v35 = vld [vmem:[%s2299_s1 + $0x280] ss:$8 sps:$4 sm:$0xff]  }
   0xd   :  { %1115 = vmatprep.subr.bf16.mxu0 %v1555_v13  ;;  %v1589_v36 = vld [vmem:[%s2299_s1 + $0x94] ss:$8 sps:$4 sm:$0xff]   ;;  %v1593_v38 = vld [vmem:[%s2299_s1 + $0x90] ss:$8 sps:$4 sm:$0xff]   ;;  %v1595_v40 = vld [vmem:[%s2299_s1 + $0xa4] ss:$8 sps:$4 sm:$0xff]  }
   0xe   :  { %v1591_v37 = vld [vmem:[%s2299_s1 + $0x294] ss:$8 sps:$4 sm:$0xff]   ;;  %v1594_v39 = vld [vmem:[%s2299_s1 + $0x290] ss:$8 sps:$4 sm:$0xff]   ;;  %v1597_v41 = vld [vmem:[%s2299_s1 + $0x2a4] ss:$8 sps:$4 sm:$0xff]  }
   0xf   :  { %1010 = vmatpush1.bf16.msra.mxu1 %v1557_v14  ;;  %v1599_v42 = vld [vmem:[%s2299_s1 + $0xa0] ss:$8 sps:$4 sm:$0xff]   ;;  %v1601_v44 = vld [vmem:[%s2299_s1 + $0xb4] ss:$8 sps:$4 sm:$0xff]   ;;  %v1605_v46 = vld [vmem:[%s2299_s1 + $0xb0] ss:$8 sps:$4 sm:$0xff]  }
  0x10   :  { %1116 = vmatpush1.bf16.msra.mxu0 %v1558_v15  ;;  %1011 = vmatprep.subr.bf16.mxu1 %v1559_v16  ;;  %v1600_v43 = vld [vmem:[%s2299_s1 + $0x2a0] ss:$8 sps:$4 sm:$0xff]   ;;  %v1603_v45 = vld [vmem:[%s2299_s1 + $0x2b4] ss:$8 sps:$4 sm:$0xff]   ;;  %v1606_v47 = vld [vmem:[%s2299_s1 + $0x2b0] ss:$8 sps:$4 sm:$0xff]  }
  0x11   :  { %1117 = vmatprep.subr.bf16.mxu0 %v1561_v17  ;;  %v1633_v48 = vld [vmem:[%s2300_s0 + $0x4] ss:$36 sps:$4 sm:$0xff]   ;;  %v1639_v51 = vld [vmem:[%s2300_s0 + $0x14] ss:$36 sps:$4 sm:$0xff]  }
  0x12   :  { %v1607_v49 = vld [vmem:[%s2299_s1 + $0xc4] ss:$8 sps:$4 sm:$0xff]   ;;  %1035 = vmatprep.mubr.bf16.mxu1 %v1633_v48  ;;  %v1611_v52 = vld [vmem:[%s2299_s1 + $0xc0] ss:$8 sps:$4 sm:$0xff]   ;;  %v1613_v54 = vld [vmem:[%s2299_s1 + $0xd4] ss:$8 sps:$4 sm:$0xff]   ;;  %1141 = vmatprep.mubr.bf16.mxu0 %v1639_v51 }
  0x13   :  { %1012 = vmatpush1.bf16.msra.mxu1 %v1563_v18  ;;  %v1609_v50 = vld [vmem:[%s2299_s1 + $0x2c4] ss:$8 sps:$4 sm:$0xff]   ;;  %v1612_v53 = vld [vmem:[%s2299_s1 + $0x2c0] ss:$8 sps:$4 sm:$0xff]   ;;  %v1615_v55 = vld [vmem:[%s2299_s1 + $0x2d4] ss:$8 sps:$4 sm:$0xff]  }
  0x14   :  { %1118 = vmatpush1.bf16.msra.mxu0 %v1564_v19  ;;  %1013 = vmatprep.subr.bf16.mxu1 %v1565_v20  ;;  %v1617_v56 = vld [vmem:[%s2299_s1 + $0xd0] ss:$8 sps:$4 sm:$0xff]   ;;  %v1619_v58 = vld [vmem:[%s2299_s1 + $0xe4] ss:$8 sps:$4 sm:$0xff]   ;;  %v1623_v60 = vld [vmem:[%s2299_s1 + $0xe0] ss:$8 sps:$4 sm:$0xff]  }
  0x15   :  { %1119 = vmatprep.subr.bf16.mxu0 %v1567_v21  ;;  %v1618_v57 = vld [vmem:[%s2299_s1 + $0x2d0] ss:$8 sps:$4 sm:$0xff]   ;;  %v1621_v59 = vld [vmem:[%s2299_s1 + $0x2e4] ss:$8 sps:$4 sm:$0xff]   ;;  %v1624_v61 = vld [vmem:[%s2299_s1 + $0x2e0] ss:$8 sps:$4 sm:$0xff]  }
  0x16   :  { %v1625_v62 = vld [vmem:[%s2299_s1 + $0xf4] ss:$8 sps:$4 sm:$0xff]   ;;  %v1629_v0 = vld [vmem:[%s2299_s1 + $0xf0] ss:$8 sps:$4 sm:$0xff]   ;;  %v1636_v2 = vld [vmem:[%s2299_s1 + $0x104] ss:$8 sps:$4 sm:$0xff]  }
  0x17   :  { %1014 = vmatpush1.bf16.msra.mxu1 %v1569_v22  ;;  %v1627_v63 = vld [vmem:[%s2299_s1 + $0x2f4] ss:$8 sps:$4 sm:$0xff]   ;;  %v1630_v1 = vld [vmem:[%s2299_s1 + $0x2f0] ss:$8 sps:$4 sm:$0xff]   ;;  %v1642_v3 = vld [vmem:[%s2299_s1 + $0x304] ss:$8 sps:$4 sm:$0xff]  }
  0x18   :  { %1120 = vmatpush1.bf16.msra.mxu0 %v1570_v23  ;;  %1015 = vmatprep.subr.bf16.mxu1 %v1571_v24  ;;  %v1631_v4 = vld [vmem:[%s2300_s0] ss:$36 sps:$4 sm:$0xff]   ;;  %v1637_v6 = vld [vmem:[%s2300_s0 + $0x10] ss:$36 sps:$4 sm:$0xff]  }
  0x19   :  { %1121 = vmatprep.subr.bf16.mxu0 %v1573_v25  ;;  %v1634_v5 = vld [vmem:[%s2299_s1 + $0x100] ss:$8 sps:$4 sm:$0xff]   ;;  %v1645_v8 = vld [vmem:[%s2299_s1 + $0x114] ss:$8 sps:$4 sm:$0xff]   ;;  %v1643_v10 = vld [vmem:[%s2299_s1 + $0x110] ss:$8 sps:$4 sm:$0xff]  }
  0x1a   :  { %v1640_v7 = vld [vmem:[%s2299_s1 + $0x300] ss:$8 sps:$4 sm:$0xff]   ;;  %v1648_v9 = vld [vmem:[%s2299_s1 + $0x314] ss:$8 sps:$4 sm:$0xff]   ;;  %v1646_v11 = vld [vmem:[%s2299_s1 + $0x310] ss:$8 sps:$4 sm:$0xff]  }
  0x1b   :  { %1016 = vmatpush1.bf16.msra.mxu1 %v1575_v26  ;;  %v1651_v12 = vld [vmem:[%s2299_s1 + $0x124] ss:$8 sps:$4 sm:$0xff]   ;;  %v1649_v14 = vld [vmem:[%s2299_s1 + $0x120] ss:$8 sps:$4 sm:$0xff]   ;;  %v1657_v16 = vld [vmem:[%s2299_s1 + $0x134] ss:$8 sps:$4 sm:$0xff]  }
  0x1c   :  { %1122 = vmatpush1.bf16.msra.mxu0 %v1576_v27  ;;  %1017 = vmatprep.subr.bf16.mxu1 %v1577_v28  ;;  %v1654_v13 = vld [vmem:[%s2299_s1 + $0x324] ss:$8 sps:$4 sm:$0xff]   ;;  %v1652_v15 = vld [vmem:[%s2299_s1 + $0x320] ss:$8 sps:$4 sm:$0xff]   ;;  %v1660_v17 = vld [vmem:[%s2299_s1 + $0x334] ss:$8 sps:$4 sm:$0xff]  }
  0x1d   :  { %1123 = vmatprep.subr.bf16.mxu0 %v1579_v29  ;;  %v1655_v18 = vld [vmem:[%s2299_s1 + $0x130] ss:$8 sps:$4 sm:$0xff]   ;;  %v1663_v20 = vld [vmem:[%s2299_s1 + $0x144] ss:$8 sps:$4 sm:$0xff]   ;;  %v1661_v22 = vld [vmem:[%s2299_s1 + $0x140] ss:$8 sps:$4 sm:$0xff]  }
  0x1e   :  { %v1658_v19 = vld [vmem:[%s2299_s1 + $0x330] ss:$8 sps:$4 sm:$0xff]   ;;  %v1666_v21 = vld [vmem:[%s2299_s1 + $0x344] ss:$8 sps:$4 sm:$0xff]   ;;  %v1664_v23 = vld [vmem:[%s2299_s1 + $0x340] ss:$8 sps:$4 sm:$0xff]  }
  0x1f   :  { %1018 = vmatpush1.bf16.msra.mxu1 %v1581_v30  ;;  %v1669_v24 = vld [vmem:[%s2299_s1 + $0x154] ss:$8 sps:$4 sm:$0xff]   ;;  %v1667_v26 = vld [vmem:[%s2299_s1 + $0x150] ss:$8 sps:$4 sm:$0xff]   ;;  %v1675_v28 = vld [vmem:[%s2299_s1 + $0x164] ss:$8 sps:$4 sm:$0xff]  }
  0x20   :  { %1124 = vmatpush1.bf16.msra.mxu0 %v1582_v31  ;;  %1019 = vmatprep.subr.bf16.mxu1 %v1583_v32  ;;  %v1672_v25 = vld [vmem:[%s2299_s1 + $0x354] ss:$8 sps:$4 sm:$0xff]   ;;  %v1670_v27 = vld [vmem:[%s2299_s1 + $0x350] ss:$8 sps:$4 sm:$0xff]   ;;  %v1725_v31 = vld [vmem:[%s2300_s0 + $0x48] ss:$36 sps:$4 sm:$0xff]  }
  0x21   :  { %1125 = vmatprep.subr.bf16.mxu0 %v1585_v33  ;;  %v1721_v29 = vld [vmem:[%s2300_s0 + $0x4c] ss:$36 sps:$4 sm:$0xff]   ;;  %v1723_v30 = vld [vmem:[%s2300_s0 + $0x5c] ss:$36 sps:$4 sm:$0xff]  }
  0x22   :  { %v1678_v32 = vld [vmem:[%s2299_s1 + $0x364] ss:$8 sps:$4 sm:$0xff]   ;;  %v1729_v33 = vld [vmem:[%s2300_s0 + $0x58] ss:$36 sps:$4 sm:$0xff]  }
  0x23   :  { %1020 = vmatpush1.bf16.msra.mxu1 %v1587_v34  ;;  %v1673_v34 = vld [vmem:[%s2299_s1 + $0x160] ss:$8 sps:$4 sm:$0xff]   ;;  %v1691_v48 = vld [vmem:[%s2299_s1 + $0x190] ss:$8 sps:$4 sm:$0xff]   ;;  %v1702_v51 = vld [vmem:[%s2299_s1 + $0x3a4] ss:$8 sps:$4 sm:$0xff]  }
  0x24   :  { %1126 = vmatpush1.bf16.msra.mxu0 %v1588_v35  ;;  %1021 = vmatprep.subr.bf16.mxu1 %v1589_v36  ;;  %v1676_v35 = vld [vmem:[%s2299_s1 + $0x360] ss:$8 sps:$4 sm:$0xff]   ;;  %v1681_v36 = vld [vmem:[%s2299_s1 + $0x174] ss:$8 sps:$4 sm:$0xff]  }
  0x25   :  { %1127 = vmatprep.subr.bf16.mxu0 %v1591_v37  ;;  %v1684_v37 = vld [vmem:[%s2299_s1 + $0x374] ss:$8 sps:$4 sm:$0xff]  }
  0x27   :  { %1022 = vmatpush1.bf16.msra.mxu1 %v1593_v38  ;;  %v1679_v38 = vld [vmem:[%s2299_s1 + $0x170] ss:$8 sps:$4 sm:$0xff]  }
  0x28   :  { %1128 = vmatpush1.bf16.msra.mxu0 %v1594_v39  ;;  %1023 = vmatprep.subr.bf16.mxu1 %v1595_v40  ;;  %v1682_v39 = vld [vmem:[%s2299_s1 + $0x370] ss:$8 sps:$4 sm:$0xff]   ;;  %v1687_v40 = vld [vmem:[%s2299_s1 + $0x184] ss:$8 sps:$4 sm:$0xff]  }
  0x29   :  { %1129 = vmatprep.subr.bf16.mxu0 %v1597_v41  ;;  %v1741_v41 = vld [vmem:[%s2300_s0 + $0xc] ss:$36 sps:$4 sm:$0xff]  }
  0x2b   :  { %1024 = vmatpush1.bf16.msra.mxu1 %v1599_v42  ;;  %v1690_v42 = vld [vmem:[%s2299_s1 + $0x384] ss:$8 sps:$4 sm:$0xff]  }
  0x2c   :  { %1130 = vmatpush1.bf16.msra.mxu0 %v1600_v43  ;;  %1025 = vmatprep.subr.bf16.mxu1 %v1601_v44  ;;  %v1744_v43 = vld [vmem:[%s2300_s0 + $0x1c] ss:$36 sps:$4 sm:$0xff]  }
  0x2d   :  { %1131 = vmatprep.subr.bf16.mxu0 %v1603_v45  ;;  %v1685_v44 = vld [vmem:[%s2299_s1 + $0x180] ss:$8 sps:$4 sm:$0xff]  }
  0x2e   :  { %v1688_v45 = vld [vmem:[%s2299_s1 + $0x380] ss:$8 sps:$4 sm:$0xff]  }
  0x2f   :  { %1026 = vmatpush1.bf16.msra.mxu1 %v1605_v46  ;;  %v1693_v46 = vld [vmem:[%s2299_s1 + $0x194] ss:$8 sps:$4 sm:$0xff]  }
  0x30   :  { %1132 = vmatpush1.bf16.msra.mxu0 %v1606_v47  ;;  %1027 = vmatprep.subr.bf16.mxu1 %v1607_v49  ;;  %v1696_v47 = vld [vmem:[%s2299_s1 + $0x394] ss:$8 sps:$4 sm:$0xff]   ;;  %v1694_v49 = vld [vmem:[%s2299_s1 + $0x390] ss:$8 sps:$4 sm:$0xff]  }
  0x31   :  { %1133 = vmatprep.subr.bf16.mxu0 %v1609_v50  ;;  %v1699_v50 = vld [vmem:[%s2299_s1 + $0x1a4] ss:$8 sps:$4 sm:$0xff]  }
  0x33   :  { %1028 = vmatpush1.bf16.msra.mxu1 %v1611_v52  ;;  %v1697_v52 = vld [vmem:[%s2299_s1 + $0x1a0] ss:$8 sps:$4 sm:$0xff]  }
  0x34   :  { %1134 = vmatpush1.bf16.msra.mxu0 %v1612_v53  ;;  %1029 = vmatprep.subr.bf16.mxu1 %v1613_v54  ;;  %v1700_v53 = vld [vmem:[%s2299_s1 + $0x3a0] ss:$8 sps:$4 sm:$0xff]   ;;  %v1705_v54 = vld [vmem:[%s2299_s1 + $0x1b4] ss:$8 sps:$4 sm:$0xff]  }
  0x35   :  { %1135 = vmatprep.subr.bf16.mxu0 %v1615_v55  ;;  %v1708_v55 = vld [vmem:[%s2299_s1 + $0x3b4] ss:$8 sps:$4 sm:$0xff]  }
  0x37   :  { %1030 = vmatpush1.bf16.msra.mxu1 %v1617_v56  ;;  %v1703_v56 = vld [vmem:[%s2299_s1 + $0x1b0] ss:$8 sps:$4 sm:$0xff]  }
  0x38   :  { %1136 = vmatpush1.bf16.msra.mxu0 %v1618_v57  ;;  %1031 = vmatprep.subr.bf16.mxu1 %v1619_v58  ;;  %v1706_v57 = vld [vmem:[%s2299_s1 + $0x3b0] ss:$8 sps:$4 sm:$0xff]   ;;  %v1711_v58 = vld [vmem:[%s2299_s1 + $0x1c4] ss:$8 sps:$4 sm:$0xff]  }
  0x39   :  { %1137 = vmatprep.subr.bf16.mxu0 %v1621_v59  ;;  %v1714_v59 = vld [vmem:[%s2299_s1 + $0x3c4] ss:$8 sps:$4 sm:$0xff]  }
  0x3b   :  { %1032 = vmatpush1.bf16.msra.mxu1 %v1623_v60  ;;  %v1709_v60 = vld [vmem:[%s2299_s1 + $0x1c0] ss:$8 sps:$4 sm:$0xff]  }
  0x3c   :  { %1138 = vmatpush1.bf16.msra.mxu0 %v1624_v61  ;;  %1033 = vmatprep.subr.bf16.mxu1 %v1625_v62  ;;  %v1712_v61 = vld [vmem:[%s2299_s1 + $0x3c0] ss:$8 sps:$4 sm:$0xff]   ;;  %v1717_v62 = vld [vmem:[%s2299_s1 + $0x1d4] ss:$8 sps:$4 sm:$0xff]  }
  0x3d   :  { %1139 = vmatprep.subr.bf16.mxu0 %v1627_v63  ;;  %v1720_v63 = vld [vmem:[%s2299_s1 + $0x3d4] ss:$8 sps:$4 sm:$0xff]  }
  0x3f   :  { %1034 = vmatpush1.bf16.msra.mxu1 %v1629_v0  ;;  %v1715_v0 = vld [vmem:[%s2299_s1 + $0x1d0] ss:$8 sps:$4 sm:$0xff]  }
  0x40   :  { %1140 = vmatpush1.bf16.msra.mxu0 %v1630_v1  ;;  %1056 = vmatprep.subr.bf16.mxu1 %v1636_v2  ;;  %v1718_v1 = vld [vmem:[%s2299_s1 + $0x3d0] ss:$8 sps:$4 sm:$0xff]   ;;  %v1728_v2 = vld [vmem:[%s2299_s1 + $0x1e4] ss:$8 sps:$4 sm:$0xff]  }
  0x41   :  { %1162 = vmatprep.subr.bf16.mxu0 %v1642_v3  ;;  %v1732_v3 = vld [vmem:[%s2299_s1 + $0x3e4] ss:$8 sps:$4 sm:$0xff]  }
  0x42   :  { %1036 = vmatmul.mubr.bf16.vlgmr.msra.gmra.mrb[0].mxu1 %v1631_v4  ;;  %v1726_v4 = vld [vmem:[%s2299_s1 + $0x1e0] ss:$8 sps:$4 sm:$0xff]  }
  0x43   :  { %1142 = vmatmul.mubr.bf16.vlgmr.msra.gmra.mrb[0].mxu0 %v1637_v6  ;;  %1057 = vmatpush1.bf16.msra.mxu1 %v1634_v5  ;;  %v1730_v5 = vld [vmem:[%s2299_s1 + $0x3e0] ss:$8 sps:$4 sm:$0xff]   ;;  %v1735_v6 = vld [vmem:[%s2299_s1 + $0x1f4] ss:$8 sps:$4 sm:$0xff]  }
  0x44   :  { %1163 = vmatpush1.bf16.msra.mxu0 %v1640_v7  ;;  %1058 = vmatprep.subr.bf16.mxu1 %v1645_v8  ;;  %v1738_v7 = vld [vmem:[%s2299_s1 + $0x3f4] ss:$8 sps:$4 sm:$0xff]   ;;  %v1733_v8 = vld [vmem:[%s2299_s1 + $0x1f0] ss:$8 sps:$4 sm:$0xff]  }
  0x45   :  { %1164 = vmatprep.subr.bf16.mxu0 %v1648_v9  ;;  %1045 = vmatprep.mubr.bf16.mxu1 %v1721_v29  ;;  %v1736_v9 = vld [vmem:[%s2299_s1 + $0x3f0] ss:$8 sps:$4 sm:$0xff]   ;;  %v1771_v29 = vld [vmem:[%s2299_s1 + $0x464] ss:$8 sps:$4 sm:$0xff]  }
  0x46   :  { %1151 = vmatprep.mubr.bf16.mxu0 %v1723_v30  ;;  %v1769_v30 = vld [vmem:[%s2299_s1 + $0x460] ss:$8 sps:$4 sm:$0xff]  }
  0x47   :  { %1059 = vmatpush1.bf16.msra.mxu1 %v1643_v10  ;;  %v1747_v10 = vld [vmem:[%s2299_s1 + $0x404] ss:$8 sps:$4 sm:$0xff]  }
  0x48   :  { %1165 = vmatpush1.bf16.msra.mxu0 %v1646_v11  ;;  %1060 = vmatprep.subr.bf16.mxu1 %v1651_v12  ;;  %v1739_v11 = vld [vmem:[%s2300_s0 + $0x8] ss:$36 sps:$4 sm:$0xff]   ;;  %v1742_v12 = vld [vmem:[%s2300_s0 + $0x18] ss:$36 sps:$4 sm:$0xff]  }
  0x49   :  { %1166 = vmatprep.subr.bf16.mxu0 %v1654_v13  ;;  %v1745_v13 = vld [vmem:[%s2299_s1 + $0x400] ss:$8 sps:$4 sm:$0xff]  }
  0x4a   :  { %1046 = vmatmul.mubr.bf16.gmra.mrb[4].mxu1 %v1725_v31  ;;  %v1774_v31 = vld [vmem:[%s2299_s1 + $0x474] ss:$8 sps:$4 sm:$0xff]  }
  0x4b   :  { %1061 = vmatpush1.bf16.msra.mxu1 %v1649_v14  ;;  %1152 = vmatmul.mubr.bf16.gmra.mrb[4].mxu0 %v1729_v33  ;;  %v1750_v14 = vld [vmem:[%s2299_s1 + $0x414] ss:$8 sps:$4 sm:$0xff]   ;;  %v1775_v33 = vld [vmem:[%s2300_s0 + $0x20] ss:$36 sps:$4 sm:$0xff]  }
  0x4c   :  { %1167 = vmatpush1.bf16.msra.mxu0 %v1652_v15  ;;  %1062 = vmatprep.subr.bf16.mxu1 %v1657_v16  ;;  %v1751_v15 = vld [vmem:[%s2300_s0 + $0x54] ss:$36 sps:$4 sm:$0xff]   ;;  %v1753_v16 = vld [vmem:[%s2300_s0 + $0x64] ss:$36 sps:$4 sm:$0xff]  }
  0x4d   :  { %1168 = vmatprep.subr.bf16.mxu0 %v1660_v17  ;;  %1088 = vmatprep.mubr.bf16.mxu1 %v1741_v41  ;;  %v1748_v17 = vld [vmem:[%s2299_s1 + $0x410] ss:$8 sps:$4 sm:$0xff]  }
  0x4e   :  { %1194 = vmatprep.mubr.bf16.mxu0 %v1744_v43 }
  0x4f   :  { %1063 = vmatpush1.bf16.msra.mxu1 %v1655_v18  ;;  %v1759_v18 = vld [vmem:[%s2299_s1 + $0x424] ss:$8 sps:$4 sm:$0xff]  }
  0x50   :  { %1169 = vmatpush1.bf16.msra.mxu0 %v1658_v19  ;;  %1064 = vmatprep.subr.bf16.mxu1 %v1663_v20  ;;  %v1755_v19 = vld [vmem:[%s2300_s0 + $0x50] ss:$36 sps:$4 sm:$0xff]   ;;  %v1756_v20 = vld [vmem:[%s2300_s0 + $0x60] ss:$36 sps:$4 sm:$0xff]  }
  0x51   :  { %1170 = vmatprep.subr.bf16.mxu0 %v1666_v21  ;;  %v1757_v21 = vld [vmem:[%s2299_s1 + $0x420] ss:$8 sps:$4 sm:$0xff]  }
  0x53   :  { %1065 = vmatpush1.bf16.msra.mxu1 %v1661_v22  ;;  %v1762_v22 = vld [vmem:[%s2299_s1 + $0x434] ss:$8 sps:$4 sm:$0xff]  }
  0x54   :  { %1171 = vmatpush1.bf16.msra.mxu0 %v1664_v23  ;;  %1066 = vmatprep.subr.bf16.mxu1 %v1669_v24  ;;  %v1760_v23 = vld [vmem:[%s2299_s1 + $0x430] ss:$8 sps:$4 sm:$0xff]   ;;  %v1765_v24 = vld [vmem:[%s2299_s1 + $0x444] ss:$8 sps:$4 sm:$0xff]  }
  0x55   :  { %1172 = vmatprep.subr.bf16.mxu0 %v1672_v25  ;;  %v1777_v25 = vmov 0  }
  0x57   :  { %1067 = vmatpush1.bf16.msra.mxu1 %v1667_v26  ;;  %v1763_v26 = vld [vmem:[%s2299_s1 + $0x440] ss:$8 sps:$4 sm:$0xff]  }
  0x58   :  { %1173 = vmatpush1.bf16.msra.mxu0 %v1670_v27  ;;  %1068 = vmatprep.subr.bf16.mxu1 %v1675_v28  ;;  %v1768_v27 = vld [vmem:[%s2299_s1 + $0x454] ss:$8 sps:$4 sm:$0xff]   ;;  %v1766_v28 = vld [vmem:[%s2299_s1 + $0x450] ss:$8 sps:$4 sm:$0xff]  }
  0x59   :  { %1174 = vmatprep.subr.bf16.mxu0 %v1678_v32  ;;  %v1772_v32 = vld [vmem:[%s2299_s1 + $0x470] ss:$8 sps:$4 sm:$0xff]  }
  0x5b   :  { %1069 = vmatpush1.bf16.msra.mxu1 %v1673_v34  ;;  %v1776_v34 = vld [vmem:[%s2300_s0 + $0x68] ss:$36 sps:$4 sm:$0xff]  }
  0x5c   :  { %1175 = vmatpush1.bf16.msra.mxu0 %v1676_v35  ;;  %1070 = vmatprep.subr.bf16.mxu1 %v1681_v36  ;;  %v181_v35 = vlaneseq }
  0x5d   :  { %1176 = vmatprep.subr.bf16.mxu0 %v1684_v37 }
  0x5e   :  { %v182_v36 = vshrl.u32 %v181_v35, 7 }
  0x5f   :  { %1071 = vmatpush1.bf16.msra.mxu1 %v1679_v38 }
  0x60   :  { %1177 = vmatpush1.bf16.msra.mxu0 %v1682_v39  ;;  %1072 = vmatprep.subr.bf16.mxu1 %v1687_v40  ;;  %v183_v40 = vsub.s32 0, %v182_v36  ;;  %v187_v43 = vsub.s32 1, %v182_v36 }
  0x61   :  { %1178 = vmatprep.subr.bf16.mxu0 %v1690_v42  ;;  %v179_v42 = vld [vmem:[%s2301_s2] sm:$0x3] }
  0x63   :  { %1073 = vmatpush1.bf16.msra.mxu1 %v1685_v44  ;;  %v184_v44 = vrot.slane %v179_v42, %v183_v40 }
  0x64   :  { %1179 = vmatpush1.bf16.msra.mxu0 %v1688_v45  ;;  %1074 = vmatprep.subr.bf16.mxu1 %v1693_v46  ;;  %v188_v45 = vrot.slane %v179_v42, %v187_v43 }
  0x65   :  { %1180 = vmatprep.subr.bf16.mxu0 %v1696_v47 }
  0x67   :  { %1075 = vmatpush1.bf16.msra.mxu1 %v1691_v48 }
  0x68   :  { %1181 = vmatpush1.bf16.msra.mxu0 %v1694_v49  ;;  %1076 = vmatprep.subr.bf16.mxu1 %v1699_v50 }
  0x69   :  { %1182 = vmatprep.subr.bf16.mxu0 %v1702_v51 }
  0x6b   :  { %1077 = vmatpush1.bf16.msra.mxu1 %v1697_v52 }
  0x6c   :  { %1183 = vmatpush1.bf16.msra.mxu0 %v1700_v53  ;;  %1078 = vmatprep.subr.bf16.mxu1 %v1705_v54 }
  0x6d   :  { %1184 = vmatprep.subr.bf16.mxu0 %v1708_v55 }
  0x6f   :  { %1079 = vmatpush1.bf16.msra.mxu1 %v1703_v56 }
  0x70   :  { %1185 = vmatpush1.bf16.msra.mxu0 %v1706_v57  ;;  %1080 = vmatprep.subr.bf16.mxu1 %v1711_v58 }
  0x71   :  { %1186 = vmatprep.subr.bf16.mxu0 %v1714_v59 }
  0x73   :  { %1081 = vmatpush1.bf16.msra.mxu1 %v1709_v60 }
  0x74   :  { %1187 = vmatpush1.bf16.msra.mxu0 %v1712_v61  ;;  %1082 = vmatprep.subr.bf16.mxu1 %v1717_v62 }
  0x75   :  { %1188 = vmatprep.subr.bf16.mxu0 %v1720_v63 }
  0x77   :  { %1083 = vmatpush1.bf16.msra.mxu1 %v1715_v0 }
  0x78   :  { %1189 = vmatpush1.bf16.msra.mxu0 %v1718_v1  ;;  %1084 = vmatprep.subr.bf16.mxu1 %v1728_v2 }
  0x79   :  { %1190 = vmatprep.subr.bf16.mxu0 %v1732_v3 }
  0x7b   :  { %1085 = vmatpush1.bf16.msra.mxu1 %v1726_v4 }
  0x7c   :  { %1191 = vmatpush1.bf16.msra.mxu0 %v1730_v5  ;;  %1086 = vmatprep.subr.bf16.mxu1 %v1735_v6 }
  0x7d   :  { %1192 = vmatprep.subr.bf16.mxu0 %v1738_v7 }
  0x7f   :  { %1087 = vmatpush1.bf16.msra.mxu1 %v1733_v8 }
  0x80   :  { %1193 = vmatpush1.bf16.msra.mxu0 %v1736_v9  ;;  %1478 = vmatprep.subr.bf16.mxu1 %v1747_v10 }
  0x81   :  { %1215 = vmatprep.subr.bf16.mxu0 %v1747_v10 }
  0x82   :  { %1089 = vmatmul.mubr.bf16.vlgmr.msra.gmra.mrb[0].mxu1 %v1739_v11 }
  0x83   :  { %1195 = vmatmul.mubr.bf16.vlgmr.msra.gmra.mrb[0].mxu0 %v1742_v12  ;;  %1486 = vmatpush1.bf16.msra.mxu1 %v1745_v13 }
  0x84   :  { %1216 = vmatpush1.bf16.msra.mxu0 %v1745_v13  ;;  %1479 = vmatprep.subr.bf16.mxu1 %v1750_v14 }
  0x85   :  { %1217 = vmatprep.subr.bf16.mxu0 %v1750_v14  ;;  %1098 = vmatprep.mubr.bf16.mxu1 %v1751_v15 }
  0x86   :  { %1204 = vmatprep.mubr.bf16.mxu0 %v1753_v16 }
  0x87   :  { %1487 = vmatpush1.bf16.msra.mxu1 %v1748_v17 }
  0x88   :  { %1218 = vmatpush1.bf16.msra.mxu0 %v1748_v17  ;;  %1480 = vmatprep.subr.bf16.mxu1 %v1759_v18 }
  0x89   :  { %1219 = vmatprep.subr.bf16.mxu0 %v1759_v18 }
  0x8a   :  { %1099 = vmatmul.mubr.bf16.gmra.mrb[4].mxu1 %v1755_v19 }
  0x8b   :  { %1205 = vmatmul.mubr.bf16.gmra.mrb[4].mxu0 %v1756_v20  ;;  %1488 = vmatpush1.bf16.msra.mxu1 %v1757_v21 }
  0x8c   :  { %1220 = vmatpush1.bf16.msra.mxu0 %v1757_v21  ;;  %1481 = vmatprep.subr.bf16.mxu1 %v1762_v22 }
  0x8d   :  { %1221 = vmatprep.subr.bf16.mxu0 %v1762_v22  ;;  %1247 = vmatprep.mubr.bf16.mxu0 %v1777_v25 }
  0x8e   :  { %1257 = vmatprep.mubr.bf16.mxu1 %v1777_v25 }
  0x8f   :  { %1489 = vmatpush1.bf16.msra.mxu1 %v1760_v23 }
  0x90   :  { %1222 = vmatpush1.bf16.msra.mxu0 %v1760_v23  ;;  %1482 = vmatprep.subr.bf16.mxu1 %v1765_v24 }
  0x91   :  { %1223 = vmatprep.subr.bf16.mxu0 %v1765_v24 }
  0x93   :  { %1490 = vmatpush1.bf16.msra.mxu1 %v1763_v26 }
  0x94   :  { %1224 = vmatpush1.bf16.msra.mxu0 %v1763_v26  ;;  %1483 = vmatprep.subr.bf16.mxu1 %v1768_v27 }
  0x95   :  { %1225 = vmatprep.subr.bf16.mxu0 %v1768_v27 }
  0x97   :  { %1491 = vmatpush1.bf16.msra.mxu1 %v1766_v28 }
  0x98   :  { %1226 = vmatpush1.bf16.msra.mxu0 %v1766_v28  ;;  %1484 = vmatprep.subr.bf16.mxu1 %v1771_v29 }
  0x99   :  { %1227 = vmatprep.subr.bf16.mxu0 %v1771_v29 }
  0x9b   :  { %1492 = vmatpush1.bf16.msra.mxu1 %v1769_v30 }
  0x9c   :  { %1228 = vmatpush1.bf16.msra.mxu0 %v1769_v30  ;;  %1485 = vmatprep.subr.bf16.mxu1 %v1774_v31 }
  0x9d   :  { %1229 = vmatprep.subr.bf16.mxu0 %v1774_v31 }
  0x9f   :  { %1493 = vmatpush1.bf16.msra.mxu1 %v1772_v32 }
  0xa0   :  { %1230 = vmatpush1.bf16.msra.mxu0 %v1772_v32 }
  0xa2   :  { %1258 = vmatmul.mubr.bf16.vlgmr.msra.gmra.mrb[8].mxu1 %v1776_v34 }
  0xa3   :  { %1248 = vmatmul.mubr.bf16.vlgmr.msra.gmra.mrb[0].mxu0 %v1775_v33 }
 0x155   :  { %v1090_v37 = vpop.f32.mrb[0].mxu1 }
 0x156   :  { %v1092_v38 = vpop.f32.mrb[1].mxu1  ;;  %v1494_v62 = vadd.f32 %v1090_v37, %v184_v44 }
 0x157   :  { %v1094_v39 = vpop.f32.mrb[2].mxu1  ;;  %v1496_v63 = vadd.f32 %v1092_v38, %v188_v45 }
 0x158   :  { %v1096_v41 = vpop.f32.mrb[3].mxu1  ;;  %v1498_v2 = vadd.f32 %v1094_v39, %v184_v44 }
 0x159   :  { %v1500_v7 = vadd.f32 %v1096_v41, %v188_v45 }
 0x15d   :  { %v1100_v46 = vpop.f32.mrb[4].mxu1 }
 0x15e   :  { %v1206_v47 = vpop.f32.mrb[4].mxu0  ;;  %v1502_v48 = vadd.f32 %v1100_v46, %v184_v44  ;;  %v1102_v49 = vpop.f32.mrb[5].mxu1 }
 0x15f   :  { %v1208_v50 = vpop.f32.mrb[5].mxu0  ;;  %v1505_v51 = vadd.f32 %v1102_v49, %v188_v45  ;;  %v1104_v52 = vpop.f32.mrb[6].mxu1 }
 0x160   :  { %v1210_v53 = vpop.f32.mrb[6].mxu0  ;;  %v1503_v54 = vadd.f32 %v1502_v48, %v1206_v47  ;;  %v1508_v55 = vadd.f32 %v1104_v52, %v184_v44  ;;  %v1106_v56 = vpop.f32.mrb[7].mxu1 }
 0x161   :  { %v1212_v57 = vpop.f32.mrb[7].mxu0  ;;  %v1506_v58 = vadd.f32 %v1505_v51, %v1208_v50  ;;  %v1511_v59 = vadd.f32 %v1106_v56, %v188_v45 }
 0x162   :  { %v1509_v60 = vadd.f32 %v1508_v55, %v1210_v53 }
 0x163   :  { %v1512_v61 = vadd.f32 %v1511_v59, %v1212_v57 }
 0x175   :  { %v1259_v1 = vpop.f32.mrb[8].mxu1 }
 0x176   :  { %v1249_v0 = vpop.f32.mrb[0].mxu0  ;;  %v1504_v4 = vadd.f32 %v1503_v54, %v1259_v1  ;;  %v1261_v6 = vpop.f32.mrb[9].mxu1 }
 0x177   :  { %v1495_v3 = vadd.f32 %v1494_v62, %v1249_v0  ;;  %v1251_v5 = vpop.f32.mrb[1].mxu0  ;;  %v1507_v9 = vadd.f32 %v1506_v58, %v1261_v6  ;;  %v1263_v11 = vpop.f32.mrb[10].mxu1 }
 0x178   :  { %v1497_v8 = vadd.f32 %v1496_v63, %v1251_v5  ;;  %v1253_v10 = vpop.f32.mrb[2].mxu0  ;;  %v1272_v13 = vmax.f32 %v1504_v4, 0.0  ;;  %v1510_v15 = vadd.f32 %v1509_v60, %v1263_v11  ;;  %v1265_v17 = vpop.f32.mrb[11].mxu1 }
 0x179   :  { %v1268_v12 = vmax.f32 %v1495_v3, 0.0  ;;  %v1499_v14 = vadd.f32 %v1498_v2, %v1253_v10  ;;  %v1255_v16 = vpop.f32.mrb[3].mxu0  ;;  %v1273_v19 = vmax.f32 %v1507_v9, 0.0  ;;  %v1513_v21 = vadd.f32 %v1512_v61, %v1265_v17 }
 0x17a   :  { %v1269_v18 = vmax.f32 %v1497_v8, 0.0  ;;  %v1501_v20 = vadd.f32 %v1500_v7, %v1255_v16  ;;  %v1274_v23 = vmax.f32 %v1510_v15, 0.0 }
 0x17b   :  { %v1270_v22 = vmax.f32 %v1499_v14, 0.0  ;;  %v1476_v25 = vpack.c.bf16 %v1273_v19, %v1272_v13  ;;  %v1275_v27 = vmax.f32 %v1513_v21, 0.0 }
 0x17c   :  { %v1474_v24 = vpack.c.bf16 %v1269_v18, %v1268_v12  ;;  %v1271_v26 = vmax.f32 %v1501_v20, 0.0 }
 0x17d   :  { %1302 = vst [vmem:[%s2302_s3 + $0x10] sm:$0xff] %v1476_v25  ;;  %v1477_v29 = vpack.c.bf16 %v1275_v27, %v1274_v23 }
 0x17e   :  { %1300 = vst [vmem:[%s2302_s3] sm:$0xff] %v1474_v24  ;;  %v1475_v28 = vpack.c.bf16 %v1271_v26, %v1270_v22 }
 0x17f   :  { %1303 = vst [vmem:[%s2302_s3 + $0x18] sm:$0xff] %v1477_v29 }
 0x180   :  { %1301 = vst [vmem:[%s2302_s3 + $0x8] sm:$0xff] %v1475_v28 }

// kernel: style_encoder_forward.8
= control target key start
LH: loop header
LB: loop body
LE: loop exit
PB: predicated region body
PF: predicated region fallthrough
CT: control target
= control target key end

     0   :  { %s7796_s1 = inlined_call_operand.vmem [shape: bf16[2304,512], index: 1, kind: input, shape index: {}]   ;;  %s7797_s0 = inlined_call_operand.vmem [shape: bf16[16,2304], index: 0, kind: input, shape index: {}]   ;;  %s7798_s2 = inlined_call_operand.vmem [shape: f32[1,512], index: 2, kind: input, shape index: {}]   ;;  %s7799_s3 = inlined_call_operand.vmem [shape: bf16[16,512], index: 3, kind: output, shape index: {}]  }
   0x1   :  { %v5088_v0 = vld [vmem:[%s7796_s1 + $0x4] ss:$16 sps:$4 sm:$0xff]   ;;  %v5090_v1 = vld [vmem:[%s7796_s1 + $0xc] ss:$16 sps:$4 sm:$0xff]   ;;  %v5092_v2 = vld [vmem:[%s7796_s1] ss:$16 sps:$4 sm:$0xff]  }
   0x2   :  { %3600 = vmatprep.subr.bf16.mxu0 %v5088_v0  ;;  %v5093_v3 = vld [vmem:[%s7796_s1 + $0x8] ss:$16 sps:$4 sm:$0xff]   ;;  %3987 = vmatprep.subr.bf16.mxu1 %v5090_v1  ;;  %v5094_v4 = vld [vmem:[%s7796_s1 + $0x24] ss:$16 sps:$4 sm:$0xff]   ;;  %v5096_v5 = vld [vmem:[%s7796_s1 + $0x2c] ss:$16 sps:$4 sm:$0xff]  }
   0x3   :  { %3601 = vmatpush1.bf16.msra.mxu0 %v5092_v2  ;;  %3988 = vmatpush1.bf16.msra.mxu1 %v5093_v3  ;;  %v5098_v6 = vld [vmem:[%s7796_s1 + $0x20] ss:$16 sps:$4 sm:$0xff]   ;;  %v5099_v7 = vld [vmem:[%s7796_s1 + $0x28] ss:$16 sps:$4 sm:$0xff]   ;;  %v5100_v8 = vld [vmem:[%s7796_s1 + $0x44] ss:$16 sps:$4 sm:$0xff]  }
   0x4   :  { %3602 = vmatprep.subr.bf16.mxu0 %v5094_v4  ;;  %3989 = vmatprep.subr.bf16.mxu1 %v5096_v5  ;;  %v5102_v9 = vld [vmem:[%s7796_s1 + $0x4c] ss:$16 sps:$4 sm:$0xff]   ;;  %v5104_v10 = vld [vmem:[%s7796_s1 + $0x40] ss:$16 sps:$4 sm:$0xff]   ;;  %v5105_v11 = vld [vmem:[%s7796_s1 + $0x48] ss:$16 sps:$4 sm:$0xff]  }
   0x5   :  { %v5106_v12 = vld [vmem:[%s7796_s1 + $0x64] ss:$16 sps:$4 sm:$0xff]   ;;  %v5108_v13 = vld [vmem:[%s7796_s1 + $0x6c] ss:$16 sps:$4 sm:$0xff]   ;;  %v5110_v14 = vld [vmem:[%s7796_s1 + $0x60] ss:$16 sps:$4 sm:$0xff]  }
   0x6   :  { %v5111_v15 = vld [vmem:[%s7796_s1 + $0x68] ss:$16 sps:$4 sm:$0xff]   ;;  %v5112_v16 = vld [vmem:[%s7796_s1 + $0x84] ss:$16 sps:$4 sm:$0xff]   ;;  %v5114_v17 = vld [vmem:[%s7796_s1 + $0x8c] ss:$16 sps:$4 sm:$0xff]  }
   0x7   :  { %3603 = vmatpush1.bf16.msra.mxu0 %v5098_v6  ;;  %3990 = vmatpush1.bf16.msra.mxu1 %v5099_v7  ;;  %v5116_v18 = vld [vmem:[%s7796_s1 + $0x80] ss:$16 sps:$4 sm:$0xff]   ;;  %v5117_v19 = vld [vmem:[%s7796_s1 + $0x88] ss:$16 sps:$4 sm:$0xff]   ;;  %v5118_v20 = vld [vmem:[%s7796_s1 + $0xa4] ss:$16 sps:$4 sm:$0xff]  }
   0x8   :  { %3604 = vmatprep.subr.bf16.mxu0 %v5100_v8  ;;  %3991 = vmatprep.subr.bf16.mxu1 %v5102_v9  ;;  %v5120_v21 = vld [vmem:[%s7796_s1 + $0xac] ss:$16 sps:$4 sm:$0xff]   ;;  %v5122_v22 = vld [vmem:[%s7796_s1 + $0xa0] ss:$16 sps:$4 sm:$0xff]   ;;  %v5123_v23 = vld [vmem:[%s7796_s1 + $0xa8] ss:$16 sps:$4 sm:$0xff]  }
   0x9   :  { %v5124_v24 = vld [vmem:[%s7796_s1 + $0xc4] ss:$16 sps:$4 sm:$0xff]   ;;  %v5126_v25 = vld [vmem:[%s7796_s1 + $0xcc] ss:$16 sps:$4 sm:$0xff]   ;;  %v5128_v26 = vld [vmem:[%s7796_s1 + $0xc0] ss:$16 sps:$4 sm:$0xff]  }
   0xa   :  { %v5129_v27 = vld [vmem:[%s7796_s1 + $0xc8] ss:$16 sps:$4 sm:$0xff]   ;;  %v5130_v28 = vld [vmem:[%s7796_s1 + $0xe4] ss:$16 sps:$4 sm:$0xff]   ;;  %v5132_v29 = vld [vmem:[%s7796_s1 + $0xec] ss:$16 sps:$4 sm:$0xff]  }
   0xb   :  { %3605 = vmatpush1.bf16.msra.mxu0 %v5104_v10  ;;  %3992 = vmatpush1.bf16.msra.mxu1 %v5105_v11  ;;  %v5134_v30 = vld [vmem:[%s7796_s1 + $0xe0] ss:$16 sps:$4 sm:$0xff]   ;;  %v5135_v31 = vld [vmem:[%s7796_s1 + $0xe8] ss:$16 sps:$4 sm:$0xff]   ;;  %v5136_v32 = vld [vmem:[%s7796_s1 + $0x104] ss:$16 sps:$4 sm:$0xff]  }
   0xc   :  { %3606 = vmatprep.subr.bf16.mxu0 %v5106_v12  ;;  %3993 = vmatprep.subr.bf16.mxu1 %v5108_v13  ;;  %v5138_v33 = vld [vmem:[%s7796_s1 + $0x10c] ss:$16 sps:$4 sm:$0xff]   ;;  %v5140_v34 = vld [vmem:[%s7796_s1 + $0x100] ss:$16 sps:$4 sm:$0xff]   ;;  %v5141_v35 = vld [vmem:[%s7796_s1 + $0x108] ss:$16 sps:$4 sm:$0xff]  }
   0xd   :  { %v5142_v36 = vld [vmem:[%s7796_s1 + $0x124] ss:$16 sps:$4 sm:$0xff]   ;;  %v5144_v37 = vld [vmem:[%s7796_s1 + $0x12c] ss:$16 sps:$4 sm:$0xff]   ;;  %v5146_v38 = vld [vmem:[%s7796_s1 + $0x120] ss:$16 sps:$4 sm:$0xff]  }
   0xe   :  { %v5147_v39 = vld [vmem:[%s7796_s1 + $0x128] ss:$16 sps:$4 sm:$0xff]   ;;  %v5148_v40 = vld [vmem:[%s7796_s1 + $0x144] ss:$16 sps:$4 sm:$0xff]   ;;  %v5150_v41 = vld [vmem:[%s7796_s1 + $0x14c] ss:$16 sps:$4 sm:$0xff]  }
   0xf   :  { %3607 = vmatpush1.bf16.msra.mxu0 %v5110_v14  ;;  %3994 = vmatpush1.bf16.msra.mxu1 %v5111_v15  ;;  %v5152_v42 = vld [vmem:[%s7796_s1 + $0x140] ss:$16 sps:$4 sm:$0xff]   ;;  %v5153_v43 = vld [vmem:[%s7796_s1 + $0x148] ss:$16 sps:$4 sm:$0xff]   ;;  %v5154_v44 = vld [vmem:[%s7796_s1 + $0x164] ss:$16 sps:$4 sm:$0xff]  }
  0x10   :  { %3608 = vmatprep.subr.bf16.mxu0 %v5112_v16  ;;  %3995 = vmatprep.subr.bf16.mxu1 %v5114_v17  ;;  %v5156_v45 = vld [vmem:[%s7796_s1 + $0x16c] ss:$16 sps:$4 sm:$0xff]   ;;  %v5158_v46 = vld [vmem:[%s7796_s1 + $0x160] ss:$16 sps:$4 sm:$0xff]   ;;  %v5159_v47 = vld [vmem:[%s7796_s1 + $0x168] ss:$16 sps:$4 sm:$0xff]  }
  0x11   :  { %v5186_v48 = vld [vmem:[%s7797_s0 + $0x4] ss:$72 sps:$4 sm:$0xff]   ;;  %v5164_v51 = vld [vmem:[%s7796_s1 + $0x180] ss:$16 sps:$4 sm:$0xff]   ;;  %v5165_v52 = vld [vmem:[%s7796_s1 + $0x188] ss:$16 sps:$4 sm:$0xff]  }
  0x12   :  { %v5160_v49 = vld [vmem:[%s7796_s1 + $0x184] ss:$16 sps:$4 sm:$0xff]   ;;  %v5162_v50 = vld [vmem:[%s7796_s1 + $0x18c] ss:$16 sps:$4 sm:$0xff]   ;;  %3632 = vmatprep.mubr.bf16.mxu0 %v5186_v48  ;;  %4019 = vmatprep.mubr.bf16.mxu1 %v5186_v48  ;;  %v5170_v55 = vld [vmem:[%s7796_s1 + $0x1a0] ss:$16 sps:$4 sm:$0xff]  }
  0x13   :  { %3609 = vmatpush1.bf16.msra.mxu0 %v5116_v18  ;;  %3996 = vmatpush1.bf16.msra.mxu1 %v5117_v19  ;;  %v5166_v53 = vld [vmem:[%s7796_s1 + $0x1a4] ss:$16 sps:$4 sm:$0xff]   ;;  %v5168_v54 = vld [vmem:[%s7796_s1 + $0x1ac] ss:$16 sps:$4 sm:$0xff]   ;;  %v5171_v56 = vld [vmem:[%s7796_s1 + $0x1a8] ss:$16 sps:$4 sm:$0xff]  }
  0x14   :  { %3610 = vmatprep.subr.bf16.mxu0 %v5118_v20  ;;  %3997 = vmatprep.subr.bf16.mxu1 %v5120_v21  ;;  %v5172_v57 = vld [vmem:[%s7796_s1 + $0x1c4] ss:$16 sps:$4 sm:$0xff]   ;;  %v5174_v58 = vld [vmem:[%s7796_s1 + $0x1cc] ss:$16 sps:$4 sm:$0xff]   ;;  %v5176_v59 = vld [vmem:[%s7796_s1 + $0x1c0] ss:$16 sps:$4 sm:$0xff]  }
  0x15   :  { %v5177_v60 = vld [vmem:[%s7796_s1 + $0x1c8] ss:$16 sps:$4 sm:$0xff]   ;;  %v5178_v61 = vld [vmem:[%s7796_s1 + $0x1e4] ss:$16 sps:$4 sm:$0xff]   ;;  %v5180_v62 = vld [vmem:[%s7796_s1 + $0x1ec] ss:$16 sps:$4 sm:$0xff]  }
  0x16   :  { %v5182_v63 = vld [vmem:[%s7796_s1 + $0x1e0] ss:$16 sps:$4 sm:$0xff]   ;;  %v5183_v0 = vld [vmem:[%s7796_s1 + $0x1e8] ss:$16 sps:$4 sm:$0xff]   ;;  %v5189_v1 = vld [vmem:[%s7796_s1 + $0x204] ss:$16 sps:$4 sm:$0xff]  }
  0x17   :  { %3611 = vmatpush1.bf16.msra.mxu0 %v5122_v22  ;;  %3998 = vmatpush1.bf16.msra.mxu1 %v5123_v23  ;;  %v5192_v2 = vld [vmem:[%s7796_s1 + $0x20c] ss:$16 sps:$4 sm:$0xff]   ;;  %v5184_v3 = vld [vmem:[%s7797_s0] ss:$72 sps:$4 sm:$0xff]   ;;  %v5195_v6 = vld [vmem:[%s7796_s1 + $0x224] ss:$16 sps:$4 sm:$0xff]  }
  0x18   :  { %3612 = vmatprep.subr.bf16.mxu0 %v5124_v24  ;;  %3999 = vmatprep.subr.bf16.mxu1 %v5126_v25  ;;  %v5187_v4 = vld [vmem:[%s7796_s1 + $0x200] ss:$16 sps:$4 sm:$0xff]   ;;  %v5190_v5 = vld [vmem:[%s7796_s1 + $0x208] ss:$16 sps:$4 sm:$0xff]   ;;  %v5198_v7 = vld [vmem:[%s7796_s1 + $0x22c] ss:$16 sps:$4 sm:$0xff]  }
  0x19   :  { %v5193_v8 = vld [vmem:[%s7796_s1 + $0x220] ss:$16 sps:$4 sm:$0xff]   ;;  %v5196_v9 = vld [vmem:[%s7796_s1 + $0x228] ss:$16 sps:$4 sm:$0xff]   ;;  %v5201_v10 = vld [vmem:[%s7796_s1 + $0x244] ss:$16 sps:$4 sm:$0xff]  }
  0x1a   :  { %v5204_v11 = vld [vmem:[%s7796_s1 + $0x24c] ss:$16 sps:$4 sm:$0xff]   ;;  %v5199_v12 = vld [vmem:[%s7796_s1 + $0x240] ss:$16 sps:$4 sm:$0xff]   ;;  %v5202_v13 = vld [vmem:[%s7796_s1 + $0x248] ss:$16 sps:$4 sm:$0xff]  }
  0x1b   :  { %3613 = vmatpush1.bf16.msra.mxu0 %v5128_v26  ;;  %4000 = vmatpush1.bf16.msra.mxu1 %v5129_v27  ;;  %v5207_v14 = vld [vmem:[%s7796_s1 + $0x264] ss:$16 sps:$4 sm:$0xff]   ;;  %v5210_v15 = vld [vmem:[%s7796_s1 + $0x26c] ss:$16 sps:$4 sm:$0xff]   ;;  %v5205_v16 = vld [vmem:[%s7796_s1 + $0x260] ss:$16 sps:$4 sm:$0xff]  }
  0x1c   :  { %3614 = vmatprep.subr.bf16.mxu0 %v5130_v28  ;;  %4001 = vmatprep.subr.bf16.mxu1 %v5132_v29  ;;  %v5208_v17 = vld [vmem:[%s7796_s1 + $0x268] ss:$16 sps:$4 sm:$0xff]   ;;  %v5213_v18 = vld [vmem:[%s7796_s1 + $0x284] ss:$16 sps:$4 sm:$0xff]   ;;  %v5216_v19 = vld [vmem:[%s7796_s1 + $0x28c] ss:$16 sps:$4 sm:$0xff]  }
  0x1d   :  { %v5211_v20 = vld [vmem:[%s7796_s1 + $0x280] ss:$16 sps:$4 sm:$0xff]   ;;  %v5214_v21 = vld [vmem:[%s7796_s1 + $0x288] ss:$16 sps:$4 sm:$0xff]   ;;  %v5219_v22 = vld [vmem:[%s7796_s1 + $0x2a4] ss:$16 sps:$4 sm:$0xff]  }
  0x1e   :  { %v5222_v23 = vld [vmem:[%s7796_s1 + $0x2ac] ss:$16 sps:$4 sm:$0xff]   ;;  %v5217_v24 = vld [vmem:[%s7796_s1 + $0x2a0] ss:$16 sps:$4 sm:$0xff]   ;;  %v5220_v25 = vld [vmem:[%s7796_s1 + $0x2a8] ss:$16 sps:$4 sm:$0xff]  }
  0x1f   :  { %3615 = vmatpush1.bf16.msra.mxu0 %v5134_v30  ;;  %4002 = vmatpush1.bf16.msra.mxu1 %v5135_v31  ;;  %v5225_v26 = vld [vmem:[%s7796_s1 + $0x2c4] ss:$16 sps:$4 sm:$0xff]   ;;  %v5228_v27 = vld [vmem:[%s7796_s1 + $0x2cc] ss:$16 sps:$4 sm:$0xff]   ;;  %v5223_v28 = vld [vmem:[%s7796_s1 + $0x2c0] ss:$16 sps:$4 sm:$0xff]  }
  0x20   :  { %3616 = vmatprep.subr.bf16.mxu0 %v5136_v32  ;;  %4003 = vmatprep.subr.bf16.mxu1 %v5138_v33  ;;  %v5226_v29 = vld [vmem:[%s7796_s1 + $0x2c8] ss:$16 sps:$4 sm:$0xff]   ;;  %v5285_v30 = vld [vmem:[%s7797_s0 + $0xc] ss:$72 sps:$4 sm:$0xff]   ;;  %v5229_v33 = vld [vmem:[%s7796_s1 + $0x2e0] ss:$16 sps:$4 sm:$0xff]  }
  0x21   :  { %v5231_v31 = vld [vmem:[%s7796_s1 + $0x2e4] ss:$16 sps:$4 sm:$0xff]   ;;  %v5234_v32 = vld [vmem:[%s7796_s1 + $0x2ec] ss:$16 sps:$4 sm:$0xff]  }
  0x22   :  { %v5258_v48 = vld [vmem:[%s7796_s1 + $0x36c] ss:$16 sps:$4 sm:$0xff]  }
  0x23   :  { %3617 = vmatpush1.bf16.msra.mxu0 %v5140_v34  ;;  %4004 = vmatpush1.bf16.msra.mxu1 %v5141_v35  ;;  %v5232_v34 = vld [vmem:[%s7796_s1 + $0x2e8] ss:$16 sps:$4 sm:$0xff]   ;;  %v5237_v35 = vld [vmem:[%s7796_s1 + $0x304] ss:$16 sps:$4 sm:$0xff]  }
  0x24   :  { %3618 = vmatprep.subr.bf16.mxu0 %v5142_v36  ;;  %4005 = vmatprep.subr.bf16.mxu1 %v5144_v37  ;;  %v5240_v36 = vld [vmem:[%s7796_s1 + $0x30c] ss:$16 sps:$4 sm:$0xff]   ;;  %v5235_v37 = vld [vmem:[%s7796_s1 + $0x300] ss:$16 sps:$4 sm:$0xff]  }
  0x27   :  { %3619 = vmatpush1.bf16.msra.mxu0 %v5146_v38  ;;  %4006 = vmatpush1.bf16.msra.mxu1 %v5147_v39  ;;  %v5238_v38 = vld [vmem:[%s7796_s1 + $0x308] ss:$16 sps:$4 sm:$0xff]   ;;  %v5243_v39 = vld [vmem:[%s7796_s1 + $0x324] ss:$16 sps:$4 sm:$0xff]  }
  0x28   :  { %3620 = vmatprep.subr.bf16.mxu0 %v5148_v40  ;;  %4007 = vmatprep.subr.bf16.mxu1 %v5150_v41  ;;  %v5246_v40 = vld [vmem:[%s7796_s1 + $0x32c] ss:$16 sps:$4 sm:$0xff]   ;;  %v5241_v41 = vld [vmem:[%s7796_s1 + $0x320] ss:$16 sps:$4 sm:$0xff]  }
  0x2b   :  { %3621 = vmatpush1.bf16.msra.mxu0 %v5152_v42  ;;  %4008 = vmatpush1.bf16.msra.mxu1 %v5153_v43  ;;  %v5244_v42 = vld [vmem:[%s7796_s1 + $0x328] ss:$16 sps:$4 sm:$0xff]   ;;  %v5249_v43 = vld [vmem:[%s7796_s1 + $0x344] ss:$16 sps:$4 sm:$0xff]  }
  0x2c   :  { %3622 = vmatprep.subr.bf16.mxu0 %v5154_v44  ;;  %4009 = vmatprep.subr.bf16.mxu1 %v5156_v45  ;;  %v5252_v44 = vld [vmem:[%s7796_s1 + $0x34c] ss:$16 sps:$4 sm:$0xff]   ;;  %v5247_v45 = vld [vmem:[%s7796_s1 + $0x340] ss:$16 sps:$4 sm:$0xff]  }
  0x2f   :  { %3623 = vmatpush1.bf16.msra.mxu0 %v5158_v46  ;;  %4010 = vmatpush1.bf16.msra.mxu1 %v5159_v47  ;;  %v5250_v46 = vld [vmem:[%s7796_s1 + $0x348] ss:$16 sps:$4 sm:$0xff]   ;;  %v5255_v47 = vld [vmem:[%s7796_s1 + $0x364] ss:$16 sps:$4 sm:$0xff]  }
  0x30   :  { %3624 = vmatprep.subr.bf16.mxu0 %v5160_v49  ;;  %4011 = vmatprep.subr.bf16.mxu1 %v5162_v50  ;;  %v5253_v49 = vld [vmem:[%s7796_s1 + $0x360] ss:$16 sps:$4 sm:$0xff]   ;;  %v5256_v50 = vld [vmem:[%s7796_s1 + $0x368] ss:$16 sps:$4 sm:$0xff]  }
  0x33   :  { %3625 = vmatpush1.bf16.msra.mxu0 %v5164_v51  ;;  %4012 = vmatpush1.bf16.msra.mxu1 %v5165_v52  ;;  %v5261_v51 = vld [vmem:[%s7796_s1 + $0x384] ss:$16 sps:$4 sm:$0xff]   ;;  %v5264_v52 = vld [vmem:[%s7796_s1 + $0x38c] ss:$16 sps:$4 sm:$0xff]  }
  0x34   :  { %3626 = vmatprep.subr.bf16.mxu0 %v5166_v53  ;;  %4013 = vmatprep.subr.bf16.mxu1 %v5168_v54  ;;  %v5259_v53 = vld [vmem:[%s7796_s1 + $0x380] ss:$16 sps:$4 sm:$0xff]   ;;  %v5262_v54 = vld [vmem:[%s7796_s1 + $0x388] ss:$16 sps:$4 sm:$0xff]  }
  0x37   :  { %3627 = vmatpush1.bf16.msra.mxu0 %v5170_v55  ;;  %4014 = vmatpush1.bf16.msra.mxu1 %v5171_v56  ;;  %v5267_v55 = vld [vmem:[%s7796_s1 + $0x3a4] ss:$16 sps:$4 sm:$0xff]   ;;  %v5270_v56 = vld [vmem:[%s7796_s1 + $0x3ac] ss:$16 sps:$4 sm:$0xff]  }
  0x38   :  { %3628 = vmatprep.subr.bf16.mxu0 %v5172_v57  ;;  %4015 = vmatprep.subr.bf16.mxu1 %v5174_v58  ;;  %v5265_v57 = vld [vmem:[%s7796_s1 + $0x3a0] ss:$16 sps:$4 sm:$0xff]   ;;  %v5268_v58 = vld [vmem:[%s7796_s1 + $0x3a8] ss:$16 sps:$4 sm:$0xff]  }
  0x3b   :  { %3629 = vmatpush1.bf16.msra.mxu0 %v5176_v59  ;;  %4016 = vmatpush1.bf16.msra.mxu1 %v5177_v60  ;;  %v5273_v59 = vld [vmem:[%s7796_s1 + $0x3c4] ss:$16 sps:$4 sm:$0xff]   ;;  %v5276_v60 = vld [vmem:[%s7796_s1 + $0x3cc] ss:$16 sps:$4 sm:$0xff]  }
  0x3c   :  { %3630 = vmatprep.subr.bf16.mxu0 %v5178_v61  ;;  %4017 = vmatprep.subr.bf16.mxu1 %v5180_v62  ;;  %v5271_v61 = vld [vmem:[%s7796_s1 + $0x3c0] ss:$16 sps:$4 sm:$0xff]   ;;  %v5274_v62 = vld [vmem:[%s7796_s1 + $0x3c8] ss:$16 sps:$4 sm:$0xff]  }
  0x3f   :  { %3631 = vmatpush1.bf16.msra.mxu0 %v5182_v63  ;;  %4018 = vmatpush1.bf16.msra.mxu1 %v5183_v0  ;;  %v5279_v63 = vld [vmem:[%s7796_s1 + $0x3e4] ss:$16 sps:$4 sm:$0xff]   ;;  %v5282_v0 = vld [vmem:[%s7796_s1 + $0x3ec] ss:$16 sps:$4 sm:$0xff]  }
  0x40   :  { %3643 = vmatprep.subr.bf16.mxu0 %v5189_v1  ;;  %4030 = vmatprep.subr.bf16.mxu1 %v5192_v2  ;;  %v5277_v1 = vld [vmem:[%s7796_s1 + $0x3e0] ss:$16 sps:$4 sm:$0xff]   ;;  %v5280_v2 = vld [vmem:[%s7796_s1 + $0x3e8] ss:$16 sps:$4 sm:$0xff]  }
  0x42   :  { %3633 = vmatmul.mubr.bf16.vlgmr.msra.gmra.mrb[0].mxu0 %v5184_v3  ;;  %4020 = vmatmul.mubr.bf16.vlgmr.msra.gmra.mrb[0].mxu1 %v5184_v3  ;;  %v5288_v3 = vld [vmem:[%s7796_s1 + $0x404] ss:$16 sps:$4 sm:$0xff]  }
  0x43   :  { %3644 = vmatpush1.bf16.msra.mxu0 %v5187_v4  ;;  %4031 = vmatpush1.bf16.msra.mxu1 %v5190_v5  ;;  %v5291_v4 = vld [vmem:[%s7796_s1 + $0x40c] ss:$16 sps:$4 sm:$0xff]   ;;  %v5283_v5 = vld [vmem:[%s7797_s0 + $0x8] ss:$72 sps:$4 sm:$0xff]  }
  0x44   :  { %3645 = vmatprep.subr.bf16.mxu0 %v5195_v6  ;;  %4032 = vmatprep.subr.bf16.mxu1 %v5198_v7  ;;  %v5286_v6 = vld [vmem:[%s7796_s1 + $0x400] ss:$16 sps:$4 sm:$0xff]   ;;  %v5289_v7 = vld [vmem:[%s7796_s1 + $0x408] ss:$16 sps:$4 sm:$0xff]  }
  0x45   :  { %3675 = vmatprep.mubr.bf16.mxu0 %v5285_v30  ;;  %4062 = vmatprep.mubr.bf16.mxu1 %v5285_v30  ;;  %v5327_v30 = vld [vmem:[%s7796_s1 + $0x4cc] ss:$16 sps:$4 sm:$0xff]  }
  0x47   :  { %3646 = vmatpush1.bf16.msra.mxu0 %v5193_v8  ;;  %4033 = vmatpush1.bf16.msra.mxu1 %v5196_v9  ;;  %v5294_v8 = vld [vmem:[%s7796_s1 + $0x424] ss:$16 sps:$4 sm:$0xff]   ;;  %v5297_v9 = vld [vmem:[%s7796_s1 + $0x42c] ss:$16 sps:$4 sm:$0xff]  }
  0x48   :  { %3647 = vmatprep.subr.bf16.mxu0 %v5201_v10  ;;  %4034 = vmatprep.subr.bf16.mxu1 %v5204_v11  ;;  %v5292_v10 = vld [vmem:[%s7796_s1 + $0x420] ss:$16 sps:$4 sm:$0xff]   ;;  %v5295_v11 = vld [vmem:[%s7796_s1 + $0x428] ss:$16 sps:$4 sm:$0xff]  }
  0x4b   :  { %3648 = vmatpush1.bf16.msra.mxu0 %v5199_v12  ;;  %4035 = vmatpush1.bf16.msra.mxu1 %v5202_v13  ;;  %v5384_v12 = vld [vmem:[%s7797_s0 + $0x14] ss:$72 sps:$4 sm:$0xff]  }
  0x4c   :  { %3649 = vmatprep.subr.bf16.mxu0 %v5207_v14  ;;  %4036 = vmatprep.subr.bf16.mxu1 %v5210_v15  ;;  %v5300_v13 = vld [vmem:[%s7796_s1 + $0x444] ss:$16 sps:$4 sm:$0xff]   ;;  %v5303_v14 = vld [vmem:[%s7796_s1 + $0x44c] ss:$16 sps:$4 sm:$0xff]   ;;  %v5298_v15 = vld [vmem:[%s7796_s1 + $0x440] ss:$16 sps:$4 sm:$0xff]  }
  0x4f   :  { %3650 = vmatpush1.bf16.msra.mxu0 %v5205_v16  ;;  %4037 = vmatpush1.bf16.msra.mxu1 %v5208_v17  ;;  %v5301_v16 = vld [vmem:[%s7796_s1 + $0x448] ss:$16 sps:$4 sm:$0xff]   ;;  %v5306_v17 = vld [vmem:[%s7796_s1 + $0x464] ss:$16 sps:$4 sm:$0xff]  }
  0x50   :  { %3651 = vmatprep.subr.bf16.mxu0 %v5213_v18  ;;  %4038 = vmatprep.subr.bf16.mxu1 %v5216_v19  ;;  %v5309_v18 = vld [vmem:[%s7796_s1 + $0x46c] ss:$16 sps:$4 sm:$0xff]   ;;  %v5304_v19 = vld [vmem:[%s7796_s1 + $0x460] ss:$16 sps:$4 sm:$0xff]  }
  0x53   :  { %3652 = vmatpush1.bf16.msra.mxu0 %v5211_v20  ;;  %4039 = vmatpush1.bf16.msra.mxu1 %v5214_v21  ;;  %v5307_v20 = vld [vmem:[%s7796_s1 + $0x468] ss:$16 sps:$4 sm:$0xff]   ;;  %v5312_v21 = vld [vmem:[%s7796_s1 + $0x484] ss:$16 sps:$4 sm:$0xff]  }
  0x54   :  { %3653 = vmatprep.subr.bf16.mxu0 %v5219_v22  ;;  %4040 = vmatprep.subr.bf16.mxu1 %v5222_v23  ;;  %v5315_v22 = vld [vmem:[%s7796_s1 + $0x48c] ss:$16 sps:$4 sm:$0xff]   ;;  %v5310_v23 = vld [vmem:[%s7796_s1 + $0x480] ss:$16 sps:$4 sm:$0xff]  }
  0x57   :  { %3654 = vmatpush1.bf16.msra.mxu0 %v5217_v24  ;;  %4041 = vmatpush1.bf16.msra.mxu1 %v5220_v25  ;;  %v5313_v24 = vld [vmem:[%s7796_s1 + $0x488] ss:$16 sps:$4 sm:$0xff]   ;;  %v5318_v25 = vld [vmem:[%s7796_s1 + $0x4a4] ss:$16 sps:$4 sm:$0xff]  }
  0x58   :  { %3655 = vmatprep.subr.bf16.mxu0 %v5225_v26  ;;  %4042 = vmatprep.subr.bf16.mxu1 %v5228_v27  ;;  %v5321_v26 = vld [vmem:[%s7796_s1 + $0x4ac] ss:$16 sps:$4 sm:$0xff]   ;;  %v5316_v27 = vld [vmem:[%s7796_s1 + $0x4a0] ss:$16 sps:$4 sm:$0xff]  }
  0x5b   :  { %3656 = vmatpush1.bf16.msra.mxu0 %v5223_v28  ;;  %4043 = vmatpush1.bf16.msra.mxu1 %v5226_v29  ;;  %v5319_v28 = vld [vmem:[%s7796_s1 + $0x4a8] ss:$16 sps:$4 sm:$0xff]   ;;  %v5324_v29 = vld [vmem:[%s7796_s1 + $0x4c4] ss:$16 sps:$4 sm:$0xff]  }
  0x5c   :  { %3657 = vmatprep.subr.bf16.mxu0 %v5231_v31  ;;  %4044 = vmatprep.subr.bf16.mxu1 %v5234_v32  ;;  %v5322_v31 = vld [vmem:[%s7796_s1 + $0x4c0] ss:$16 sps:$4 sm:$0xff]   ;;  %v5325_v32 = vld [vmem:[%s7796_s1 + $0x4c8] ss:$16 sps:$4 sm:$0xff]  }
  0x5f   :  { %3658 = vmatpush1.bf16.msra.mxu0 %v5229_v33  ;;  %4045 = vmatpush1.bf16.msra.mxu1 %v5232_v34  ;;  %v5330_v33 = vld [vmem:[%s7796_s1 + $0x4e4] ss:$16 sps:$4 sm:$0xff]   ;;  %v5333_v34 = vld [vmem:[%s7796_s1 + $0x4ec] ss:$16 sps:$4 sm:$0xff]  }
  0x60   :  { %3659 = vmatprep.subr.bf16.mxu0 %v5237_v35  ;;  %4046 = vmatprep.subr.bf16.mxu1 %v5240_v36  ;;  %v5328_v35 = vld [vmem:[%s7796_s1 + $0x4e0] ss:$16 sps:$4 sm:$0xff]   ;;  %v5331_v36 = vld [vmem:[%s7796_s1 + $0x4e8] ss:$16 sps:$4 sm:$0xff]  }
  0x63   :  { %3660 = vmatpush1.bf16.msra.mxu0 %v5235_v37  ;;  %4047 = vmatpush1.bf16.msra.mxu1 %v5238_v38  ;;  %v5336_v37 = vld [vmem:[%s7796_s1 + $0x504] ss:$16 sps:$4 sm:$0xff]   ;;  %v5339_v38 = vld [vmem:[%s7796_s1 + $0x50c] ss:$16 sps:$4 sm:$0xff]  }
  0x64   :  { %3661 = vmatprep.subr.bf16.mxu0 %v5243_v39  ;;  %4048 = vmatprep.subr.bf16.mxu1 %v5246_v40  ;;  %v5334_v39 = vld [vmem:[%s7796_s1 + $0x500] ss:$16 sps:$4 sm:$0xff]   ;;  %v5337_v40 = vld [vmem:[%s7796_s1 + $0x508] ss:$16 sps:$4 sm:$0xff]  }
  0x67   :  { %3662 = vmatpush1.bf16.msra.mxu0 %v5241_v41  ;;  %4049 = vmatpush1.bf16.msra.mxu1 %v5244_v42  ;;  %v5342_v41 = vld [vmem:[%s7796_s1 + $0x524] ss:$16 sps:$4 sm:$0xff]   ;;  %v5345_v42 = vld [vmem:[%s7796_s1 + $0x52c] ss:$16 sps:$4 sm:$0xff]  }
  0x68   :  { %3663 = vmatprep.subr.bf16.mxu0 %v5249_v43  ;;  %4050 = vmatprep.subr.bf16.mxu1 %v5252_v44  ;;  %v5340_v43 = vld [vmem:[%s7796_s1 + $0x520] ss:$16 sps:$4 sm:$0xff]   ;;  %v5343_v44 = vld [vmem:[%s7796_s1 + $0x528] ss:$16 sps:$4 sm:$0xff]  }
  0x6b   :  { %3664 = vmatpush1.bf16.msra.mxu0 %v5247_v45  ;;  %4051 = vmatpush1.bf16.msra.mxu1 %v5250_v46  ;;  %v5348_v45 = vld [vmem:[%s7796_s1 + $0x544] ss:$16 sps:$4 sm:$0xff]   ;;  %v5351_v46 = vld [vmem:[%s7796_s1 + $0x54c] ss:$16 sps:$4 sm:$0xff]  }
  0x6c   :  { %3665 = vmatprep.subr.bf16.mxu0 %v5255_v47  ;;  %4052 = vmatprep.subr.bf16.mxu1 %v5258_v48  ;;  %v5346_v47 = vld [vmem:[%s7796_s1 + $0x540] ss:$16 sps:$4 sm:$0xff]   ;;  %v5349_v48 = vld [vmem:[%s7796_s1 + $0x548] ss:$16 sps:$4 sm:$0xff]  }
  0x6f   :  { %3666 = vmatpush1.bf16.msra.mxu0 %v5253_v49  ;;  %4053 = vmatpush1.bf16.msra.mxu1 %v5256_v50  ;;  %v5354_v49 = vld [vmem:[%s7796_s1 + $0x564] ss:$16 sps:$4 sm:$0xff]   ;;  %v5357_v50 = vld [vmem:[%s7796_s1 + $0x56c] ss:$16 sps:$4 sm:$0xff]  }
  0x70   :  { %3667 = vmatprep.subr.bf16.mxu0 %v5261_v51  ;;  %4054 = vmatprep.subr.bf16.mxu1 %v5264_v52  ;;  %v5352_v51 = vld [vmem:[%s7796_s1 + $0x560] ss:$16 sps:$4 sm:$0xff]   ;;  %v5355_v52 = vld [vmem:[%s7796_s1 + $0x568] ss:$16 sps:$4 sm:$0xff]  }
  0x73   :  { %3668 = vmatpush1.bf16.msra.mxu0 %v5259_v53  ;;  %4055 = vmatpush1.bf16.msra.mxu1 %v5262_v54  ;;  %v5360_v53 = vld [vmem:[%s7796_s1 + $0x584] ss:$16 sps:$4 sm:$0xff]   ;;  %v5363_v54 = vld [vmem:[%s7796_s1 + $0x58c] ss:$16 sps:$4 sm:$0xff]  }
  0x74   :  { %3669 = vmatprep.subr.bf16.mxu0 %v5267_v55  ;;  %4056 = vmatprep.subr.bf16.mxu1 %v5270_v56  ;;  %v5358_v55 = vld [vmem:[%s7796_s1 + $0x580] ss:$16 sps:$4 sm:$0xff]   ;;  %v5361_v56 = vld [vmem:[%s7796_s1 + $0x588] ss:$16 sps:$4 sm:$0xff]  }
  0x77   :  { %3670 = vmatpush1.bf16.msra.mxu0 %v5265_v57  ;;  %4057 = vmatpush1.bf16.msra.mxu1 %v5268_v58  ;;  %v5366_v57 = vld [vmem:[%s7796_s1 + $0x5a4] ss:$16 sps:$4 sm:$0xff]   ;;  %v5369_v58 = vld [vmem:[%s7796_s1 + $0x5ac] ss:$16 sps:$4 sm:$0xff]  }
  0x78   :  { %3671 = vmatprep.subr.bf16.mxu0 %v5273_v59  ;;  %4058 = vmatprep.subr.bf16.mxu1 %v5276_v60  ;;  %v5364_v59 = vld [vmem:[%s7796_s1 + $0x5a0] ss:$16 sps:$4 sm:$0xff]   ;;  %v5367_v60 = vld [vmem:[%s7796_s1 + $0x5a8] ss:$16 sps:$4 sm:$0xff]  }
  0x7b   :  { %3672 = vmatpush1.bf16.msra.mxu0 %v5271_v61  ;;  %4059 = vmatpush1.bf16.msra.mxu1 %v5274_v62  ;;  %v5372_v61 = vld [vmem:[%s7796_s1 + $0x5c4] ss:$16 sps:$4 sm:$0xff]   ;;  %v5375_v62 = vld [vmem:[%s7796_s1 + $0x5cc] ss:$16 sps:$4 sm:$0xff]  }
  0x7c   :  { %3673 = vmatprep.subr.bf16.mxu0 %v5279_v63  ;;  %4060 = vmatprep.subr.bf16.mxu1 %v5282_v0  ;;  %v5370_v63 = vld [vmem:[%s7796_s1 + $0x5c0] ss:$16 sps:$4 sm:$0xff]   ;;  %v5373_v0 = vld [vmem:[%s7796_s1 + $0x5c8] ss:$16 sps:$4 sm:$0xff]  }
  0x7f   :  { %3674 = vmatpush1.bf16.msra.mxu0 %v5277_v1  ;;  %4061 = vmatpush1.bf16.msra.mxu1 %v5280_v2  ;;  %v5378_v1 = vld [vmem:[%s7796_s1 + $0x5e4] ss:$16 sps:$4 sm:$0xff]   ;;  %v5381_v2 = vld [vmem:[%s7796_s1 + $0x5ec] ss:$16 sps:$4 sm:$0xff]  }
  0x80   :  { %3686 = vmatprep.subr.bf16.mxu0 %v5288_v3  ;;  %4073 = vmatprep.subr.bf16.mxu1 %v5291_v4  ;;  %v5376_v3 = vld [vmem:[%s7796_s1 + $0x5e0] ss:$16 sps:$4 sm:$0xff]   ;;  %v5379_v4 = vld [vmem:[%s7796_s1 + $0x5e8] ss:$16 sps:$4 sm:$0xff]  }
  0x82   :  { %3676 = vmatmul.mubr.bf16.vlgmr.msra.gmra.mrb[0].mxu0 %v5283_v5  ;;  %4063 = vmatmul.mubr.bf16.vlgmr.msra.gmra.mrb[0].mxu1 %v5283_v5  ;;  %v5387_v5 = vld [vmem:[%s7796_s1 + $0x604] ss:$16 sps:$4 sm:$0xff]  }
  0x83   :  { %3687 = vmatpush1.bf16.msra.mxu0 %v5286_v6  ;;  %4074 = vmatpush1.bf16.msra.mxu1 %v5289_v7  ;;  %v5390_v6 = vld [vmem:[%s7796_s1 + $0x60c] ss:$16 sps:$4 sm:$0xff]   ;;  %v5382_v7 = vld [vmem:[%s7797_s0 + $0x10] ss:$72 sps:$4 sm:$0xff]  }
  0x84   :  { %3688 = vmatprep.subr.bf16.mxu0 %v5294_v8  ;;  %4075 = vmatprep.subr.bf16.mxu1 %v5297_v9  ;;  %v5385_v8 = vld [vmem:[%s7796_s1 + $0x600] ss:$16 sps:$4 sm:$0xff]   ;;  %v5388_v9 = vld [vmem:[%s7796_s1 + $0x608] ss:$16 sps:$4 sm:$0xff]  }
  0x85   :  { %3718 = vmatprep.mubr.bf16.mxu0 %v5384_v12  ;;  %4105 = vmatprep.mubr.bf16.mxu1 %v5384_v12  ;;  %v5483_v12 = vld [vmem:[%s7797_s0 + $0x1c] ss:$72 sps:$4 sm:$0xff]  }
  0x87   :  { %3689 = vmatpush1.bf16.msra.mxu0 %v5292_v10  ;;  %4076 = vmatpush1.bf16.msra.mxu1 %v5295_v11  ;;  %v5393_v10 = vld [vmem:[%s7796_s1 + $0x624] ss:$16 sps:$4 sm:$0xff]   ;;  %v5396_v11 = vld [vmem:[%s7796_s1 + $0x62c] ss:$16 sps:$4 sm:$0xff]  }
  0x88   :  { %3690 = vmatprep.subr.bf16.mxu0 %v5300_v13  ;;  %4077 = vmatprep.subr.bf16.mxu1 %v5303_v14  ;;  %v5391_v13 = vld [vmem:[%s7796_s1 + $0x620] ss:$16 sps:$4 sm:$0xff]   ;;  %v5394_v14 = vld [vmem:[%s7796_s1 + $0x628] ss:$16 sps:$4 sm:$0xff]  }
  0x8b   :  { %3691 = vmatpush1.bf16.msra.mxu0 %v5298_v15  ;;  %4078 = vmatpush1.bf16.msra.mxu1 %v5301_v16  ;;  %v5399_v15 = vld [vmem:[%s7796_s1 + $0x644] ss:$16 sps:$4 sm:$0xff]   ;;  %v5402_v16 = vld [vmem:[%s7796_s1 + $0x64c] ss:$16 sps:$4 sm:$0xff]  }
  0x8c   :  { %3692 = vmatprep.subr.bf16.mxu0 %v5306_v17  ;;  %4079 = vmatprep.subr.bf16.mxu1 %v5309_v18  ;;  %v5397_v17 = vld [vmem:[%s7796_s1 + $0x640] ss:$16 sps:$4 sm:$0xff]   ;;  %v5400_v18 = vld [vmem:[%s7796_s1 + $0x648] ss:$16 sps:$4 sm:$0xff]  }
  0x8f   :  { %3693 = vmatpush1.bf16.msra.mxu0 %v5304_v19  ;;  %4080 = vmatpush1.bf16.msra.mxu1 %v5307_v20  ;;  %v5405_v19 = vld [vmem:[%s7796_s1 + $0x664] ss:$16 sps:$4 sm:$0xff]   ;;  %v5408_v20 = vld [vmem:[%s7796_s1 + $0x66c] ss:$16 sps:$4 sm:$0xff]  }
  0x90   :  { %3694 = vmatprep.subr.bf16.mxu0 %v5312_v21  ;;  %4081 = vmatprep.subr.bf16.mxu1 %v5315_v22  ;;  %v5403_v21 = vld [vmem:[%s7796_s1 + $0x660] ss:$16 sps:$4 sm:$0xff]   ;;  %v5406_v22 = vld [vmem:[%s7796_s1 + $0x668] ss:$16 sps:$4 sm:$0xff]  }
  0x93   :  { %3695 = vmatpush1.bf16.msra.mxu0 %v5310_v23  ;;  %4082 = vmatpush1.bf16.msra.mxu1 %v5313_v24  ;;  %v5411_v23 = vld [vmem:[%s7796_s1 + $0x684] ss:$16 sps:$4 sm:$0xff]   ;;  %v5414_v24 = vld [vmem:[%s7796_s1 + $0x68c] ss:$16 sps:$4 sm:$0xff]  }
  0x94   :  { %3696 = vmatprep.subr.bf16.mxu0 %v5318_v25  ;;  %4083 = vmatprep.subr.bf16.mxu1 %v5321_v26  ;;  %v5409_v25 = vld [vmem:[%s7796_s1 + $0x680] ss:$16 sps:$4 sm:$0xff]   ;;  %v5412_v26 = vld [vmem:[%s7796_s1 + $0x688] ss:$16 sps:$4 sm:$0xff]  }
  0x97   :  { %3697 = vmatpush1.bf16.msra.mxu0 %v5316_v27  ;;  %4084 = vmatpush1.bf16.msra.mxu1 %v5319_v28  ;;  %v5417_v27 = vld [vmem:[%s7796_s1 + $0x6a4] ss:$16 sps:$4 sm:$0xff]   ;;  %v5420_v28 = vld [vmem:[%s7796_s1 + $0x6ac] ss:$16 sps:$4 sm:$0xff]  }
  0x98   :  { %3698 = vmatprep.subr.bf16.mxu0 %v5324_v29  ;;  %4085 = vmatprep.subr.bf16.mxu1 %v5327_v30  ;;  %v5415_v29 = vld [vmem:[%s7796_s1 + $0x6a0] ss:$16 sps:$4 sm:$0xff]   ;;  %v5418_v30 = vld [vmem:[%s7796_s1 + $0x6a8] ss:$16 sps:$4 sm:$0xff]  }
  0x9b   :  { %3699 = vmatpush1.bf16.msra.mxu0 %v5322_v31  ;;  %4086 = vmatpush1.bf16.msra.mxu1 %v5325_v32  ;;  %v5423_v31 = vld [vmem:[%s7796_s1 + $0x6c4] ss:$16 sps:$4 sm:$0xff]   ;;  %v5426_v32 = vld [vmem:[%s7796_s1 + $0x6cc] ss:$16 sps:$4 sm:$0xff]  }
  0x9c   :  { %3700 = vmatprep.subr.bf16.mxu0 %v5330_v33  ;;  %4087 = vmatprep.subr.bf16.mxu1 %v5333_v34  ;;  %v5421_v33 = vld [vmem:[%s7796_s1 + $0x6c0] ss:$16 sps:$4 sm:$0xff]   ;;  %v5424_v34 = vld [vmem:[%s7796_s1 + $0x6c8] ss:$16 sps:$4 sm:$0xff]  }
  0x9f   :  { %3701 = vmatpush1.bf16.msra.mxu0 %v5328_v35  ;;  %4088 = vmatpush1.bf16.msra.mxu1 %v5331_v36  ;;  %v5429_v35 = vld [vmem:[%s7796_s1 + $0x6e4] ss:$16 sps:$4 sm:$0xff]   ;;  %v5432_v36 = vld [vmem:[%s7796_s1 + $0x6ec] ss:$16 sps:$4 sm:$0xff]  }
  0xa0   :  { %3702 = vmatprep.subr.bf16.mxu0 %v5336_v37  ;;  %4089 = vmatprep.subr.bf16.mxu1 %v5339_v38  ;;  %v5427_v37 = vld [vmem:[%s7796_s1 + $0x6e0] ss:$16 sps:$4 sm:$0xff]   ;;  %v5430_v38 = vld [vmem:[%s7796_s1 + $0x6e8] ss:$16 sps:$4 sm:$0xff]  }
  0xa3   :  { %3703 = vmatpush1.bf16.msra.mxu0 %v5334_v39  ;;  %4090 = vmatpush1.bf16.msra.mxu1 %v5337_v40  ;;  %v5435_v39 = vld [vmem:[%s7796_s1 + $0x704] ss:$16 sps:$4 sm:$0xff]   ;;  %v5438_v40 = vld [vmem:[%s7796_s1 + $0x70c] ss:$16 sps:$4 sm:$0xff]  }
  0xa4   :  { %3704 = vmatprep.subr.bf16.mxu0 %v5342_v41  ;;  %4091 = vmatprep.subr.bf16.mxu1 %v5345_v42  ;;  %v5433_v41 = vld [vmem:[%s7796_s1 + $0x700] ss:$16 sps:$4 sm:$0xff]   ;;  %v5436_v42 = vld [vmem:[%s7796_s1 + $0x708] ss:$16 sps:$4 sm:$0xff]  }
  0xa7   :  { %3705 = vmatpush1.bf16.msra.mxu0 %v5340_v43  ;;  %4092 = vmatpush1.bf16.msra.mxu1 %v5343_v44  ;;  %v5441_v43 = vld [vmem:[%s7796_s1 + $0x724] ss:$16 sps:$4 sm:$0xff]   ;;  %v5444_v44 = vld [vmem:[%s7796_s1 + $0x72c] ss:$16 sps:$4 sm:$0xff]  }
  0xa8   :  { %3706 = vmatprep.subr.bf16.mxu0 %v5348_v45  ;;  %4093 = vmatprep.subr.bf16.mxu1 %v5351_v46  ;;  %v5439_v45 = vld [vmem:[%s7796_s1 + $0x720] ss:$16 sps:$4 sm:$0xff]   ;;  %v5442_v46 = vld [vmem:[%s7796_s1 + $0x728] ss:$16 sps:$4 sm:$0xff]  }
  0xab   :  { %3707 = vmatpush1.bf16.msra.mxu0 %v5346_v47  ;;  %4094 = vmatpush1.bf16.msra.mxu1 %v5349_v48  ;;  %v5447_v47 = vld [vmem:[%s7796_s1 + $0x744] ss:$16 sps:$4 sm:$0xff]   ;;  %v5450_v48 = vld [vmem:[%s7796_s1 + $0x74c] ss:$16 sps:$4 sm:$0xff]  }
  0xac   :  { %3708 = vmatprep.subr.bf16.mxu0 %v5354_v49  ;;  %4095 = vmatprep.subr.bf16.mxu1 %v5357_v50  ;;  %v5445_v49 = vld [vmem:[%s7796_s1 + $0x740] ss:$16 sps:$4 sm:$0xff]   ;;  %v5448_v50 = vld [vmem:[%s7796_s1 + $0x748] ss:$16 sps:$4 sm:$0xff]  }
  0xaf   :  { %3709 = vmatpush1.bf16.msra.mxu0 %v5352_v51  ;;  %4096 = vmatpush1.bf16.msra.mxu1 %v5355_v52  ;;  %v5453_v51 = vld [vmem:[%s7796_s1 + $0x764] ss:$16 sps:$4 sm:$0xff]   ;;  %v5456_v52 = vld [vmem:[%s7796_s1 + $0x76c] ss:$16 sps:$4 sm:$0xff]  }
  0xb0   :  { %3710 = vmatprep.subr.bf16.mxu0 %v5360_v53  ;;  %4097 = vmatprep.subr.bf16.mxu1 %v5363_v54  ;;  %v5451_v53 = vld [vmem:[%s7796_s1 + $0x760] ss:$16 sps:$4 sm:$0xff]   ;;  %v5454_v54 = vld [vmem:[%s7796_s1 + $0x768] ss:$16 sps:$4 sm:$0xff]  }
  0xb3   :  { %3711 = vmatpush1.bf16.msra.mxu0 %v5358_v55  ;;  %4098 = vmatpush1.bf16.msra.mxu1 %v5361_v56  ;;  %v5459_v55 = vld [vmem:[%s7796_s1 + $0x784] ss:$16 sps:$4 sm:$0xff]   ;;  %v5462_v56 = vld [vmem:[%s7796_s1 + $0x78c] ss:$16 sps:$4 sm:$0xff]  }
  0xb4   :  { %3712 = vmatprep.subr.bf16.mxu0 %v5366_v57  ;;  %4099 = vmatprep.subr.bf16.mxu1 %v5369_v58  ;;  %v5457_v57 = vld [vmem:[%s7796_s1 + $0x780] ss:$16 sps:$4 sm:$0xff]   ;;  %v5460_v58 = vld [vmem:[%s7796_s1 + $0x788] ss:$16 sps:$4 sm:$0xff]  }
  0xb7   :  { %3713 = vmatpush1.bf16.msra.mxu0 %v5364_v59  ;;  %4100 = vmatpush1.bf16.msra.mxu1 %v5367_v60  ;;  %v5465_v59 = vld [vmem:[%s7796_s1 + $0x7a4] ss:$16 sps:$4 sm:$0xff]   ;;  %v5468_v60 = vld [vmem:[%s7796_s1 + $0x7ac] ss:$16 sps:$4 sm:$0xff]  }
  0xb8   :  { %3714 = vmatprep.subr.bf16.mxu0 %v5372_v61  ;;  %4101 = vmatprep.subr.bf16.mxu1 %v5375_v62  ;;  %v5463_v61 = vld [vmem:[%s7796_s1 + $0x7a0] ss:$16 sps:$4 sm:$0xff]   ;;  %v5466_v62 = vld [vmem:[%s7796_s1 + $0x7a8] ss:$16 sps:$4 sm:$0xff]  }
  0xbb   :  { %3715 = vmatpush1.bf16.msra.mxu0 %v5370_v63  ;;  %4102 = vmatpush1.bf16.msra.mxu1 %v5373_v0  ;;  %v5471_v63 = vld [vmem:[%s7796_s1 + $0x7c4] ss:$16 sps:$4 sm:$0xff]   ;;  %v5474_v0 = vld [vmem:[%s7796_s1 + $0x7cc] ss:$16 sps:$4 sm:$0xff]  }
  0xbc   :  { %3716 = vmatprep.subr.bf16.mxu0 %v5378_v1  ;;  %4103 = vmatprep.subr.bf16.mxu1 %v5381_v2  ;;  %v5469_v1 = vld [vmem:[%s7796_s1 + $0x7c0] ss:$16 sps:$4 sm:$0xff]   ;;  %v5472_v2 = vld [vmem:[%s7796_s1 + $0x7c8] ss:$16 sps:$4 sm:$0xff]  }
  0xbf   :  { %3717 = vmatpush1.bf16.msra.mxu0 %v5376_v3  ;;  %4104 = vmatpush1.bf16.msra.mxu1 %v5379_v4  ;;  %v5477_v3 = vld [vmem:[%s7796_s1 + $0x7e4] ss:$16 sps:$4 sm:$0xff]   ;;  %v5480_v4 = vld [vmem:[%s7796_s1 + $0x7ec] ss:$16 sps:$4 sm:$0xff]  }
  0xc0   :  { %3729 = vmatprep.subr.bf16.mxu0 %v5387_v5  ;;  %4116 = vmatprep.subr.bf16.mxu1 %v5390_v6  ;;  %v5475_v5 = vld [vmem:[%s7796_s1 + $0x7e0] ss:$16 sps:$4 sm:$0xff]   ;;  %v5478_v6 = vld [vmem:[%s7796_s1 + $0x7e8] ss:$16 sps:$4 sm:$0xff]  }
  0xc2   :  { %3719 = vmatmul.mubr.bf16.vlgmr.msra.gmra.mrb[0].mxu0 %v5382_v7  ;;  %4106 = vmatmul.mubr.bf16.vlgmr.msra.gmra.mrb[0].mxu1 %v5382_v7  ;;  %v5486_v7 = vld [vmem:[%s7796_s1 + $0x804] ss:$16 sps:$4 sm:$0xff]  }
  0xc3   :  { %3730 = vmatpush1.bf16.msra.mxu0 %v5385_v8  ;;  %4117 = vmatpush1.bf16.msra.mxu1 %v5388_v9  ;;  %v5489_v8 = vld [vmem:[%s7796_s1 + $0x80c] ss:$16 sps:$4 sm:$0xff]   ;;  %v5481_v9 = vld [vmem:[%s7797_s0 + $0x18] ss:$72 sps:$4 sm:$0xff]  }
  0xc4   :  { %3731 = vmatprep.subr.bf16.mxu0 %v5393_v10  ;;  %4118 = vmatprep.subr.bf16.mxu1 %v5396_v11  ;;  %v5484_v10 = vld [vmem:[%s7796_s1 + $0x800] ss:$16 sps:$4 sm:$0xff]   ;;  %v5487_v11 = vld [vmem:[%s7796_s1 + $0x808] ss:$16 sps:$4 sm:$0xff]  }
  0xc5   :  { %3761 = vmatprep.mubr.bf16.mxu0 %v5483_v12  ;;  %4148 = vmatprep.mubr.bf16.mxu1 %v5483_v12  ;;  %v5492_v12 = vld [vmem:[%s7796_s1 + $0x824] ss:$16 sps:$4 sm:$0xff]  }
  0xc7   :  { %3732 = vmatpush1.bf16.msra.mxu0 %v5391_v13  ;;  %4119 = vmatpush1.bf16.msra.mxu1 %v5394_v14  ;;  %v5495_v13 = vld [vmem:[%s7796_s1 + $0x82c] ss:$16 sps:$4 sm:$0xff]  }
  0xc8   :  { %3733 = vmatprep.subr.bf16.mxu0 %v5399_v15  ;;  %4120 = vmatprep.subr.bf16.mxu1 %v5402_v16  ;;  %v5582_v14 = vld [vmem:[%s7797_s0 + $0x24] ss:$72 sps:$4 sm:$0xff]   ;;  %v5490_v15 = vld [vmem:[%s7796_s1 + $0x820] ss:$16 sps:$4 sm:$0xff]   ;;  %v5493_v16 = vld [vmem:[%s7796_s1 + $0x828] ss:$16 sps:$4 sm:$0xff]  }
  0xcb   :  { %3734 = vmatpush1.bf16.msra.mxu0 %v5397_v17  ;;  %4121 = vmatpush1.bf16.msra.mxu1 %v5400_v18  ;;  %v5498_v17 = vld [vmem:[%s7796_s1 + $0x844] ss:$16 sps:$4 sm:$0xff]   ;;  %v5501_v18 = vld [vmem:[%s7796_s1 + $0x84c] ss:$16 sps:$4 sm:$0xff]  }
  0xcc   :  { %3735 = vmatprep.subr.bf16.mxu0 %v5405_v19  ;;  %4122 = vmatprep.subr.bf16.mxu1 %v5408_v20  ;;  %v5496_v19 = vld [vmem:[%s7796_s1 + $0x840] ss:$16 sps:$4 sm:$0xff]   ;;  %v5499_v20 = vld [vmem:[%s7796_s1 + $0x848] ss:$16 sps:$4 sm:$0xff]  }
  0xcf   :  { %3736 = vmatpush1.bf16.msra.mxu0 %v5403_v21  ;;  %4123 = vmatpush1.bf16.msra.mxu1 %v5406_v22  ;;  %v5504_v21 = vld [vmem:[%s7796_s1 + $0x864] ss:$16 sps:$4 sm:$0xff]   ;;  %v5507_v22 = vld [vmem:[%s7796_s1 + $0x86c] ss:$16 sps:$4 sm:$0xff]  }
  0xd0   :  { %3737 = vmatprep.subr.bf16.mxu0 %v5411_v23  ;;  %4124 = vmatprep.subr.bf16.mxu1 %v5414_v24  ;;  %v5502_v23 = vld [vmem:[%s7796_s1 + $0x860] ss:$16 sps:$4 sm:$0xff]   ;;  %v5505_v24 = vld [vmem:[%s7796_s1 + $0x868] ss:$16 sps:$4 sm:$0xff]  }
  0xd3   :  { %3738 = vmatpush1.bf16.msra.mxu0 %v5409_v25  ;;  %4125 = vmatpush1.bf16.msra.mxu1 %v5412_v26  ;;  %v5510_v25 = vld [vmem:[%s7796_s1 + $0x884] ss:$16 sps:$4 sm:$0xff]   ;;  %v5513_v26 = vld [vmem:[%s7796_s1 + $0x88c] ss:$16 sps:$4 sm:$0xff]  }
  0xd4   :  { %3739 = vmatprep.subr.bf16.mxu0 %v5417_v27  ;;  %4126 = vmatprep.subr.bf16.mxu1 %v5420_v28  ;;  %v5508_v27 = vld [vmem:[%s7796_s1 + $0x880] ss:$16 sps:$4 sm:$0xff]   ;;  %v5511_v28 = vld [vmem:[%s7796_s1 + $0x888] ss:$16 sps:$4 sm:$0xff]  }
  0xd7   :  { %3740 = vmatpush1.bf16.msra.mxu0 %v5415_v29  ;;  %4127 = vmatpush1.bf16.msra.mxu1 %v5418_v30  ;;  %v5516_v29 = vld [vmem:[%s7796_s1 + $0x8a4] ss:$16 sps:$4 sm:$0xff]   ;;  %v5519_v30 = vld [vmem:[%s7796_s1 + $0x8ac] ss:$16 sps:$4 sm:$0xff]  }
  0xd8   :  { %3741 = vmatprep.subr.bf16.mxu0 %v5423_v31  ;;  %4128 = vmatprep.subr.bf16.mxu1 %v5426_v32  ;;  %v5514_v31 = vld [vmem:[%s7796_s1 + $0x8a0] ss:$16 sps:$4 sm:$0xff]   ;;  %v5517_v32 = vld [vmem:[%s7796_s1 + $0x8a8] ss:$16 sps:$4 sm:$0xff]  }
  0xdb   :  { %3742 = vmatpush1.bf16.msra.mxu0 %v5421_v33  ;;  %4129 = vmatpush1.bf16.msra.mxu1 %v5424_v34  ;;  %v5522_v33 = vld [vmem:[%s7796_s1 + $0x8c4] ss:$16 sps:$4 sm:$0xff]   ;;  %v5525_v34 = vld [vmem:[%s7796_s1 + $0x8cc] ss:$16 sps:$4 sm:$0xff]  }
  0xdc   :  { %3743 = vmatprep.subr.bf16.mxu0 %v5429_v35  ;;  %4130 = vmatprep.subr.bf16.mxu1 %v5432_v36  ;;  %v5520_v35 = vld [vmem:[%s7796_s1 + $0x8c0] ss:$16 sps:$4 sm:$0xff]   ;;  %v5523_v36 = vld [vmem:[%s7796_s1 + $0x8c8] ss:$16 sps:$4 sm:$0xff]  }
  0xdf   :  { %3744 = vmatpush1.bf16.msra.mxu0 %v5427_v37  ;;  %4131 = vmatpush1.bf16.msra.mxu1 %v5430_v38  ;;  %v5528_v37 = vld [vmem:[%s7796_s1 + $0x8e4] ss:$16 sps:$4 sm:$0xff]   ;;  %v5531_v38 = vld [vmem:[%s7796_s1 + $0x8ec] ss:$16 sps:$4 sm:$0xff]  }
  0xe0   :  { %3745 = vmatprep.subr.bf16.mxu0 %v5435_v39  ;;  %4132 = vmatprep.subr.bf16.mxu1 %v5438_v40  ;;  %v5526_v39 = vld [vmem:[%s7796_s1 + $0x8e0] ss:$16 sps:$4 sm:$0xff]   ;;  %v5529_v40 = vld [vmem:[%s7796_s1 + $0x8e8] ss:$16 sps:$4 sm:$0xff]  }
  0xe3   :  { %3746 = vmatpush1.bf16.msra.mxu0 %v5433_v41  ;;  %4133 = vmatpush1.bf16.msra.mxu1 %v5436_v42  ;;  %v5534_v41 = vld [vmem:[%s7796_s1 + $0x904] ss:$16 sps:$4 sm:$0xff]   ;;  %v5537_v42 = vld [vmem:[%s7796_s1 + $0x90c] ss:$16 sps:$4 sm:$0xff]  }
  0xe4   :  { %3747 = vmatprep.subr.bf16.mxu0 %v5441_v43  ;;  %4134 = vmatprep.subr.bf16.mxu1 %v5444_v44  ;;  %v5532_v43 = vld [vmem:[%s7796_s1 + $0x900] ss:$16 sps:$4 sm:$0xff]   ;;  %v5535_v44 = vld [vmem:[%s7796_s1 + $0x908] ss:$16 sps:$4 sm:$0xff]  }
  0xe7   :  { %3748 = vmatpush1.bf16.msra.mxu0 %v5439_v45  ;;  %4135 = vmatpush1.bf16.msra.mxu1 %v5442_v46  ;;  %v5540_v45 = vld [vmem:[%s7796_s1 + $0x924] ss:$16 sps:$4 sm:$0xff]   ;;  %v5543_v46 = vld [vmem:[%s7796_s1 + $0x92c] ss:$16 sps:$4 sm:$0xff]  }
  0xe8   :  { %3749 = vmatprep.subr.bf16.mxu0 %v5447_v47  ;;  %4136 = vmatprep.subr.bf16.mxu1 %v5450_v48  ;;  %v5538_v47 = vld [vmem:[%s7796_s1 + $0x920] ss:$16 sps:$4 sm:$0xff]   ;;  %v5541_v48 = vld [vmem:[%s7796_s1 + $0x928] ss:$16 sps:$4 sm:$0xff]  }
  0xeb   :  { %3750 = vmatpush1.bf16.msra.mxu0 %v5445_v49  ;;  %4137 = vmatpush1.bf16.msra.mxu1 %v5448_v50  ;;  %v5546_v49 = vld [vmem:[%s7796_s1 + $0x944] ss:$16 sps:$4 sm:$0xff]   ;;  %v5549_v50 = vld [vmem:[%s7796_s1 + $0x94c] ss:$16 sps:$4 sm:$0xff]  }
  0xec   :  { %3751 = vmatprep.subr.bf16.mxu0 %v5453_v51  ;;  %4138 = vmatprep.subr.bf16.mxu1 %v5456_v52  ;;  %v5544_v51 = vld [vmem:[%s7796_s1 + $0x940] ss:$16 sps:$4 sm:$0xff]   ;;  %v5547_v52 = vld [vmem:[%s7796_s1 + $0x948] ss:$16 sps:$4 sm:$0xff]  }
  0xef   :  { %3752 = vmatpush1.bf16.msra.mxu0 %v5451_v53  ;;  %4139 = vmatpush1.bf16.msra.mxu1 %v5454_v54  ;;  %v5552_v53 = vld [vmem:[%s7796_s1 + $0x964] ss:$16 sps:$4 sm:$0xff]   ;;  %v5555_v54 = vld [vmem:[%s7796_s1 + $0x96c] ss:$16 sps:$4 sm:$0xff]  }
  0xf0   :  { %3753 = vmatprep.subr.bf16.mxu0 %v5459_v55  ;;  %4140 = vmatprep.subr.bf16.mxu1 %v5462_v56  ;;  %v5550_v55 = vld [vmem:[%s7796_s1 + $0x960] ss:$16 sps:$4 sm:$0xff]   ;;  %v5553_v56 = vld [vmem:[%s7796_s1 + $0x968] ss:$16 sps:$4 sm:$0xff]  }
  0xf3   :  { %3754 = vmatpush1.bf16.msra.mxu0 %v5457_v57  ;;  %4141 = vmatpush1.bf16.msra.mxu1 %v5460_v58  ;;  %v5558_v57 = vld [vmem:[%s7796_s1 + $0x984] ss:$16 sps:$4 sm:$0xff]   ;;  %v5561_v58 = vld [vmem:[%s7796_s1 + $0x98c] ss:$16 sps:$4 sm:$0xff]  }
  0xf4   :  { %3755 = vmatprep.subr.bf16.mxu0 %v5465_v59  ;;  %4142 = vmatprep.subr.bf16.mxu1 %v5468_v60  ;;  %v5556_v59 = vld [vmem:[%s7796_s1 + $0x980] ss:$16 sps:$4 sm:$0xff]   ;;  %v5559_v60 = vld [vmem:[%s7796_s1 + $0x988] ss:$16 sps:$4 sm:$0xff]  }
  0xf7   :  { %3756 = vmatpush1.bf16.msra.mxu0 %v5463_v61  ;;  %4143 = vmatpush1.bf16.msra.mxu1 %v5466_v62  ;;  %v5564_v61 = vld [vmem:[%s7796_s1 + $0x9a4] ss:$16 sps:$4 sm:$0xff]   ;;  %v5567_v62 = vld [vmem:[%s7796_s1 + $0x9ac] ss:$16 sps:$4 sm:$0xff]  }
  0xf8   :  { %3757 = vmatprep.subr.bf16.mxu0 %v5471_v63  ;;  %4144 = vmatprep.subr.bf16.mxu1 %v5474_v0  ;;  %v5562_v63 = vld [vmem:[%s7796_s1 + $0x9a0] ss:$16 sps:$4 sm:$0xff]   ;;  %v5565_v0 = vld [vmem:[%s7796_s1 + $0x9a8] ss:$16 sps:$4 sm:$0xff]  }
  0xfb   :  { %3758 = vmatpush1.bf16.msra.mxu0 %v5469_v1  ;;  %4145 = vmatpush1.bf16.msra.mxu1 %v5472_v2  ;;  %v5570_v1 = vld [vmem:[%s7796_s1 + $0x9c4] ss:$16 sps:$4 sm:$0xff]   ;;  %v5573_v2 = vld [vmem:[%s7796_s1 + $0x9cc] ss:$16 sps:$4 sm:$0xff]  }
  0xfc   :  { %3759 = vmatprep.subr.bf16.mxu0 %v5477_v3  ;;  %4146 = vmatprep.subr.bf16.mxu1 %v5480_v4  ;;  %v5568_v3 = vld [vmem:[%s7796_s1 + $0x9c0] ss:$16 sps:$4 sm:$0xff]   ;;  %v5571_v4 = vld [vmem:[%s7796_s1 + $0x9c8] ss:$16 sps:$4 sm:$0xff]  }
  0xff   :  { %3760 = vmatpush1.bf16.msra.mxu0 %v5475_v5  ;;  %4147 = vmatpush1.bf16.msra.mxu1 %v5478_v6  ;;  %v5576_v5 = vld [vmem:[%s7796_s1 + $0x9e4] ss:$16 sps:$4 sm:$0xff]   ;;  %v5579_v6 = vld [vmem:[%s7796_s1 + $0x9ec] ss:$16 sps:$4 sm:$0xff]  }
 0x100   :  { %3772 = vmatprep.subr.bf16.mxu0 %v5486_v7  ;;  %4159 = vmatprep.subr.bf16.mxu1 %v5489_v8  ;;  %v5574_v7 = vld [vmem:[%s7796_s1 + $0x9e0] ss:$16 sps:$4 sm:$0xff]   ;;  %v5577_v8 = vld [vmem:[%s7796_s1 + $0x9e8] ss:$16 sps:$4 sm:$0xff]  }
 0x102   :  { %3762 = vmatmul.mubr.bf16.vlgmr.msra.gmra.mrb[0].mxu0 %v5481_v9  ;;  %4149 = vmatmul.mubr.bf16.vlgmr.msra.gmra.mrb[0].mxu1 %v5481_v9  ;;  %v5580_v9 = vld [vmem:[%s7797_s0 + $0x20] ss:$72 sps:$4 sm:$0xff]  }
 0x103   :  { %3773 = vmatpush1.bf16.msra.mxu0 %v5484_v10  ;;  %4160 = vmatpush1.bf16.msra.mxu1 %v5487_v11  ;;  %v5585_v10 = vld [vmem:[%s7796_s1 + $0xa04] ss:$16 sps:$4 sm:$0xff]   ;;  %v5588_v11 = vld [vmem:[%s7796_s1 + $0xa0c] ss:$16 sps:$4 sm:$0xff]  }
 0x104   :  { %3774 = vmatprep.subr.bf16.mxu0 %v5492_v12  ;;  %4161 = vmatprep.subr.bf16.mxu1 %v5495_v13  ;;  %v5583_v12 = vld [vmem:[%s7796_s1 + $0xa00] ss:$16 sps:$4 sm:$0xff]   ;;  %v5586_v13 = vld [vmem:[%s7796_s1 + $0xa08] ss:$16 sps:$4 sm:$0xff]  }
 0x105   :  { %3804 = vmatprep.mubr.bf16.mxu0 %v5582_v14  ;;  %4191 = vmatprep.mubr.bf16.mxu1 %v5582_v14  ;;  %v5591_v14 = vld [vmem:[%s7796_s1 + $0xa24] ss:$16 sps:$4 sm:$0xff]  }
 0x107   :  { %3775 = vmatpush1.bf16.msra.mxu0 %v5490_v15  ;;  %4162 = vmatpush1.bf16.msra.mxu1 %v5493_v16  ;;  %v5594_v15 = vld [vmem:[%s7796_s1 + $0xa2c] ss:$16 sps:$4 sm:$0xff]  }
 0x108   :  { %3776 = vmatprep.subr.bf16.mxu0 %v5498_v17  ;;  %4163 = vmatprep.subr.bf16.mxu1 %v5501_v18  ;;  %v5681_v16 = vld [vmem:[%s7797_s0 + $0x2c] ss:$72 sps:$4 sm:$0xff]   ;;  %v5589_v17 = vld [vmem:[%s7796_s1 + $0xa20] ss:$16 sps:$4 sm:$0xff]   ;;  %v5592_v18 = vld [vmem:[%s7796_s1 + $0xa28] ss:$16 sps:$4 sm:$0xff]  }
 0x10b   :  { %3777 = vmatpush1.bf16.msra.mxu0 %v5496_v19  ;;  %4164 = vmatpush1.bf16.msra.mxu1 %v5499_v20  ;;  %v5597_v19 = vld [vmem:[%s7796_s1 + $0xa44] ss:$16 sps:$4 sm:$0xff]   ;;  %v5600_v20 = vld [vmem:[%s7796_s1 + $0xa4c] ss:$16 sps:$4 sm:$0xff]  }
 0x10c   :  { %3778 = vmatprep.subr.bf16.mxu0 %v5504_v21  ;;  %4165 = vmatprep.subr.bf16.mxu1 %v5507_v22  ;;  %v5595_v21 = vld [vmem:[%s7796_s1 + $0xa40] ss:$16 sps:$4 sm:$0xff]   ;;  %v5598_v22 = vld [vmem:[%s7796_s1 + $0xa48] ss:$16 sps:$4 sm:$0xff]  }
 0x10f   :  { %3779 = vmatpush1.bf16.msra.mxu0 %v5502_v23  ;;  %4166 = vmatpush1.bf16.msra.mxu1 %v5505_v24  ;;  %v5603_v23 = vld [vmem:[%s7796_s1 + $0xa64] ss:$16 sps:$4 sm:$0xff]   ;;  %v5606_v24 = vld [vmem:[%s7796_s1 + $0xa6c] ss:$16 sps:$4 sm:$0xff]  }
 0x110   :  { %3780 = vmatprep.subr.bf16.mxu0 %v5510_v25  ;;  %4167 = vmatprep.subr.bf16.mxu1 %v5513_v26  ;;  %v5601_v25 = vld [vmem:[%s7796_s1 + $0xa60] ss:$16 sps:$4 sm:$0xff]   ;;  %v5604_v26 = vld [vmem:[%s7796_s1 + $0xa68] ss:$16 sps:$4 sm:$0xff]  }
 0x113   :  { %3781 = vmatpush1.bf16.msra.mxu0 %v5508_v27  ;;  %4168 = vmatpush1.bf16.msra.mxu1 %v5511_v28  ;;  %v5609_v27 = vld [vmem:[%s7796_s1 + $0xa84] ss:$16 sps:$4 sm:$0xff]   ;;  %v5612_v28 = vld [vmem:[%s7796_s1 + $0xa8c] ss:$16 sps:$4 sm:$0xff]  }
 0x114   :  { %3782 = vmatprep.subr.bf16.mxu0 %v5516_v29  ;;  %4169 = vmatprep.subr.bf16.mxu1 %v5519_v30  ;;  %v5607_v29 = vld [vmem:[%s7796_s1 + $0xa80] ss:$16 sps:$4 sm:$0xff]   ;;  %v5610_v30 = vld [vmem:[%s7796_s1 + $0xa88] ss:$16 sps:$4 sm:$0xff]  }
 0x117   :  { %3783 = vmatpush1.bf16.msra.mxu0 %v5514_v31  ;;  %4170 = vmatpush1.bf16.msra.mxu1 %v5517_v32  ;;  %v5615_v31 = vld [vmem:[%s7796_s1 + $0xaa4] ss:$16 sps:$4 sm:$0xff]   ;;  %v5618_v32 = vld [vmem:[%s7796_s1 + $0xaac] ss:$16 sps:$4 sm:$0xff]  }
 0x118   :  { %3784 = vmatprep.subr.bf16.mxu0 %v5522_v33  ;;  %4171 = vmatprep.subr.bf16.mxu1 %v5525_v34  ;;  %v5613_v33 = vld [vmem:[%s7796_s1 + $0xaa0] ss:$16 sps:$4 sm:$0xff]   ;;  %v5616_v34 = vld [vmem:[%s7796_s1 + $0xaa8] ss:$16 sps:$4 sm:$0xff]  }
 0x11b   :  { %3785 = vmatpush1.bf16.msra.mxu0 %v5520_v35  ;;  %4172 = vmatpush1.bf16.msra.mxu1 %v5523_v36  ;;  %v5621_v35 = vld [vmem:[%s7796_s1 + $0xac4] ss:$16 sps:$4 sm:$0xff]   ;;  %v5624_v36 = vld [vmem:[%s7796_s1 + $0xacc] ss:$16 sps:$4 sm:$0xff]  }
 0x11c   :  { %3786 = vmatprep.subr.bf16.mxu0 %v5528_v37  ;;  %4173 = vmatprep.subr.bf16.mxu1 %v5531_v38  ;;  %v5619_v37 = vld [vmem:[%s7796_s1 + $0xac0] ss:$16 sps:$4 sm:$0xff]   ;;  %v5622_v38 = vld [vmem:[%s7796_s1 + $0xac8] ss:$16 sps:$4 sm:$0xff]  }
 0x11f   :  { %3787 = vmatpush1.bf16.msra.mxu0 %v5526_v39  ;;  %4174 = vmatpush1.bf16.msra.mxu1 %v5529_v40  ;;  %v5627_v39 = vld [vmem:[%s7796_s1 + $0xae4] ss:$16 sps:$4 sm:$0xff]   ;;  %v5630_v40 = vld [vmem:[%s7796_s1 + $0xaec] ss:$16 sps:$4 sm:$0xff]  }
 0x120   :  { %3788 = vmatprep.subr.bf16.mxu0 %v5534_v41  ;;  %4175 = vmatprep.subr.bf16.mxu1 %v5537_v42  ;;  %v5625_v41 = vld [vmem:[%s7796_s1 + $0xae0] ss:$16 sps:$4 sm:$0xff]   ;;  %v5628_v42 = vld [vmem:[%s7796_s1 + $0xae8] ss:$16 sps:$4 sm:$0xff]  }
 0x123   :  { %3789 = vmatpush1.bf16.msra.mxu0 %v5532_v43  ;;  %4176 = vmatpush1.bf16.msra.mxu1 %v5535_v44  ;;  %v5633_v43 = vld [vmem:[%s7796_s1 + $0xb04] ss:$16 sps:$4 sm:$0xff]   ;;  %v5636_v44 = vld [vmem:[%s7796_s1 + $0xb0c] ss:$16 sps:$4 sm:$0xff]  }
 0x124   :  { %3790 = vmatprep.subr.bf16.mxu0 %v5540_v45  ;;  %4177 = vmatprep.subr.bf16.mxu1 %v5543_v46  ;;  %v5631_v45 = vld [vmem:[%s7796_s1 + $0xb00] ss:$16 sps:$4 sm:$0xff]   ;;  %v5634_v46 = vld [vmem:[%s7796_s1 + $0xb08] ss:$16 sps:$4 sm:$0xff]  }
 0x127   :  { %3791 = vmatpush1.bf16.msra.mxu0 %v5538_v47  ;;  %4178 = vmatpush1.bf16.msra.mxu1 %v5541_v48  ;;  %v5639_v47 = vld [vmem:[%s7796_s1 + $0xb24] ss:$16 sps:$4 sm:$0xff]   ;;  %v5642_v48 = vld [vmem:[%s7796_s1 + $0xb2c] ss:$16 sps:$4 sm:$0xff]  }
 0x128   :  { %3792 = vmatprep.subr.bf16.mxu0 %v5546_v49  ;;  %4179 = vmatprep.subr.bf16.mxu1 %v5549_v50  ;;  %v5637_v49 = vld [vmem:[%s7796_s1 + $0xb20] ss:$16 sps:$4 sm:$0xff]   ;;  %v5640_v50 = vld [vmem:[%s7796_s1 + $0xb28] ss:$16 sps:$4 sm:$0xff]  }
 0x12b   :  { %3793 = vmatpush1.bf16.msra.mxu0 %v5544_v51  ;;  %4180 = vmatpush1.bf16.msra.mxu1 %v5547_v52  ;;  %v5645_v51 = vld [vmem:[%s7796_s1 + $0xb44] ss:$16 sps:$4 sm:$0xff]   ;;  %v5648_v52 = vld [vmem:[%s7796_s1 + $0xb4c] ss:$16 sps:$4 sm:$0xff]  }
 0x12c   :  { %3794 = vmatprep.subr.bf16.mxu0 %v5552_v53  ;;  %4181 = vmatprep.subr.bf16.mxu1 %v5555_v54  ;;  %v5643_v53 = vld [vmem:[%s7796_s1 + $0xb40] ss:$16 sps:$4 sm:$0xff]   ;;  %v5646_v54 = vld [vmem:[%s7796_s1 + $0xb48] ss:$16 sps:$4 sm:$0xff]  }
 0x12f   :  { %3795 = vmatpush1.bf16.msra.mxu0 %v5550_v55  ;;  %4182 = vmatpush1.bf16.msra.mxu1 %v5553_v56  ;;  %v5651_v55 = vld [vmem:[%s7796_s1 + $0xb64] ss:$16 sps:$4 sm:$0xff]   ;;  %v5654_v56 = vld [vmem:[%s7796_s1 + $0xb6c] ss:$16 sps:$4 sm:$0xff]  }
 0x130   :  { %3796 = vmatprep.subr.bf16.mxu0 %v5558_v57  ;;  %4183 = vmatprep.subr.bf16.mxu1 %v5561_v58  ;;  %v5649_v57 = vld [vmem:[%s7796_s1 + $0xb60] ss:$16 sps:$4 sm:$0xff]   ;;  %v5652_v58 = vld [vmem:[%s7796_s1 + $0xb68] ss:$16 sps:$4 sm:$0xff]  }
 0x133   :  { %3797 = vmatpush1.bf16.msra.mxu0 %v5556_v59  ;;  %4184 = vmatpush1.bf16.msra.mxu1 %v5559_v60  ;;  %v5657_v59 = vld [vmem:[%s7796_s1 + $0xb84] ss:$16 sps:$4 sm:$0xff]   ;;  %v5660_v60 = vld [vmem:[%s7796_s1 + $0xb8c] ss:$16 sps:$4 sm:$0xff]  }
 0x134   :  { %3798 = vmatprep.subr.bf16.mxu0 %v5564_v61  ;;  %4185 = vmatprep.subr.bf16.mxu1 %v5567_v62  ;;  %v5655_v61 = vld [vmem:[%s7796_s1 + $0xb80] ss:$16 sps:$4 sm:$0xff]   ;;  %v5658_v62 = vld [vmem:[%s7796_s1 + $0xb88] ss:$16 sps:$4 sm:$0xff]  }
 0x137   :  { %3799 = vmatpush1.bf16.msra.mxu0 %v5562_v63  ;;  %4186 = vmatpush1.bf16.msra.mxu1 %v5565_v0  ;;  %v5663_v63 = vld [vmem:[%s7796_s1 + $0xba4] ss:$16 sps:$4 sm:$0xff]   ;;  %v5666_v0 = vld [vmem:[%s7796_s1 + $0xbac] ss:$16 sps:$4 sm:$0xff]  }
 0x138   :  { %3800 = vmatprep.subr.bf16.mxu0 %v5570_v1  ;;  %4187 = vmatprep.subr.bf16.mxu1 %v5573_v2  ;;  %v5661_v1 = vld [vmem:[%s7796_s1 + $0xba0] ss:$16 sps:$4 sm:$0xff]   ;;  %v5664_v2 = vld [vmem:[%s7796_s1 + $0xba8] ss:$16 sps:$4 sm:$0xff]  }
 0x13b   :  { %3801 = vmatpush1.bf16.msra.mxu0 %v5568_v3  ;;  %4188 = vmatpush1.bf16.msra.mxu1 %v5571_v4  ;;  %v5669_v3 = vld [vmem:[%s7796_s1 + $0xbc4] ss:$16 sps:$4 sm:$0xff]   ;;  %v5672_v4 = vld [vmem:[%s7796_s1 + $0xbcc] ss:$16 sps:$4 sm:$0xff]  }
 0x13c   :  { %3802 = vmatprep.subr.bf16.mxu0 %v5576_v5  ;;  %4189 = vmatprep.subr.bf16.mxu1 %v5579_v6  ;;  %v5667_v5 = vld [vmem:[%s7796_s1 + $0xbc0] ss:$16 sps:$4 sm:$0xff]   ;;  %v5670_v6 = vld [vmem:[%s7796_s1 + $0xbc8] ss:$16 sps:$4 sm:$0xff]  }
 0x13f   :  { %3803 = vmatpush1.bf16.msra.mxu0 %v5574_v7  ;;  %4190 = vmatpush1.bf16.msra.mxu1 %v5577_v8  ;;  %v5675_v7 = vld [vmem:[%s7796_s1 + $0xbe4] ss:$16 sps:$4 sm:$0xff]   ;;  %v5678_v8 = vld [vmem:[%s7796_s1 + $0xbec] ss:$16 sps:$4 sm:$0xff]  }
 0x140   :  { %3815 = vmatprep.subr.bf16.mxu0 %v5585_v10  ;;  %4202 = vmatprep.subr.bf16.mxu1 %v5588_v11  ;;  %v5676_v10 = vld [vmem:[%s7796_s1 + $0xbe8] ss:$16 sps:$4 sm:$0xff]   ;;  %v5684_v11 = vld [vmem:[%s7796_s1 + $0xc04] ss:$16 sps:$4 sm:$0xff]  }
 0x142   :  { %3805 = vmatmul.mubr.bf16.vlgmr.msra.gmra.mrb[0].mxu0 %v5580_v9  ;;  %4192 = vmatmul.mubr.bf16.vlgmr.msra.gmra.mrb[0].mxu1 %v5580_v9  ;;  %v5673_v9 = vld [vmem:[%s7796_s1 + $0xbe0] ss:$16 sps:$4 sm:$0xff]  }
 0x143   :  { %3816 = vmatpush1.bf16.msra.mxu0 %v5583_v12  ;;  %4203 = vmatpush1.bf16.msra.mxu1 %v5586_v13  ;;  %v5687_v12 = vld [vmem:[%s7796_s1 + $0xc0c] ss:$16 sps:$4 sm:$0xff]   ;;  %v5679_v13 = vld [vmem:[%s7797_s0 + $0x28] ss:$72 sps:$4 sm:$0xff]  }
 0x144   :  { %3817 = vmatprep.subr.bf16.mxu0 %v5591_v14  ;;  %4204 = vmatprep.subr.bf16.mxu1 %v5594_v15  ;;  %v5682_v14 = vld [vmem:[%s7796_s1 + $0xc00] ss:$16 sps:$4 sm:$0xff]   ;;  %v5685_v15 = vld [vmem:[%s7796_s1 + $0xc08] ss:$16 sps:$4 sm:$0xff]  }
 0x145   :  { %3847 = vmatprep.mubr.bf16.mxu0 %v5681_v16  ;;  %4234 = vmatprep.mubr.bf16.mxu1 %v5681_v16  ;;  %v5690_v16 = vld [vmem:[%s7796_s1 + $0xc24] ss:$16 sps:$4 sm:$0xff]  }
 0x147   :  { %3818 = vmatpush1.bf16.msra.mxu0 %v5589_v17  ;;  %4205 = vmatpush1.bf16.msra.mxu1 %v5592_v18  ;;  %v5693_v17 = vld [vmem:[%s7796_s1 + $0xc2c] ss:$16 sps:$4 sm:$0xff]  }
 0x148   :  { %3819 = vmatprep.subr.bf16.mxu0 %v5597_v19  ;;  %4206 = vmatprep.subr.bf16.mxu1 %v5600_v20  ;;  %v5780_v18 = vld [vmem:[%s7797_s0 + $0x34] ss:$72 sps:$4 sm:$0xff]   ;;  %v5688_v19 = vld [vmem:[%s7796_s1 + $0xc20] ss:$16 sps:$4 sm:$0xff]   ;;  %v5691_v20 = vld [vmem:[%s7796_s1 + $0xc28] ss:$16 sps:$4 sm:$0xff]  }
 0x14b   :  { %3820 = vmatpush1.bf16.msra.mxu0 %v5595_v21  ;;  %4207 = vmatpush1.bf16.msra.mxu1 %v5598_v22  ;;  %v5696_v21 = vld [vmem:[%s7796_s1 + $0xc44] ss:$16 sps:$4 sm:$0xff]   ;;  %v5699_v22 = vld [vmem:[%s7796_s1 + $0xc4c] ss:$16 sps:$4 sm:$0xff]  }
 0x14c   :  { %3821 = vmatprep.subr.bf16.mxu0 %v5603_v23  ;;  %4208 = vmatprep.subr.bf16.mxu1 %v5606_v24  ;;  %v5694_v23 = vld [vmem:[%s7796_s1 + $0xc40] ss:$16 sps:$4 sm:$0xff]   ;;  %v5697_v24 = vld [vmem:[%s7796_s1 + $0xc48] ss:$16 sps:$4 sm:$0xff]  }
 0x14f   :  { %3822 = vmatpush1.bf16.msra.mxu0 %v5601_v25  ;;  %4209 = vmatpush1.bf16.msra.mxu1 %v5604_v26  ;;  %v5702_v25 = vld [vmem:[%s7796_s1 + $0xc64] ss:$16 sps:$4 sm:$0xff]   ;;  %v5705_v26 = vld [vmem:[%s7796_s1 + $0xc6c] ss:$16 sps:$4 sm:$0xff]  }
 0x150   :  { %3823 = vmatprep.subr.bf16.mxu0 %v5609_v27  ;;  %4210 = vmatprep.subr.bf16.mxu1 %v5612_v28  ;;  %v5700_v27 = vld [vmem:[%s7796_s1 + $0xc60] ss:$16 sps:$4 sm:$0xff]   ;;  %v5703_v28 = vld [vmem:[%s7796_s1 + $0xc68] ss:$16 sps:$4 sm:$0xff]  }
 0x153   :  { %3824 = vmatpush1.bf16.msra.mxu0 %v5607_v29  ;;  %4211 = vmatpush1.bf16.msra.mxu1 %v5610_v30  ;;  %v5708_v29 = vld [vmem:[%s7796_s1 + $0xc84] ss:$16 sps:$4 sm:$0xff]   ;;  %v5711_v30 = vld [vmem:[%s7796_s1 + $0xc8c] ss:$16 sps:$4 sm:$0xff]  }
 0x154   :  { %3825 = vmatprep.subr.bf16.mxu0 %v5615_v31  ;;  %4212 = vmatprep.subr.bf16.mxu1 %v5618_v32  ;;  %v5706_v31 = vld [vmem:[%s7796_s1 + $0xc80] ss:$16 sps:$4 sm:$0xff]   ;;  %v5709_v32 = vld [vmem:[%s7796_s1 + $0xc88] ss:$16 sps:$4 sm:$0xff]  }
 0x157   :  { %3826 = vmatpush1.bf16.msra.mxu0 %v5613_v33  ;;  %4213 = vmatpush1.bf16.msra.mxu1 %v5616_v34  ;;  %v5714_v33 = vld [vmem:[%s7796_s1 + $0xca4] ss:$16 sps:$4 sm:$0xff]   ;;  %v5717_v34 = vld [vmem:[%s7796_s1 + $0xcac] ss:$16 sps:$4 sm:$0xff]  }
 0x158   :  { %3827 = vmatprep.subr.bf16.mxu0 %v5621_v35  ;;  %4214 = vmatprep.subr.bf16.mxu1 %v5624_v36  ;;  %v5712_v35 = vld [vmem:[%s7796_s1 + $0xca0] ss:$16 sps:$4 sm:$0xff]   ;;  %v5715_v36 = vld [vmem:[%s7796_s1 + $0xca8] ss:$16 sps:$4 sm:$0xff]  }
 0x15b   :  { %3828 = vmatpush1.bf16.msra.mxu0 %v5619_v37  ;;  %4215 = vmatpush1.bf16.msra.mxu1 %v5622_v38  ;;  %v5720_v37 = vld [vmem:[%s7796_s1 + $0xcc4] ss:$16 sps:$4 sm:$0xff]   ;;  %v5723_v38 = vld [vmem:[%s7796_s1 + $0xccc] ss:$16 sps:$4 sm:$0xff]  }
 0x15c   :  { %3829 = vmatprep.subr.bf16.mxu0 %v5627_v39  ;;  %4216 = vmatprep.subr.bf16.mxu1 %v5630_v40  ;;  %v5718_v39 = vld [vmem:[%s7796_s1 + $0xcc0] ss:$16 sps:$4 sm:$0xff]   ;;  %v5721_v40 = vld [vmem:[%s7796_s1 + $0xcc8] ss:$16 sps:$4 sm:$0xff]  }
 0x15f   :  { %3830 = vmatpush1.bf16.msra.mxu0 %v5625_v41  ;;  %4217 = vmatpush1.bf16.msra.mxu1 %v5628_v42  ;;  %v5726_v41 = vld [vmem:[%s7796_s1 + $0xce4] ss:$16 sps:$4 sm:$0xff]   ;;  %v5729_v42 = vld [vmem:[%s7796_s1 + $0xcec] ss:$16 sps:$4 sm:$0xff]  }
 0x160   :  { %3831 = vmatprep.subr.bf16.mxu0 %v5633_v43  ;;  %4218 = vmatprep.subr.bf16.mxu1 %v5636_v44  ;;  %v5724_v43 = vld [vmem:[%s7796_s1 + $0xce0] ss:$16 sps:$4 sm:$0xff]   ;;  %v5727_v44 = vld [vmem:[%s7796_s1 + $0xce8] ss:$16 sps:$4 sm:$0xff]  }
 0x163   :  { %3832 = vmatpush1.bf16.msra.mxu0 %v5631_v45  ;;  %4219 = vmatpush1.bf16.msra.mxu1 %v5634_v46  ;;  %v5732_v45 = vld [vmem:[%s7796_s1 + $0xd04] ss:$16 sps:$4 sm:$0xff]   ;;  %v5735_v46 = vld [vmem:[%s7796_s1 + $0xd0c] ss:$16 sps:$4 sm:$0xff]  }
 0x164   :  { %3833 = vmatprep.subr.bf16.mxu0 %v5639_v47  ;;  %4220 = vmatprep.subr.bf16.mxu1 %v5642_v48  ;;  %v5730_v47 = vld [vmem:[%s7796_s1 + $0xd00] ss:$16 sps:$4 sm:$0xff]   ;;  %v5733_v48 = vld [vmem:[%s7796_s1 + $0xd08] ss:$16 sps:$4 sm:$0xff]  }
 0x167   :  { %3834 = vmatpush1.bf16.msra.mxu0 %v5637_v49  ;;  %4221 = vmatpush1.bf16.msra.mxu1 %v5640_v50  ;;  %v5738_v49 = vld [vmem:[%s7796_s1 + $0xd24] ss:$16 sps:$4 sm:$0xff]   ;;  %v5741_v50 = vld [vmem:[%s7796_s1 + $0xd2c] ss:$16 sps:$4 sm:$0xff]  }
 0x168   :  { %3835 = vmatprep.subr.bf16.mxu0 %v5645_v51  ;;  %4222 = vmatprep.subr.bf16.mxu1 %v5648_v52  ;;  %v5736_v51 = vld [vmem:[%s7796_s1 + $0xd20] ss:$16 sps:$4 sm:$0xff]   ;;  %v5739_v52 = vld [vmem:[%s7796_s1 + $0xd28] ss:$16 sps:$4 sm:$0xff]  }
 0x16b   :  { %3836 = vmatpush1.bf16.msra.mxu0 %v5643_v53  ;;  %4223 = vmatpush1.bf16.msra.mxu1 %v5646_v54  ;;  %v5744_v53 = vld [vmem:[%s7796_s1 + $0xd44] ss:$16 sps:$4 sm:$0xff]   ;;  %v5747_v54 = vld [vmem:[%s7796_s1 + $0xd4c] ss:$16 sps:$4 sm:$0xff]  }
 0x16c   :  { %3837 = vmatprep.subr.bf16.mxu0 %v5651_v55  ;;  %4224 = vmatprep.subr.bf16.mxu1 %v5654_v56  ;;  %v5742_v55 = vld [vmem:[%s7796_s1 + $0xd40] ss:$16 sps:$4 sm:$0xff]   ;;  %v5745_v56 = vld [vmem:[%s7796_s1 + $0xd48] ss:$16 sps:$4 sm:$0xff]  }
 0x16f   :  { %3838 = vmatpush1.bf16.msra.mxu0 %v5649_v57  ;;  %4225 = vmatpush1.bf16.msra.mxu1 %v5652_v58  ;;  %v5750_v57 = vld [vmem:[%s7796_s1 + $0xd64] ss:$16 sps:$4 sm:$0xff]   ;;  %v5753_v58 = vld [vmem:[%s7796_s1 + $0xd6c] ss:$16 sps:$4 sm:$0xff]  }
 0x170   :  { %3839 = vmatprep.subr.bf16.mxu0 %v5657_v59  ;;  %4226 = vmatprep.subr.bf16.mxu1 %v5660_v60  ;;  %v5748_v59 = vld [vmem:[%s7796_s1 + $0xd60] ss:$16 sps:$4 sm:$0xff]   ;;  %v5751_v60 = vld [vmem:[%s7796_s1 + $0xd68] ss:$16 sps:$4 sm:$0xff]  }
 0x173   :  { %3840 = vmatpush1.bf16.msra.mxu0 %v5655_v61  ;;  %4227 = vmatpush1.bf16.msra.mxu1 %v5658_v62  ;;  %v5756_v61 = vld [vmem:[%s7796_s1 + $0xd84] ss:$16 sps:$4 sm:$0xff]   ;;  %v5759_v62 = vld [vmem:[%s7796_s1 + $0xd8c] ss:$16 sps:$4 sm:$0xff]  }
 0x174   :  { %3841 = vmatprep.subr.bf16.mxu0 %v5663_v63  ;;  %4228 = vmatprep.subr.bf16.mxu1 %v5666_v0  ;;  %v5754_v63 = vld [vmem:[%s7796_s1 + $0xd80] ss:$16 sps:$4 sm:$0xff]   ;;  %v5757_v0 = vld [vmem:[%s7796_s1 + $0xd88] ss:$16 sps:$4 sm:$0xff]  }
 0x177   :  { %3842 = vmatpush1.bf16.msra.mxu0 %v5661_v1  ;;  %4229 = vmatpush1.bf16.msra.mxu1 %v5664_v2  ;;  %v5762_v1 = vld [vmem:[%s7796_s1 + $0xda4] ss:$16 sps:$4 sm:$0xff]   ;;  %v5765_v2 = vld [vmem:[%s7796_s1 + $0xdac] ss:$16 sps:$4 sm:$0xff]  }
 0x178   :  { %3843 = vmatprep.subr.bf16.mxu0 %v5669_v3  ;;  %4230 = vmatprep.subr.bf16.mxu1 %v5672_v4  ;;  %v5760_v3 = vld [vmem:[%s7796_s1 + $0xda0] ss:$16 sps:$4 sm:$0xff]   ;;  %v5763_v4 = vld [vmem:[%s7796_s1 + $0xda8] ss:$16 sps:$4 sm:$0xff]  }
 0x17b   :  { %3844 = vmatpush1.bf16.msra.mxu0 %v5667_v5  ;;  %4231 = vmatpush1.bf16.msra.mxu1 %v5670_v6  ;;  %v5768_v5 = vld [vmem:[%s7796_s1 + $0xdc4] ss:$16 sps:$4 sm:$0xff]   ;;  %v5771_v6 = vld [vmem:[%s7796_s1 + $0xdcc] ss:$16 sps:$4 sm:$0xff]  }
 0x17c   :  { %3845 = vmatprep.subr.bf16.mxu0 %v5675_v7  ;;  %4232 = vmatprep.subr.bf16.mxu1 %v5678_v8  ;;  %v5766_v7 = vld [vmem:[%s7796_s1 + $0xdc0] ss:$16 sps:$4 sm:$0xff]   ;;  %v5769_v8 = vld [vmem:[%s7796_s1 + $0xdc8] ss:$16 sps:$4 sm:$0xff]  }
 0x17f   :  { %3846 = vmatpush1.bf16.msra.mxu0 %v5673_v9  ;;  %4233 = vmatpush1.bf16.msra.mxu1 %v5676_v10  ;;  %v5774_v9 = vld [vmem:[%s7796_s1 + $0xde4] ss:$16 sps:$4 sm:$0xff]   ;;  %v5777_v10 = vld [vmem:[%s7796_s1 + $0xdec] ss:$16 sps:$4 sm:$0xff]  }
 0x180   :  { %3858 = vmatprep.subr.bf16.mxu0 %v5684_v11  ;;  %4245 = vmatprep.subr.bf16.mxu1 %v5687_v12  ;;  %v5772_v11 = vld [vmem:[%s7796_s1 + $0xde0] ss:$16 sps:$4 sm:$0xff]   ;;  %v5775_v12 = vld [vmem:[%s7796_s1 + $0xde8] ss:$16 sps:$4 sm:$0xff]  }
 0x182   :  { %3848 = vmatmul.mubr.bf16.vlgmr.msra.gmra.mrb[0].mxu0 %v5679_v13  ;;  %4235 = vmatmul.mubr.bf16.vlgmr.msra.gmra.mrb[0].mxu1 %v5679_v13  ;;  %v5783_v13 = vld [vmem:[%s7796_s1 + $0xe04] ss:$16 sps:$4 sm:$0xff]  }
 0x183   :  { %3859 = vmatpush1.bf16.msra.mxu0 %v5682_v14  ;;  %4246 = vmatpush1.bf16.msra.mxu1 %v5685_v15  ;;  %v5786_v14 = vld [vmem:[%s7796_s1 + $0xe0c] ss:$16 sps:$4 sm:$0xff]   ;;  %v5778_v15 = vld [vmem:[%s7797_s0 + $0x30] ss:$72 sps:$4 sm:$0xff]  }
 0x184   :  { %3860 = vmatprep.subr.bf16.mxu0 %v5690_v16  ;;  %4247 = vmatprep.subr.bf16.mxu1 %v5693_v17  ;;  %v5781_v16 = vld [vmem:[%s7796_s1 + $0xe00] ss:$16 sps:$4 sm:$0xff]   ;;  %v5784_v17 = vld [vmem:[%s7796_s1 + $0xe08] ss:$16 sps:$4 sm:$0xff]  }
 0x185   :  { %3890 = vmatprep.mubr.bf16.mxu0 %v5780_v18  ;;  %4277 = vmatprep.mubr.bf16.mxu1 %v5780_v18  ;;  %v5789_v18 = vld [vmem:[%s7796_s1 + $0xe24] ss:$16 sps:$4 sm:$0xff]  }
 0x187   :  { %3861 = vmatpush1.bf16.msra.mxu0 %v5688_v19  ;;  %4248 = vmatpush1.bf16.msra.mxu1 %v5691_v20  ;;  %v5792_v19 = vld [vmem:[%s7796_s1 + $0xe2c] ss:$16 sps:$4 sm:$0xff]  }
 0x188   :  { %3862 = vmatprep.subr.bf16.mxu0 %v5696_v21  ;;  %4249 = vmatprep.subr.bf16.mxu1 %v5699_v22  ;;  %v5879_v20 = vld [vmem:[%s7797_s0 + $0x3c] ss:$72 sps:$4 sm:$0xff]   ;;  %v5787_v21 = vld [vmem:[%s7796_s1 + $0xe20] ss:$16 sps:$4 sm:$0xff]   ;;  %v5790_v22 = vld [vmem:[%s7796_s1 + $0xe28] ss:$16 sps:$4 sm:$0xff]  }
 0x18b   :  { %3863 = vmatpush1.bf16.msra.mxu0 %v5694_v23  ;;  %4250 = vmatpush1.bf16.msra.mxu1 %v5697_v24  ;;  %v5795_v23 = vld [vmem:[%s7796_s1 + $0xe44] ss:$16 sps:$4 sm:$0xff]   ;;  %v5798_v24 = vld [vmem:[%s7796_s1 + $0xe4c] ss:$16 sps:$4 sm:$0xff]  }
 0x18c   :  { %3864 = vmatprep.subr.bf16.mxu0 %v5702_v25  ;;  %4251 = vmatprep.subr.bf16.mxu1 %v5705_v26  ;;  %v5793_v25 = vld [vmem:[%s7796_s1 + $0xe40] ss:$16 sps:$4 sm:$0xff]   ;;  %v5796_v26 = vld [vmem:[%s7796_s1 + $0xe48] ss:$16 sps:$4 sm:$0xff]  }
 0x18f   :  { %3865 = vmatpush1.bf16.msra.mxu0 %v5700_v27  ;;  %4252 = vmatpush1.bf16.msra.mxu1 %v5703_v28  ;;  %v5801_v27 = vld [vmem:[%s7796_s1 + $0xe64] ss:$16 sps:$4 sm:$0xff]   ;;  %v5804_v28 = vld [vmem:[%s7796_s1 + $0xe6c] ss:$16 sps:$4 sm:$0xff]  }
 0x190   :  { %3866 = vmatprep.subr.bf16.mxu0 %v5708_v29  ;;  %4253 = vmatprep.subr.bf16.mxu1 %v5711_v30  ;;  %v5799_v29 = vld [vmem:[%s7796_s1 + $0xe60] ss:$16 sps:$4 sm:$0xff]   ;;  %v5802_v30 = vld [vmem:[%s7796_s1 + $0xe68] ss:$16 sps:$4 sm:$0xff]  }
 0x193   :  { %3867 = vmatpush1.bf16.msra.mxu0 %v5706_v31  ;;  %4254 = vmatpush1.bf16.msra.mxu1 %v5709_v32  ;;  %v5807_v31 = vld [vmem:[%s7796_s1 + $0xe84] ss:$16 sps:$4 sm:$0xff]   ;;  %v5810_v32 = vld [vmem:[%s7796_s1 + $0xe8c] ss:$16 sps:$4 sm:$0xff]  }
 0x194   :  { %3868 = vmatprep.subr.bf16.mxu0 %v5714_v33  ;;  %4255 = vmatprep.subr.bf16.mxu1 %v5717_v34  ;;  %v5805_v33 = vld [vmem:[%s7796_s1 + $0xe80] ss:$16 sps:$4 sm:$0xff]   ;;  %v5808_v34 = vld [vmem:[%s7796_s1 + $0xe88] ss:$16 sps:$4 sm:$0xff]  }
 0x197   :  { %3869 = vmatpush1.bf16.msra.mxu0 %v5712_v35  ;;  %4256 = vmatpush1.bf16.msra.mxu1 %v5715_v36  ;;  %v5813_v35 = vld [vmem:[%s7796_s1 + $0xea4] ss:$16 sps:$4 sm:$0xff]   ;;  %v5816_v36 = vld [vmem:[%s7796_s1 + $0xeac] ss:$16 sps:$4 sm:$0xff]  }
 0x198   :  { %3870 = vmatprep.subr.bf16.mxu0 %v5720_v37  ;;  %4257 = vmatprep.subr.bf16.mxu1 %v5723_v38  ;;  %v5811_v37 = vld [vmem:[%s7796_s1 + $0xea0] ss:$16 sps:$4 sm:$0xff]   ;;  %v5814_v38 = vld [vmem:[%s7796_s1 + $0xea8] ss:$16 sps:$4 sm:$0xff]  }
 0x19b   :  { %3871 = vmatpush1.bf16.msra.mxu0 %v5718_v39  ;;  %4258 = vmatpush1.bf16.msra.mxu1 %v5721_v40  ;;  %v5819_v39 = vld [vmem:[%s7796_s1 + $0xec4] ss:$16 sps:$4 sm:$0xff]   ;;  %v5822_v40 = vld [vmem:[%s7796_s1 + $0xecc] ss:$16 sps:$4 sm:$0xff]  }
 0x19c   :  { %3872 = vmatprep.subr.bf16.mxu0 %v5726_v41  ;;  %4259 = vmatprep.subr.bf16.mxu1 %v5729_v42  ;;  %v5817_v41 = vld [vmem:[%s7796_s1 + $0xec0] ss:$16 sps:$4 sm:$0xff]   ;;  %v5820_v42 = vld [vmem:[%s7796_s1 + $0xec8] ss:$16 sps:$4 sm:$0xff]  }
 0x19f   :  { %3873 = vmatpush1.bf16.msra.mxu0 %v5724_v43  ;;  %4260 = vmatpush1.bf16.msra.mxu1 %v5727_v44  ;;  %v5825_v43 = vld [vmem:[%s7796_s1 + $0xee4] ss:$16 sps:$4 sm:$0xff]   ;;  %v5828_v44 = vld [vmem:[%s7796_s1 + $0xeec] ss:$16 sps:$4 sm:$0xff]  }
 0x1a0   :  { %3874 = vmatprep.subr.bf16.mxu0 %v5732_v45  ;;  %4261 = vmatprep.subr.bf16.mxu1 %v5735_v46  ;;  %v5823_v45 = vld [vmem:[%s7796_s1 + $0xee0] ss:$16 sps:$4 sm:$0xff]   ;;  %v5826_v46 = vld [vmem:[%s7796_s1 + $0xee8] ss:$16 sps:$4 sm:$0xff]  }
 0x1a3   :  { %3875 = vmatpush1.bf16.msra.mxu0 %v5730_v47  ;;  %4262 = vmatpush1.bf16.msra.mxu1 %v5733_v48  ;;  %v5831_v47 = vld [vmem:[%s7796_s1 + $0xf04] ss:$16 sps:$4 sm:$0xff]   ;;  %v5834_v48 = vld [vmem:[%s7796_s1 + $0xf0c] ss:$16 sps:$4 sm:$0xff]  }
 0x1a4   :  { %3876 = vmatprep.subr.bf16.mxu0 %v5738_v49  ;;  %4263 = vmatprep.subr.bf16.mxu1 %v5741_v50  ;;  %v5829_v49 = vld [vmem:[%s7796_s1 + $0xf00] ss:$16 sps:$4 sm:$0xff]   ;;  %v5832_v50 = vld [vmem:[%s7796_s1 + $0xf08] ss:$16 sps:$4 sm:$0xff]  }
 0x1a7   :  { %3877 = vmatpush1.bf16.msra.mxu0 %v5736_v51  ;;  %4264 = vmatpush1.bf16.msra.mxu1 %v5739_v52  ;;  %v5837_v51 = vld [vmem:[%s7796_s1 + $0xf24] ss:$16 sps:$4 sm:$0xff]   ;;  %v5840_v52 = vld [vmem:[%s7796_s1 + $0xf2c] ss:$16 sps:$4 sm:$0xff]  }
 0x1a8   :  { %3878 = vmatprep.subr.bf16.mxu0 %v5744_v53  ;;  %4265 = vmatprep.subr.bf16.mxu1 %v5747_v54  ;;  %v5835_v53 = vld [vmem:[%s7796_s1 + $0xf20] ss:$16 sps:$4 sm:$0xff]   ;;  %v5838_v54 = vld [vmem:[%s7796_s1 + $0xf28] ss:$16 sps:$4 sm:$0xff]  }
 0x1ab   :  { %3879 = vmatpush1.bf16.msra.mxu0 %v5742_v55  ;;  %4266 = vmatpush1.bf16.msra.mxu1 %v5745_v56  ;;  %v5843_v55 = vld [vmem:[%s7796_s1 + $0xf44] ss:$16 sps:$4 sm:$0xff]   ;;  %v5846_v56 = vld [vmem:[%s7796_s1 + $0xf4c] ss:$16 sps:$4 sm:$0xff]  }
 0x1ac   :  { %3880 = vmatprep.subr.bf16.mxu0 %v5750_v57  ;;  %4267 = vmatprep.subr.bf16.mxu1 %v5753_v58  ;;  %v5841_v57 = vld [vmem:[%s7796_s1 + $0xf40] ss:$16 sps:$4 sm:$0xff]   ;;  %v5844_v58 = vld [vmem:[%s7796_s1 + $0xf48] ss:$16 sps:$4 sm:$0xff]  }
 0x1af   :  { %3881 = vmatpush1.bf16.msra.mxu0 %v5748_v59  ;;  %4268 = vmatpush1.bf16.msra.mxu1 %v5751_v60  ;;  %v5849_v59 = vld [vmem:[%s7796_s1 + $0xf64] ss:$16 sps:$4 sm:$0xff]   ;;  %v5852_v60 = vld [vmem:[%s7796_s1 + $0xf6c] ss:$16 sps:$4 sm:$0xff]  }
 0x1b0   :  { %3882 = vmatprep.subr.bf16.mxu0 %v5756_v61  ;;  %4269 = vmatprep.subr.bf16.mxu1 %v5759_v62  ;;  %v5847_v61 = vld [vmem:[%s7796_s1 + $0xf60] ss:$16 sps:$4 sm:$0xff]   ;;  %v5850_v62 = vld [vmem:[%s7796_s1 + $0xf68] ss:$16 sps:$4 sm:$0xff]  }
 0x1b3   :  { %3883 = vmatpush1.bf16.msra.mxu0 %v5754_v63  ;;  %4270 = vmatpush1.bf16.msra.mxu1 %v5757_v0  ;;  %v5855_v63 = vld [vmem:[%s7796_s1 + $0xf84] ss:$16 sps:$4 sm:$0xff]   ;;  %v5858_v0 = vld [vmem:[%s7796_s1 + $0xf8c] ss:$16 sps:$4 sm:$0xff]  }
 0x1b4   :  { %3884 = vmatprep.subr.bf16.mxu0 %v5762_v1  ;;  %4271 = vmatprep.subr.bf16.mxu1 %v5765_v2  ;;  %v5853_v1 = vld [vmem:[%s7796_s1 + $0xf80] ss:$16 sps:$4 sm:$0xff]   ;;  %v5856_v2 = vld [vmem:[%s7796_s1 + $0xf88] ss:$16 sps:$4 sm:$0xff]  }
 0x1b7   :  { %3885 = vmatpush1.bf16.msra.mxu0 %v5760_v3  ;;  %4272 = vmatpush1.bf16.msra.mxu1 %v5763_v4  ;;  %v5861_v3 = vld [vmem:[%s7796_s1 + $0xfa4] ss:$16 sps:$4 sm:$0xff]   ;;  %v5864_v4 = vld [vmem:[%s7796_s1 + $0xfac] ss:$16 sps:$4 sm:$0xff]  }
 0x1b8   :  { %3886 = vmatprep.subr.bf16.mxu0 %v5768_v5  ;;  %4273 = vmatprep.subr.bf16.mxu1 %v5771_v6  ;;  %v5859_v5 = vld [vmem:[%s7796_s1 + $0xfa0] ss:$16 sps:$4 sm:$0xff]   ;;  %v5862_v6 = vld [vmem:[%s7796_s1 + $0xfa8] ss:$16 sps:$4 sm:$0xff]  }
 0x1bb   :  { %3887 = vmatpush1.bf16.msra.mxu0 %v5766_v7  ;;  %4274 = vmatpush1.bf16.msra.mxu1 %v5769_v8  ;;  %v5867_v7 = vld [vmem:[%s7796_s1 + $0xfc4] ss:$16 sps:$4 sm:$0xff]   ;;  %v5870_v8 = vld [vmem:[%s7796_s1 + $0xfcc] ss:$16 sps:$4 sm:$0xff]  }
 0x1bc   :  { %3888 = vmatprep.subr.bf16.mxu0 %v5774_v9  ;;  %4275 = vmatprep.subr.bf16.mxu1 %v5777_v10  ;;  %v5865_v9 = vld [vmem:[%s7796_s1 + $0xfc0] ss:$16 sps:$4 sm:$0xff]   ;;  %v5868_v10 = vld [vmem:[%s7796_s1 + $0xfc8] ss:$16 sps:$4 sm:$0xff]  }
 0x1bf   :  { %3889 = vmatpush1.bf16.msra.mxu0 %v5772_v11  ;;  %4276 = vmatpush1.bf16.msra.mxu1 %v5775_v12  ;;  %v5873_v11 = vld [vmem:[%s7796_s1 + $0xfe4] ss:$16 sps:$4 sm:$0xff]   ;;  %v5876_v12 = vld [vmem:[%s7796_s1 + $0xfec] ss:$16 sps:$4 sm:$0xff]  }
 0x1c0   :  { %3901 = vmatprep.subr.bf16.mxu0 %v5783_v13  ;;  %4288 = vmatprep.subr.bf16.mxu1 %v5786_v14  ;;  %v5871_v13 = vld [vmem:[%s7796_s1 + $0xfe0] ss:$16 sps:$4 sm:$0xff]   ;;  %v5874_v14 = vld [vmem:[%s7796_s1 + $0xfe8] ss:$16 sps:$4 sm:$0xff]  }
 0x1c2   :  { %3891 = vmatmul.mubr.bf16.vlgmr.msra.gmra.mrb[0].mxu0 %v5778_v15  ;;  %4278 = vmatmul.mubr.bf16.vlgmr.msra.gmra.mrb[0].mxu1 %v5778_v15  ;;  %v5882_v15 = vld [vmem:[%s7796_s1 + $0x1004] ss:$16 sps:$4 sm:$0xff]  }
 0x1c3   :  { %3902 = vmatpush1.bf16.msra.mxu0 %v5781_v16  ;;  %4289 = vmatpush1.bf16.msra.mxu1 %v5784_v17  ;;  %v5885_v16 = vld [vmem:[%s7796_s1 + $0x100c] ss:$16 sps:$4 sm:$0xff]   ;;  %v5877_v17 = vld [vmem:[%s7797_s0 + $0x38] ss:$72 sps:$4 sm:$0xff]  }
 0x1c4   :  { %3903 = vmatprep.subr.bf16.mxu0 %v5789_v18  ;;  %4290 = vmatprep.subr.bf16.mxu1 %v5792_v19  ;;  %v5880_v18 = vld [vmem:[%s7796_s1 + $0x1000] ss:$16 sps:$4 sm:$0xff]   ;;  %v5883_v19 = vld [vmem:[%s7796_s1 + $0x1008] ss:$16 sps:$4 sm:$0xff]  }
 0x1c5   :  { %3933 = vmatprep.mubr.bf16.mxu0 %v5879_v20  ;;  %4320 = vmatprep.mubr.bf16.mxu1 %v5879_v20  ;;  %v5888_v20 = vld [vmem:[%s7796_s1 + $0x1024] ss:$16 sps:$4 sm:$0xff]  }
 0x1c7   :  { %3904 = vmatpush1.bf16.msra.mxu0 %v5787_v21  ;;  %4291 = vmatpush1.bf16.msra.mxu1 %v5790_v22  ;;  %v5891_v21 = vld [vmem:[%s7796_s1 + $0x102c] ss:$16 sps:$4 sm:$0xff]  }
 0x1c8   :  { %3905 = vmatprep.subr.bf16.mxu0 %v5795_v23  ;;  %4292 = vmatprep.subr.bf16.mxu1 %v5798_v24  ;;  %v5978_v22 = vld [vmem:[%s7797_s0 + $0x44] ss:$72 sps:$4 sm:$0xff]   ;;  %v5886_v23 = vld [vmem:[%s7796_s1 + $0x1020] ss:$16 sps:$4 sm:$0xff]   ;;  %v5889_v24 = vld [vmem:[%s7796_s1 + $0x1028] ss:$16 sps:$4 sm:$0xff]  }
 0x1cb   :  { %3906 = vmatpush1.bf16.msra.mxu0 %v5793_v25  ;;  %4293 = vmatpush1.bf16.msra.mxu1 %v5796_v26  ;;  %v5894_v25 = vld [vmem:[%s7796_s1 + $0x1044] ss:$16 sps:$4 sm:$0xff]   ;;  %v5897_v26 = vld [vmem:[%s7796_s1 + $0x104c] ss:$16 sps:$4 sm:$0xff]  }
 0x1cc   :  { %3907 = vmatprep.subr.bf16.mxu0 %v5801_v27  ;;  %4294 = vmatprep.subr.bf16.mxu1 %v5804_v28  ;;  %v5892_v27 = vld [vmem:[%s7796_s1 + $0x1040] ss:$16 sps:$4 sm:$0xff]   ;;  %v5895_v28 = vld [vmem:[%s7796_s1 + $0x1048] ss:$16 sps:$4 sm:$0xff]  }
 0x1cf   :  { %3908 = vmatpush1.bf16.msra.mxu0 %v5799_v29  ;;  %4295 = vmatpush1.bf16.msra.mxu1 %v5802_v30  ;;  %v5900_v29 = vld [vmem:[%s7796_s1 + $0x1064] ss:$16 sps:$4 sm:$0xff]   ;;  %v5903_v30 = vld [vmem:[%s7796_s1 + $0x106c] ss:$16 sps:$4 sm:$0xff]  }
 0x1d0   :  { %3909 = vmatprep.subr.bf16.mxu0 %v5807_v31  ;;  %4296 = vmatprep.subr.bf16.mxu1 %v5810_v32  ;;  %v5898_v31 = vld [vmem:[%s7796_s1 + $0x1060] ss:$16 sps:$4 sm:$0xff]   ;;  %v5901_v32 = vld [vmem:[%s7796_s1 + $0x1068] ss:$16 sps:$4 sm:$0xff]  }
 0x1d3   :  { %3910 = vmatpush1.bf16.msra.mxu0 %v5805_v33  ;;  %4297 = vmatpush1.bf16.msra.mxu1 %v5808_v34  ;;  %v5906_v33 = vld [vmem:[%s7796_s1 + $0x1084] ss:$16 sps:$4 sm:$0xff]   ;;  %v5909_v34 = vld [vmem:[%s7796_s1 + $0x108c] ss:$16 sps:$4 sm:$0xff]  }
 0x1d4   :  { %3911 = vmatprep.subr.bf16.mxu0 %v5813_v35  ;;  %4298 = vmatprep.subr.bf16.mxu1 %v5816_v36  ;;  %v5904_v35 = vld [vmem:[%s7796_s1 + $0x1080] ss:$16 sps:$4 sm:$0xff]   ;;  %v5907_v36 = vld [vmem:[%s7796_s1 + $0x1088] ss:$16 sps:$4 sm:$0xff]  }
 0x1d7   :  { %3912 = vmatpush1.bf16.msra.mxu0 %v5811_v37  ;;  %4299 = vmatpush1.bf16.msra.mxu1 %v5814_v38  ;;  %v5912_v37 = vld [vmem:[%s7796_s1 + $0x10a4] ss:$16 sps:$4 sm:$0xff]   ;;  %v5915_v38 = vld [vmem:[%s7796_s1 + $0x10ac] ss:$16 sps:$4 sm:$0xff]  }
 0x1d8   :  { %3913 = vmatprep.subr.bf16.mxu0 %v5819_v39  ;;  %4300 = vmatprep.subr.bf16.mxu1 %v5822_v40  ;;  %v5910_v39 = vld [vmem:[%s7796_s1 + $0x10a0] ss:$16 sps:$4 sm:$0xff]   ;;  %v5913_v40 = vld [vmem:[%s7796_s1 + $0x10a8] ss:$16 sps:$4 sm:$0xff]  }
 0x1db   :  { %3914 = vmatpush1.bf16.msra.mxu0 %v5817_v41  ;;  %4301 = vmatpush1.bf16.msra.mxu1 %v5820_v42  ;;  %v5918_v41 = vld [vmem:[%s7796_s1 + $0x10c4] ss:$16 sps:$4 sm:$0xff]   ;;  %v5921_v42 = vld [vmem:[%s7796_s1 + $0x10cc] ss:$16 sps:$4 sm:$0xff]  }
 0x1dc   :  { %3915 = vmatprep.subr.bf16.mxu0 %v5825_v43  ;;  %4302 = vmatprep.subr.bf16.mxu1 %v5828_v44  ;;  %v5916_v43 = vld [vmem:[%s7796_s1 + $0x10c0] ss:$16 sps:$4 sm:$0xff]   ;;  %v5919_v44 = vld [vmem:[%s7796_s1 + $0x10c8] ss:$16 sps:$4 sm:$0xff]  }
 0x1df   :  { %3916 = vmatpush1.bf16.msra.mxu0 %v5823_v45  ;;  %4303 = vmatpush1.bf16.msra.mxu1 %v5826_v46  ;;  %v5924_v45 = vld [vmem:[%s7796_s1 + $0x10e4] ss:$16 sps:$4 sm:$0xff]   ;;  %v5927_v46 = vld [vmem:[%s7796_s1 + $0x10ec] ss:$16 sps:$4 sm:$0xff]  }
 0x1e0   :  { %3917 = vmatprep.subr.bf16.mxu0 %v5831_v47  ;;  %4304 = vmatprep.subr.bf16.mxu1 %v5834_v48  ;;  %v5922_v47 = vld [vmem:[%s7796_s1 + $0x10e0] ss:$16 sps:$4 sm:$0xff]   ;;  %v5925_v48 = vld [vmem:[%s7796_s1 + $0x10e8] ss:$16 sps:$4 sm:$0xff]  }
 0x1e3   :  { %3918 = vmatpush1.bf16.msra.mxu0 %v5829_v49  ;;  %4305 = vmatpush1.bf16.msra.mxu1 %v5832_v50  ;;  %v5930_v49 = vld [vmem:[%s7796_s1 + $0x1104] ss:$16 sps:$4 sm:$0xff]   ;;  %v5933_v50 = vld [vmem:[%s7796_s1 + $0x110c] ss:$16 sps:$4 sm:$0xff]  }
 0x1e4   :  { %3919 = vmatprep.subr.bf16.mxu0 %v5837_v51  ;;  %4306 = vmatprep.subr.bf16.mxu1 %v5840_v52  ;;  %v5928_v51 = vld [vmem:[%s7796_s1 + $0x1100] ss:$16 sps:$4 sm:$0xff]   ;;  %v5931_v52 = vld [vmem:[%s7796_s1 + $0x1108] ss:$16 sps:$4 sm:$0xff]  }
 0x1e7   :  { %3920 = vmatpush1.bf16.msra.mxu0 %v5835_v53  ;;  %4307 = vmatpush1.bf16.msra.mxu1 %v5838_v54  ;;  %v5936_v53 = vld [vmem:[%s7796_s1 + $0x1124] ss:$16 sps:$4 sm:$0xff]   ;;  %v5939_v54 = vld [vmem:[%s7796_s1 + $0x112c] ss:$16 sps:$4 sm:$0xff]  }
 0x1e8   :  { %3921 = vmatprep.subr.bf16.mxu0 %v5843_v55  ;;  %4308 = vmatprep.subr.bf16.mxu1 %v5846_v56  ;;  %v5934_v55 = vld [vmem:[%s7796_s1 + $0x1120] ss:$16 sps:$4 sm:$0xff]   ;;  %v5937_v56 = vld [vmem:[%s7796_s1 + $0x1128] ss:$16 sps:$4 sm:$0xff]  }
 0x1eb   :  { %3922 = vmatpush1.bf16.msra.mxu0 %v5841_v57  ;;  %4309 = vmatpush1.bf16.msra.mxu1 %v5844_v58  ;;  %v5942_v57 = vld [vmem:[%s7796_s1 + $0x1144] ss:$16 sps:$4 sm:$0xff]   ;;  %v5945_v58 = vld [vmem:[%s7796_s1 + $0x114c] ss:$16 sps:$4 sm:$0xff]  }
 0x1ec   :  { %3923 = vmatprep.subr.bf16.mxu0 %v5849_v59  ;;  %4310 = vmatprep.subr.bf16.mxu1 %v5852_v60  ;;  %v5940_v59 = vld [vmem:[%s7796_s1 + $0x1140] ss:$16 sps:$4 sm:$0xff]   ;;  %v5943_v60 = vld [vmem:[%s7796_s1 + $0x1148] ss:$16 sps:$4 sm:$0xff]  }
 0x1ef   :  { %3924 = vmatpush1.bf16.msra.mxu0 %v5847_v61  ;;  %4311 = vmatpush1.bf16.msra.mxu1 %v5850_v62  ;;  %v5948_v61 = vld [vmem:[%s7796_s1 + $0x1164] ss:$16 sps:$4 sm:$0xff]   ;;  %v5951_v62 = vld [vmem:[%s7796_s1 + $0x116c] ss:$16 sps:$4 sm:$0xff]  }
 0x1f0   :  { %3925 = vmatprep.subr.bf16.mxu0 %v5855_v63  ;;  %4312 = vmatprep.subr.bf16.mxu1 %v5858_v0  ;;  %v5946_v63 = vld [vmem:[%s7796_s1 + $0x1160] ss:$16 sps:$4 sm:$0xff]   ;;  %v5949_v0 = vld [vmem:[%s7796_s1 + $0x1168] ss:$16 sps:$4 sm:$0xff]  }
 0x1f3   :  { %3926 = vmatpush1.bf16.msra.mxu0 %v5853_v1  ;;  %4313 = vmatpush1.bf16.msra.mxu1 %v5856_v2  ;;  %v5954_v1 = vld [vmem:[%s7796_s1 + $0x1184] ss:$16 sps:$4 sm:$0xff]   ;;  %v5957_v2 = vld [vmem:[%s7796_s1 + $0x118c] ss:$16 sps:$4 sm:$0xff]  }
 0x1f4   :  { %3927 = vmatprep.subr.bf16.mxu0 %v5861_v3  ;;  %4314 = vmatprep.subr.bf16.mxu1 %v5864_v4  ;;  %v5952_v3 = vld [vmem:[%s7796_s1 + $0x1180] ss:$16 sps:$4 sm:$0xff]   ;;  %v5955_v4 = vld [vmem:[%s7796_s1 + $0x1188] ss:$16 sps:$4 sm:$0xff]  }
 0x1f7   :  { %3928 = vmatpush1.bf16.msra.mxu0 %v5859_v5  ;;  %4315 = vmatpush1.bf16.msra.mxu1 %v5862_v6  ;;  %v5960_v5 = vld [vmem:[%s7796_s1 + $0x11a4] ss:$16 sps:$4 sm:$0xff]   ;;  %v5963_v6 = vld [vmem:[%s7796_s1 + $0x11ac] ss:$16 sps:$4 sm:$0xff]  }
 0x1f8   :  { %3929 = vmatprep.subr.bf16.mxu0 %v5867_v7  ;;  %4316 = vmatprep.subr.bf16.mxu1 %v5870_v8  ;;  %v5958_v7 = vld [vmem:[%s7796_s1 + $0x11a0] ss:$16 sps:$4 sm:$0xff]   ;;  %v5961_v8 = vld [vmem:[%s7796_s1 + $0x11a8] ss:$16 sps:$4 sm:$0xff]  }
 0x1fb   :  { %3930 = vmatpush1.bf16.msra.mxu0 %v5865_v9  ;;  %4317 = vmatpush1.bf16.msra.mxu1 %v5868_v10  ;;  %v5966_v9 = vld [vmem:[%s7796_s1 + $0x11c4] ss:$16 sps:$4 sm:$0xff]   ;;  %v5969_v10 = vld [vmem:[%s7796_s1 + $0x11cc] ss:$16 sps:$4 sm:$0xff]  }
 0x1fc   :  { %3931 = vmatprep.subr.bf16.mxu0 %v5873_v11  ;;  %4318 = vmatprep.subr.bf16.mxu1 %v5876_v12  ;;  %v5964_v11 = vld [vmem:[%s7796_s1 + $0x11c0] ss:$16 sps:$4 sm:$0xff]   ;;  %v5967_v12 = vld [vmem:[%s7796_s1 + $0x11c8] ss:$16 sps:$4 sm:$0xff]  }
 0x1ff   :  { %3932 = vmatpush1.bf16.msra.mxu0 %v5871_v13  ;;  %4319 = vmatpush1.bf16.msra.mxu1 %v5874_v14  ;;  %v5972_v13 = vld [vmem:[%s7796_s1 + $0x11e4] ss:$16 sps:$4 sm:$0xff]   ;;  %v5975_v14 = vld [vmem:[%s7796_s1 + $0x11ec] ss:$16 sps:$4 sm:$0xff]  }
 0x200   :  { %3944 = vmatprep.subr.bf16.mxu0 %v5882_v15  ;;  %4331 = vmatprep.subr.bf16.mxu1 %v5885_v16  ;;  %v5970_v15 = vld [vmem:[%s7796_s1 + $0x11e0] ss:$16 sps:$4 sm:$0xff]   ;;  %v5973_v16 = vld [vmem:[%s7796_s1 + $0x11e8] ss:$16 sps:$4 sm:$0xff]  }
 0x202   :  { %3934 = vmatmul.mubr.bf16.vlgmr.msra.gmra.mrb[0].mxu0 %v5877_v17  ;;  %4321 = vmatmul.mubr.bf16.vlgmr.msra.gmra.mrb[0].mxu1 %v5877_v17  ;;  %v5976_v17 = vld [vmem:[%s7797_s0 + $0x40] ss:$72 sps:$4 sm:$0xff]  }
 0x203   :  { %3945 = vmatpush1.bf16.msra.mxu0 %v5880_v18  ;;  %4332 = vmatpush1.bf16.msra.mxu1 %v5883_v19  ;;  %v610_v18 = vlaneseq }
 0x204   :  { %3946 = vmatprep.subr.bf16.mxu0 %v5888_v20  ;;  %4333 = vmatprep.subr.bf16.mxu1 %v5891_v21 }
 0x205   :  { %3976 = vmatprep.mubr.bf16.mxu0 %v5978_v22  ;;  %4363 = vmatprep.mubr.bf16.mxu1 %v5978_v22  ;;  %v611_v19 = vshrl.u32 %v610_v18, 7  ;;  %v608_v22 = vld [vmem:[%s7798_s2] sm:$0xf] }
 0x207   :  { %3947 = vmatpush1.bf16.msra.mxu0 %v5886_v23  ;;  %4334 = vmatpush1.bf16.msra.mxu1 %v5889_v24  ;;  %v612_v20 = vsub.s32 0, %v611_v19  ;;  %v620_v21 = vsub.s32 2, %v611_v19  ;;  %v616_v23 = vsub.s32 1, %v611_v19  ;;  %v624_v24 = vsub.s32 3, %v611_v19 }
 0x208   :  { %3948 = vmatprep.subr.bf16.mxu0 %v5894_v25  ;;  %4335 = vmatprep.subr.bf16.mxu1 %v5897_v26 }
 0x209   :  { %v613_v25 = vrot.slane %v608_v22, %v612_v20  ;;  %v621_v26 = vrot.slane %v608_v22, %v620_v21 }
 0x20b   :  { %3949 = vmatpush1.bf16.msra.mxu0 %v5892_v27  ;;  %4336 = vmatpush1.bf16.msra.mxu1 %v5895_v28  ;;  %v617_v27 = vrot.slane %v608_v22, %v616_v23  ;;  %v625_v28 = vrot.slane %v608_v22, %v624_v24 }
 0x20c   :  { %3950 = vmatprep.subr.bf16.mxu0 %v5900_v29  ;;  %4337 = vmatprep.subr.bf16.mxu1 %v5903_v30 }
 0x20f   :  { %3951 = vmatpush1.bf16.msra.mxu0 %v5898_v31  ;;  %4338 = vmatpush1.bf16.msra.mxu1 %v5901_v32 }
 0x210   :  { %3952 = vmatprep.subr.bf16.mxu0 %v5906_v33  ;;  %4339 = vmatprep.subr.bf16.mxu1 %v5909_v34 }
 0x213   :  { %3953 = vmatpush1.bf16.msra.mxu0 %v5904_v35  ;;  %4340 = vmatpush1.bf16.msra.mxu1 %v5907_v36 }
 0x214   :  { %3954 = vmatprep.subr.bf16.mxu0 %v5912_v37  ;;  %4341 = vmatprep.subr.bf16.mxu1 %v5915_v38 }
 0x217   :  { %3955 = vmatpush1.bf16.msra.mxu0 %v5910_v39  ;;  %4342 = vmatpush1.bf16.msra.mxu1 %v5913_v40 }
 0x218   :  { %3956 = vmatprep.subr.bf16.mxu0 %v5918_v41  ;;  %4343 = vmatprep.subr.bf16.mxu1 %v5921_v42 }
 0x21b   :  { %3957 = vmatpush1.bf16.msra.mxu0 %v5916_v43  ;;  %4344 = vmatpush1.bf16.msra.mxu1 %v5919_v44 }
 0x21c   :  { %3958 = vmatprep.subr.bf16.mxu0 %v5924_v45  ;;  %4345 = vmatprep.subr.bf16.mxu1 %v5927_v46 }
 0x21f   :  { %3959 = vmatpush1.bf16.msra.mxu0 %v5922_v47  ;;  %4346 = vmatpush1.bf16.msra.mxu1 %v5925_v48 }
 0x220   :  { %3960 = vmatprep.subr.bf16.mxu0 %v5930_v49  ;;  %4347 = vmatprep.subr.bf16.mxu1 %v5933_v50 }
 0x223   :  { %3961 = vmatpush1.bf16.msra.mxu0 %v5928_v51  ;;  %4348 = vmatpush1.bf16.msra.mxu1 %v5931_v52 }
 0x224   :  { %3962 = vmatprep.subr.bf16.mxu0 %v5936_v53  ;;  %4349 = vmatprep.subr.bf16.mxu1 %v5939_v54 }
 0x227   :  { %3963 = vmatpush1.bf16.msra.mxu0 %v5934_v55  ;;  %4350 = vmatpush1.bf16.msra.mxu1 %v5937_v56 }
 0x228   :  { %3964 = vmatprep.subr.bf16.mxu0 %v5942_v57  ;;  %4351 = vmatprep.subr.bf16.mxu1 %v5945_v58 }
 0x22b   :  { %3965 = vmatpush1.bf16.msra.mxu0 %v5940_v59  ;;  %4352 = vmatpush1.bf16.msra.mxu1 %v5943_v60 }
 0x22c   :  { %3966 = vmatprep.subr.bf16.mxu0 %v5948_v61  ;;  %4353 = vmatprep.subr.bf16.mxu1 %v5951_v62 }
 0x22f   :  { %3967 = vmatpush1.bf16.msra.mxu0 %v5946_v63  ;;  %4354 = vmatpush1.bf16.msra.mxu1 %v5949_v0 }
 0x230   :  { %3968 = vmatprep.subr.bf16.mxu0 %v5954_v1  ;;  %4355 = vmatprep.subr.bf16.mxu1 %v5957_v2 }
 0x233   :  { %3969 = vmatpush1.bf16.msra.mxu0 %v5952_v3  ;;  %4356 = vmatpush1.bf16.msra.mxu1 %v5955_v4 }
 0x234   :  { %3970 = vmatprep.subr.bf16.mxu0 %v5960_v5  ;;  %4357 = vmatprep.subr.bf16.mxu1 %v5963_v6 }
 0x237   :  { %3971 = vmatpush1.bf16.msra.mxu0 %v5958_v7  ;;  %4358 = vmatpush1.bf16.msra.mxu1 %v5961_v8 }
 0x238   :  { %3972 = vmatprep.subr.bf16.mxu0 %v5966_v9  ;;  %4359 = vmatprep.subr.bf16.mxu1 %v5969_v10 }
 0x23b   :  { %3973 = vmatpush1.bf16.msra.mxu0 %v5964_v11  ;;  %4360 = vmatpush1.bf16.msra.mxu1 %v5967_v12 }
 0x23c   :  { %3974 = vmatprep.subr.bf16.mxu0 %v5972_v13  ;;  %4361 = vmatprep.subr.bf16.mxu1 %v5975_v14 }
 0x23f   :  { %3975 = vmatpush1.bf16.msra.mxu0 %v5970_v15  ;;  %4362 = vmatpush1.bf16.msra.mxu1 %v5973_v16 }
 0x242   :  { %3977 = vmatmul.mubr.bf16.vlgmr.msra.gmra.mrb[0].mxu0 %v5976_v17  ;;  %4364 = vmatmul.mubr.bf16.vlgmr.msra.gmra.mrb[0].mxu1 %v5976_v17 }
 0x315   :  { %v3978_v29 = vpop.f32.mrb[0].mxu0  ;;  %v4365_v30 = vpop.f32.mrb[0].mxu1 }
 0x316   :  { %v5016_v31 = vadd.f32 %v3978_v29, %v613_v25  ;;  %v5020_v32 = vadd.f32 %v4365_v30, %v621_v26  ;;  %v3980_v33 = vpop.f32.mrb[1].mxu0  ;;  %v4367_v34 = vpop.f32.mrb[1].mxu1 }
 0x317   :  { %v5017_v35 = vadd.f32 %v3980_v33, %v617_v27  ;;  %v5021_v36 = vadd.f32 %v4367_v34, %v625_v28  ;;  %v3982_v37 = vpop.f32.mrb[2].mxu0  ;;  %v4369_v38 = vpop.f32.mrb[2].mxu1 }
 0x318   :  { %v4374_v39 = vmax.f32 %v5016_v31, 0.0  ;;  %v4376_v40 = vmax.f32 %v5020_v32, 0.0  ;;  %v5018_v41 = vadd.f32 %v3982_v37, %v613_v25  ;;  %v5022_v42 = vadd.f32 %v4369_v38, %v621_v26  ;;  %v3984_v43 = vpop.f32.mrb[3].mxu0  ;;  %v4371_v44 = vpop.f32.mrb[3].mxu1 }
 0x319   :  { %v4375_v45 = vmax.f32 %v5017_v35, 0.0  ;;  %v4377_v46 = vmax.f32 %v5021_v36, 0.0  ;;  %v5019_v47 = vadd.f32 %v3984_v43, %v617_v27  ;;  %v5023_v48 = vadd.f32 %v4371_v44, %v625_v28 }
 0x31a   :  { %v4378_v49 = vmax.f32 %v5018_v41, 0.0  ;;  %v4380_v50 = vmax.f32 %v5022_v42, 0.0 }
 0x31b   :  { %v5012_v51 = vpack.c.bf16 %v4375_v45, %v4374_v39  ;;  %v5013_v52 = vpack.c.bf16 %v4377_v46, %v4376_v40  ;;  %v4379_v53 = vmax.f32 %v5019_v47, 0.0  ;;  %v4381_v54 = vmax.f32 %v5023_v48, 0.0 }
 0x31d   :  { %4406 = vst [vmem:[%s7799_s3] sm:$0xff] %v5012_v51  ;;  %4407 = vst [vmem:[%s7799_s3 + $0x8] sm:$0xff] %v5013_v52  ;;  %v5014_v55 = vpack.c.bf16 %v4379_v53, %v4378_v49  ;;  %v5015_v56 = vpack.c.bf16 %v4381_v54, %v4380_v50 }
 0x31f   :  { %4408 = vst [vmem:[%s7799_s3 + $0x10] sm:$0xff] %v5014_v55  ;;  %4409 = vst [vmem:[%s7799_s3 + $0x18] sm:$0xff] %v5015_v56 }

// kernel: style_encoder_forward.9
= control target key start
LH: loop header
LB: loop body
LE: loop exit
PB: predicated region body
PF: predicated region fallthrough
CT: control target
= control target key end

     0   :  { %s10429_s1 = inlined_call_operand.vmem [shape: bf16[2048,512], index: 1, kind: input, shape index: {}]   ;;  %s10430_s0 = inlined_call_operand.vmem [shape: bf16[16,2048], index: 0, kind: input, shape index: {}]   ;;  %s10431_s3 = inlined_call_operand.vmem [shape: bf16[512,512], index: 3, kind: input, shape index: {}]   ;;  %s10432_s5 = inlined_call_operand.vmem [shape: bf16[512,512], index: 5, kind: input, shape index: {}]   ;;  %s10433_s2 = inlined_call_operand.vmem [shape: f32[1,512], index: 2, kind: input, shape index: {}]   ;;  %s10434_s4 = inlined_call_operand.vmem [shape: f32[1,512], index: 4, kind: input, shape index: {}]   ;;  %s10435_s6 = inlined_call_operand.vmem [shape: f32[1,512], index: 6, kind: input, shape index: {}]   ;;  %s10436_s7 = inlined_call_operand.vmem [shape: bf16[16,512], index: 7, kind: output, shape index: {}]  }
   0x1   :  { %v6780_v0 = vld [vmem:[%s10429_s1 + $0x4] ss:$16 sps:$4 sm:$0xff]   ;;  %v6782_v1 = vld [vmem:[%s10429_s1 + $0xc] ss:$16 sps:$4 sm:$0xff]   ;;  %v6784_v2 = vld [vmem:[%s10429_s1] ss:$16 sps:$4 sm:$0xff]  }
   0x2   :  { %3216 = vmatprep.subr.bf16.mxu0 %v6780_v0  ;;  %v6785_v3 = vld [vmem:[%s10429_s1 + $0x8] ss:$16 sps:$4 sm:$0xff]   ;;  %3560 = vmatprep.subr.bf16.mxu1 %v6782_v1  ;;  %v6786_v4 = vld [vmem:[%s10429_s1 + $0x24] ss:$16 sps:$4 sm:$0xff]   ;;  %v6788_v5 = vld [vmem:[%s10429_s1 + $0x2c] ss:$16 sps:$4 sm:$0xff]  }
   0x3   :  { %3217 = vmatpush1.bf16.msra.mxu0 %v6784_v2  ;;  %3561 = vmatpush1.bf16.msra.mxu1 %v6785_v3  ;;  %v6790_v6 = vld [vmem:[%s10429_s1 + $0x20] ss:$16 sps:$4 sm:$0xff]   ;;  %v6791_v7 = vld [vmem:[%s10429_s1 + $0x28] ss:$16 sps:$4 sm:$0xff]   ;;  %v6792_v8 = vld [vmem:[%s10429_s1 + $0x44] ss:$16 sps:$4 sm:$0xff]  }
   0x4   :  { %3218 = vmatprep.subr.bf16.mxu0 %v6786_v4  ;;  %3562 = vmatprep.subr.bf16.mxu1 %v6788_v5  ;;  %v6794_v9 = vld [vmem:[%s10429_s1 + $0x4c] ss:$16 sps:$4 sm:$0xff]   ;;  %v6796_v10 = vld [vmem:[%s10429_s1 + $0x40] ss:$16 sps:$4 sm:$0xff]   ;;  %v6797_v11 = vld [vmem:[%s10429_s1 + $0x48] ss:$16 sps:$4 sm:$0xff]  }
   0x5   :  { %v6798_v12 = vld [vmem:[%s10429_s1 + $0x64] ss:$16 sps:$4 sm:$0xff]   ;;  %v6800_v13 = vld [vmem:[%s10429_s1 + $0x6c] ss:$16 sps:$4 sm:$0xff]   ;;  %v6802_v14 = vld [vmem:[%s10429_s1 + $0x60] ss:$16 sps:$4 sm:$0xff]  }
   0x6   :  { %v6803_v15 = vld [vmem:[%s10429_s1 + $0x68] ss:$16 sps:$4 sm:$0xff]   ;;  %v6804_v16 = vld [vmem:[%s10429_s1 + $0x84] ss:$16 sps:$4 sm:$0xff]   ;;  %v6806_v17 = vld [vmem:[%s10429_s1 + $0x8c] ss:$16 sps:$4 sm:$0xff]  }
   0x7   :  { %3219 = vmatpush1.bf16.msra.mxu0 %v6790_v6  ;;  %3563 = vmatpush1.bf16.msra.mxu1 %v6791_v7  ;;  %v6808_v18 = vld [vmem:[%s10429_s1 + $0x80] ss:$16 sps:$4 sm:$0xff]   ;;  %v6809_v19 = vld [vmem:[%s10429_s1 + $0x88] ss:$16 sps:$4 sm:$0xff]   ;;  %v6810_v20 = vld [vmem:[%s10429_s1 + $0xa4] ss:$16 sps:$4 sm:$0xff]  }
   0x8   :  { %3220 = vmatprep.subr.bf16.mxu0 %v6792_v8  ;;  %3564 = vmatprep.subr.bf16.mxu1 %v6794_v9  ;;  %v6812_v21 = vld [vmem:[%s10429_s1 + $0xac] ss:$16 sps:$4 sm:$0xff]   ;;  %v6814_v22 = vld [vmem:[%s10429_s1 + $0xa0] ss:$16 sps:$4 sm:$0xff]   ;;  %v6815_v23 = vld [vmem:[%s10429_s1 + $0xa8] ss:$16 sps:$4 sm:$0xff]  }
   0x9   :  { %v6816_v24 = vld [vmem:[%s10429_s1 + $0xc4] ss:$16 sps:$4 sm:$0xff]   ;;  %v6818_v25 = vld [vmem:[%s10429_s1 + $0xcc] ss:$16 sps:$4 sm:$0xff]   ;;  %v6820_v26 = vld [vmem:[%s10429_s1 + $0xc0] ss:$16 sps:$4 sm:$0xff]  }
   0xa   :  { %v6821_v27 = vld [vmem:[%s10429_s1 + $0xc8] ss:$16 sps:$4 sm:$0xff]   ;;  %v6822_v28 = vld [vmem:[%s10429_s1 + $0xe4] ss:$16 sps:$4 sm:$0xff]   ;;  %v6824_v29 = vld [vmem:[%s10429_s1 + $0xec] ss:$16 sps:$4 sm:$0xff]  }
   0xb   :  { %3221 = vmatpush1.bf16.msra.mxu0 %v6796_v10  ;;  %3565 = vmatpush1.bf16.msra.mxu1 %v6797_v11  ;;  %v6826_v30 = vld [vmem:[%s10429_s1 + $0xe0] ss:$16 sps:$4 sm:$0xff]   ;;  %v6827_v31 = vld [vmem:[%s10429_s1 + $0xe8] ss:$16 sps:$4 sm:$0xff]   ;;  %v6828_v32 = vld [vmem:[%s10429_s1 + $0x104] ss:$16 sps:$4 sm:$0xff]  }
   0xc   :  { %3222 = vmatprep.subr.bf16.mxu0 %v6798_v12  ;;  %3566 = vmatprep.subr.bf16.mxu1 %v6800_v13  ;;  %v6830_v33 = vld [vmem:[%s10429_s1 + $0x10c] ss:$16 sps:$4 sm:$0xff]   ;;  %v6832_v34 = vld [vmem:[%s10429_s1 + $0x100] ss:$16 sps:$4 sm:$0xff]   ;;  %v6833_v35 = vld [vmem:[%s10429_s1 + $0x108] ss:$16 sps:$4 sm:$0xff]  }
   0xd   :  { %v6834_v36 = vld [vmem:[%s10429_s1 + $0x124] ss:$16 sps:$4 sm:$0xff]   ;;  %v6836_v37 = vld [vmem:[%s10429_s1 + $0x12c] ss:$16 sps:$4 sm:$0xff]   ;;  %v6838_v38 = vld [vmem:[%s10429_s1 + $0x120] ss:$16 sps:$4 sm:$0xff]  }
   0xe   :  { %v6839_v39 = vld [vmem:[%s10429_s1 + $0x128] ss:$16 sps:$4 sm:$0xff]   ;;  %v6840_v40 = vld [vmem:[%s10429_s1 + $0x144] ss:$16 sps:$4 sm:$0xff]   ;;  %v6842_v41 = vld [vmem:[%s10429_s1 + $0x14c] ss:$16 sps:$4 sm:$0xff]  }
   0xf   :  { %3223 = vmatpush1.bf16.msra.mxu0 %v6802_v14  ;;  %3567 = vmatpush1.bf16.msra.mxu1 %v6803_v15  ;;  %v6844_v42 = vld [vmem:[%s10429_s1 + $0x140] ss:$16 sps:$4 sm:$0xff]   ;;  %v6845_v43 = vld [vmem:[%s10429_s1 + $0x148] ss:$16 sps:$4 sm:$0xff]   ;;  %v6846_v44 = vld [vmem:[%s10429_s1 + $0x164] ss:$16 sps:$4 sm:$0xff]  }
  0x10   :  { %3224 = vmatprep.subr.bf16.mxu0 %v6804_v16  ;;  %3568 = vmatprep.subr.bf16.mxu1 %v6806_v17  ;;  %v6848_v45 = vld [vmem:[%s10429_s1 + $0x16c] ss:$16 sps:$4 sm:$0xff]   ;;  %v26_v46 = vld [vmem:[%s10430_s0] sm:$0xff]  ;;  %v6851_v49 = vld [vmem:[%s10429_s1 + $0x168] ss:$16 sps:$4 sm:$0xff]  }
  0x11   :  { %v34_v47 = vld [vmem:[%s10430_s0 + $0x40] sm:$0xff]  ;;  %v6854_v52 = vld [vmem:[%s10429_s1 + $0x18c] ss:$16 sps:$4 sm:$0xff]   ;;  %v6857_v54 = vld [vmem:[%s10429_s1 + $0x188] ss:$16 sps:$4 sm:$0xff]  }
  0x12   :  { %v6850_v48 = vld [vmem:[%s10429_s1 + $0x160] ss:$16 sps:$4 sm:$0xff]   ;;  %v5893_v50 = vcombine.high %v26_v46, %v34_v47  ;;  %v6852_v51 = vld [vmem:[%s10429_s1 + $0x184] ss:$16 sps:$4 sm:$0xff]   ;;  %v6860_v56 = vld [vmem:[%s10429_s1 + $0x1ac] ss:$16 sps:$4 sm:$0xff]   ;;  %v5892_v5 = vcombine.low %v26_v46, %v34_v47 }
  0x13   :  { %3225 = vmatpush1.bf16.msra.mxu0 %v6808_v18  ;;  %3569 = vmatpush1.bf16.msra.mxu1 %v6809_v19  ;;  %v6856_v53 = vld [vmem:[%s10429_s1 + $0x180] ss:$16 sps:$4 sm:$0xff]   ;;  %v6858_v55 = vld [vmem:[%s10429_s1 + $0x1a4] ss:$16 sps:$4 sm:$0xff]   ;;  %v6863_v58 = vld [vmem:[%s10429_s1 + $0x1a8] ss:$16 sps:$4 sm:$0xff]  }
  0x14   :  { %3226 = vmatprep.subr.bf16.mxu0 %v6810_v20  ;;  %3570 = vmatprep.subr.bf16.mxu1 %v6812_v21  ;;  %v6862_v57 = vld [vmem:[%s10429_s1 + $0x1a0] ss:$16 sps:$4 sm:$0xff]   ;;  %v6864_v59 = vld [vmem:[%s10429_s1 + $0x1c4] ss:$16 sps:$4 sm:$0xff]   ;;  %v6866_v60 = vld [vmem:[%s10429_s1 + $0x1cc] ss:$16 sps:$4 sm:$0xff]  }
  0x15   :  { %3248 = vmatprep.mubr.bf16.mxu0 %v5893_v50  ;;  %3592 = vmatprep.mubr.bf16.mxu1 %v5893_v50  ;;  %v6868_v61 = vld [vmem:[%s10429_s1 + $0x1c0] ss:$16 sps:$4 sm:$0xff]   ;;  %v6869_v62 = vld [vmem:[%s10429_s1 + $0x1c8] ss:$16 sps:$4 sm:$0xff]   ;;  %v6870_v63 = vld [vmem:[%s10429_s1 + $0x1e4] ss:$16 sps:$4 sm:$0xff]  }
  0x16   :  { %v6872_v0 = vld [vmem:[%s10429_s1 + $0x1ec] ss:$16 sps:$4 sm:$0xff]   ;;  %v6874_v1 = vld [vmem:[%s10429_s1 + $0x1e0] ss:$16 sps:$4 sm:$0xff]   ;;  %v6875_v2 = vld [vmem:[%s10429_s1 + $0x1e8] ss:$16 sps:$4 sm:$0xff]  }
  0x17   :  { %3227 = vmatpush1.bf16.msra.mxu0 %v6814_v22  ;;  %3571 = vmatpush1.bf16.msra.mxu1 %v6815_v23  ;;  %v6878_v3 = vld [vmem:[%s10429_s1 + $0x204] ss:$16 sps:$4 sm:$0xff]   ;;  %v6881_v4 = vld [vmem:[%s10429_s1 + $0x20c] ss:$16 sps:$4 sm:$0xff]   ;;  %v6876_v6 = vld [vmem:[%s10429_s1 + $0x200] ss:$16 sps:$4 sm:$0xff]  }
  0x18   :  { %3228 = vmatprep.subr.bf16.mxu0 %v6816_v24  ;;  %3572 = vmatprep.subr.bf16.mxu1 %v6818_v25  ;;  %v6879_v7 = vld [vmem:[%s10429_s1 + $0x208] ss:$16 sps:$4 sm:$0xff]   ;;  %v6884_v8 = vld [vmem:[%s10429_s1 + $0x224] ss:$16 sps:$4 sm:$0xff]   ;;  %v6887_v9 = vld [vmem:[%s10429_s1 + $0x22c] ss:$16 sps:$4 sm:$0xff]  }
  0x19   :  { %v6882_v10 = vld [vmem:[%s10429_s1 + $0x220] ss:$16 sps:$4 sm:$0xff]   ;;  %v6885_v11 = vld [vmem:[%s10429_s1 + $0x228] ss:$16 sps:$4 sm:$0xff]   ;;  %v6890_v12 = vld [vmem:[%s10429_s1 + $0x244] ss:$16 sps:$4 sm:$0xff]  }
  0x1a   :  { %v6893_v13 = vld [vmem:[%s10429_s1 + $0x24c] ss:$16 sps:$4 sm:$0xff]   ;;  %v6888_v14 = vld [vmem:[%s10429_s1 + $0x240] ss:$16 sps:$4 sm:$0xff]   ;;  %v6891_v15 = vld [vmem:[%s10429_s1 + $0x248] ss:$16 sps:$4 sm:$0xff]  }
  0x1b   :  { %3229 = vmatpush1.bf16.msra.mxu0 %v6820_v26  ;;  %3573 = vmatpush1.bf16.msra.mxu1 %v6821_v27  ;;  %v6896_v16 = vld [vmem:[%s10429_s1 + $0x264] ss:$16 sps:$4 sm:$0xff]   ;;  %v6899_v17 = vld [vmem:[%s10429_s1 + $0x26c] ss:$16 sps:$4 sm:$0xff]   ;;  %v6894_v18 = vld [vmem:[%s10429_s1 + $0x260] ss:$16 sps:$4 sm:$0xff]  }
  0x1c   :  { %3230 = vmatprep.subr.bf16.mxu0 %v6822_v28  ;;  %3574 = vmatprep.subr.bf16.mxu1 %v6824_v29  ;;  %v6897_v19 = vld [vmem:[%s10429_s1 + $0x268] ss:$16 sps:$4 sm:$0xff]   ;;  %v6902_v20 = vld [vmem:[%s10429_s1 + $0x284] ss:$16 sps:$4 sm:$0xff]   ;;  %v6905_v21 = vld [vmem:[%s10429_s1 + $0x28c] ss:$16 sps:$4 sm:$0xff]  }
  0x1d   :  { %v6900_v22 = vld [vmem:[%s10429_s1 + $0x280] ss:$16 sps:$4 sm:$0xff]   ;;  %v6903_v23 = vld [vmem:[%s10429_s1 + $0x288] ss:$16 sps:$4 sm:$0xff]   ;;  %v6908_v24 = vld [vmem:[%s10429_s1 + $0x2a4] ss:$16 sps:$4 sm:$0xff]  }
  0x1e   :  { %v6911_v25 = vld [vmem:[%s10429_s1 + $0x2ac] ss:$16 sps:$4 sm:$0xff]   ;;  %v6906_v26 = vld [vmem:[%s10429_s1 + $0x2a0] ss:$16 sps:$4 sm:$0xff]   ;;  %v6909_v27 = vld [vmem:[%s10429_s1 + $0x2a8] ss:$16 sps:$4 sm:$0xff]  }
  0x1f   :  { %3231 = vmatpush1.bf16.msra.mxu0 %v6826_v30  ;;  %3575 = vmatpush1.bf16.msra.mxu1 %v6827_v31  ;;  %v6914_v28 = vld [vmem:[%s10429_s1 + $0x2c4] ss:$16 sps:$4 sm:$0xff]   ;;  %v6917_v29 = vld [vmem:[%s10429_s1 + $0x2cc] ss:$16 sps:$4 sm:$0xff]   ;;  %v6933_v46 = vld [vmem:[%s10429_s1 + $0x328] ss:$16 sps:$4 sm:$0xff]  }
  0x20   :  { %3232 = vmatprep.subr.bf16.mxu0 %v6828_v32  ;;  %3576 = vmatprep.subr.bf16.mxu1 %v6830_v33  ;;  %v8251_v30 = vld [vmem:[%s10430_s0 + $0x8] sm:$0xff]  ;;  %v6912_v32 = vld [vmem:[%s10429_s1 + $0x2c0] ss:$16 sps:$4 sm:$0xff]   ;;  %v6938_v47 = vld [vmem:[%s10429_s1 + $0x344] ss:$16 sps:$4 sm:$0xff]  }
  0x21   :  { %v8256_v31 = vld [vmem:[%s10430_s0 + $0x48] sm:$0xff] }
  0x22   :  { %v6915_v33 = vld [vmem:[%s10429_s1 + $0x2c8] ss:$16 sps:$4 sm:$0xff]  }
  0x23   :  { %3233 = vmatpush1.bf16.msra.mxu0 %v6832_v34  ;;  %3577 = vmatpush1.bf16.msra.mxu1 %v6833_v35  ;;  %v5895_v34 = vcombine.high %v8251_v30, %v8256_v31  ;;  %v6920_v35 = vld [vmem:[%s10429_s1 + $0x2e4] ss:$16 sps:$4 sm:$0xff]   ;;  %v6939_v50 = vld [vmem:[%s10429_s1 + $0x348] ss:$16 sps:$4 sm:$0xff]  }
  0x24   :  { %3234 = vmatprep.subr.bf16.mxu0 %v6834_v36  ;;  %3578 = vmatprep.subr.bf16.mxu1 %v6836_v37  ;;  %v6923_v36 = vld [vmem:[%s10429_s1 + $0x2ec] ss:$16 sps:$4 sm:$0xff]   ;;  %v6918_v37 = vld [vmem:[%s10429_s1 + $0x2e0] ss:$16 sps:$4 sm:$0xff]  }
  0x27   :  { %3235 = vmatpush1.bf16.msra.mxu0 %v6838_v38  ;;  %3579 = vmatpush1.bf16.msra.mxu1 %v6839_v39  ;;  %v6921_v38 = vld [vmem:[%s10429_s1 + $0x2e8] ss:$16 sps:$4 sm:$0xff]   ;;  %v6926_v39 = vld [vmem:[%s10429_s1 + $0x304] ss:$16 sps:$4 sm:$0xff]  }
  0x28   :  { %3236 = vmatprep.subr.bf16.mxu0 %v6840_v40  ;;  %3580 = vmatprep.subr.bf16.mxu1 %v6842_v41  ;;  %v6929_v40 = vld [vmem:[%s10429_s1 + $0x30c] ss:$16 sps:$4 sm:$0xff]   ;;  %v6924_v41 = vld [vmem:[%s10429_s1 + $0x300] ss:$16 sps:$4 sm:$0xff]  }
  0x2b   :  { %3237 = vmatpush1.bf16.msra.mxu0 %v6844_v42  ;;  %3581 = vmatpush1.bf16.msra.mxu1 %v6845_v43  ;;  %v6927_v42 = vld [vmem:[%s10429_s1 + $0x308] ss:$16 sps:$4 sm:$0xff]   ;;  %v6932_v43 = vld [vmem:[%s10429_s1 + $0x324] ss:$16 sps:$4 sm:$0xff]  }
  0x2c   :  { %3238 = vmatprep.subr.bf16.mxu0 %v6846_v44  ;;  %3582 = vmatprep.subr.bf16.mxu1 %v6848_v45  ;;  %v6935_v44 = vld [vmem:[%s10429_s1 + $0x32c] ss:$16 sps:$4 sm:$0xff]   ;;  %v6930_v45 = vld [vmem:[%s10429_s1 + $0x320] ss:$16 sps:$4 sm:$0xff]  }
  0x2f   :  { %3239 = vmatpush1.bf16.msra.mxu0 %v6850_v48  ;;  %3583 = vmatpush1.bf16.msra.mxu1 %v6851_v49  ;;  %v6941_v48 = vld [vmem:[%s10429_s1 + $0x34c] ss:$16 sps:$4 sm:$0xff]   ;;  %v6936_v49 = vld [vmem:[%s10429_s1 + $0x340] ss:$16 sps:$4 sm:$0xff]  }
  0x30   :  { %3240 = vmatprep.subr.bf16.mxu0 %v6852_v51  ;;  %3584 = vmatprep.subr.bf16.mxu1 %v6854_v52  ;;  %v6944_v51 = vld [vmem:[%s10429_s1 + $0x364] ss:$16 sps:$4 sm:$0xff]   ;;  %v6947_v52 = vld [vmem:[%s10429_s1 + $0x36c] ss:$16 sps:$4 sm:$0xff]  }
  0x33   :  { %3241 = vmatpush1.bf16.msra.mxu0 %v6856_v53  ;;  %3585 = vmatpush1.bf16.msra.mxu1 %v6857_v54  ;;  %v6942_v53 = vld [vmem:[%s10429_s1 + $0x360] ss:$16 sps:$4 sm:$0xff]   ;;  %v6945_v54 = vld [vmem:[%s10429_s1 + $0x368] ss:$16 sps:$4 sm:$0xff]  }
  0x34   :  { %3242 = vmatprep.subr.bf16.mxu0 %v6858_v55  ;;  %3586 = vmatprep.subr.bf16.mxu1 %v6860_v56  ;;  %v6950_v55 = vld [vmem:[%s10429_s1 + $0x384] ss:$16 sps:$4 sm:$0xff]   ;;  %v6953_v56 = vld [vmem:[%s10429_s1 + $0x38c] ss:$16 sps:$4 sm:$0xff]  }
  0x37   :  { %3243 = vmatpush1.bf16.msra.mxu0 %v6862_v57  ;;  %3587 = vmatpush1.bf16.msra.mxu1 %v6863_v58  ;;  %v6948_v57 = vld [vmem:[%s10429_s1 + $0x380] ss:$16 sps:$4 sm:$0xff]   ;;  %v6951_v58 = vld [vmem:[%s10429_s1 + $0x388] ss:$16 sps:$4 sm:$0xff]  }
  0x38   :  { %3244 = vmatprep.subr.bf16.mxu0 %v6864_v59  ;;  %3588 = vmatprep.subr.bf16.mxu1 %v6866_v60  ;;  %v6956_v59 = vld [vmem:[%s10429_s1 + $0x3a4] ss:$16 sps:$4 sm:$0xff]   ;;  %v6959_v60 = vld [vmem:[%s10429_s1 + $0x3ac] ss:$16 sps:$4 sm:$0xff]  }
  0x3b   :  { %3245 = vmatpush1.bf16.msra.mxu0 %v6868_v61  ;;  %3589 = vmatpush1.bf16.msra.mxu1 %v6869_v62  ;;  %v6954_v61 = vld [vmem:[%s10429_s1 + $0x3a0] ss:$16 sps:$4 sm:$0xff]   ;;  %v6957_v62 = vld [vmem:[%s10429_s1 + $0x3a8] ss:$16 sps:$4 sm:$0xff]  }
  0x3c   :  { %3246 = vmatprep.subr.bf16.mxu0 %v6870_v63  ;;  %3590 = vmatprep.subr.bf16.mxu1 %v6872_v0  ;;  %v6962_v63 = vld [vmem:[%s10429_s1 + $0x3c4] ss:$16 sps:$4 sm:$0xff]   ;;  %v6965_v0 = vld [vmem:[%s10429_s1 + $0x3cc] ss:$16 sps:$4 sm:$0xff]  }
  0x3f   :  { %3247 = vmatpush1.bf16.msra.mxu0 %v6874_v1  ;;  %3591 = vmatpush1.bf16.msra.mxu1 %v6875_v2  ;;  %v6960_v1 = vld [vmem:[%s10429_s1 + $0x3c0] ss:$16 sps:$4 sm:$0xff]   ;;  %v6963_v2 = vld [vmem:[%s10429_s1 + $0x3c8] ss:$16 sps:$4 sm:$0xff]  }
  0x40   :  { %3259 = vmatprep.subr.bf16.mxu0 %v6878_v3  ;;  %3603 = vmatprep.subr.bf16.mxu1 %v6881_v4  ;;  %v6968_v3 = vld [vmem:[%s10429_s1 + $0x3e4] ss:$16 sps:$4 sm:$0xff]   ;;  %v6971_v4 = vld [vmem:[%s10429_s1 + $0x3ec] ss:$16 sps:$4 sm:$0xff]  }
  0x42   :  { %3249 = vmatmul.mubr.bf16.vlgmr.msra.gmra.mrb[0].mxu0 %v5892_v5  ;;  %3593 = vmatmul.mubr.bf16.vlgmr.msra.gmra.mrb[0].mxu1 %v5892_v5  ;;  %v6966_v5 = vld [vmem:[%s10429_s1 + $0x3e0] ss:$16 sps:$4 sm:$0xff]  }
  0x43   :  { %3260 = vmatpush1.bf16.msra.mxu0 %v6876_v6  ;;  %3604 = vmatpush1.bf16.msra.mxu1 %v6879_v7  ;;  %v6969_v6 = vld [vmem:[%s10429_s1 + $0x3e8] ss:$16 sps:$4 sm:$0xff]   ;;  %v6974_v7 = vld [vmem:[%s10429_s1 + $0x404] ss:$16 sps:$4 sm:$0xff]  }
  0x44   :  { %3261 = vmatprep.subr.bf16.mxu0 %v6884_v8  ;;  %3605 = vmatprep.subr.bf16.mxu1 %v6887_v9  ;;  %v6977_v8 = vld [vmem:[%s10429_s1 + $0x40c] ss:$16 sps:$4 sm:$0xff]   ;;  %v5894_v9 = vcombine.low %v8251_v30, %v8256_v31  ;;  %v6999_v30 = vld [vmem:[%s10429_s1 + $0x488] ss:$16 sps:$4 sm:$0xff]   ;;  %v7004_v31 = vld [vmem:[%s10429_s1 + $0x4a4] ss:$16 sps:$4 sm:$0xff]  }
  0x45   :  { %3291 = vmatprep.mubr.bf16.mxu0 %v5895_v34  ;;  %3635 = vmatprep.mubr.bf16.mxu1 %v5895_v34  ;;  %v7005_v34 = vld [vmem:[%s10429_s1 + $0x4a8] ss:$16 sps:$4 sm:$0xff]  }
  0x47   :  { %3262 = vmatpush1.bf16.msra.mxu0 %v6882_v10  ;;  %3606 = vmatpush1.bf16.msra.mxu1 %v6885_v11  ;;  %v6972_v10 = vld [vmem:[%s10429_s1 + $0x400] ss:$16 sps:$4 sm:$0xff]   ;;  %v6975_v11 = vld [vmem:[%s10429_s1 + $0x408] ss:$16 sps:$4 sm:$0xff]  }
  0x48   :  { %3263 = vmatprep.subr.bf16.mxu0 %v6890_v12  ;;  %3607 = vmatprep.subr.bf16.mxu1 %v6893_v13  ;;  %v6980_v12 = vld [vmem:[%s10429_s1 + $0x424] ss:$16 sps:$4 sm:$0xff]   ;;  %v6983_v13 = vld [vmem:[%s10429_s1 + $0x42c] ss:$16 sps:$4 sm:$0xff]  }
  0x4b   :  { %3264 = vmatpush1.bf16.msra.mxu0 %v6888_v14  ;;  %3608 = vmatpush1.bf16.msra.mxu1 %v6891_v15  ;;  %v8397_v14 = vld [vmem:[%s10430_s0 + $0x10] sm:$0xff] }
  0x4c   :  { %3265 = vmatprep.subr.bf16.mxu0 %v6896_v16  ;;  %3609 = vmatprep.subr.bf16.mxu1 %v6899_v17  ;;  %v8402_v15 = vld [vmem:[%s10430_s0 + $0x50] sm:$0xff] }
  0x4d   :  { %v5897_v16 = vcombine.high %v8397_v14, %v8402_v15  ;;  %v6978_v17 = vld [vmem:[%s10429_s1 + $0x420] ss:$16 sps:$4 sm:$0xff]  }
  0x4f   :  { %3266 = vmatpush1.bf16.msra.mxu0 %v6894_v18  ;;  %3610 = vmatpush1.bf16.msra.mxu1 %v6897_v19  ;;  %v6981_v18 = vld [vmem:[%s10429_s1 + $0x428] ss:$16 sps:$4 sm:$0xff]   ;;  %v6986_v19 = vld [vmem:[%s10429_s1 + $0x444] ss:$16 sps:$4 sm:$0xff]  }
  0x50   :  { %3267 = vmatprep.subr.bf16.mxu0 %v6902_v20  ;;  %3611 = vmatprep.subr.bf16.mxu1 %v6905_v21  ;;  %v6989_v20 = vld [vmem:[%s10429_s1 + $0x44c] ss:$16 sps:$4 sm:$0xff]   ;;  %v6984_v21 = vld [vmem:[%s10429_s1 + $0x440] ss:$16 sps:$4 sm:$0xff]  }
  0x53   :  { %3268 = vmatpush1.bf16.msra.mxu0 %v6900_v22  ;;  %3612 = vmatpush1.bf16.msra.mxu1 %v6903_v23  ;;  %v6987_v22 = vld [vmem:[%s10429_s1 + $0x448] ss:$16 sps:$4 sm:$0xff]   ;;  %v6992_v23 = vld [vmem:[%s10429_s1 + $0x464] ss:$16 sps:$4 sm:$0xff]  }
  0x54   :  { %3269 = vmatprep.subr.bf16.mxu0 %v6908_v24  ;;  %3613 = vmatprep.subr.bf16.mxu1 %v6911_v25  ;;  %v6995_v24 = vld [vmem:[%s10429_s1 + $0x46c] ss:$16 sps:$4 sm:$0xff]   ;;  %v6990_v25 = vld [vmem:[%s10429_s1 + $0x460] ss:$16 sps:$4 sm:$0xff]  }
  0x57   :  { %3270 = vmatpush1.bf16.msra.mxu0 %v6906_v26  ;;  %3614 = vmatpush1.bf16.msra.mxu1 %v6909_v27  ;;  %v6993_v26 = vld [vmem:[%s10429_s1 + $0x468] ss:$16 sps:$4 sm:$0xff]   ;;  %v6998_v27 = vld [vmem:[%s10429_s1 + $0x484] ss:$16 sps:$4 sm:$0xff]  }
  0x58   :  { %3271 = vmatprep.subr.bf16.mxu0 %v6914_v28  ;;  %3615 = vmatprep.subr.bf16.mxu1 %v6917_v29  ;;  %v7001_v28 = vld [vmem:[%s10429_s1 + $0x48c] ss:$16 sps:$4 sm:$0xff]   ;;  %v6996_v29 = vld [vmem:[%s10429_s1 + $0x480] ss:$16 sps:$4 sm:$0xff]  }
  0x5b   :  { %3272 = vmatpush1.bf16.msra.mxu0 %v6912_v32  ;;  %3616 = vmatpush1.bf16.msra.mxu1 %v6915_v33  ;;  %v7007_v32 = vld [vmem:[%s10429_s1 + $0x4ac] ss:$16 sps:$4 sm:$0xff]   ;;  %v7002_v33 = vld [vmem:[%s10429_s1 + $0x4a0] ss:$16 sps:$4 sm:$0xff]  }
  0x5c   :  { %3273 = vmatprep.subr.bf16.mxu0 %v6920_v35  ;;  %3617 = vmatprep.subr.bf16.mxu1 %v6923_v36  ;;  %v7010_v35 = vld [vmem:[%s10429_s1 + $0x4c4] ss:$16 sps:$4 sm:$0xff]   ;;  %v7013_v36 = vld [vmem:[%s10429_s1 + $0x4cc] ss:$16 sps:$4 sm:$0xff]  }
  0x5f   :  { %3274 = vmatpush1.bf16.msra.mxu0 %v6918_v37  ;;  %3618 = vmatpush1.bf16.msra.mxu1 %v6921_v38  ;;  %v7008_v37 = vld [vmem:[%s10429_s1 + $0x4c0] ss:$16 sps:$4 sm:$0xff]   ;;  %v7011_v38 = vld [vmem:[%s10429_s1 + $0x4c8] ss:$16 sps:$4 sm:$0xff]  }
  0x60   :  { %3275 = vmatprep.subr.bf16.mxu0 %v6926_v39  ;;  %3619 = vmatprep.subr.bf16.mxu1 %v6929_v40  ;;  %v7016_v39 = vld [vmem:[%s10429_s1 + $0x4e4] ss:$16 sps:$4 sm:$0xff]   ;;  %v7019_v40 = vld [vmem:[%s10429_s1 + $0x4ec] ss:$16 sps:$4 sm:$0xff]  }
  0x63   :  { %3276 = vmatpush1.bf16.msra.mxu0 %v6924_v41  ;;  %3620 = vmatpush1.bf16.msra.mxu1 %v6927_v42  ;;  %v7014_v41 = vld [vmem:[%s10429_s1 + $0x4e0] ss:$16 sps:$4 sm:$0xff]   ;;  %v7017_v42 = vld [vmem:[%s10429_s1 + $0x4e8] ss:$16 sps:$4 sm:$0xff]  }
  0x64   :  { %3277 = vmatprep.subr.bf16.mxu0 %v6932_v43  ;;  %3621 = vmatprep.subr.bf16.mxu1 %v6935_v44  ;;  %v7022_v43 = vld [vmem:[%s10429_s1 + $0x504] ss:$16 sps:$4 sm:$0xff]   ;;  %v7025_v44 = vld [vmem:[%s10429_s1 + $0x50c] ss:$16 sps:$4 sm:$0xff]  }
  0x67   :  { %3278 = vmatpush1.bf16.msra.mxu0 %v6930_v45  ;;  %3622 = vmatpush1.bf16.msra.mxu1 %v6933_v46  ;;  %v7020_v45 = vld [vmem:[%s10429_s1 + $0x500] ss:$16 sps:$4 sm:$0xff]   ;;  %v7023_v46 = vld [vmem:[%s10429_s1 + $0x508] ss:$16 sps:$4 sm:$0xff]  }
  0x68   :  { %3279 = vmatprep.subr.bf16.mxu0 %v6938_v47  ;;  %3623 = vmatprep.subr.bf16.mxu1 %v6941_v48  ;;  %v7028_v47 = vld [vmem:[%s10429_s1 + $0x524] ss:$16 sps:$4 sm:$0xff]   ;;  %v7031_v48 = vld [vmem:[%s10429_s1 + $0x52c] ss:$16 sps:$4 sm:$0xff]  }
  0x6b   :  { %3280 = vmatpush1.bf16.msra.mxu0 %v6936_v49  ;;  %3624 = vmatpush1.bf16.msra.mxu1 %v6939_v50  ;;  %v7026_v49 = vld [vmem:[%s10429_s1 + $0x520] ss:$16 sps:$4 sm:$0xff]   ;;  %v7029_v50 = vld [vmem:[%s10429_s1 + $0x528] ss:$16 sps:$4 sm:$0xff]  }
  0x6c   :  { %3281 = vmatprep.subr.bf16.mxu0 %v6944_v51  ;;  %3625 = vmatprep.subr.bf16.mxu1 %v6947_v52  ;;  %v7034_v51 = vld [vmem:[%s10429_s1 + $0x544] ss:$16 sps:$4 sm:$0xff]   ;;  %v7037_v52 = vld [vmem:[%s10429_s1 + $0x54c] ss:$16 sps:$4 sm:$0xff]  }
  0x6f   :  { %3282 = vmatpush1.bf16.msra.mxu0 %v6942_v53  ;;  %3626 = vmatpush1.bf16.msra.mxu1 %v6945_v54  ;;  %v7032_v53 = vld [vmem:[%s10429_s1 + $0x540] ss:$16 sps:$4 sm:$0xff]   ;;  %v7035_v54 = vld [vmem:[%s10429_s1 + $0x548] ss:$16 sps:$4 sm:$0xff]  }
  0x70   :  { %3283 = vmatprep.subr.bf16.mxu0 %v6950_v55  ;;  %3627 = vmatprep.subr.bf16.mxu1 %v6953_v56  ;;  %v7040_v55 = vld [vmem:[%s10429_s1 + $0x564] ss:$16 sps:$4 sm:$0xff]   ;;  %v7043_v56 = vld [vmem:[%s10429_s1 + $0x56c] ss:$16 sps:$4 sm:$0xff]  }
  0x73   :  { %3284 = vmatpush1.bf16.msra.mxu0 %v6948_v57  ;;  %3628 = vmatpush1.bf16.msra.mxu1 %v6951_v58  ;;  %v7038_v57 = vld [vmem:[%s10429_s1 + $0x560] ss:$16 sps:$4 sm:$0xff]   ;;  %v7041_v58 = vld [vmem:[%s10429_s1 + $0x568] ss:$16 sps:$4 sm:$0xff]  }
  0x74   :  { %3285 = vmatprep.subr.bf16.mxu0 %v6956_v59  ;;  %3629 = vmatprep.subr.bf16.mxu1 %v6959_v60  ;;  %v7046_v59 = vld [vmem:[%s10429_s1 + $0x584] ss:$16 sps:$4 sm:$0xff]   ;;  %v7049_v60 = vld [vmem:[%s10429_s1 + $0x58c] ss:$16 sps:$4 sm:$0xff]  }
  0x77   :  { %3286 = vmatpush1.bf16.msra.mxu0 %v6954_v61  ;;  %3630 = vmatpush1.bf16.msra.mxu1 %v6957_v62  ;;  %v7044_v61 = vld [vmem:[%s10429_s1 + $0x580] ss:$16 sps:$4 sm:$0xff]   ;;  %v7047_v62 = vld [vmem:[%s10429_s1 + $0x588] ss:$16 sps:$4 sm:$0xff]  }
  0x78   :  { %3287 = vmatprep.subr.bf16.mxu0 %v6962_v63  ;;  %3631 = vmatprep.subr.bf16.mxu1 %v6965_v0  ;;  %v7052_v63 = vld [vmem:[%s10429_s1 + $0x5a4] ss:$16 sps:$4 sm:$0xff]   ;;  %v7055_v0 = vld [vmem:[%s10429_s1 + $0x5ac] ss:$16 sps:$4 sm:$0xff]  }
  0x7b   :  { %3288 = vmatpush1.bf16.msra.mxu0 %v6960_v1  ;;  %3632 = vmatpush1.bf16.msra.mxu1 %v6963_v2  ;;  %v7050_v1 = vld [vmem:[%s10429_s1 + $0x5a0] ss:$16 sps:$4 sm:$0xff]   ;;  %v7053_v2 = vld [vmem:[%s10429_s1 + $0x5a8] ss:$16 sps:$4 sm:$0xff]  }
  0x7c   :  { %3289 = vmatprep.subr.bf16.mxu0 %v6968_v3  ;;  %3633 = vmatprep.subr.bf16.mxu1 %v6971_v4  ;;  %v7058_v3 = vld [vmem:[%s10429_s1 + $0x5c4] ss:$16 sps:$4 sm:$0xff]   ;;  %v7061_v4 = vld [vmem:[%s10429_s1 + $0x5cc] ss:$16 sps:$4 sm:$0xff]  }
  0x7f   :  { %3290 = vmatpush1.bf16.msra.mxu0 %v6966_v5  ;;  %3634 = vmatpush1.bf16.msra.mxu1 %v6969_v6  ;;  %v7056_v5 = vld [vmem:[%s10429_s1 + $0x5c0] ss:$16 sps:$4 sm:$0xff]   ;;  %v7059_v6 = vld [vmem:[%s10429_s1 + $0x5c8] ss:$16 sps:$4 sm:$0xff]  }
  0x80   :  { %3302 = vmatprep.subr.bf16.mxu0 %v6974_v7  ;;  %3646 = vmatprep.subr.bf16.mxu1 %v6977_v8  ;;  %v7064_v7 = vld [vmem:[%s10429_s1 + $0x5e4] ss:$16 sps:$4 sm:$0xff]   ;;  %v7067_v8 = vld [vmem:[%s10429_s1 + $0x5ec] ss:$16 sps:$4 sm:$0xff]  }
  0x82   :  { %3292 = vmatmul.mubr.bf16.vlgmr.msra.gmra.mrb[0].mxu0 %v5894_v9  ;;  %3636 = vmatmul.mubr.bf16.vlgmr.msra.gmra.mrb[0].mxu1 %v5894_v9  ;;  %v7062_v9 = vld [vmem:[%s10429_s1 + $0x5e0] ss:$16 sps:$4 sm:$0xff]  }
  0x83   :  { %3303 = vmatpush1.bf16.msra.mxu0 %v6972_v10  ;;  %3647 = vmatpush1.bf16.msra.mxu1 %v6975_v11  ;;  %v7065_v10 = vld [vmem:[%s10429_s1 + $0x5e8] ss:$16 sps:$4 sm:$0xff]   ;;  %v7070_v11 = vld [vmem:[%s10429_s1 + $0x604] ss:$16 sps:$4 sm:$0xff]  }
  0x84   :  { %3304 = vmatprep.subr.bf16.mxu0 %v6980_v12  ;;  %3648 = vmatprep.subr.bf16.mxu1 %v6983_v13  ;;  %v7073_v12 = vld [vmem:[%s10429_s1 + $0x60c] ss:$16 sps:$4 sm:$0xff]   ;;  %v7068_v13 = vld [vmem:[%s10429_s1 + $0x600] ss:$16 sps:$4 sm:$0xff]  }
  0x85   :  { %3334 = vmatprep.mubr.bf16.mxu0 %v5897_v16  ;;  %3678 = vmatprep.mubr.bf16.mxu1 %v5897_v16  ;;  %v7071_v16 = vld [vmem:[%s10429_s1 + $0x608] ss:$16 sps:$4 sm:$0xff]  }
  0x87   :  { %3305 = vmatpush1.bf16.msra.mxu0 %v6978_v17  ;;  %3649 = vmatpush1.bf16.msra.mxu1 %v6981_v18  ;;  %v5896_v17 = vcombine.low %v8397_v14, %v8402_v15  ;;  %v8597_v18 = vld [vmem:[%s10430_s0 + $0x18] sm:$0xff] }
  0x88   :  { %3306 = vmatprep.subr.bf16.mxu0 %v6986_v19  ;;  %3650 = vmatprep.subr.bf16.mxu1 %v6989_v20  ;;  %v8602_v19 = vld [vmem:[%s10430_s0 + $0x58] sm:$0xff]  ;;  %v7076_v20 = vld [vmem:[%s10429_s1 + $0x624] ss:$16 sps:$4 sm:$0xff]  }
  0x89   :  { %v7079_v14 = vld [vmem:[%s10429_s1 + $0x62c] ss:$16 sps:$4 sm:$0xff]   ;;  %v5899_v15 = vcombine.high %v8597_v18, %v8602_v19 }
  0x8b   :  { %3307 = vmatpush1.bf16.msra.mxu0 %v6984_v21  ;;  %3651 = vmatpush1.bf16.msra.mxu1 %v6987_v22  ;;  %v7074_v21 = vld [vmem:[%s10429_s1 + $0x620] ss:$16 sps:$4 sm:$0xff]   ;;  %v7077_v22 = vld [vmem:[%s10429_s1 + $0x628] ss:$16 sps:$4 sm:$0xff]  }
  0x8c   :  { %3308 = vmatprep.subr.bf16.mxu0 %v6992_v23  ;;  %3652 = vmatprep.subr.bf16.mxu1 %v6995_v24  ;;  %v7082_v23 = vld [vmem:[%s10429_s1 + $0x644] ss:$16 sps:$4 sm:$0xff]   ;;  %v7085_v24 = vld [vmem:[%s10429_s1 + $0x64c] ss:$16 sps:$4 sm:$0xff]  }
  0x8f   :  { %3309 = vmatpush1.bf16.msra.mxu0 %v6990_v25  ;;  %3653 = vmatpush1.bf16.msra.mxu1 %v6993_v26  ;;  %v7080_v25 = vld [vmem:[%s10429_s1 + $0x640] ss:$16 sps:$4 sm:$0xff]   ;;  %v7083_v26 = vld [vmem:[%s10429_s1 + $0x648] ss:$16 sps:$4 sm:$0xff]  }
  0x90   :  { %3310 = vmatprep.subr.bf16.mxu0 %v6998_v27  ;;  %3654 = vmatprep.subr.bf16.mxu1 %v7001_v28  ;;  %v7088_v27 = vld [vmem:[%s10429_s1 + $0x664] ss:$16 sps:$4 sm:$0xff]   ;;  %v7091_v28 = vld [vmem:[%s10429_s1 + $0x66c] ss:$16 sps:$4 sm:$0xff]  }
  0x93   :  { %3311 = vmatpush1.bf16.msra.mxu0 %v6996_v29  ;;  %3655 = vmatpush1.bf16.msra.mxu1 %v6999_v30  ;;  %v7086_v29 = vld [vmem:[%s10429_s1 + $0x660] ss:$16 sps:$4 sm:$0xff]   ;;  %v7089_v30 = vld [vmem:[%s10429_s1 + $0x668] ss:$16 sps:$4 sm:$0xff]  }
  0x94   :  { %3312 = vmatprep.subr.bf16.mxu0 %v7004_v31  ;;  %3656 = vmatprep.subr.bf16.mxu1 %v7007_v32  ;;  %v7094_v31 = vld [vmem:[%s10429_s1 + $0x684] ss:$16 sps:$4 sm:$0xff]   ;;  %v7097_v32 = vld [vmem:[%s10429_s1 + $0x68c] ss:$16 sps:$4 sm:$0xff]  }
  0x97   :  { %3313 = vmatpush1.bf16.msra.mxu0 %v7002_v33  ;;  %3657 = vmatpush1.bf16.msra.mxu1 %v7005_v34  ;;  %v7092_v33 = vld [vmem:[%s10429_s1 + $0x680] ss:$16 sps:$4 sm:$0xff]   ;;  %v7095_v34 = vld [vmem:[%s10429_s1 + $0x688] ss:$16 sps:$4 sm:$0xff]  }
  0x98   :  { %3314 = vmatprep.subr.bf16.mxu0 %v7010_v35  ;;  %3658 = vmatprep.subr.bf16.mxu1 %v7013_v36  ;;  %v7100_v35 = vld [vmem:[%s10429_s1 + $0x6a4] ss:$16 sps:$4 sm:$0xff]   ;;  %v7103_v36 = vld [vmem:[%s10429_s1 + $0x6ac] ss:$16 sps:$4 sm:$0xff]  }
  0x9b   :  { %3315 = vmatpush1.bf16.msra.mxu0 %v7008_v37  ;;  %3659 = vmatpush1.bf16.msra.mxu1 %v7011_v38  ;;  %v7098_v37 = vld [vmem:[%s10429_s1 + $0x6a0] ss:$16 sps:$4 sm:$0xff]   ;;  %v7101_v38 = vld [vmem:[%s10429_s1 + $0x6a8] ss:$16 sps:$4 sm:$0xff]  }
  0x9c   :  { %3316 = vmatprep.subr.bf16.mxu0 %v7016_v39  ;;  %3660 = vmatprep.subr.bf16.mxu1 %v7019_v40  ;;  %v7106_v39 = vld [vmem:[%s10429_s1 + $0x6c4] ss:$16 sps:$4 sm:$0xff]   ;;  %v7109_v40 = vld [vmem:[%s10429_s1 + $0x6cc] ss:$16 sps:$4 sm:$0xff]  }
  0x9f   :  { %3317 = vmatpush1.bf16.msra.mxu0 %v7014_v41  ;;  %3661 = vmatpush1.bf16.msra.mxu1 %v7017_v42  ;;  %v7104_v41 = vld [vmem:[%s10429_s1 + $0x6c0] ss:$16 sps:$4 sm:$0xff]   ;;  %v7107_v42 = vld [vmem:[%s10429_s1 + $0x6c8] ss:$16 sps:$4 sm:$0xff]  }
  0xa0   :  { %3318 = vmatprep.subr.bf16.mxu0 %v7022_v43  ;;  %3662 = vmatprep.subr.bf16.mxu1 %v7025_v44  ;;  %v7112_v43 = vld [vmem:[%s10429_s1 + $0x6e4] ss:$16 sps:$4 sm:$0xff]   ;;  %v7115_v44 = vld [vmem:[%s10429_s1 + $0x6ec] ss:$16 sps:$4 sm:$0xff]  }
  0xa3   :  { %3319 = vmatpush1.bf16.msra.mxu0 %v7020_v45  ;;  %3663 = vmatpush1.bf16.msra.mxu1 %v7023_v46  ;;  %v7110_v45 = vld [vmem:[%s10429_s1 + $0x6e0] ss:$16 sps:$4 sm:$0xff]   ;;  %v7113_v46 = vld [vmem:[%s10429_s1 + $0x6e8] ss:$16 sps:$4 sm:$0xff]  }
  0xa4   :  { %3320 = vmatprep.subr.bf16.mxu0 %v7028_v47  ;;  %3664 = vmatprep.subr.bf16.mxu1 %v7031_v48  ;;  %v7118_v47 = vld [vmem:[%s10429_s1 + $0x704] ss:$16 sps:$4 sm:$0xff]   ;;  %v7121_v48 = vld [vmem:[%s10429_s1 + $0x70c] ss:$16 sps:$4 sm:$0xff]  }
  0xa7   :  { %3321 = vmatpush1.bf16.msra.mxu0 %v7026_v49  ;;  %3665 = vmatpush1.bf16.msra.mxu1 %v7029_v50  ;;  %v7116_v49 = vld [vmem:[%s10429_s1 + $0x700] ss:$16 sps:$4 sm:$0xff]   ;;  %v7119_v50 = vld [vmem:[%s10429_s1 + $0x708] ss:$16 sps:$4 sm:$0xff]  }
  0xa8   :  { %3322 = vmatprep.subr.bf16.mxu0 %v7034_v51  ;;  %3666 = vmatprep.subr.bf16.mxu1 %v7037_v52  ;;  %v7124_v51 = vld [vmem:[%s10429_s1 + $0x724] ss:$16 sps:$4 sm:$0xff]   ;;  %v7127_v52 = vld [vmem:[%s10429_s1 + $0x72c] ss:$16 sps:$4 sm:$0xff]  }
  0xab   :  { %3323 = vmatpush1.bf16.msra.mxu0 %v7032_v53  ;;  %3667 = vmatpush1.bf16.msra.mxu1 %v7035_v54  ;;  %v7122_v53 = vld [vmem:[%s10429_s1 + $0x720] ss:$16 sps:$4 sm:$0xff]   ;;  %v7125_v54 = vld [vmem:[%s10429_s1 + $0x728] ss:$16 sps:$4 sm:$0xff]  }
  0xac   :  { %3324 = vmatprep.subr.bf16.mxu0 %v7040_v55  ;;  %3668 = vmatprep.subr.bf16.mxu1 %v7043_v56  ;;  %v7130_v55 = vld [vmem:[%s10429_s1 + $0x744] ss:$16 sps:$4 sm:$0xff]   ;;  %v7133_v56 = vld [vmem:[%s10429_s1 + $0x74c] ss:$16 sps:$4 sm:$0xff]  }
  0xaf   :  { %3325 = vmatpush1.bf16.msra.mxu0 %v7038_v57  ;;  %3669 = vmatpush1.bf16.msra.mxu1 %v7041_v58  ;;  %v7128_v57 = vld [vmem:[%s10429_s1 + $0x740] ss:$16 sps:$4 sm:$0xff]   ;;  %v7131_v58 = vld [vmem:[%s10429_s1 + $0x748] ss:$16 sps:$4 sm:$0xff]  }
  0xb0   :  { %3326 = vmatprep.subr.bf16.mxu0 %v7046_v59  ;;  %3670 = vmatprep.subr.bf16.mxu1 %v7049_v60  ;;  %v7136_v59 = vld [vmem:[%s10429_s1 + $0x764] ss:$16 sps:$4 sm:$0xff]   ;;  %v7139_v60 = vld [vmem:[%s10429_s1 + $0x76c] ss:$16 sps:$4 sm:$0xff]  }
  0xb3   :  { %3327 = vmatpush1.bf16.msra.mxu0 %v7044_v61  ;;  %3671 = vmatpush1.bf16.msra.mxu1 %v7047_v62  ;;  %v7134_v61 = vld [vmem:[%s10429_s1 + $0x760] ss:$16 sps:$4 sm:$0xff]   ;;  %v7137_v62 = vld [vmem:[%s10429_s1 + $0x768] ss:$16 sps:$4 sm:$0xff]  }
  0xb4   :  { %3328 = vmatprep.subr.bf16.mxu0 %v7052_v63  ;;  %3672 = vmatprep.subr.bf16.mxu1 %v7055_v0  ;;  %v7142_v63 = vld [vmem:[%s10429_s1 + $0x784] ss:$16 sps:$4 sm:$0xff]   ;;  %v7145_v0 = vld [vmem:[%s10429_s1 + $0x78c] ss:$16 sps:$4 sm:$0xff]  }
  0xb7   :  { %3329 = vmatpush1.bf16.msra.mxu0 %v7050_v1  ;;  %3673 = vmatpush1.bf16.msra.mxu1 %v7053_v2  ;;  %v7140_v1 = vld [vmem:[%s10429_s1 + $0x780] ss:$16 sps:$4 sm:$0xff]   ;;  %v7143_v2 = vld [vmem:[%s10429_s1 + $0x788] ss:$16 sps:$4 sm:$0xff]  }
  0xb8   :  { %3330 = vmatprep.subr.bf16.mxu0 %v7058_v3  ;;  %3674 = vmatprep.subr.bf16.mxu1 %v7061_v4  ;;  %v7148_v3 = vld [vmem:[%s10429_s1 + $0x7a4] ss:$16 sps:$4 sm:$0xff]   ;;  %v7151_v4 = vld [vmem:[%s10429_s1 + $0x7ac] ss:$16 sps:$4 sm:$0xff]  }
  0xbb   :  { %3331 = vmatpush1.bf16.msra.mxu0 %v7056_v5  ;;  %3675 = vmatpush1.bf16.msra.mxu1 %v7059_v6  ;;  %v7146_v5 = vld [vmem:[%s10429_s1 + $0x7a0] ss:$16 sps:$4 sm:$0xff]   ;;  %v7149_v6 = vld [vmem:[%s10429_s1 + $0x7a8] ss:$16 sps:$4 sm:$0xff]  }
  0xbc   :  { %3332 = vmatprep.subr.bf16.mxu0 %v7064_v7  ;;  %3676 = vmatprep.subr.bf16.mxu1 %v7067_v8  ;;  %v7154_v7 = vld [vmem:[%s10429_s1 + $0x7c4] ss:$16 sps:$4 sm:$0xff]   ;;  %v7157_v8 = vld [vmem:[%s10429_s1 + $0x7cc] ss:$16 sps:$4 sm:$0xff]  }
  0xbf   :  { %3333 = vmatpush1.bf16.msra.mxu0 %v7062_v9  ;;  %3677 = vmatpush1.bf16.msra.mxu1 %v7065_v10  ;;  %v7152_v9 = vld [vmem:[%s10429_s1 + $0x7c0] ss:$16 sps:$4 sm:$0xff]   ;;  %v7155_v10 = vld [vmem:[%s10429_s1 + $0x7c8] ss:$16 sps:$4 sm:$0xff]  }
  0xc0   :  { %3345 = vmatprep.subr.bf16.mxu0 %v7070_v11  ;;  %3689 = vmatprep.subr.bf16.mxu1 %v7073_v12  ;;  %v7160_v11 = vld [vmem:[%s10429_s1 + $0x7e4] ss:$16 sps:$4 sm:$0xff]   ;;  %v7163_v12 = vld [vmem:[%s10429_s1 + $0x7ec] ss:$16 sps:$4 sm:$0xff]  }
  0xc2   :  { %3335 = vmatmul.mubr.bf16.vlgmr.msra.gmra.mrb[0].mxu0 %v5896_v17  ;;  %3679 = vmatmul.mubr.bf16.vlgmr.msra.gmra.mrb[0].mxu1 %v5896_v17  ;;  %v7166_v17 = vld [vmem:[%s10429_s1 + $0x804] ss:$16 sps:$4 sm:$0xff]  }
  0xc3   :  { %3346 = vmatpush1.bf16.msra.mxu0 %v7068_v13  ;;  %3690 = vmatpush1.bf16.msra.mxu1 %v7071_v16  ;;  %v7158_v13 = vld [vmem:[%s10429_s1 + $0x7e0] ss:$16 sps:$4 sm:$0xff]   ;;  %v7161_v16 = vld [vmem:[%s10429_s1 + $0x7e8] ss:$16 sps:$4 sm:$0xff]  }
  0xc4   :  { %3347 = vmatprep.subr.bf16.mxu0 %v7076_v20  ;;  %3691 = vmatprep.subr.bf16.mxu1 %v7079_v14  ;;  %v7169_v20 = vld [vmem:[%s10429_s1 + $0x80c] ss:$16 sps:$4 sm:$0xff]   ;;  %v8795_v14 = vld [vmem:[%s10430_s0 + $0x20] sm:$0xff] }
  0xc5   :  { %3377 = vmatprep.mubr.bf16.mxu0 %v5899_v15  ;;  %3721 = vmatprep.mubr.bf16.mxu1 %v5899_v15  ;;  %v5898_v15 = vcombine.low %v8597_v18, %v8602_v19  ;;  %v7172_v18 = vld [vmem:[%s10429_s1 + $0x824] ss:$16 sps:$4 sm:$0xff]   ;;  %v7175_v19 = vld [vmem:[%s10429_s1 + $0x82c] ss:$16 sps:$4 sm:$0xff]  }
  0xc7   :  { %3348 = vmatpush1.bf16.msra.mxu0 %v7074_v21  ;;  %3692 = vmatpush1.bf16.msra.mxu1 %v7077_v22  ;;  %v8802_v21 = vld [vmem:[%s10430_s0 + $0x60] sm:$0xff] }
  0xc8   :  { %3349 = vmatprep.subr.bf16.mxu0 %v7082_v23  ;;  %3693 = vmatprep.subr.bf16.mxu1 %v7085_v24  ;;  %v7164_v22 = vld [vmem:[%s10429_s1 + $0x800] ss:$16 sps:$4 sm:$0xff]   ;;  %v7167_v23 = vld [vmem:[%s10429_s1 + $0x808] ss:$16 sps:$4 sm:$0xff]   ;;  %v5901_v24 = vcombine.high %v8795_v14, %v8802_v21 }
  0xcb   :  { %3350 = vmatpush1.bf16.msra.mxu0 %v7080_v25  ;;  %3694 = vmatpush1.bf16.msra.mxu1 %v7083_v26  ;;  %v7170_v25 = vld [vmem:[%s10429_s1 + $0x820] ss:$16 sps:$4 sm:$0xff]   ;;  %v7173_v26 = vld [vmem:[%s10429_s1 + $0x828] ss:$16 sps:$4 sm:$0xff]  }
  0xcc   :  { %3351 = vmatprep.subr.bf16.mxu0 %v7088_v27  ;;  %3695 = vmatprep.subr.bf16.mxu1 %v7091_v28  ;;  %v7178_v27 = vld [vmem:[%s10429_s1 + $0x844] ss:$16 sps:$4 sm:$0xff]   ;;  %v7181_v28 = vld [vmem:[%s10429_s1 + $0x84c] ss:$16 sps:$4 sm:$0xff]  }
  0xcf   :  { %3352 = vmatpush1.bf16.msra.mxu0 %v7086_v29  ;;  %3696 = vmatpush1.bf16.msra.mxu1 %v7089_v30  ;;  %v7176_v29 = vld [vmem:[%s10429_s1 + $0x840] ss:$16 sps:$4 sm:$0xff]   ;;  %v7179_v30 = vld [vmem:[%s10429_s1 + $0x848] ss:$16 sps:$4 sm:$0xff]  }
  0xd0   :  { %3353 = vmatprep.subr.bf16.mxu0 %v7094_v31  ;;  %3697 = vmatprep.subr.bf16.mxu1 %v7097_v32  ;;  %v7184_v31 = vld [vmem:[%s10429_s1 + $0x864] ss:$16 sps:$4 sm:$0xff]   ;;  %v7187_v32 = vld [vmem:[%s10429_s1 + $0x86c] ss:$16 sps:$4 sm:$0xff]  }
  0xd3   :  { %3354 = vmatpush1.bf16.msra.mxu0 %v7092_v33  ;;  %3698 = vmatpush1.bf16.msra.mxu1 %v7095_v34  ;;  %v7182_v33 = vld [vmem:[%s10429_s1 + $0x860] ss:$16 sps:$4 sm:$0xff]   ;;  %v7185_v34 = vld [vmem:[%s10429_s1 + $0x868] ss:$16 sps:$4 sm:$0xff]  }
  0xd4   :  { %3355 = vmatprep.subr.bf16.mxu0 %v7100_v35  ;;  %3699 = vmatprep.subr.bf16.mxu1 %v7103_v36  ;;  %v7190_v35 = vld [vmem:[%s10429_s1 + $0x884] ss:$16 sps:$4 sm:$0xff]   ;;  %v7193_v36 = vld [vmem:[%s10429_s1 + $0x88c] ss:$16 sps:$4 sm:$0xff]  }
  0xd7   :  { %3356 = vmatpush1.bf16.msra.mxu0 %v7098_v37  ;;  %3700 = vmatpush1.bf16.msra.mxu1 %v7101_v38  ;;  %v7188_v37 = vld [vmem:[%s10429_s1 + $0x880] ss:$16 sps:$4 sm:$0xff]   ;;  %v7191_v38 = vld [vmem:[%s10429_s1 + $0x888] ss:$16 sps:$4 sm:$0xff]  }
  0xd8   :  { %3357 = vmatprep.subr.bf16.mxu0 %v7106_v39  ;;  %3701 = vmatprep.subr.bf16.mxu1 %v7109_v40  ;;  %v7196_v39 = vld [vmem:[%s10429_s1 + $0x8a4] ss:$16 sps:$4 sm:$0xff]   ;;  %v7199_v40 = vld [vmem:[%s10429_s1 + $0x8ac] ss:$16 sps:$4 sm:$0xff]  }
  0xdb   :  { %3358 = vmatpush1.bf16.msra.mxu0 %v7104_v41  ;;  %3702 = vmatpush1.bf16.msra.mxu1 %v7107_v42  ;;  %v7194_v41 = vld [vmem:[%s10429_s1 + $0x8a0] ss:$16 sps:$4 sm:$0xff]   ;;  %v7197_v42 = vld [vmem:[%s10429_s1 + $0x8a8] ss:$16 sps:$4 sm:$0xff]  }
  0xdc   :  { %3359 = vmatprep.subr.bf16.mxu0 %v7112_v43  ;;  %3703 = vmatprep.subr.bf16.mxu1 %v7115_v44  ;;  %v7202_v43 = vld [vmem:[%s10429_s1 + $0x8c4] ss:$16 sps:$4 sm:$0xff]   ;;  %v7205_v44 = vld [vmem:[%s10429_s1 + $0x8cc] ss:$16 sps:$4 sm:$0xff]  }
  0xdf   :  { %3360 = vmatpush1.bf16.msra.mxu0 %v7110_v45  ;;  %3704 = vmatpush1.bf16.msra.mxu1 %v7113_v46  ;;  %v7200_v45 = vld [vmem:[%s10429_s1 + $0x8c0] ss:$16 sps:$4 sm:$0xff]   ;;  %v7203_v46 = vld [vmem:[%s10429_s1 + $0x8c8] ss:$16 sps:$4 sm:$0xff]  }
  0xe0   :  { %3361 = vmatprep.subr.bf16.mxu0 %v7118_v47  ;;  %3705 = vmatprep.subr.bf16.mxu1 %v7121_v48  ;;  %v7208_v47 = vld [vmem:[%s10429_s1 + $0x8e4] ss:$16 sps:$4 sm:$0xff]   ;;  %v7211_v48 = vld [vmem:[%s10429_s1 + $0x8ec] ss:$16 sps:$4 sm:$0xff]  }
  0xe3   :  { %3362 = vmatpush1.bf16.msra.mxu0 %v7116_v49  ;;  %3706 = vmatpush1.bf16.msra.mxu1 %v7119_v50  ;;  %v7206_v49 = vld [vmem:[%s10429_s1 + $0x8e0] ss:$16 sps:$4 sm:$0xff]   ;;  %v7209_v50 = vld [vmem:[%s10429_s1 + $0x8e8] ss:$16 sps:$4 sm:$0xff]  }
  0xe4   :  { %3363 = vmatprep.subr.bf16.mxu0 %v7124_v51  ;;  %3707 = vmatprep.subr.bf16.mxu1 %v7127_v52  ;;  %v7214_v51 = vld [vmem:[%s10429_s1 + $0x904] ss:$16 sps:$4 sm:$0xff]   ;;  %v7217_v52 = vld [vmem:[%s10429_s1 + $0x90c] ss:$16 sps:$4 sm:$0xff]  }
  0xe7   :  { %3364 = vmatpush1.bf16.msra.mxu0 %v7122_v53  ;;  %3708 = vmatpush1.bf16.msra.mxu1 %v7125_v54  ;;  %v7212_v53 = vld [vmem:[%s10429_s1 + $0x900] ss:$16 sps:$4 sm:$0xff]   ;;  %v7215_v54 = vld [vmem:[%s10429_s1 + $0x908] ss:$16 sps:$4 sm:$0xff]  }
  0xe8   :  { %3365 = vmatprep.subr.bf16.mxu0 %v7130_v55  ;;  %3709 = vmatprep.subr.bf16.mxu1 %v7133_v56  ;;  %v7220_v55 = vld [vmem:[%s10429_s1 + $0x924] ss:$16 sps:$4 sm:$0xff]   ;;  %v7223_v56 = vld [vmem:[%s10429_s1 + $0x92c] ss:$16 sps:$4 sm:$0xff]  }
  0xeb   :  { %3366 = vmatpush1.bf16.msra.mxu0 %v7128_v57  ;;  %3710 = vmatpush1.bf16.msra.mxu1 %v7131_v58  ;;  %v7218_v57 = vld [vmem:[%s10429_s1 + $0x920] ss:$16 sps:$4 sm:$0xff]   ;;  %v7221_v58 = vld [vmem:[%s10429_s1 + $0x928] ss:$16 sps:$4 sm:$0xff]  }
  0xec   :  { %3367 = vmatprep.subr.bf16.mxu0 %v7136_v59  ;;  %3711 = vmatprep.subr.bf16.mxu1 %v7139_v60  ;;  %v7226_v59 = vld [vmem:[%s10429_s1 + $0x944] ss:$16 sps:$4 sm:$0xff]   ;;  %v7229_v60 = vld [vmem:[%s10429_s1 + $0x94c] ss:$16 sps:$4 sm:$0xff]  }
  0xef   :  { %3368 = vmatpush1.bf16.msra.mxu0 %v7134_v61  ;;  %3712 = vmatpush1.bf16.msra.mxu1 %v7137_v62  ;;  %v7224_v61 = vld [vmem:[%s10429_s1 + $0x940] ss:$16 sps:$4 sm:$0xff]   ;;  %v7227_v62 = vld [vmem:[%s10429_s1 + $0x948] ss:$16 sps:$4 sm:$0xff]  }
  0xf0   :  { %3369 = vmatprep.subr.bf16.mxu0 %v7142_v63  ;;  %3713 = vmatprep.subr.bf16.mxu1 %v7145_v0  ;;  %v7232_v63 = vld [vmem:[%s10429_s1 + $0x964] ss:$16 sps:$4 sm:$0xff]   ;;  %v7235_v0 = vld [vmem:[%s10429_s1 + $0x96c] ss:$16 sps:$4 sm:$0xff]  }
  0xf3   :  { %3370 = vmatpush1.bf16.msra.mxu0 %v7140_v1  ;;  %3714 = vmatpush1.bf16.msra.mxu1 %v7143_v2  ;;  %v7230_v1 = vld [vmem:[%s10429_s1 + $0x960] ss:$16 sps:$4 sm:$0xff]   ;;  %v7233_v2 = vld [vmem:[%s10429_s1 + $0x968] ss:$16 sps:$4 sm:$0xff]  }
  0xf4   :  { %3371 = vmatprep.subr.bf16.mxu0 %v7148_v3  ;;  %3715 = vmatprep.subr.bf16.mxu1 %v7151_v4  ;;  %v7238_v3 = vld [vmem:[%s10429_s1 + $0x984] ss:$16 sps:$4 sm:$0xff]   ;;  %v7241_v4 = vld [vmem:[%s10429_s1 + $0x98c] ss:$16 sps:$4 sm:$0xff]  }
  0xf7   :  { %3372 = vmatpush1.bf16.msra.mxu0 %v7146_v5  ;;  %3716 = vmatpush1.bf16.msra.mxu1 %v7149_v6  ;;  %v7236_v5 = vld [vmem:[%s10429_s1 + $0x980] ss:$16 sps:$4 sm:$0xff]   ;;  %v7239_v6 = vld [vmem:[%s10429_s1 + $0x988] ss:$16 sps:$4 sm:$0xff]  }
  0xf8   :  { %3373 = vmatprep.subr.bf16.mxu0 %v7154_v7  ;;  %3717 = vmatprep.subr.bf16.mxu1 %v7157_v8  ;;  %v7244_v7 = vld [vmem:[%s10429_s1 + $0x9a4] ss:$16 sps:$4 sm:$0xff]   ;;  %v7247_v8 = vld [vmem:[%s10429_s1 + $0x9ac] ss:$16 sps:$4 sm:$0xff]  }
  0xfb   :  { %3374 = vmatpush1.bf16.msra.mxu0 %v7152_v9  ;;  %3718 = vmatpush1.bf16.msra.mxu1 %v7155_v10  ;;  %v7242_v9 = vld [vmem:[%s10429_s1 + $0x9a0] ss:$16 sps:$4 sm:$0xff]   ;;  %v7245_v10 = vld [vmem:[%s10429_s1 + $0x9a8] ss:$16 sps:$4 sm:$0xff]  }
  0xfc   :  { %3375 = vmatprep.subr.bf16.mxu0 %v7160_v11  ;;  %3719 = vmatprep.subr.bf16.mxu1 %v7163_v12  ;;  %v7250_v11 = vld [vmem:[%s10429_s1 + $0x9c4] ss:$16 sps:$4 sm:$0xff]   ;;  %v7253_v12 = vld [vmem:[%s10429_s1 + $0x9cc] ss:$16 sps:$4 sm:$0xff]  }
  0xff   :  { %3376 = vmatpush1.bf16.msra.mxu0 %v7158_v13  ;;  %3720 = vmatpush1.bf16.msra.mxu1 %v7161_v16  ;;  %v7248_v13 = vld [vmem:[%s10429_s1 + $0x9c0] ss:$16 sps:$4 sm:$0xff]   ;;  %v7251_v16 = vld [vmem:[%s10429_s1 + $0x9c8] ss:$16 sps:$4 sm:$0xff]  }
 0x100   :  { %3388 = vmatprep.subr.bf16.mxu0 %v7166_v17  ;;  %3732 = vmatprep.subr.bf16.mxu1 %v7169_v20  ;;  %v7256_v17 = vld [vmem:[%s10429_s1 + $0x9e4] ss:$16 sps:$4 sm:$0xff]   ;;  %v7259_v20 = vld [vmem:[%s10429_s1 + $0x9ec] ss:$16 sps:$4 sm:$0xff]  }
 0x102   :  { %3378 = vmatmul.mubr.bf16.vlgmr.msra.gmra.mrb[0].mxu0 %v5898_v15  ;;  %3722 = vmatmul.mubr.bf16.vlgmr.msra.gmra.mrb[0].mxu1 %v5898_v15  ;;  %v7254_v15 = vld [vmem:[%s10429_s1 + $0x9e0] ss:$16 sps:$4 sm:$0xff]  }
 0x103   :  { %3389 = vmatpush1.bf16.msra.mxu0 %v7164_v22  ;;  %3733 = vmatpush1.bf16.msra.mxu1 %v7167_v23  ;;  %v7257_v22 = vld [vmem:[%s10429_s1 + $0x9e8] ss:$16 sps:$4 sm:$0xff]   ;;  %v7262_v23 = vld [vmem:[%s10429_s1 + $0xa04] ss:$16 sps:$4 sm:$0xff]  }
 0x104   :  { %3390 = vmatprep.subr.bf16.mxu0 %v7172_v18  ;;  %3734 = vmatprep.subr.bf16.mxu1 %v7175_v19  ;;  %v7265_v18 = vld [vmem:[%s10429_s1 + $0xa0c] ss:$16 sps:$4 sm:$0xff]  }
 0x105   :  { %3420 = vmatprep.mubr.bf16.mxu0 %v5901_v24  ;;  %3764 = vmatprep.mubr.bf16.mxu1 %v5901_v24  ;;  %v9001_v19 = vld [vmem:[%s10430_s0 + $0x28] sm:$0xff] }
 0x106   :  { %v9006_v24 = vld [vmem:[%s10430_s0 + $0x68] sm:$0xff] }
 0x107   :  { %3391 = vmatpush1.bf16.msra.mxu0 %v7170_v25  ;;  %3735 = vmatpush1.bf16.msra.mxu1 %v7173_v26  ;;  %v5900_v25 = vcombine.low %v8795_v14, %v8802_v21  ;;  %v7260_v26 = vld [vmem:[%s10429_s1 + $0xa00] ss:$16 sps:$4 sm:$0xff]   ;;  %v7271_v14 = vld [vmem:[%s10429_s1 + $0xa2c] ss:$16 sps:$4 sm:$0xff]   ;;  %v5903_v21 = vcombine.high %v9001_v19, %v9006_v24 }
 0x108   :  { %3392 = vmatprep.subr.bf16.mxu0 %v7178_v27  ;;  %3736 = vmatprep.subr.bf16.mxu1 %v7181_v28  ;;  %v7263_v27 = vld [vmem:[%s10429_s1 + $0xa08] ss:$16 sps:$4 sm:$0xff]   ;;  %v7268_v28 = vld [vmem:[%s10429_s1 + $0xa24] ss:$16 sps:$4 sm:$0xff]  }
 0x10b   :  { %3393 = vmatpush1.bf16.msra.mxu0 %v7176_v29  ;;  %3737 = vmatpush1.bf16.msra.mxu1 %v7179_v30  ;;  %v7266_v29 = vld [vmem:[%s10429_s1 + $0xa20] ss:$16 sps:$4 sm:$0xff]   ;;  %v7269_v30 = vld [vmem:[%s10429_s1 + $0xa28] ss:$16 sps:$4 sm:$0xff]  }
 0x10c   :  { %3394 = vmatprep.subr.bf16.mxu0 %v7184_v31  ;;  %3738 = vmatprep.subr.bf16.mxu1 %v7187_v32  ;;  %v7274_v31 = vld [vmem:[%s10429_s1 + $0xa44] ss:$16 sps:$4 sm:$0xff]   ;;  %v7277_v32 = vld [vmem:[%s10429_s1 + $0xa4c] ss:$16 sps:$4 sm:$0xff]  }
 0x10f   :  { %3395 = vmatpush1.bf16.msra.mxu0 %v7182_v33  ;;  %3739 = vmatpush1.bf16.msra.mxu1 %v7185_v34  ;;  %v7272_v33 = vld [vmem:[%s10429_s1 + $0xa40] ss:$16 sps:$4 sm:$0xff]   ;;  %v7275_v34 = vld [vmem:[%s10429_s1 + $0xa48] ss:$16 sps:$4 sm:$0xff]  }
 0x110   :  { %3396 = vmatprep.subr.bf16.mxu0 %v7190_v35  ;;  %3740 = vmatprep.subr.bf16.mxu1 %v7193_v36  ;;  %v7280_v35 = vld [vmem:[%s10429_s1 + $0xa64] ss:$16 sps:$4 sm:$0xff]   ;;  %v7283_v36 = vld [vmem:[%s10429_s1 + $0xa6c] ss:$16 sps:$4 sm:$0xff]  }
 0x113   :  { %3397 = vmatpush1.bf16.msra.mxu0 %v7188_v37  ;;  %3741 = vmatpush1.bf16.msra.mxu1 %v7191_v38  ;;  %v7278_v37 = vld [vmem:[%s10429_s1 + $0xa60] ss:$16 sps:$4 sm:$0xff]   ;;  %v7281_v38 = vld [vmem:[%s10429_s1 + $0xa68] ss:$16 sps:$4 sm:$0xff]  }
 0x114   :  { %3398 = vmatprep.subr.bf16.mxu0 %v7196_v39  ;;  %3742 = vmatprep.subr.bf16.mxu1 %v7199_v40  ;;  %v7286_v39 = vld [vmem:[%s10429_s1 + $0xa84] ss:$16 sps:$4 sm:$0xff]   ;;  %v7289_v40 = vld [vmem:[%s10429_s1 + $0xa8c] ss:$16 sps:$4 sm:$0xff]  }
 0x117   :  { %3399 = vmatpush1.bf16.msra.mxu0 %v7194_v41  ;;  %3743 = vmatpush1.bf16.msra.mxu1 %v7197_v42  ;;  %v7284_v41 = vld [vmem:[%s10429_s1 + $0xa80] ss:$16 sps:$4 sm:$0xff]   ;;  %v7287_v42 = vld [vmem:[%s10429_s1 + $0xa88] ss:$16 sps:$4 sm:$0xff]  }
 0x118   :  { %3400 = vmatprep.subr.bf16.mxu0 %v7202_v43  ;;  %3744 = vmatprep.subr.bf16.mxu1 %v7205_v44  ;;  %v7292_v43 = vld [vmem:[%s10429_s1 + $0xaa4] ss:$16 sps:$4 sm:$0xff]   ;;  %v7295_v44 = vld [vmem:[%s10429_s1 + $0xaac] ss:$16 sps:$4 sm:$0xff]  }
 0x11b   :  { %3401 = vmatpush1.bf16.msra.mxu0 %v7200_v45  ;;  %3745 = vmatpush1.bf16.msra.mxu1 %v7203_v46  ;;  %v7290_v45 = vld [vmem:[%s10429_s1 + $0xaa0] ss:$16 sps:$4 sm:$0xff]   ;;  %v7293_v46 = vld [vmem:[%s10429_s1 + $0xaa8] ss:$16 sps:$4 sm:$0xff]  }
 0x11c   :  { %3402 = vmatprep.subr.bf16.mxu0 %v7208_v47  ;;  %3746 = vmatprep.subr.bf16.mxu1 %v7211_v48  ;;  %v7298_v47 = vld [vmem:[%s10429_s1 + $0xac4] ss:$16 sps:$4 sm:$0xff]   ;;  %v7301_v48 = vld [vmem:[%s10429_s1 + $0xacc] ss:$16 sps:$4 sm:$0xff]  }
 0x11f   :  { %3403 = vmatpush1.bf16.msra.mxu0 %v7206_v49  ;;  %3747 = vmatpush1.bf16.msra.mxu1 %v7209_v50  ;;  %v7296_v49 = vld [vmem:[%s10429_s1 + $0xac0] ss:$16 sps:$4 sm:$0xff]   ;;  %v7299_v50 = vld [vmem:[%s10429_s1 + $0xac8] ss:$16 sps:$4 sm:$0xff]  }
 0x120   :  { %3404 = vmatprep.subr.bf16.mxu0 %v7214_v51  ;;  %3748 = vmatprep.subr.bf16.mxu1 %v7217_v52  ;;  %v7304_v51 = vld [vmem:[%s10429_s1 + $0xae4] ss:$16 sps:$4 sm:$0xff]   ;;  %v7307_v52 = vld [vmem:[%s10429_s1 + $0xaec] ss:$16 sps:$4 sm:$0xff]  }
 0x123   :  { %3405 = vmatpush1.bf16.msra.mxu0 %v7212_v53  ;;  %3749 = vmatpush1.bf16.msra.mxu1 %v7215_v54  ;;  %v7302_v53 = vld [vmem:[%s10429_s1 + $0xae0] ss:$16 sps:$4 sm:$0xff]   ;;  %v7305_v54 = vld [vmem:[%s10429_s1 + $0xae8] ss:$16 sps:$4 sm:$0xff]  }
 0x124   :  { %3406 = vmatprep.subr.bf16.mxu0 %v7220_v55  ;;  %3750 = vmatprep.subr.bf16.mxu1 %v7223_v56  ;;  %v7310_v55 = vld [vmem:[%s10429_s1 + $0xb04] ss:$16 sps:$4 sm:$0xff]   ;;  %v7313_v56 = vld [vmem:[%s10429_s1 + $0xb0c] ss:$16 sps:$4 sm:$0xff]  }
 0x127   :  { %3407 = vmatpush1.bf16.msra.mxu0 %v7218_v57  ;;  %3751 = vmatpush1.bf16.msra.mxu1 %v7221_v58  ;;  %v7308_v57 = vld [vmem:[%s10429_s1 + $0xb00] ss:$16 sps:$4 sm:$0xff]   ;;  %v7311_v58 = vld [vmem:[%s10429_s1 + $0xb08] ss:$16 sps:$4 sm:$0xff]  }
 0x128   :  { %3408 = vmatprep.subr.bf16.mxu0 %v7226_v59  ;;  %3752 = vmatprep.subr.bf16.mxu1 %v7229_v60  ;;  %v7316_v59 = vld [vmem:[%s10429_s1 + $0xb24] ss:$16 sps:$4 sm:$0xff]   ;;  %v7319_v60 = vld [vmem:[%s10429_s1 + $0xb2c] ss:$16 sps:$4 sm:$0xff]  }
 0x12b   :  { %3409 = vmatpush1.bf16.msra.mxu0 %v7224_v61  ;;  %3753 = vmatpush1.bf16.msra.mxu1 %v7227_v62  ;;  %v7314_v61 = vld [vmem:[%s10429_s1 + $0xb20] ss:$16 sps:$4 sm:$0xff]   ;;  %v7317_v62 = vld [vmem:[%s10429_s1 + $0xb28] ss:$16 sps:$4 sm:$0xff]  }
 0x12c   :  { %3410 = vmatprep.subr.bf16.mxu0 %v7232_v63  ;;  %3754 = vmatprep.subr.bf16.mxu1 %v7235_v0  ;;  %v7322_v63 = vld [vmem:[%s10429_s1 + $0xb44] ss:$16 sps:$4 sm:$0xff]   ;;  %v7325_v0 = vld [vmem:[%s10429_s1 + $0xb4c] ss:$16 sps:$4 sm:$0xff]  }
 0x12f   :  { %3411 = vmatpush1.bf16.msra.mxu0 %v7230_v1  ;;  %3755 = vmatpush1.bf16.msra.mxu1 %v7233_v2  ;;  %v7320_v1 = vld [vmem:[%s10429_s1 + $0xb40] ss:$16 sps:$4 sm:$0xff]   ;;  %v7323_v2 = vld [vmem:[%s10429_s1 + $0xb48] ss:$16 sps:$4 sm:$0xff]  }
 0x130   :  { %3412 = vmatprep.subr.bf16.mxu0 %v7238_v3  ;;  %3756 = vmatprep.subr.bf16.mxu1 %v7241_v4  ;;  %v7328_v3 = vld [vmem:[%s10429_s1 + $0xb64] ss:$16 sps:$4 sm:$0xff]   ;;  %v7331_v4 = vld [vmem:[%s10429_s1 + $0xb6c] ss:$16 sps:$4 sm:$0xff]  }
 0x133   :  { %3413 = vmatpush1.bf16.msra.mxu0 %v7236_v5  ;;  %3757 = vmatpush1.bf16.msra.mxu1 %v7239_v6  ;;  %v7326_v5 = vld [vmem:[%s10429_s1 + $0xb60] ss:$16 sps:$4 sm:$0xff]   ;;  %v7329_v6 = vld [vmem:[%s10429_s1 + $0xb68] ss:$16 sps:$4 sm:$0xff]  }
 0x134   :  { %3414 = vmatprep.subr.bf16.mxu0 %v7244_v7  ;;  %3758 = vmatprep.subr.bf16.mxu1 %v7247_v8  ;;  %v7334_v7 = vld [vmem:[%s10429_s1 + $0xb84] ss:$16 sps:$4 sm:$0xff]   ;;  %v7337_v8 = vld [vmem:[%s10429_s1 + $0xb8c] ss:$16 sps:$4 sm:$0xff]  }
 0x137   :  { %3415 = vmatpush1.bf16.msra.mxu0 %v7242_v9  ;;  %3759 = vmatpush1.bf16.msra.mxu1 %v7245_v10  ;;  %v7332_v9 = vld [vmem:[%s10429_s1 + $0xb80] ss:$16 sps:$4 sm:$0xff]   ;;  %v7335_v10 = vld [vmem:[%s10429_s1 + $0xb88] ss:$16 sps:$4 sm:$0xff]  }
 0x138   :  { %3416 = vmatprep.subr.bf16.mxu0 %v7250_v11  ;;  %3760 = vmatprep.subr.bf16.mxu1 %v7253_v12  ;;  %v7340_v11 = vld [vmem:[%s10429_s1 + $0xba4] ss:$16 sps:$4 sm:$0xff]   ;;  %v7343_v12 = vld [vmem:[%s10429_s1 + $0xbac] ss:$16 sps:$4 sm:$0xff]  }
 0x13b   :  { %3417 = vmatpush1.bf16.msra.mxu0 %v7248_v13  ;;  %3761 = vmatpush1.bf16.msra.mxu1 %v7251_v16  ;;  %v7338_v13 = vld [vmem:[%s10429_s1 + $0xba0] ss:$16 sps:$4 sm:$0xff]   ;;  %v7341_v16 = vld [vmem:[%s10429_s1 + $0xba8] ss:$16 sps:$4 sm:$0xff]  }
 0x13c   :  { %3418 = vmatprep.subr.bf16.mxu0 %v7256_v17  ;;  %3762 = vmatprep.subr.bf16.mxu1 %v7259_v20  ;;  %v7346_v17 = vld [vmem:[%s10429_s1 + $0xbc4] ss:$16 sps:$4 sm:$0xff]   ;;  %v7349_v20 = vld [vmem:[%s10429_s1 + $0xbcc] ss:$16 sps:$4 sm:$0xff]  }
 0x13f   :  { %3419 = vmatpush1.bf16.msra.mxu0 %v7254_v15  ;;  %3763 = vmatpush1.bf16.msra.mxu1 %v7257_v22  ;;  %v7344_v15 = vld [vmem:[%s10429_s1 + $0xbc0] ss:$16 sps:$4 sm:$0xff]   ;;  %v7347_v22 = vld [vmem:[%s10429_s1 + $0xbc8] ss:$16 sps:$4 sm:$0xff]  }
 0x140   :  { %3431 = vmatprep.subr.bf16.mxu0 %v7262_v23  ;;  %3775 = vmatprep.subr.bf16.mxu1 %v7265_v18  ;;  %v7352_v23 = vld [vmem:[%s10429_s1 + $0xbe4] ss:$16 sps:$4 sm:$0xff]   ;;  %v7355_v18 = vld [vmem:[%s10429_s1 + $0xbec] ss:$16 sps:$4 sm:$0xff]  }
 0x142   :  { %3421 = vmatmul.mubr.bf16.vlgmr.msra.gmra.mrb[0].mxu0 %v5900_v25  ;;  %3765 = vmatmul.mubr.bf16.vlgmr.msra.gmra.mrb[0].mxu1 %v5900_v25  ;;  %v7350_v25 = vld [vmem:[%s10429_s1 + $0xbe0] ss:$16 sps:$4 sm:$0xff]  }
 0x143   :  { %3432 = vmatpush1.bf16.msra.mxu0 %v7260_v26  ;;  %3776 = vmatpush1.bf16.msra.mxu1 %v7263_v27  ;;  %v7353_v26 = vld [vmem:[%s10429_s1 + $0xbe8] ss:$16 sps:$4 sm:$0xff]   ;;  %v7358_v27 = vld [vmem:[%s10429_s1 + $0xc04] ss:$16 sps:$4 sm:$0xff]  }
 0x144   :  { %3433 = vmatprep.subr.bf16.mxu0 %v7268_v28  ;;  %3777 = vmatprep.subr.bf16.mxu1 %v7271_v14  ;;  %v7361_v28 = vld [vmem:[%s10429_s1 + $0xc0c] ss:$16 sps:$4 sm:$0xff]   ;;  %v5902_v14 = vcombine.low %v9001_v19, %v9006_v24  ;;  %v7359_v19 = vld [vmem:[%s10429_s1 + $0xc08] ss:$16 sps:$4 sm:$0xff]   ;;  %v7364_v24 = vld [vmem:[%s10429_s1 + $0xc24] ss:$16 sps:$4 sm:$0xff]  }
 0x145   :  { %3463 = vmatprep.mubr.bf16.mxu0 %v5903_v21  ;;  %3807 = vmatprep.mubr.bf16.mxu1 %v5903_v21  ;;  %v9209_v21 = vld [vmem:[%s10430_s0 + $0x30] sm:$0xff] }
 0x147   :  { %3434 = vmatpush1.bf16.msra.mxu0 %v7266_v29  ;;  %3778 = vmatpush1.bf16.msra.mxu1 %v7269_v30  ;;  %v9214_v29 = vld [vmem:[%s10430_s0 + $0x70] sm:$0xff] }
 0x148   :  { %3435 = vmatprep.subr.bf16.mxu0 %v7274_v31  ;;  %3779 = vmatprep.subr.bf16.mxu1 %v7277_v32  ;;  %v7356_v30 = vld [vmem:[%s10429_s1 + $0xc00] ss:$16 sps:$4 sm:$0xff]   ;;  %v7367_v31 = vld [vmem:[%s10429_s1 + $0xc2c] ss:$16 sps:$4 sm:$0xff]   ;;  %v5905_v32 = vcombine.high %v9209_v21, %v9214_v29 }
 0x14b   :  { %3436 = vmatpush1.bf16.msra.mxu0 %v7272_v33  ;;  %3780 = vmatpush1.bf16.msra.mxu1 %v7275_v34  ;;  %v7362_v33 = vld [vmem:[%s10429_s1 + $0xc20] ss:$16 sps:$4 sm:$0xff]   ;;  %v7365_v34 = vld [vmem:[%s10429_s1 + $0xc28] ss:$16 sps:$4 sm:$0xff]  }
 0x14c   :  { %3437 = vmatprep.subr.bf16.mxu0 %v7280_v35  ;;  %3781 = vmatprep.subr.bf16.mxu1 %v7283_v36  ;;  %v7370_v35 = vld [vmem:[%s10429_s1 + $0xc44] ss:$16 sps:$4 sm:$0xff]   ;;  %v7373_v36 = vld [vmem:[%s10429_s1 + $0xc4c] ss:$16 sps:$4 sm:$0xff]  }
 0x14f   :  { %3438 = vmatpush1.bf16.msra.mxu0 %v7278_v37  ;;  %3782 = vmatpush1.bf16.msra.mxu1 %v7281_v38  ;;  %v7368_v37 = vld [vmem:[%s10429_s1 + $0xc40] ss:$16 sps:$4 sm:$0xff]   ;;  %v7371_v38 = vld [vmem:[%s10429_s1 + $0xc48] ss:$16 sps:$4 sm:$0xff]  }
 0x150   :  { %3439 = vmatprep.subr.bf16.mxu0 %v7286_v39  ;;  %3783 = vmatprep.subr.bf16.mxu1 %v7289_v40  ;;  %v7376_v39 = vld [vmem:[%s10429_s1 + $0xc64] ss:$16 sps:$4 sm:$0xff]   ;;  %v7379_v40 = vld [vmem:[%s10429_s1 + $0xc6c] ss:$16 sps:$4 sm:$0xff]  }
 0x153   :  { %3440 = vmatpush1.bf16.msra.mxu0 %v7284_v41  ;;  %3784 = vmatpush1.bf16.msra.mxu1 %v7287_v42  ;;  %v7374_v41 = vld [vmem:[%s10429_s1 + $0xc60] ss:$16 sps:$4 sm:$0xff]   ;;  %v7377_v42 = vld [vmem:[%s10429_s1 + $0xc68] ss:$16 sps:$4 sm:$0xff]  }
 0x154   :  { %3441 = vmatprep.subr.bf16.mxu0 %v7292_v43  ;;  %3785 = vmatprep.subr.bf16.mxu1 %v7295_v44  ;;  %v7382_v43 = vld [vmem:[%s10429_s1 + $0xc84] ss:$16 sps:$4 sm:$0xff]   ;;  %v7385_v44 = vld [vmem:[%s10429_s1 + $0xc8c] ss:$16 sps:$4 sm:$0xff]  }
 0x157   :  { %3442 = vmatpush1.bf16.msra.mxu0 %v7290_v45  ;;  %3786 = vmatpush1.bf16.msra.mxu1 %v7293_v46  ;;  %v7380_v45 = vld [vmem:[%s10429_s1 + $0xc80] ss:$16 sps:$4 sm:$0xff]   ;;  %v7383_v46 = vld [vmem:[%s10429_s1 + $0xc88] ss:$16 sps:$4 sm:$0xff]  }
 0x158   :  { %3443 = vmatprep.subr.bf16.mxu0 %v7298_v47  ;;  %3787 = vmatprep.subr.bf16.mxu1 %v7301_v48  ;;  %v7388_v47 = vld [vmem:[%s10429_s1 + $0xca4] ss:$16 sps:$4 sm:$0xff]   ;;  %v7391_v48 = vld [vmem:[%s10429_s1 + $0xcac] ss:$16 sps:$4 sm:$0xff]  }
 0x15b   :  { %3444 = vmatpush1.bf16.msra.mxu0 %v7296_v49  ;;  %3788 = vmatpush1.bf16.msra.mxu1 %v7299_v50  ;;  %v7386_v49 = vld [vmem:[%s10429_s1 + $0xca0] ss:$16 sps:$4 sm:$0xff]   ;;  %v7389_v50 = vld [vmem:[%s10429_s1 + $0xca8] ss:$16 sps:$4 sm:$0xff]  }
 0x15c   :  { %3445 = vmatprep.subr.bf16.mxu0 %v7304_v51  ;;  %3789 = vmatprep.subr.bf16.mxu1 %v7307_v52  ;;  %v7394_v51 = vld [vmem:[%s10429_s1 + $0xcc4] ss:$16 sps:$4 sm:$0xff]   ;;  %v7397_v52 = vld [vmem:[%s10429_s1 + $0xccc] ss:$16 sps:$4 sm:$0xff]  }
 0x15f   :  { %3446 = vmatpush1.bf16.msra.mxu0 %v7302_v53  ;;  %3790 = vmatpush1.bf16.msra.mxu1 %v7305_v54  ;;  %v7392_v53 = vld [vmem:[%s10429_s1 + $0xcc0] ss:$16 sps:$4 sm:$0xff]   ;;  %v7395_v54 = vld [vmem:[%s10429_s1 + $0xcc8] ss:$16 sps:$4 sm:$0xff]  }
 0x160   :  { %3447 = vmatprep.subr.bf16.mxu0 %v7310_v55  ;;  %3791 = vmatprep.subr.bf16.mxu1 %v7313_v56  ;;  %v7400_v55 = vld [vmem:[%s10429_s1 + $0xce4] ss:$16 sps:$4 sm:$0xff]   ;;  %v7403_v56 = vld [vmem:[%s10429_s1 + $0xcec] ss:$16 sps:$4 sm:$0xff]  }
 0x163   :  { %3448 = vmatpush1.bf16.msra.mxu0 %v7308_v57  ;;  %3792 = vmatpush1.bf16.msra.mxu1 %v7311_v58  ;;  %v7398_v57 = vld [vmem:[%s10429_s1 + $0xce0] ss:$16 sps:$4 sm:$0xff]   ;;  %v7401_v58 = vld [vmem:[%s10429_s1 + $0xce8] ss:$16 sps:$4 sm:$0xff]  }
 0x164   :  { %3449 = vmatprep.subr.bf16.mxu0 %v7316_v59  ;;  %3793 = vmatprep.subr.bf16.mxu1 %v7319_v60  ;;  %v7406_v59 = vld [vmem:[%s10429_s1 + $0xd04] ss:$16 sps:$4 sm:$0xff]   ;;  %v7409_v60 = vld [vmem:[%s10429_s1 + $0xd0c] ss:$16 sps:$4 sm:$0xff]  }
 0x167   :  { %3450 = vmatpush1.bf16.msra.mxu0 %v7314_v61  ;;  %3794 = vmatpush1.bf16.msra.mxu1 %v7317_v62  ;;  %v7404_v61 = vld [vmem:[%s10429_s1 + $0xd00] ss:$16 sps:$4 sm:$0xff]   ;;  %v7407_v62 = vld [vmem:[%s10429_s1 + $0xd08] ss:$16 sps:$4 sm:$0xff]  }
 0x168   :  { %3451 = vmatprep.subr.bf16.mxu0 %v7322_v63  ;;  %3795 = vmatprep.subr.bf16.mxu1 %v7325_v0  ;;  %v7412_v63 = vld [vmem:[%s10429_s1 + $0xd24] ss:$16 sps:$4 sm:$0xff]   ;;  %v7415_v0 = vld [vmem:[%s10429_s1 + $0xd2c] ss:$16 sps:$4 sm:$0xff]  }
 0x16b   :  { %3452 = vmatpush1.bf16.msra.mxu0 %v7320_v1  ;;  %3796 = vmatpush1.bf16.msra.mxu1 %v7323_v2  ;;  %v7410_v1 = vld [vmem:[%s10429_s1 + $0xd20] ss:$16 sps:$4 sm:$0xff]   ;;  %v7413_v2 = vld [vmem:[%s10429_s1 + $0xd28] ss:$16 sps:$4 sm:$0xff]  }
 0x16c   :  { %3453 = vmatprep.subr.bf16.mxu0 %v7328_v3  ;;  %3797 = vmatprep.subr.bf16.mxu1 %v7331_v4  ;;  %v7418_v3 = vld [vmem:[%s10429_s1 + $0xd44] ss:$16 sps:$4 sm:$0xff]   ;;  %v7421_v4 = vld [vmem:[%s10429_s1 + $0xd4c] ss:$16 sps:$4 sm:$0xff]  }
 0x16f   :  { %3454 = vmatpush1.bf16.msra.mxu0 %v7326_v5  ;;  %3798 = vmatpush1.bf16.msra.mxu1 %v7329_v6  ;;  %v7416_v5 = vld [vmem:[%s10429_s1 + $0xd40] ss:$16 sps:$4 sm:$0xff]   ;;  %v7419_v6 = vld [vmem:[%s10429_s1 + $0xd48] ss:$16 sps:$4 sm:$0xff]  }
 0x170   :  { %3455 = vmatprep.subr.bf16.mxu0 %v7334_v7  ;;  %3799 = vmatprep.subr.bf16.mxu1 %v7337_v8  ;;  %v7424_v7 = vld [vmem:[%s10429_s1 + $0xd64] ss:$16 sps:$4 sm:$0xff]   ;;  %v7427_v8 = vld [vmem:[%s10429_s1 + $0xd6c] ss:$16 sps:$4 sm:$0xff]  }
 0x173   :  { %3456 = vmatpush1.bf16.msra.mxu0 %v7332_v9  ;;  %3800 = vmatpush1.bf16.msra.mxu1 %v7335_v10  ;;  %v7422_v9 = vld [vmem:[%s10429_s1 + $0xd60] ss:$16 sps:$4 sm:$0xff]   ;;  %v7425_v10 = vld [vmem:[%s10429_s1 + $0xd68] ss:$16 sps:$4 sm:$0xff]  }
 0x174   :  { %3457 = vmatprep.subr.bf16.mxu0 %v7340_v11  ;;  %3801 = vmatprep.subr.bf16.mxu1 %v7343_v12  ;;  %v7430_v11 = vld [vmem:[%s10429_s1 + $0xd84] ss:$16 sps:$4 sm:$0xff]   ;;  %v7433_v12 = vld [vmem:[%s10429_s1 + $0xd8c] ss:$16 sps:$4 sm:$0xff]  }
 0x177   :  { %3458 = vmatpush1.bf16.msra.mxu0 %v7338_v13  ;;  %3802 = vmatpush1.bf16.msra.mxu1 %v7341_v16  ;;  %v7428_v13 = vld [vmem:[%s10429_s1 + $0xd80] ss:$16 sps:$4 sm:$0xff]   ;;  %v7431_v16 = vld [vmem:[%s10429_s1 + $0xd88] ss:$16 sps:$4 sm:$0xff]  }
 0x178   :  { %3459 = vmatprep.subr.bf16.mxu0 %v7346_v17  ;;  %3803 = vmatprep.subr.bf16.mxu1 %v7349_v20  ;;  %v7436_v17 = vld [vmem:[%s10429_s1 + $0xda4] ss:$16 sps:$4 sm:$0xff]   ;;  %v7439_v20 = vld [vmem:[%s10429_s1 + $0xdac] ss:$16 sps:$4 sm:$0xff]  }
 0x17b   :  { %3460 = vmatpush1.bf16.msra.mxu0 %v7344_v15  ;;  %3804 = vmatpush1.bf16.msra.mxu1 %v7347_v22  ;;  %v7434_v15 = vld [vmem:[%s10429_s1 + $0xda0] ss:$16 sps:$4 sm:$0xff]   ;;  %v7437_v22 = vld [vmem:[%s10429_s1 + $0xda8] ss:$16 sps:$4 sm:$0xff]  }
 0x17c   :  { %3461 = vmatprep.subr.bf16.mxu0 %v7352_v23  ;;  %3805 = vmatprep.subr.bf16.mxu1 %v7355_v18  ;;  %v7442_v23 = vld [vmem:[%s10429_s1 + $0xdc4] ss:$16 sps:$4 sm:$0xff]   ;;  %v7445_v18 = vld [vmem:[%s10429_s1 + $0xdcc] ss:$16 sps:$4 sm:$0xff]  }
 0x17f   :  { %3462 = vmatpush1.bf16.msra.mxu0 %v7350_v25  ;;  %3806 = vmatpush1.bf16.msra.mxu1 %v7353_v26  ;;  %v7440_v25 = vld [vmem:[%s10429_s1 + $0xdc0] ss:$16 sps:$4 sm:$0xff]   ;;  %v7443_v26 = vld [vmem:[%s10429_s1 + $0xdc8] ss:$16 sps:$4 sm:$0xff]  }
 0x180   :  { %3474 = vmatprep.subr.bf16.mxu0 %v7358_v27  ;;  %3818 = vmatprep.subr.bf16.mxu1 %v7361_v28  ;;  %v7448_v27 = vld [vmem:[%s10429_s1 + $0xde4] ss:$16 sps:$4 sm:$0xff]   ;;  %v7451_v28 = vld [vmem:[%s10429_s1 + $0xdec] ss:$16 sps:$4 sm:$0xff]  }
 0x182   :  { %3464 = vmatmul.mubr.bf16.vlgmr.msra.gmra.mrb[0].mxu0 %v5902_v14  ;;  %3808 = vmatmul.mubr.bf16.vlgmr.msra.gmra.mrb[0].mxu1 %v5902_v14  ;;  %v7446_v14 = vld [vmem:[%s10429_s1 + $0xde0] ss:$16 sps:$4 sm:$0xff]  }
 0x183   :  { %3475 = vmatpush1.bf16.msra.mxu0 %v7356_v30  ;;  %3819 = vmatpush1.bf16.msra.mxu1 %v7359_v19  ;;  %v7449_v30 = vld [vmem:[%s10429_s1 + $0xde8] ss:$16 sps:$4 sm:$0xff]   ;;  %v7454_v19 = vld [vmem:[%s10429_s1 + $0xe04] ss:$16 sps:$4 sm:$0xff]  }
 0x184   :  { %3476 = vmatprep.subr.bf16.mxu0 %v7364_v24  ;;  %3820 = vmatprep.subr.bf16.mxu1 %v7367_v31  ;;  %v7457_v24 = vld [vmem:[%s10429_s1 + $0xe0c] ss:$16 sps:$4 sm:$0xff]  }
 0x185   :  { %3506 = vmatprep.mubr.bf16.mxu0 %v5905_v32  ;;  %3850 = vmatprep.mubr.bf16.mxu1 %v5905_v32  ;;  %v9413_v31 = vld [vmem:[%s10430_s0 + $0x38] sm:$0xff] }
 0x186   :  { %v9418_v32 = vld [vmem:[%s10430_s0 + $0x78] sm:$0xff] }
 0x187   :  { %3477 = vmatpush1.bf16.msra.mxu0 %v7362_v33  ;;  %3821 = vmatpush1.bf16.msra.mxu1 %v7365_v34  ;;  %v7452_v33 = vld [vmem:[%s10429_s1 + $0xe00] ss:$16 sps:$4 sm:$0xff]   ;;  %v7455_v34 = vld [vmem:[%s10429_s1 + $0xe08] ss:$16 sps:$4 sm:$0xff]  }
 0x188   :  { %3478 = vmatprep.subr.bf16.mxu0 %v7370_v35  ;;  %3822 = vmatprep.subr.bf16.mxu1 %v7373_v36  ;;  %v5904_v35 = vcombine.low %v9209_v21, %v9214_v29  ;;  %v7460_v36 = vld [vmem:[%s10429_s1 + $0xe24] ss:$16 sps:$4 sm:$0xff]   ;;  %v7458_v21 = vld [vmem:[%s10429_s1 + $0xe20] ss:$16 sps:$4 sm:$0xff]   ;;  %v7461_v29 = vld [vmem:[%s10429_s1 + $0xe28] ss:$16 sps:$4 sm:$0xff]  }
 0x18b   :  { %3479 = vmatpush1.bf16.msra.mxu0 %v7368_v37  ;;  %3823 = vmatpush1.bf16.msra.mxu1 %v7371_v38  ;;  %v7463_v37 = vld [vmem:[%s10429_s1 + $0xe2c] ss:$16 sps:$4 sm:$0xff]   ;;  %v5907_v38 = vcombine.high %v9413_v31, %v9418_v32 }
 0x18c   :  { %3480 = vmatprep.subr.bf16.mxu0 %v7376_v39  ;;  %3824 = vmatprep.subr.bf16.mxu1 %v7379_v40  ;;  %v7466_v39 = vld [vmem:[%s10429_s1 + $0xe44] ss:$16 sps:$4 sm:$0xff]   ;;  %v7469_v40 = vld [vmem:[%s10429_s1 + $0xe4c] ss:$16 sps:$4 sm:$0xff]  }
 0x18f   :  { %3481 = vmatpush1.bf16.msra.mxu0 %v7374_v41  ;;  %3825 = vmatpush1.bf16.msra.mxu1 %v7377_v42  ;;  %v7464_v41 = vld [vmem:[%s10429_s1 + $0xe40] ss:$16 sps:$4 sm:$0xff]   ;;  %v7467_v42 = vld [vmem:[%s10429_s1 + $0xe48] ss:$16 sps:$4 sm:$0xff]  }
 0x190   :  { %3482 = vmatprep.subr.bf16.mxu0 %v7382_v43  ;;  %3826 = vmatprep.subr.bf16.mxu1 %v7385_v44  ;;  %v7472_v43 = vld [vmem:[%s10429_s1 + $0xe64] ss:$16 sps:$4 sm:$0xff]   ;;  %v7475_v44 = vld [vmem:[%s10429_s1 + $0xe6c] ss:$16 sps:$4 sm:$0xff]  }
 0x193   :  { %3483 = vmatpush1.bf16.msra.mxu0 %v7380_v45  ;;  %3827 = vmatpush1.bf16.msra.mxu1 %v7383_v46  ;;  %v7470_v45 = vld [vmem:[%s10429_s1 + $0xe60] ss:$16 sps:$4 sm:$0xff]   ;;  %v7473_v46 = vld [vmem:[%s10429_s1 + $0xe68] ss:$16 sps:$4 sm:$0xff]  }
 0x194   :  { %3484 = vmatprep.subr.bf16.mxu0 %v7388_v47  ;;  %3828 = vmatprep.subr.bf16.mxu1 %v7391_v48  ;;  %v7478_v47 = vld [vmem:[%s10429_s1 + $0xe84] ss:$16 sps:$4 sm:$0xff]   ;;  %v7481_v48 = vld [vmem:[%s10429_s1 + $0xe8c] ss:$16 sps:$4 sm:$0xff]  }
 0x197   :  { %3485 = vmatpush1.bf16.msra.mxu0 %v7386_v49  ;;  %3829 = vmatpush1.bf16.msra.mxu1 %v7389_v50  ;;  %v7476_v49 = vld [vmem:[%s10429_s1 + $0xe80] ss:$16 sps:$4 sm:$0xff]   ;;  %v7479_v50 = vld [vmem:[%s10429_s1 + $0xe88] ss:$16 sps:$4 sm:$0xff]  }
 0x198   :  { %3486 = vmatprep.subr.bf16.mxu0 %v7394_v51  ;;  %3830 = vmatprep.subr.bf16.mxu1 %v7397_v52  ;;  %v7484_v51 = vld [vmem:[%s10429_s1 + $0xea4] ss:$16 sps:$4 sm:$0xff]   ;;  %v7487_v52 = vld [vmem:[%s10429_s1 + $0xeac] ss:$16 sps:$4 sm:$0xff]  }
 0x19b   :  { %3487 = vmatpush1.bf16.msra.mxu0 %v7392_v53  ;;  %3831 = vmatpush1.bf16.msra.mxu1 %v7395_v54  ;;  %v7482_v53 = vld [vmem:[%s10429_s1 + $0xea0] ss:$16 sps:$4 sm:$0xff]   ;;  %v7485_v54 = vld [vmem:[%s10429_s1 + $0xea8] ss:$16 sps:$4 sm:$0xff]  }
 0x19c   :  { %3488 = vmatprep.subr.bf16.mxu0 %v7400_v55  ;;  %3832 = vmatprep.subr.bf16.mxu1 %v7403_v56  ;;  %v7490_v55 = vld [vmem:[%s10429_s1 + $0xec4] ss:$16 sps:$4 sm:$0xff]   ;;  %v7493_v56 = vld [vmem:[%s10429_s1 + $0xecc] ss:$16 sps:$4 sm:$0xff]  }
 0x19f   :  { %3489 = vmatpush1.bf16.msra.mxu0 %v7398_v57  ;;  %3833 = vmatpush1.bf16.msra.mxu1 %v7401_v58  ;;  %v7488_v57 = vld [vmem:[%s10429_s1 + $0xec0] ss:$16 sps:$4 sm:$0xff]   ;;  %v7491_v58 = vld [vmem:[%s10429_s1 + $0xec8] ss:$16 sps:$4 sm:$0xff]  }
 0x1a0   :  { %3490 = vmatprep.subr.bf16.mxu0 %v7406_v59  ;;  %3834 = vmatprep.subr.bf16.mxu1 %v7409_v60  ;;  %v7496_v59 = vld [vmem:[%s10429_s1 + $0xee4] ss:$16 sps:$4 sm:$0xff]   ;;  %v7499_v60 = vld [vmem:[%s10429_s1 + $0xeec] ss:$16 sps:$4 sm:$0xff]  }
 0x1a3   :  { %3491 = vmatpush1.bf16.msra.mxu0 %v7404_v61  ;;  %3835 = vmatpush1.bf16.msra.mxu1 %v7407_v62  ;;  %v7494_v61 = vld [vmem:[%s10429_s1 + $0xee0] ss:$16 sps:$4 sm:$0xff]   ;;  %v7497_v62 = vld [vmem:[%s10429_s1 + $0xee8] ss:$16 sps:$4 sm:$0xff]  }
 0x1a4   :  { %3492 = vmatprep.subr.bf16.mxu0 %v7412_v63  ;;  %3836 = vmatprep.subr.bf16.mxu1 %v7415_v0  ;;  %v7502_v63 = vld [vmem:[%s10429_s1 + $0xf04] ss:$16 sps:$4 sm:$0xff]   ;;  %v7505_v0 = vld [vmem:[%s10429_s1 + $0xf0c] ss:$16 sps:$4 sm:$0xff]  }
 0x1a7   :  { %3493 = vmatpush1.bf16.msra.mxu0 %v7410_v1  ;;  %3837 = vmatpush1.bf16.msra.mxu1 %v7413_v2  ;;  %v7500_v1 = vld [vmem:[%s10429_s1 + $0xf00] ss:$16 sps:$4 sm:$0xff]   ;;  %v7503_v2 = vld [vmem:[%s10429_s1 + $0xf08] ss:$16 sps:$4 sm:$0xff]  }
 0x1a8   :  { %3494 = vmatprep.subr.bf16.mxu0 %v7418_v3  ;;  %3838 = vmatprep.subr.bf16.mxu1 %v7421_v4  ;;  %v7508_v3 = vld [vmem:[%s10429_s1 + $0xf24] ss:$16 sps:$4 sm:$0xff]   ;;  %v7511_v4 = vld [vmem:[%s10429_s1 + $0xf2c] ss:$16 sps:$4 sm:$0xff]  }
 0x1ab   :  { %3495 = vmatpush1.bf16.msra.mxu0 %v7416_v5  ;;  %3839 = vmatpush1.bf16.msra.mxu1 %v7419_v6  ;;  %v7506_v5 = vld [vmem:[%s10429_s1 + $0xf20] ss:$16 sps:$4 sm:$0xff]   ;;  %v7509_v6 = vld [vmem:[%s10429_s1 + $0xf28] ss:$16 sps:$4 sm:$0xff]  }
 0x1ac   :  { %3496 = vmatprep.subr.bf16.mxu0 %v7424_v7  ;;  %3840 = vmatprep.subr.bf16.mxu1 %v7427_v8  ;;  %v7514_v7 = vld [vmem:[%s10429_s1 + $0xf44] ss:$16 sps:$4 sm:$0xff]   ;;  %v7517_v8 = vld [vmem:[%s10429_s1 + $0xf4c] ss:$16 sps:$4 sm:$0xff]  }
 0x1af   :  { %3497 = vmatpush1.bf16.msra.mxu0 %v7422_v9  ;;  %3841 = vmatpush1.bf16.msra.mxu1 %v7425_v10  ;;  %v7512_v9 = vld [vmem:[%s10429_s1 + $0xf40] ss:$16 sps:$4 sm:$0xff]   ;;  %v7515_v10 = vld [vmem:[%s10429_s1 + $0xf48] ss:$16 sps:$4 sm:$0xff]  }
 0x1b0   :  { %3498 = vmatprep.subr.bf16.mxu0 %v7430_v11  ;;  %3842 = vmatprep.subr.bf16.mxu1 %v7433_v12  ;;  %v7520_v11 = vld [vmem:[%s10429_s1 + $0xf64] ss:$16 sps:$4 sm:$0xff]   ;;  %v7523_v12 = vld [vmem:[%s10429_s1 + $0xf6c] ss:$16 sps:$4 sm:$0xff]  }
 0x1b3   :  { %3499 = vmatpush1.bf16.msra.mxu0 %v7428_v13  ;;  %3843 = vmatpush1.bf16.msra.mxu1 %v7431_v16  ;;  %v7518_v13 = vld [vmem:[%s10429_s1 + $0xf60] ss:$16 sps:$4 sm:$0xff]   ;;  %v7521_v16 = vld [vmem:[%s10429_s1 + $0xf68] ss:$16 sps:$4 sm:$0xff]  }
 0x1b4   :  { %3500 = vmatprep.subr.bf16.mxu0 %v7436_v17  ;;  %3844 = vmatprep.subr.bf16.mxu1 %v7439_v20  ;;  %v7526_v17 = vld [vmem:[%s10429_s1 + $0xf84] ss:$16 sps:$4 sm:$0xff]   ;;  %v7529_v20 = vld [vmem:[%s10429_s1 + $0xf8c] ss:$16 sps:$4 sm:$0xff]  }
 0x1b7   :  { %3501 = vmatpush1.bf16.msra.mxu0 %v7434_v15  ;;  %3845 = vmatpush1.bf16.msra.mxu1 %v7437_v22  ;;  %v7524_v15 = vld [vmem:[%s10429_s1 + $0xf80] ss:$16 sps:$4 sm:$0xff]   ;;  %v7527_v22 = vld [vmem:[%s10429_s1 + $0xf88] ss:$16 sps:$4 sm:$0xff]  }
 0x1b8   :  { %3502 = vmatprep.subr.bf16.mxu0 %v7442_v23  ;;  %3846 = vmatprep.subr.bf16.mxu1 %v7445_v18  ;;  %v7532_v23 = vld [vmem:[%s10429_s1 + $0xfa4] ss:$16 sps:$4 sm:$0xff]   ;;  %v7535_v18 = vld [vmem:[%s10429_s1 + $0xfac] ss:$16 sps:$4 sm:$0xff]  }
 0x1bb   :  { %3503 = vmatpush1.bf16.msra.mxu0 %v7440_v25  ;;  %3847 = vmatpush1.bf16.msra.mxu1 %v7443_v26  ;;  %v7530_v25 = vld [vmem:[%s10429_s1 + $0xfa0] ss:$16 sps:$4 sm:$0xff]   ;;  %v7533_v26 = vld [vmem:[%s10429_s1 + $0xfa8] ss:$16 sps:$4 sm:$0xff]  }
 0x1bc   :  { %3504 = vmatprep.subr.bf16.mxu0 %v7448_v27  ;;  %3848 = vmatprep.subr.bf16.mxu1 %v7451_v28  ;;  %v7538_v27 = vld [vmem:[%s10429_s1 + $0xfc4] ss:$16 sps:$4 sm:$0xff]   ;;  %v7541_v28 = vld [vmem:[%s10429_s1 + $0xfcc] ss:$16 sps:$4 sm:$0xff]  }
 0x1bf   :  { %3505 = vmatpush1.bf16.msra.mxu0 %v7446_v14  ;;  %3849 = vmatpush1.bf16.msra.mxu1 %v7449_v30  ;;  %v7536_v14 = vld [vmem:[%s10429_s1 + $0xfc0] ss:$16 sps:$4 sm:$0xff]   ;;  %v7539_v30 = vld [vmem:[%s10429_s1 + $0xfc8] ss:$16 sps:$4 sm:$0xff]  }
 0x1c0   :  { %3517 = vmatprep.subr.bf16.mxu0 %v7454_v19  ;;  %3861 = vmatprep.subr.bf16.mxu1 %v7457_v24  ;;  %v7544_v19 = vld [vmem:[%s10429_s1 + $0xfe4] ss:$16 sps:$4 sm:$0xff]   ;;  %v7547_v24 = vld [vmem:[%s10429_s1 + $0xfec] ss:$16 sps:$4 sm:$0xff]  }
 0x1c2   :  { %3507 = vmatmul.mubr.bf16.vlgmr.msra.gmra.mrb[0].mxu0 %v5904_v35  ;;  %3851 = vmatmul.mubr.bf16.vlgmr.msra.gmra.mrb[0].mxu1 %v5904_v35  ;;  %v7550_v35 = vld [vmem:[%s10431_s3 + $0x4] ss:$16 sps:$4 sm:$0xff]  }
 0x1c3   :  { %3518 = vmatpush1.bf16.msra.mxu0 %v7452_v33  ;;  %3862 = vmatpush1.bf16.msra.mxu1 %v7455_v34  ;;  %v7542_v33 = vld [vmem:[%s10429_s1 + $0xfe0] ss:$16 sps:$4 sm:$0xff]   ;;  %v7545_v34 = vld [vmem:[%s10429_s1 + $0xfe8] ss:$16 sps:$4 sm:$0xff]  }
 0x1c4   :  { %3519 = vmatprep.subr.bf16.mxu0 %v7460_v36  ;;  %3863 = vmatprep.subr.bf16.mxu1 %v7463_v37  ;;  %v7553_v36 = vld [vmem:[%s10431_s3 + $0xc] ss:$16 sps:$4 sm:$0xff]   ;;  %v5906_v37 = vcombine.low %v9413_v31, %v9418_v32  ;;  %v7554_v32 = vld [vmem:[%s10431_s3 + $0x20] ss:$16 sps:$4 sm:$0xff]  }
 0x1c5   :  { %3549 = vmatprep.mubr.bf16.mxu0 %v5907_v38  ;;  %3893 = vmatprep.mubr.bf16.mxu1 %v5907_v38  ;;  %v7548_v38 = vld [vmem:[%s10431_s3] ss:$16 sps:$4 sm:$0xff]   ;;  %v7559_v31 = vld [vmem:[%s10431_s3 + $0x2c] ss:$16 sps:$4 sm:$0xff]  }
 0x1c7   :  { %3520 = vmatpush1.bf16.msra.mxu0 %v7458_v21  ;;  %3864 = vmatpush1.bf16.msra.mxu1 %v7461_v29  ;;  %v7551_v21 = vld [vmem:[%s10431_s3 + $0x8] ss:$16 sps:$4 sm:$0xff]   ;;  %v7556_v29 = vld [vmem:[%s10431_s3 + $0x24] ss:$16 sps:$4 sm:$0xff]  }
 0x1c8   :  { %3521 = vmatprep.subr.bf16.mxu0 %v7466_v39  ;;  %3865 = vmatprep.subr.bf16.mxu1 %v7469_v40  ;;  %v7557_v39 = vld [vmem:[%s10431_s3 + $0x28] ss:$16 sps:$4 sm:$0xff]   ;;  %v7562_v40 = vld [vmem:[%s10431_s3 + $0x44] ss:$16 sps:$4 sm:$0xff]  }
 0x1cb   :  { %3522 = vmatpush1.bf16.msra.mxu0 %v7464_v41  ;;  %3866 = vmatpush1.bf16.msra.mxu1 %v7467_v42  ;;  %v7565_v41 = vld [vmem:[%s10431_s3 + $0x4c] ss:$16 sps:$4 sm:$0xff]   ;;  %v7560_v42 = vld [vmem:[%s10431_s3 + $0x40] ss:$16 sps:$4 sm:$0xff]  }
 0x1cc   :  { %3523 = vmatprep.subr.bf16.mxu0 %v7472_v43  ;;  %3867 = vmatprep.subr.bf16.mxu1 %v7475_v44  ;;  %v7563_v43 = vld [vmem:[%s10431_s3 + $0x48] ss:$16 sps:$4 sm:$0xff]   ;;  %v7568_v44 = vld [vmem:[%s10431_s3 + $0x64] ss:$16 sps:$4 sm:$0xff]  }
 0x1cf   :  { %3524 = vmatpush1.bf16.msra.mxu0 %v7470_v45  ;;  %3868 = vmatpush1.bf16.msra.mxu1 %v7473_v46  ;;  %v7571_v45 = vld [vmem:[%s10431_s3 + $0x6c] ss:$16 sps:$4 sm:$0xff]   ;;  %v7566_v46 = vld [vmem:[%s10431_s3 + $0x60] ss:$16 sps:$4 sm:$0xff]  }
 0x1d0   :  { %3525 = vmatprep.subr.bf16.mxu0 %v7478_v47  ;;  %3869 = vmatprep.subr.bf16.mxu1 %v7481_v48  ;;  %v7569_v47 = vld [vmem:[%s10431_s3 + $0x68] ss:$16 sps:$4 sm:$0xff]   ;;  %v7574_v48 = vld [vmem:[%s10431_s3 + $0x84] ss:$16 sps:$4 sm:$0xff]  }
 0x1d3   :  { %3526 = vmatpush1.bf16.msra.mxu0 %v7476_v49  ;;  %3870 = vmatpush1.bf16.msra.mxu1 %v7479_v50  ;;  %v7577_v49 = vld [vmem:[%s10431_s3 + $0x8c] ss:$16 sps:$4 sm:$0xff]   ;;  %v7572_v50 = vld [vmem:[%s10431_s3 + $0x80] ss:$16 sps:$4 sm:$0xff]  }
 0x1d4   :  { %3527 = vmatprep.subr.bf16.mxu0 %v7484_v51  ;;  %3871 = vmatprep.subr.bf16.mxu1 %v7487_v52  ;;  %v7575_v51 = vld [vmem:[%s10431_s3 + $0x88] ss:$16 sps:$4 sm:$0xff]   ;;  %v7580_v52 = vld [vmem:[%s10431_s3 + $0xa4] ss:$16 sps:$4 sm:$0xff]  }
 0x1d7   :  { %3528 = vmatpush1.bf16.msra.mxu0 %v7482_v53  ;;  %3872 = vmatpush1.bf16.msra.mxu1 %v7485_v54  ;;  %v7583_v53 = vld [vmem:[%s10431_s3 + $0xac] ss:$16 sps:$4 sm:$0xff]   ;;  %v7578_v54 = vld [vmem:[%s10431_s3 + $0xa0] ss:$16 sps:$4 sm:$0xff]  }
 0x1d8   :  { %3529 = vmatprep.subr.bf16.mxu0 %v7490_v55  ;;  %3873 = vmatprep.subr.bf16.mxu1 %v7493_v56  ;;  %v7581_v55 = vld [vmem:[%s10431_s3 + $0xa8] ss:$16 sps:$4 sm:$0xff]   ;;  %v7586_v56 = vld [vmem:[%s10431_s3 + $0xc4] ss:$16 sps:$4 sm:$0xff]  }
 0x1db   :  { %3530 = vmatpush1.bf16.msra.mxu0 %v7488_v57  ;;  %3874 = vmatpush1.bf16.msra.mxu1 %v7491_v58  ;;  %v7589_v57 = vld [vmem:[%s10431_s3 + $0xcc] ss:$16 sps:$4 sm:$0xff]   ;;  %v7584_v58 = vld [vmem:[%s10431_s3 + $0xc0] ss:$16 sps:$4 sm:$0xff]  }
 0x1dc   :  { %3531 = vmatprep.subr.bf16.mxu0 %v7496_v59  ;;  %3875 = vmatprep.subr.bf16.mxu1 %v7499_v60  ;;  %v7587_v59 = vld [vmem:[%s10431_s3 + $0xc8] ss:$16 sps:$4 sm:$0xff]   ;;  %v7592_v60 = vld [vmem:[%s10431_s3 + $0xe4] ss:$16 sps:$4 sm:$0xff]  }
 0x1df   :  { %3532 = vmatpush1.bf16.msra.mxu0 %v7494_v61  ;;  %3876 = vmatpush1.bf16.msra.mxu1 %v7497_v62  ;;  %v7595_v61 = vld [vmem:[%s10431_s3 + $0xec] ss:$16 sps:$4 sm:$0xff]   ;;  %v7590_v62 = vld [vmem:[%s10431_s3 + $0xe0] ss:$16 sps:$4 sm:$0xff]  }
 0x1e0   :  { %3533 = vmatprep.subr.bf16.mxu0 %v7502_v63  ;;  %3877 = vmatprep.subr.bf16.mxu1 %v7505_v0  ;;  %v7593_v63 = vld [vmem:[%s10431_s3 + $0xe8] ss:$16 sps:$4 sm:$0xff]   ;;  %v7598_v0 = vld [vmem:[%s10431_s3 + $0x104] ss:$16 sps:$4 sm:$0xff]  }
 0x1e3   :  { %3534 = vmatpush1.bf16.msra.mxu0 %v7500_v1  ;;  %3878 = vmatpush1.bf16.msra.mxu1 %v7503_v2  ;;  %v7601_v1 = vld [vmem:[%s10431_s3 + $0x10c] ss:$16 sps:$4 sm:$0xff]   ;;  %v7596_v2 = vld [vmem:[%s10431_s3 + $0x100] ss:$16 sps:$4 sm:$0xff]  }
 0x1e4   :  { %3535 = vmatprep.subr.bf16.mxu0 %v7508_v3  ;;  %3879 = vmatprep.subr.bf16.mxu1 %v7511_v4  ;;  %v7599_v3 = vld [vmem:[%s10431_s3 + $0x108] ss:$16 sps:$4 sm:$0xff]   ;;  %v7604_v4 = vld [vmem:[%s10431_s3 + $0x124] ss:$16 sps:$4 sm:$0xff]  }
 0x1e7   :  { %3536 = vmatpush1.bf16.msra.mxu0 %v7506_v5  ;;  %3880 = vmatpush1.bf16.msra.mxu1 %v7509_v6  ;;  %v7607_v5 = vld [vmem:[%s10431_s3 + $0x12c] ss:$16 sps:$4 sm:$0xff]   ;;  %v7602_v6 = vld [vmem:[%s10431_s3 + $0x120] ss:$16 sps:$4 sm:$0xff]  }
 0x1e8   :  { %3537 = vmatprep.subr.bf16.mxu0 %v7514_v7  ;;  %3881 = vmatprep.subr.bf16.mxu1 %v7517_v8  ;;  %v7605_v7 = vld [vmem:[%s10431_s3 + $0x128] ss:$16 sps:$4 sm:$0xff]   ;;  %v7610_v8 = vld [vmem:[%s10431_s3 + $0x144] ss:$16 sps:$4 sm:$0xff]  }
 0x1eb   :  { %3538 = vmatpush1.bf16.msra.mxu0 %v7512_v9  ;;  %3882 = vmatpush1.bf16.msra.mxu1 %v7515_v10  ;;  %v7613_v9 = vld [vmem:[%s10431_s3 + $0x14c] ss:$16 sps:$4 sm:$0xff]   ;;  %v7608_v10 = vld [vmem:[%s10431_s3 + $0x140] ss:$16 sps:$4 sm:$0xff]  }
 0x1ec   :  { %3539 = vmatprep.subr.bf16.mxu0 %v7520_v11  ;;  %3883 = vmatprep.subr.bf16.mxu1 %v7523_v12  ;;  %v7611_v11 = vld [vmem:[%s10431_s3 + $0x148] ss:$16 sps:$4 sm:$0xff]   ;;  %v7616_v12 = vld [vmem:[%s10431_s3 + $0x164] ss:$16 sps:$4 sm:$0xff]  }
 0x1ef   :  { %3540 = vmatpush1.bf16.msra.mxu0 %v7518_v13  ;;  %3884 = vmatpush1.bf16.msra.mxu1 %v7521_v16  ;;  %v7619_v13 = vld [vmem:[%s10431_s3 + $0x16c] ss:$16 sps:$4 sm:$0xff]   ;;  %v7614_v16 = vld [vmem:[%s10431_s3 + $0x160] ss:$16 sps:$4 sm:$0xff]  }
 0x1f0   :  { %3541 = vmatprep.subr.bf16.mxu0 %v7526_v17  ;;  %3885 = vmatprep.subr.bf16.mxu1 %v7529_v20  ;;  %v7617_v17 = vld [vmem:[%s10431_s3 + $0x168] ss:$16 sps:$4 sm:$0xff]   ;;  %v7622_v20 = vld [vmem:[%s10431_s3 + $0x184] ss:$16 sps:$4 sm:$0xff]  }
 0x1f3   :  { %3542 = vmatpush1.bf16.msra.mxu0 %v7524_v15  ;;  %3886 = vmatpush1.bf16.msra.mxu1 %v7527_v22  ;;  %v7625_v15 = vld [vmem:[%s10431_s3 + $0x18c] ss:$16 sps:$4 sm:$0xff]   ;;  %v7620_v22 = vld [vmem:[%s10431_s3 + $0x180] ss:$16 sps:$4 sm:$0xff]  }
 0x1f4   :  { %3543 = vmatprep.subr.bf16.mxu0 %v7532_v23  ;;  %3887 = vmatprep.subr.bf16.mxu1 %v7535_v18  ;;  %v7623_v23 = vld [vmem:[%s10431_s3 + $0x188] ss:$16 sps:$4 sm:$0xff]   ;;  %v7628_v18 = vld [vmem:[%s10431_s3 + $0x1a4] ss:$16 sps:$4 sm:$0xff]  }
 0x1f7   :  { %3544 = vmatpush1.bf16.msra.mxu0 %v7530_v25  ;;  %3888 = vmatpush1.bf16.msra.mxu1 %v7533_v26  ;;  %v7631_v25 = vld [vmem:[%s10431_s3 + $0x1ac] ss:$16 sps:$4 sm:$0xff]   ;;  %v7626_v26 = vld [vmem:[%s10431_s3 + $0x1a0] ss:$16 sps:$4 sm:$0xff]  }
 0x1f8   :  { %3545 = vmatprep.subr.bf16.mxu0 %v7538_v27  ;;  %3889 = vmatprep.subr.bf16.mxu1 %v7541_v28  ;;  %v7629_v27 = vld [vmem:[%s10431_s3 + $0x1a8] ss:$16 sps:$4 sm:$0xff]   ;;  %v7634_v28 = vld [vmem:[%s10431_s3 + $0x1c4] ss:$16 sps:$4 sm:$0xff]  }
 0x1fb   :  { %3546 = vmatpush1.bf16.msra.mxu0 %v7536_v14  ;;  %3890 = vmatpush1.bf16.msra.mxu1 %v7539_v30  ;;  %v7637_v14 = vld [vmem:[%s10431_s3 + $0x1cc] ss:$16 sps:$4 sm:$0xff]   ;;  %v7632_v30 = vld [vmem:[%s10431_s3 + $0x1c0] ss:$16 sps:$4 sm:$0xff]  }
 0x1fc   :  { %3547 = vmatprep.subr.bf16.mxu0 %v7544_v19  ;;  %3891 = vmatprep.subr.bf16.mxu1 %v7547_v24  ;;  %v7635_v19 = vld [vmem:[%s10431_s3 + $0x1c8] ss:$16 sps:$4 sm:$0xff]   ;;  %v7640_v24 = vld [vmem:[%s10431_s3 + $0x1e4] ss:$16 sps:$4 sm:$0xff]  }
 0x1ff   :  { %3548 = vmatpush1.bf16.msra.mxu0 %v7542_v33  ;;  %3892 = vmatpush1.bf16.msra.mxu1 %v7545_v34  ;;  %v7643_v33 = vld [vmem:[%s10431_s3 + $0x1ec] ss:$16 sps:$4 sm:$0xff]   ;;  %v7638_v34 = vld [vmem:[%s10431_s3 + $0x1e0] ss:$16 sps:$4 sm:$0xff]  }
 0x200   :  { %4706 = vmatprep.subr.bf16.mxu0 %v7550_v35  ;;  %4792 = vmatprep.subr.bf16.mxu1 %v7553_v36  ;;  %v7641_v35 = vld [vmem:[%s10431_s3 + $0x1e8] ss:$16 sps:$4 sm:$0xff]   ;;  %v7646_v36 = vld [vmem:[%s10431_s3 + $0x204] ss:$16 sps:$4 sm:$0xff]  }
 0x202   :  { %3550 = vmatmul.mubr.bf16.vlgmr.msra.gmra.mrb[0].mxu0 %v5906_v37  ;;  %3894 = vmatmul.mubr.bf16.vlgmr.msra.gmra.mrb[0].mxu1 %v5906_v37  ;;  %v7649_v37 = vld [vmem:[%s10431_s3 + $0x20c] ss:$16 sps:$4 sm:$0xff]  }
 0x203   :  { %4707 = vmatpush1.bf16.msra.mxu0 %v7548_v38  ;;  %4793 = vmatpush1.bf16.msra.mxu1 %v7551_v21  ;;  %v556_v38 = vlaneseq }
 0x204   :  { %4708 = vmatprep.subr.bf16.mxu0 %v7556_v29  ;;  %4794 = vmatprep.subr.bf16.mxu1 %v7559_v31  ;;  %v554_v29 = vld [vmem:[%s10433_s2] sm:$0xf] }
 0x205   :  { %v557_v21 = vshrl.u32 %v556_v38, 7  ;;  %v7683_v38 = vld [vmem:[%s10431_s3 + $0x2c8] ss:$16 sps:$4 sm:$0xff]  }
 0x207   :  { %4709 = vmatpush1.bf16.msra.mxu0 %v7554_v32  ;;  %4795 = vmatpush1.bf16.msra.mxu1 %v7557_v39  ;;  %v9813_v31 = vsub.s32 0, %v557_v21  ;;  %v9815_v32 = vsub.s32 2, %v557_v21  ;;  %v9817_v39 = vsub.s32 1, %v557_v21 }
 0x208   :  { %4710 = vmatprep.subr.bf16.mxu0 %v7562_v40  ;;  %4796 = vmatprep.subr.bf16.mxu1 %v7565_v41  ;;  %v9819_v40 = vsub.s32 3, %v557_v21  ;;  %v7688_v21 = vld [vmem:[%s10431_s3 + $0x2e4] ss:$16 sps:$4 sm:$0xff]  }
 0x209   :  { %v559_v41 = vrot.slane %v554_v29, %v9813_v31 }
 0x20b   :  { %4711 = vmatpush1.bf16.msra.mxu0 %v7560_v42  ;;  %4797 = vmatpush1.bf16.msra.mxu1 %v7563_v43  ;;  %v567_v42 = vrot.slane %v554_v29, %v9815_v32  ;;  %v563_v43 = vrot.slane %v554_v29, %v9817_v39 }
 0x20c   :  { %4712 = vmatprep.subr.bf16.mxu0 %v7568_v44  ;;  %4798 = vmatprep.subr.bf16.mxu1 %v7571_v45  ;;  %v571_v44 = vrot.slane %v554_v29, %v9819_v40  ;;  %v7691_v29 = vld [vmem:[%s10431_s3 + $0x2ec] ss:$16 sps:$4 sm:$0xff]  }
 0x20f   :  { %4713 = vmatpush1.bf16.msra.mxu0 %v7566_v46  ;;  %4799 = vmatpush1.bf16.msra.mxu1 %v7569_v47 }
 0x210   :  { %4714 = vmatprep.subr.bf16.mxu0 %v7574_v48  ;;  %4800 = vmatprep.subr.bf16.mxu1 %v7577_v49 }
 0x213   :  { %4715 = vmatpush1.bf16.msra.mxu0 %v7572_v50  ;;  %4801 = vmatpush1.bf16.msra.mxu1 %v7575_v51 }
 0x214   :  { %4716 = vmatprep.subr.bf16.mxu0 %v7580_v52  ;;  %4802 = vmatprep.subr.bf16.mxu1 %v7583_v53 }
 0x217   :  { %4717 = vmatpush1.bf16.msra.mxu0 %v7578_v54  ;;  %4803 = vmatpush1.bf16.msra.mxu1 %v7581_v55 }
 0x218   :  { %4718 = vmatprep.subr.bf16.mxu0 %v7586_v56  ;;  %4804 = vmatprep.subr.bf16.mxu1 %v7589_v57 }
 0x21b   :  { %4719 = vmatpush1.bf16.msra.mxu0 %v7584_v58  ;;  %4805 = vmatpush1.bf16.msra.mxu1 %v7587_v59 }
 0x21c   :  { %4720 = vmatprep.subr.bf16.mxu0 %v7592_v60  ;;  %4806 = vmatprep.subr.bf16.mxu1 %v7595_v61 }
 0x21f   :  { %4721 = vmatpush1.bf16.msra.mxu0 %v7590_v62  ;;  %4807 = vmatpush1.bf16.msra.mxu1 %v7593_v63 }
 0x220   :  { %4722 = vmatprep.subr.bf16.mxu0 %v7598_v0  ;;  %4808 = vmatprep.subr.bf16.mxu1 %v7601_v1 }
 0x223   :  { %4723 = vmatpush1.bf16.msra.mxu0 %v7596_v2  ;;  %4809 = vmatpush1.bf16.msra.mxu1 %v7599_v3 }
 0x224   :  { %4724 = vmatprep.subr.bf16.mxu0 %v7604_v4  ;;  %4810 = vmatprep.subr.bf16.mxu1 %v7607_v5  ;;  %v7644_v5 = vld [vmem:[%s10431_s3 + $0x200] ss:$16 sps:$4 sm:$0xff]  }
 0x227   :  { %4725 = vmatpush1.bf16.msra.mxu0 %v7602_v6  ;;  %4811 = vmatpush1.bf16.msra.mxu1 %v7605_v7  ;;  %v7647_v6 = vld [vmem:[%s10431_s3 + $0x208] ss:$16 sps:$4 sm:$0xff]  }
 0x228   :  { %4726 = vmatprep.subr.bf16.mxu0 %v7610_v8  ;;  %4812 = vmatprep.subr.bf16.mxu1 %v7613_v9 }
 0x22b   :  { %4727 = vmatpush1.bf16.msra.mxu0 %v7608_v10  ;;  %4813 = vmatpush1.bf16.msra.mxu1 %v7611_v11  ;;  %v7652_v11 = vld [vmem:[%s10431_s3 + $0x224] ss:$16 sps:$4 sm:$0xff]  }
 0x22c   :  { %4728 = vmatprep.subr.bf16.mxu0 %v7616_v12  ;;  %4814 = vmatprep.subr.bf16.mxu1 %v7619_v13  ;;  %v7655_v12 = vld [vmem:[%s10431_s3 + $0x22c] ss:$16 sps:$4 sm:$0xff]   ;;  %v7650_v13 = vld [vmem:[%s10431_s3 + $0x220] ss:$16 sps:$4 sm:$0xff]  }
 0x22f   :  { %4729 = vmatpush1.bf16.msra.mxu0 %v7614_v16  ;;  %4815 = vmatpush1.bf16.msra.mxu1 %v7617_v17  ;;  %v7653_v16 = vld [vmem:[%s10431_s3 + $0x228] ss:$16 sps:$4 sm:$0xff]   ;;  %v7658_v17 = vld [vmem:[%s10431_s3 + $0x244] ss:$16 sps:$4 sm:$0xff]  }
 0x230   :  { %4730 = vmatprep.subr.bf16.mxu0 %v7622_v20  ;;  %4816 = vmatprep.subr.bf16.mxu1 %v7625_v15  ;;  %v7661_v20 = vld [vmem:[%s10431_s3 + $0x24c] ss:$16 sps:$4 sm:$0xff]   ;;  %v7656_v15 = vld [vmem:[%s10431_s3 + $0x240] ss:$16 sps:$4 sm:$0xff]  }
 0x233   :  { %4731 = vmatpush1.bf16.msra.mxu0 %v7620_v22  ;;  %4817 = vmatpush1.bf16.msra.mxu1 %v7623_v23  ;;  %v7659_v22 = vld [vmem:[%s10431_s3 + $0x248] ss:$16 sps:$4 sm:$0xff]   ;;  %v7664_v23 = vld [vmem:[%s10431_s3 + $0x264] ss:$16 sps:$4 sm:$0xff]  }
 0x234   :  { %4732 = vmatprep.subr.bf16.mxu0 %v7628_v18  ;;  %4818 = vmatprep.subr.bf16.mxu1 %v7631_v25  ;;  %v7667_v18 = vld [vmem:[%s10431_s3 + $0x26c] ss:$16 sps:$4 sm:$0xff]   ;;  %v7662_v25 = vld [vmem:[%s10431_s3 + $0x260] ss:$16 sps:$4 sm:$0xff]  }
 0x237   :  { %4733 = vmatpush1.bf16.msra.mxu0 %v7626_v26  ;;  %4819 = vmatpush1.bf16.msra.mxu1 %v7629_v27  ;;  %v7665_v26 = vld [vmem:[%s10431_s3 + $0x268] ss:$16 sps:$4 sm:$0xff]   ;;  %v7670_v27 = vld [vmem:[%s10431_s3 + $0x284] ss:$16 sps:$4 sm:$0xff]  }
 0x238   :  { %4734 = vmatprep.subr.bf16.mxu0 %v7634_v28  ;;  %4820 = vmatprep.subr.bf16.mxu1 %v7637_v14  ;;  %v7673_v28 = vld [vmem:[%s10431_s3 + $0x28c] ss:$16 sps:$4 sm:$0xff]   ;;  %v7668_v14 = vld [vmem:[%s10431_s3 + $0x280] ss:$16 sps:$4 sm:$0xff]  }
 0x23b   :  { %4735 = vmatpush1.bf16.msra.mxu0 %v7632_v30  ;;  %4821 = vmatpush1.bf16.msra.mxu1 %v7635_v19  ;;  %v7671_v30 = vld [vmem:[%s10431_s3 + $0x288] ss:$16 sps:$4 sm:$0xff]   ;;  %v7676_v19 = vld [vmem:[%s10431_s3 + $0x2a4] ss:$16 sps:$4 sm:$0xff]  }
 0x23c   :  { %4736 = vmatprep.subr.bf16.mxu0 %v7640_v24  ;;  %4822 = vmatprep.subr.bf16.mxu1 %v7643_v33  ;;  %v7679_v24 = vld [vmem:[%s10431_s3 + $0x2ac] ss:$16 sps:$4 sm:$0xff]   ;;  %v7674_v33 = vld [vmem:[%s10431_s3 + $0x2a0] ss:$16 sps:$4 sm:$0xff]  }
 0x23f   :  { %4737 = vmatpush1.bf16.msra.mxu0 %v7638_v34  ;;  %4823 = vmatpush1.bf16.msra.mxu1 %v7641_v35  ;;  %v7677_v34 = vld [vmem:[%s10431_s3 + $0x2a8] ss:$16 sps:$4 sm:$0xff]   ;;  %v7682_v35 = vld [vmem:[%s10431_s3 + $0x2c4] ss:$16 sps:$4 sm:$0xff]  }
 0x240   :  { %4749 = vmatprep.subr.bf16.mxu0 %v7646_v36  ;;  %4835 = vmatprep.subr.bf16.mxu1 %v7649_v37  ;;  %v7685_v36 = vld [vmem:[%s10431_s3 + $0x2cc] ss:$16 sps:$4 sm:$0xff]   ;;  %v7680_v37 = vld [vmem:[%s10431_s3 + $0x2c0] ss:$16 sps:$4 sm:$0xff]  }
 0x2d5   :  { %v3551_v45 = vpop.f32.mrb[0].mxu0  ;;  %v3895_v46 = vpop.f32.mrb[0].mxu1 }
 0x2d6   :  { %v6684_v47 = vadd.f32 %v3551_v45, %v559_v41  ;;  %v6688_v48 = vadd.f32 %v3895_v46, %v567_v42  ;;  %v3553_v49 = vpop.f32.mrb[1].mxu0  ;;  %v3897_v50 = vpop.f32.mrb[1].mxu1  ;;  %v7692_v45 = vld [vmem:[%s10431_s3 + $0x300] ss:$16 sps:$4 sm:$0xff]   ;;  %v7695_v46 = vld [vmem:[%s10431_s3 + $0x308] ss:$16 sps:$4 sm:$0xff]  }
 0x2d7   :  { %v6685_v51 = vadd.f32 %v3553_v49, %v563_v43  ;;  %v6689_v52 = vadd.f32 %v3897_v50, %v571_v44  ;;  %v3555_v53 = vpop.f32.mrb[2].mxu0  ;;  %v3899_v54 = vpop.f32.mrb[2].mxu1  ;;  %v7698_v49 = vld [vmem:[%s10431_s3 + $0x320] ss:$16 sps:$4 sm:$0xff]   ;;  %v7701_v50 = vld [vmem:[%s10431_s3 + $0x328] ss:$16 sps:$4 sm:$0xff]  }
 0x2d8   :  { %v6686_v55 = vadd.f32 %v3555_v53, %v559_v41  ;;  %v6690_v56 = vadd.f32 %v3899_v54, %v567_v42  ;;  %v3557_v57 = vpop.f32.mrb[3].mxu0  ;;  %v3901_v58 = vpop.f32.mrb[3].mxu1  ;;  %v3904_v59 = vmax.f32 %v6684_v47, 0.0  ;;  %v3906_v60 = vmax.f32 %v6688_v48, 0.0  ;;  %v7686_v41 = vld [vmem:[%s10431_s3 + $0x2e0] ss:$16 sps:$4 sm:$0xff]  }
 0x2d9   :  { %v6687_v61 = vadd.f32 %v3557_v57, %v563_v43  ;;  %v6691_v62 = vadd.f32 %v3901_v58, %v571_v44  ;;  %v3905_v63 = vmax.f32 %v6685_v51, 0.0  ;;  %v3907_v2 = vmax.f32 %v6689_v52, 0.0  ;;  %v7689_v42 = vld [vmem:[%s10431_s3 + $0x2e8] ss:$16 sps:$4 sm:$0xff]   ;;  %v7694_v43 = vld [vmem:[%s10431_s3 + $0x304] ss:$16 sps:$4 sm:$0xff]  }
 0x2da   :  { %v3908_v0 = vmax.f32 %v6686_v55, 0.0  ;;  %v3910_v1 = vmax.f32 %v6690_v56, 0.0  ;;  %v7697_v44 = vld [vmem:[%s10431_s3 + $0x30c] ss:$16 sps:$4 sm:$0xff]   ;;  %v7700_v47 = vld [vmem:[%s10431_s3 + $0x324] ss:$16 sps:$4 sm:$0xff]  }
 0x2db   :  { %v3909_v3 = vmax.f32 %v6687_v61, 0.0  ;;  %v3911_v4 = vmax.f32 %v6691_v62, 0.0  ;;  %v7703_v48 = vld [vmem:[%s10431_s3 + $0x32c] ss:$16 sps:$4 sm:$0xff]   ;;  %v7706_v51 = vld [vmem:[%s10431_s3 + $0x344] ss:$16 sps:$4 sm:$0xff]  }
 0x2dc   :  { %v3912_v7 = vpack.c.bf16 %v3908_v0, %v3904_v59  ;;  %v9831_v8 = vpack.c.bf16 %v3910_v1, %v3906_v60  ;;  %v7709_v52 = vld [vmem:[%s10431_s3 + $0x34c] ss:$16 sps:$4 sm:$0xff]   ;;  %v7704_v53 = vld [vmem:[%s10431_s3 + $0x340] ss:$16 sps:$4 sm:$0xff]   ;;  %v7707_v54 = vld [vmem:[%s10431_s3 + $0x348] ss:$16 sps:$4 sm:$0xff]  }
 0x2dd   :  { %v3913_v9 = vpack.c.bf16 %v3909_v3, %v3905_v63  ;;  %v3915_v10 = vpack.c.bf16 %v3911_v4, %v3907_v2  ;;  %v7712_v55 = vld [vmem:[%s10431_s3 + $0x364] ss:$16 sps:$4 sm:$0xff]   ;;  %v7715_v56 = vld [vmem:[%s10431_s3 + $0x36c] ss:$16 sps:$4 sm:$0xff]   ;;  %v7710_v57 = vld [vmem:[%s10431_s3 + $0x360] ss:$16 sps:$4 sm:$0xff]  }
 0x2de   :  { %v7713_v58 = vld [vmem:[%s10431_s3 + $0x368] ss:$16 sps:$4 sm:$0xff]   ;;  %v7718_v59 = vld [vmem:[%s10431_s3 + $0x384] ss:$16 sps:$4 sm:$0xff]   ;;  %v7721_v60 = vld [vmem:[%s10431_s3 + $0x38c] ss:$16 sps:$4 sm:$0xff]  }
 0x2df   :  { %4738 = vmatprep.mubr.bf16.mxu0 %v3913_v9  ;;  %4824 = vmatprep.mubr.bf16.mxu1 %v3913_v9  ;;  %v7716_v61 = vld [vmem:[%s10431_s3 + $0x380] ss:$16 sps:$4 sm:$0xff]   ;;  %v7719_v62 = vld [vmem:[%s10431_s3 + $0x388] ss:$16 sps:$4 sm:$0xff]   ;;  %v7724_v63 = vld [vmem:[%s10431_s3 + $0x3a4] ss:$16 sps:$4 sm:$0xff]  }
 0x2e0   :  { %4739 = vmatmul.mubr.bf16.vlgmr.msra.gmra.mrb[4].mxu0 %v3912_v7  ;;  %4825 = vmatmul.mubr.bf16.vlgmr.msra.gmra.mrb[4].mxu1 %v3912_v7  ;;  %v7727_v0 = vld [vmem:[%s10431_s3 + $0x3ac] ss:$16 sps:$4 sm:$0xff]   ;;  %v7722_v1 = vld [vmem:[%s10431_s3 + $0x3a0] ss:$16 sps:$4 sm:$0xff]   ;;  %v7725_v2 = vld [vmem:[%s10431_s3 + $0x3a8] ss:$16 sps:$4 sm:$0xff]  }
 0x2e1   :  { %4750 = vmatpush1.bf16.msra.mxu0 %v7644_v5  ;;  %4836 = vmatpush1.bf16.msra.mxu1 %v7647_v6  ;;  %v7730_v3 = vld [vmem:[%s10431_s3 + $0x3c4] ss:$16 sps:$4 sm:$0xff]   ;;  %v7733_v4 = vld [vmem:[%s10431_s3 + $0x3cc] ss:$16 sps:$4 sm:$0xff]   ;;  %v7728_v5 = vld [vmem:[%s10431_s3 + $0x3c0] ss:$16 sps:$4 sm:$0xff]  }
 0x2e2   :  { %4781 = vmatprep.mubr.bf16.mxu0 %v3915_v10  ;;  %4867 = vmatprep.mubr.bf16.mxu1 %v3915_v10  ;;  %v7731_v6 = vld [vmem:[%s10431_s3 + $0x3c8] ss:$16 sps:$4 sm:$0xff]   ;;  %v7736_v7 = vld [vmem:[%s10431_s3 + $0x3e4] ss:$16 sps:$4 sm:$0xff]   ;;  %v7739_v9 = vld [vmem:[%s10431_s3 + $0x3ec] ss:$16 sps:$4 sm:$0xff]  }
 0x2e3   :  { %4751 = vmatprep.subr.bf16.mxu0 %v7652_v11  ;;  %4837 = vmatprep.subr.bf16.mxu1 %v7655_v12  ;;  %v7734_v10 = vld [vmem:[%s10431_s3 + $0x3e0] ss:$16 sps:$4 sm:$0xff]   ;;  %v7737_v11 = vld [vmem:[%s10431_s3 + $0x3e8] ss:$16 sps:$4 sm:$0xff]   ;;  %v7742_v12 = vld [vmem:[%s10432_s5 + $0x4] ss:$16 sps:$4 sm:$0xff]  }
 0x2e5   :  { %4752 = vmatpush1.bf16.msra.mxu0 %v7650_v13  ;;  %4838 = vmatpush1.bf16.msra.mxu1 %v7653_v16  ;;  %v7745_v13 = vld [vmem:[%s10432_s5 + $0xc] ss:$16 sps:$4 sm:$0xff]   ;;  %v7740_v16 = vld [vmem:[%s10432_s5] ss:$16 sps:$4 sm:$0xff]  }
 0x2e6   :  { %4753 = vmatprep.subr.bf16.mxu0 %v7658_v17  ;;  %4839 = vmatprep.subr.bf16.mxu1 %v7661_v20  ;;  %v7743_v17 = vld [vmem:[%s10432_s5 + $0x8] ss:$16 sps:$4 sm:$0xff]   ;;  %v7748_v20 = vld [vmem:[%s10432_s5 + $0x24] ss:$16 sps:$4 sm:$0xff]  }
 0x2e9   :  { %4754 = vmatpush1.bf16.msra.mxu0 %v7656_v15  ;;  %4840 = vmatpush1.bf16.msra.mxu1 %v7659_v22  ;;  %v7751_v15 = vld [vmem:[%s10432_s5 + $0x2c] ss:$16 sps:$4 sm:$0xff]   ;;  %v7746_v22 = vld [vmem:[%s10432_s5 + $0x20] ss:$16 sps:$4 sm:$0xff]  }
 0x2ea   :  { %4755 = vmatprep.subr.bf16.mxu0 %v7664_v23  ;;  %4841 = vmatprep.subr.bf16.mxu1 %v7667_v18  ;;  %v7749_v23 = vld [vmem:[%s10432_s5 + $0x28] ss:$16 sps:$4 sm:$0xff]   ;;  %v7754_v18 = vld [vmem:[%s10432_s5 + $0x44] ss:$16 sps:$4 sm:$0xff]  }
 0x2ed   :  { %4756 = vmatpush1.bf16.msra.mxu0 %v7662_v25  ;;  %4842 = vmatpush1.bf16.msra.mxu1 %v7665_v26  ;;  %v7752_v25 = vld [vmem:[%s10432_s5 + $0x40] ss:$16 sps:$4 sm:$0xff]   ;;  %v7755_v26 = vld [vmem:[%s10432_s5 + $0x48] ss:$16 sps:$4 sm:$0xff]  }
 0x2ee   :  { %4757 = vmatprep.subr.bf16.mxu0 %v7670_v27  ;;  %4843 = vmatprep.subr.bf16.mxu1 %v7673_v28  ;;  %v7760_v27 = vld [vmem:[%s10432_s5 + $0x64] ss:$16 sps:$4 sm:$0xff]   ;;  %v7763_v28 = vld [vmem:[%s10432_s5 + $0x6c] ss:$16 sps:$4 sm:$0xff]  }
 0x2f1   :  { %4758 = vmatpush1.bf16.msra.mxu0 %v7668_v14  ;;  %4844 = vmatpush1.bf16.msra.mxu1 %v7671_v30  ;;  %v7758_v14 = vld [vmem:[%s10432_s5 + $0x60] ss:$16 sps:$4 sm:$0xff]   ;;  %v7761_v30 = vld [vmem:[%s10432_s5 + $0x68] ss:$16 sps:$4 sm:$0xff]  }
 0x2f2   :  { %4759 = vmatprep.subr.bf16.mxu0 %v7676_v19  ;;  %4845 = vmatprep.subr.bf16.mxu1 %v7679_v24  ;;  %v7766_v19 = vld [vmem:[%s10432_s5 + $0x84] ss:$16 sps:$4 sm:$0xff]   ;;  %v7769_v24 = vld [vmem:[%s10432_s5 + $0x8c] ss:$16 sps:$4 sm:$0xff]  }
 0x2f5   :  { %4760 = vmatpush1.bf16.msra.mxu0 %v7674_v33  ;;  %4846 = vmatpush1.bf16.msra.mxu1 %v7677_v34  ;;  %v7764_v33 = vld [vmem:[%s10432_s5 + $0x80] ss:$16 sps:$4 sm:$0xff]   ;;  %v7767_v34 = vld [vmem:[%s10432_s5 + $0x88] ss:$16 sps:$4 sm:$0xff]  }
 0x2f6   :  { %4761 = vmatprep.subr.bf16.mxu0 %v7682_v35  ;;  %4847 = vmatprep.subr.bf16.mxu1 %v7685_v36  ;;  %v7772_v35 = vld [vmem:[%s10432_s5 + $0xa4] ss:$16 sps:$4 sm:$0xff]   ;;  %v7775_v36 = vld [vmem:[%s10432_s5 + $0xac] ss:$16 sps:$4 sm:$0xff]  }
 0x2f9   :  { %4762 = vmatpush1.bf16.msra.mxu0 %v7680_v37  ;;  %4848 = vmatpush1.bf16.msra.mxu1 %v7683_v38  ;;  %v7770_v37 = vld [vmem:[%s10432_s5 + $0xa0] ss:$16 sps:$4 sm:$0xff]   ;;  %v7773_v38 = vld [vmem:[%s10432_s5 + $0xa8] ss:$16 sps:$4 sm:$0xff]  }
 0x2fa   :  { %4763 = vmatprep.subr.bf16.mxu0 %v7688_v21  ;;  %4849 = vmatprep.subr.bf16.mxu1 %v7691_v29  ;;  %v7778_v21 = vld [vmem:[%s10432_s5 + $0xc4] ss:$16 sps:$4 sm:$0xff]   ;;  %v7781_v29 = vld [vmem:[%s10432_s5 + $0xcc] ss:$16 sps:$4 sm:$0xff]  }
 0x2fd   :  { %4764 = vmatpush1.bf16.msra.mxu0 %v7686_v41  ;;  %4850 = vmatpush1.bf16.msra.mxu1 %v7689_v42  ;;  %v7776_v41 = vld [vmem:[%s10432_s5 + $0xc0] ss:$16 sps:$4 sm:$0xff]   ;;  %v7779_v42 = vld [vmem:[%s10432_s5 + $0xc8] ss:$16 sps:$4 sm:$0xff]  }
 0x2fe   :  { %4765 = vmatprep.subr.bf16.mxu0 %v7694_v43  ;;  %4851 = vmatprep.subr.bf16.mxu1 %v7697_v44  ;;  %v7784_v43 = vld [vmem:[%s10432_s5 + $0xe4] ss:$16 sps:$4 sm:$0xff]   ;;  %v7787_v44 = vld [vmem:[%s10432_s5 + $0xec] ss:$16 sps:$4 sm:$0xff]  }
 0x301   :  { %4766 = vmatpush1.bf16.msra.mxu0 %v7692_v45  ;;  %4852 = vmatpush1.bf16.msra.mxu1 %v7695_v46  ;;  %v7782_v45 = vld [vmem:[%s10432_s5 + $0xe0] ss:$16 sps:$4 sm:$0xff]   ;;  %v7785_v46 = vld [vmem:[%s10432_s5 + $0xe8] ss:$16 sps:$4 sm:$0xff]  }
 0x302   :  { %4767 = vmatprep.subr.bf16.mxu0 %v7700_v47  ;;  %4853 = vmatprep.subr.bf16.mxu1 %v7703_v48  ;;  %v7790_v47 = vld [vmem:[%s10432_s5 + $0x104] ss:$16 sps:$4 sm:$0xff]   ;;  %v7793_v48 = vld [vmem:[%s10432_s5 + $0x10c] ss:$16 sps:$4 sm:$0xff]  }
 0x305   :  { %4768 = vmatpush1.bf16.msra.mxu0 %v7698_v49  ;;  %4854 = vmatpush1.bf16.msra.mxu1 %v7701_v50  ;;  %v7788_v49 = vld [vmem:[%s10432_s5 + $0x100] ss:$16 sps:$4 sm:$0xff]   ;;  %v7791_v50 = vld [vmem:[%s10432_s5 + $0x108] ss:$16 sps:$4 sm:$0xff]  }
 0x306   :  { %4769 = vmatprep.subr.bf16.mxu0 %v7706_v51  ;;  %4855 = vmatprep.subr.bf16.mxu1 %v7709_v52  ;;  %v7796_v51 = vld [vmem:[%s10432_s5 + $0x124] ss:$16 sps:$4 sm:$0xff]   ;;  %v7799_v52 = vld [vmem:[%s10432_s5 + $0x12c] ss:$16 sps:$4 sm:$0xff]  }
 0x309   :  { %4770 = vmatpush1.bf16.msra.mxu0 %v7704_v53  ;;  %4856 = vmatpush1.bf16.msra.mxu1 %v7707_v54  ;;  %v7794_v53 = vld [vmem:[%s10432_s5 + $0x120] ss:$16 sps:$4 sm:$0xff]   ;;  %v7797_v54 = vld [vmem:[%s10432_s5 + $0x128] ss:$16 sps:$4 sm:$0xff]  }
 0x30a   :  { %4771 = vmatprep.subr.bf16.mxu0 %v7712_v55  ;;  %4857 = vmatprep.subr.bf16.mxu1 %v7715_v56  ;;  %v7802_v55 = vld [vmem:[%s10432_s5 + $0x144] ss:$16 sps:$4 sm:$0xff]   ;;  %v7805_v56 = vld [vmem:[%s10432_s5 + $0x14c] ss:$16 sps:$4 sm:$0xff]  }
 0x30d   :  { %4772 = vmatpush1.bf16.msra.mxu0 %v7710_v57  ;;  %4858 = vmatpush1.bf16.msra.mxu1 %v7713_v58  ;;  %v7800_v57 = vld [vmem:[%s10432_s5 + $0x140] ss:$16 sps:$4 sm:$0xff]   ;;  %v7803_v58 = vld [vmem:[%s10432_s5 + $0x148] ss:$16 sps:$4 sm:$0xff]  }
 0x30e   :  { %4773 = vmatprep.subr.bf16.mxu0 %v7718_v59  ;;  %4859 = vmatprep.subr.bf16.mxu1 %v7721_v60  ;;  %v7808_v59 = vld [vmem:[%s10432_s5 + $0x164] ss:$16 sps:$4 sm:$0xff]   ;;  %v7811_v60 = vld [vmem:[%s10432_s5 + $0x16c] ss:$16 sps:$4 sm:$0xff]  }
 0x311   :  { %4774 = vmatpush1.bf16.msra.mxu0 %v7716_v61  ;;  %4860 = vmatpush1.bf16.msra.mxu1 %v7719_v62  ;;  %v7806_v61 = vld [vmem:[%s10432_s5 + $0x160] ss:$16 sps:$4 sm:$0xff]   ;;  %v7809_v62 = vld [vmem:[%s10432_s5 + $0x168] ss:$16 sps:$4 sm:$0xff]  }
 0x312   :  { %4775 = vmatprep.subr.bf16.mxu0 %v7724_v63  ;;  %4861 = vmatprep.subr.bf16.mxu1 %v7727_v0  ;;  %v7814_v63 = vld [vmem:[%s10432_s5 + $0x184] ss:$16 sps:$4 sm:$0xff]   ;;  %v7817_v0 = vld [vmem:[%s10432_s5 + $0x18c] ss:$16 sps:$4 sm:$0xff]  }
 0x315   :  { %4776 = vmatpush1.bf16.msra.mxu0 %v7722_v1  ;;  %4862 = vmatpush1.bf16.msra.mxu1 %v7725_v2  ;;  %v7812_v1 = vld [vmem:[%s10432_s5 + $0x180] ss:$16 sps:$4 sm:$0xff]   ;;  %v7815_v2 = vld [vmem:[%s10432_s5 + $0x188] ss:$16 sps:$4 sm:$0xff]  }
 0x316   :  { %4777 = vmatprep.subr.bf16.mxu0 %v7730_v3  ;;  %4863 = vmatprep.subr.bf16.mxu1 %v7733_v4  ;;  %v7820_v3 = vld [vmem:[%s10432_s5 + $0x1a4] ss:$16 sps:$4 sm:$0xff]   ;;  %v7823_v4 = vld [vmem:[%s10432_s5 + $0x1ac] ss:$16 sps:$4 sm:$0xff]  }
 0x319   :  { %4778 = vmatpush1.bf16.msra.mxu0 %v7728_v5  ;;  %4864 = vmatpush1.bf16.msra.mxu1 %v7731_v6  ;;  %v7818_v5 = vld [vmem:[%s10432_s5 + $0x1a0] ss:$16 sps:$4 sm:$0xff]   ;;  %v7821_v6 = vld [vmem:[%s10432_s5 + $0x1a8] ss:$16 sps:$4 sm:$0xff]  }
 0x31a   :  { %4779 = vmatprep.subr.bf16.mxu0 %v7736_v7  ;;  %4865 = vmatprep.subr.bf16.mxu1 %v7739_v9  ;;  %v7826_v7 = vld [vmem:[%s10432_s5 + $0x1c4] ss:$16 sps:$4 sm:$0xff]   ;;  %v7829_v9 = vld [vmem:[%s10432_s5 + $0x1cc] ss:$16 sps:$4 sm:$0xff]  }
 0x31d   :  { %4780 = vmatpush1.bf16.msra.mxu0 %v7734_v10  ;;  %4866 = vmatpush1.bf16.msra.mxu1 %v7737_v11  ;;  %v7824_v10 = vld [vmem:[%s10432_s5 + $0x1c0] ss:$16 sps:$4 sm:$0xff]   ;;  %v7827_v11 = vld [vmem:[%s10432_s5 + $0x1c8] ss:$16 sps:$4 sm:$0xff]  }
 0x31e   :  { %5680 = vmatprep.subr.bf16.mxu0 %v7742_v12  ;;  %5766 = vmatprep.subr.bf16.mxu1 %v7745_v13  ;;  %v7832_v12 = vld [vmem:[%s10432_s5 + $0x1e4] ss:$16 sps:$4 sm:$0xff]   ;;  %v7835_v13 = vld [vmem:[%s10432_s5 + $0x1ec] ss:$16 sps:$4 sm:$0xff]  }
 0x320   :  { %4782 = vmatmul.mubr.bf16.vlgmr.msra.gmra.mrb[4].mxu0 %v9831_v8  ;;  %4868 = vmatmul.mubr.bf16.vlgmr.msra.gmra.mrb[4].mxu1 %v9831_v8  ;;  %v7757_v8 = vld [vmem:[%s10432_s5 + $0x4c] ss:$16 sps:$4 sm:$0xff]  }
 0x321   :  { %5681 = vmatpush1.bf16.msra.mxu0 %v7740_v16  ;;  %5767 = vmatpush1.bf16.msra.mxu1 %v7743_v17  ;;  %v7830_v16 = vld [vmem:[%s10432_s5 + $0x1e0] ss:$16 sps:$4 sm:$0xff]   ;;  %v7833_v17 = vld [vmem:[%s10432_s5 + $0x1e8] ss:$16 sps:$4 sm:$0xff]  }
 0x322   :  { %5682 = vmatprep.subr.bf16.mxu0 %v7748_v20  ;;  %5768 = vmatprep.subr.bf16.mxu1 %v7751_v15  ;;  %v7838_v20 = vld [vmem:[%s10432_s5 + $0x204] ss:$16 sps:$4 sm:$0xff]   ;;  %v7841_v15 = vld [vmem:[%s10432_s5 + $0x20c] ss:$16 sps:$4 sm:$0xff]  }
 0x325   :  { %5683 = vmatpush1.bf16.msra.mxu0 %v7746_v22  ;;  %5769 = vmatpush1.bf16.msra.mxu1 %v7749_v23  ;;  %v4044_v22 = vld [vmem:[%s10434_s4] sm:$0xf] }
 0x326   :  { %5684 = vmatprep.subr.bf16.mxu0 %v7754_v18  ;;  %5770 = vmatprep.subr.bf16.mxu1 %v7757_v8  ;;  %v4049_v23 = vrot.slane %v4044_v22, %v9813_v31  ;;  %v4057_v18 = vrot.slane %v4044_v22, %v9815_v32  ;;  %v4053_v8 = vrot.slane %v4044_v22, %v9817_v39 }
 0x329   :  { %5685 = vmatpush1.bf16.msra.mxu0 %v7752_v25  ;;  %5771 = vmatpush1.bf16.msra.mxu1 %v7755_v26  ;;  %v4061_v25 = vrot.slane %v4044_v22, %v9819_v40  ;;  %v7883_v22 = vld [vmem:[%s10432_s5 + $0x2ec] ss:$16 sps:$4 sm:$0xff]  }
 0x32a   :  { %5686 = vmatprep.subr.bf16.mxu0 %v7760_v27  ;;  %5772 = vmatprep.subr.bf16.mxu1 %v7763_v28 }
 0x32d   :  { %5687 = vmatpush1.bf16.msra.mxu0 %v7758_v14  ;;  %5773 = vmatpush1.bf16.msra.mxu1 %v7761_v30 }
 0x32e   :  { %5688 = vmatprep.subr.bf16.mxu0 %v7766_v19  ;;  %5774 = vmatprep.subr.bf16.mxu1 %v7769_v24 }
 0x331   :  { %5689 = vmatpush1.bf16.msra.mxu0 %v7764_v33  ;;  %5775 = vmatpush1.bf16.msra.mxu1 %v7767_v34 }
 0x332   :  { %5690 = vmatprep.subr.bf16.mxu0 %v7772_v35  ;;  %5776 = vmatprep.subr.bf16.mxu1 %v7775_v36 }
 0x335   :  { %5691 = vmatpush1.bf16.msra.mxu0 %v7770_v37  ;;  %5777 = vmatpush1.bf16.msra.mxu1 %v7773_v38 }
 0x336   :  { %5692 = vmatprep.subr.bf16.mxu0 %v7778_v21  ;;  %5778 = vmatprep.subr.bf16.mxu1 %v7781_v29 }
 0x339   :  { %5693 = vmatpush1.bf16.msra.mxu0 %v7776_v41  ;;  %5779 = vmatpush1.bf16.msra.mxu1 %v7779_v42 }
 0x33a   :  { %5694 = vmatprep.subr.bf16.mxu0 %v7784_v43  ;;  %5780 = vmatprep.subr.bf16.mxu1 %v7787_v44 }
 0x33d   :  { %5695 = vmatpush1.bf16.msra.mxu0 %v7782_v45  ;;  %5781 = vmatpush1.bf16.msra.mxu1 %v7785_v46 }
 0x33e   :  { %5696 = vmatprep.subr.bf16.mxu0 %v7790_v47  ;;  %5782 = vmatprep.subr.bf16.mxu1 %v7793_v48 }
 0x341   :  { %5697 = vmatpush1.bf16.msra.mxu0 %v7788_v49  ;;  %5783 = vmatpush1.bf16.msra.mxu1 %v7791_v50 }
 0x342   :  { %5698 = vmatprep.subr.bf16.mxu0 %v7796_v51  ;;  %5784 = vmatprep.subr.bf16.mxu1 %v7799_v52 }
 0x345   :  { %5699 = vmatpush1.bf16.msra.mxu0 %v7794_v53  ;;  %5785 = vmatpush1.bf16.msra.mxu1 %v7797_v54  ;;  %v7836_v54 = vld [vmem:[%s10432_s5 + $0x200] ss:$16 sps:$4 sm:$0xff]  }
 0x346   :  { %5700 = vmatprep.subr.bf16.mxu0 %v7802_v55  ;;  %5786 = vmatprep.subr.bf16.mxu1 %v7805_v56  ;;  %v7839_v55 = vld [vmem:[%s10432_s5 + $0x208] ss:$16 sps:$4 sm:$0xff]   ;;  %v7844_v56 = vld [vmem:[%s10432_s5 + $0x224] ss:$16 sps:$4 sm:$0xff]  }
 0x349   :  { %5701 = vmatpush1.bf16.msra.mxu0 %v7800_v57  ;;  %5787 = vmatpush1.bf16.msra.mxu1 %v7803_v58  ;;  %v7847_v57 = vld [vmem:[%s10432_s5 + $0x22c] ss:$16 sps:$4 sm:$0xff]   ;;  %v7842_v58 = vld [vmem:[%s10432_s5 + $0x220] ss:$16 sps:$4 sm:$0xff]  }
 0x34a   :  { %5702 = vmatprep.subr.bf16.mxu0 %v7808_v59  ;;  %5788 = vmatprep.subr.bf16.mxu1 %v7811_v60  ;;  %v7845_v59 = vld [vmem:[%s10432_s5 + $0x228] ss:$16 sps:$4 sm:$0xff]   ;;  %v7850_v60 = vld [vmem:[%s10432_s5 + $0x244] ss:$16 sps:$4 sm:$0xff]  }
 0x34d   :  { %5703 = vmatpush1.bf16.msra.mxu0 %v7806_v61  ;;  %5789 = vmatpush1.bf16.msra.mxu1 %v7809_v62  ;;  %v7853_v61 = vld [vmem:[%s10432_s5 + $0x24c] ss:$16 sps:$4 sm:$0xff]   ;;  %v7848_v62 = vld [vmem:[%s10432_s5 + $0x240] ss:$16 sps:$4 sm:$0xff]  }
 0x34e   :  { %5704 = vmatprep.subr.bf16.mxu0 %v7814_v63  ;;  %5790 = vmatprep.subr.bf16.mxu1 %v7817_v0  ;;  %v7851_v63 = vld [vmem:[%s10432_s5 + $0x248] ss:$16 sps:$4 sm:$0xff]   ;;  %v7856_v0 = vld [vmem:[%s10432_s5 + $0x264] ss:$16 sps:$4 sm:$0xff]  }
 0x351   :  { %5705 = vmatpush1.bf16.msra.mxu0 %v7812_v1  ;;  %5791 = vmatpush1.bf16.msra.mxu1 %v7815_v2  ;;  %v7859_v1 = vld [vmem:[%s10432_s5 + $0x26c] ss:$16 sps:$4 sm:$0xff]   ;;  %v7854_v2 = vld [vmem:[%s10432_s5 + $0x260] ss:$16 sps:$4 sm:$0xff]  }
 0x352   :  { %5706 = vmatprep.subr.bf16.mxu0 %v7820_v3  ;;  %5792 = vmatprep.subr.bf16.mxu1 %v7823_v4  ;;  %v7857_v3 = vld [vmem:[%s10432_s5 + $0x268] ss:$16 sps:$4 sm:$0xff]   ;;  %v7862_v4 = vld [vmem:[%s10432_s5 + $0x284] ss:$16 sps:$4 sm:$0xff]  }
 0x355   :  { %5707 = vmatpush1.bf16.msra.mxu0 %v7818_v5  ;;  %5793 = vmatpush1.bf16.msra.mxu1 %v7821_v6  ;;  %v7865_v5 = vld [vmem:[%s10432_s5 + $0x28c] ss:$16 sps:$4 sm:$0xff]   ;;  %v7860_v6 = vld [vmem:[%s10432_s5 + $0x280] ss:$16 sps:$4 sm:$0xff]  }
 0x356   :  { %5708 = vmatprep.subr.bf16.mxu0 %v7826_v7  ;;  %5794 = vmatprep.subr.bf16.mxu1 %v7829_v9  ;;  %v7863_v7 = vld [vmem:[%s10432_s5 + $0x288] ss:$16 sps:$4 sm:$0xff]   ;;  %v7868_v9 = vld [vmem:[%s10432_s5 + $0x2a4] ss:$16 sps:$4 sm:$0xff]  }
 0x359   :  { %5709 = vmatpush1.bf16.msra.mxu0 %v7824_v10  ;;  %5795 = vmatpush1.bf16.msra.mxu1 %v7827_v11  ;;  %v7871_v10 = vld [vmem:[%s10432_s5 + $0x2ac] ss:$16 sps:$4 sm:$0xff]   ;;  %v7866_v11 = vld [vmem:[%s10432_s5 + $0x2a0] ss:$16 sps:$4 sm:$0xff]  }
 0x35a   :  { %5710 = vmatprep.subr.bf16.mxu0 %v7832_v12  ;;  %5796 = vmatprep.subr.bf16.mxu1 %v7835_v13  ;;  %v7869_v12 = vld [vmem:[%s10432_s5 + $0x2a8] ss:$16 sps:$4 sm:$0xff]   ;;  %v7874_v13 = vld [vmem:[%s10432_s5 + $0x2c4] ss:$16 sps:$4 sm:$0xff]  }
 0x35d   :  { %5711 = vmatpush1.bf16.msra.mxu0 %v7830_v16  ;;  %5797 = vmatpush1.bf16.msra.mxu1 %v7833_v17  ;;  %v7877_v16 = vld [vmem:[%s10432_s5 + $0x2cc] ss:$16 sps:$4 sm:$0xff]   ;;  %v7872_v17 = vld [vmem:[%s10432_s5 + $0x2c0] ss:$16 sps:$4 sm:$0xff]  }
 0x35e   :  { %5723 = vmatprep.subr.bf16.mxu0 %v7838_v20  ;;  %5809 = vmatprep.subr.bf16.mxu1 %v7841_v15  ;;  %v7875_v20 = vld [vmem:[%s10432_s5 + $0x2c8] ss:$16 sps:$4 sm:$0xff]   ;;  %v7880_v15 = vld [vmem:[%s10432_s5 + $0x2e4] ss:$16 sps:$4 sm:$0xff]  }
 0x3f3   :  { %v4783_v26 = vpop.f32.mrb[4].mxu0  ;;  %v4869_v27 = vpop.f32.mrb[4].mxu1 }
 0x3f4   :  { %v6692_v28 = vadd.f32 %v4783_v26, %v4049_v23  ;;  %v6696_v14 = vadd.f32 %v4869_v27, %v4057_v18  ;;  %v4785_v30 = vpop.f32.mrb[5].mxu0  ;;  %v4871_v19 = vpop.f32.mrb[5].mxu1  ;;  %v7884_v26 = vld [vmem:[%s10432_s5 + $0x300] ss:$16 sps:$4 sm:$0xff]   ;;  %v7887_v27 = vld [vmem:[%s10432_s5 + $0x308] ss:$16 sps:$4 sm:$0xff]  }
 0x3f5   :  { %v6693_v24 = vadd.f32 %v4785_v30, %v4053_v8  ;;  %v6697_v33 = vadd.f32 %v4871_v19, %v4061_v25  ;;  %v4787_v34 = vpop.f32.mrb[6].mxu0  ;;  %v4873_v35 = vpop.f32.mrb[6].mxu1  ;;  %v7890_v30 = vld [vmem:[%s10432_s5 + $0x320] ss:$16 sps:$4 sm:$0xff]   ;;  %v7893_v19 = vld [vmem:[%s10432_s5 + $0x328] ss:$16 sps:$4 sm:$0xff]  }
 0x3f6   :  { %v6694_v36 = vadd.f32 %v4787_v34, %v4049_v23  ;;  %v6698_v37 = vadd.f32 %v4873_v35, %v4057_v18  ;;  %v4789_v38 = vpop.f32.mrb[7].mxu0  ;;  %v4875_v21 = vpop.f32.mrb[7].mxu1  ;;  %v4878_v42 = vmax.f32 %v6692_v28, 0.0  ;;  %v4880_v43 = vmax.f32 %v6696_v14, 0.0  ;;  %v7878_v23 = vld [vmem:[%s10432_s5 + $0x2e0] ss:$16 sps:$4 sm:$0xff]  }
 0x3f7   :  { %v6695_v29 = vadd.f32 %v4789_v38, %v4053_v8  ;;  %v6699_v41 = vadd.f32 %v4875_v21, %v4061_v25  ;;  %v4879_v46 = vmax.f32 %v6693_v24, 0.0  ;;  %v4881_v47 = vmax.f32 %v6697_v33, 0.0  ;;  %v7881_v18 = vld [vmem:[%s10432_s5 + $0x2e8] ss:$16 sps:$4 sm:$0xff]   ;;  %v7886_v8 = vld [vmem:[%s10432_s5 + $0x304] ss:$16 sps:$4 sm:$0xff]  }
 0x3f8   :  { %v4882_v44 = vmax.f32 %v6694_v36, 0.0  ;;  %v4884_v45 = vmax.f32 %v6698_v37, 0.0  ;;  %v7889_v25 = vld [vmem:[%s10432_s5 + $0x30c] ss:$16 sps:$4 sm:$0xff]   ;;  %v7892_v28 = vld [vmem:[%s10432_s5 + $0x324] ss:$16 sps:$4 sm:$0xff]  }
 0x3f9   :  { %v4883_v48 = vmax.f32 %v6695_v29, 0.0  ;;  %v4885_v49 = vmax.f32 %v6699_v41, 0.0  ;;  %v7895_v14 = vld [vmem:[%s10432_s5 + $0x32c] ss:$16 sps:$4 sm:$0xff]   ;;  %v7898_v24 = vld [vmem:[%s10432_s5 + $0x344] ss:$16 sps:$4 sm:$0xff]  }
 0x3fa   :  { %v4886_v50 = vpack.c.bf16 %v4882_v44, %v4878_v42  ;;  %v10220_v51 = vpack.c.bf16 %v4884_v45, %v4880_v43  ;;  %v7901_v33 = vld [vmem:[%s10432_s5 + $0x34c] ss:$16 sps:$4 sm:$0xff]   ;;  %v7896_v34 = vld [vmem:[%s10432_s5 + $0x340] ss:$16 sps:$4 sm:$0xff]   ;;  %v7899_v35 = vld [vmem:[%s10432_s5 + $0x348] ss:$16 sps:$4 sm:$0xff]  }
 0x3fb   :  { %v4887_v52 = vpack.c.bf16 %v4883_v48, %v4879_v46  ;;  %v4889_v53 = vpack.c.bf16 %v4885_v49, %v4881_v47  ;;  %v7904_v36 = vld [vmem:[%s10432_s5 + $0x364] ss:$16 sps:$4 sm:$0xff]   ;;  %v7907_v37 = vld [vmem:[%s10432_s5 + $0x36c] ss:$16 sps:$4 sm:$0xff]   ;;  %v7902_v38 = vld [vmem:[%s10432_s5 + $0x360] ss:$16 sps:$4 sm:$0xff]  }
 0x3fc   :  { %v7905_v21 = vld [vmem:[%s10432_s5 + $0x368] ss:$16 sps:$4 sm:$0xff]   ;;  %v7910_v29 = vld [vmem:[%s10432_s5 + $0x384] ss:$16 sps:$4 sm:$0xff]   ;;  %v7913_v41 = vld [vmem:[%s10432_s5 + $0x38c] ss:$16 sps:$4 sm:$0xff]  }
 0x3fd   :  { %5712 = vmatprep.mubr.bf16.mxu0 %v4887_v52  ;;  %5798 = vmatprep.mubr.bf16.mxu1 %v4887_v52  ;;  %v7908_v42 = vld [vmem:[%s10432_s5 + $0x380] ss:$16 sps:$4 sm:$0xff]   ;;  %v7911_v43 = vld [vmem:[%s10432_s5 + $0x388] ss:$16 sps:$4 sm:$0xff]   ;;  %v7916_v44 = vld [vmem:[%s10432_s5 + $0x3a4] ss:$16 sps:$4 sm:$0xff]  }
 0x3fe   :  { %5713 = vmatmul.mubr.bf16.vlgmr.msra.gmra.mrb[8].mxu0 %v4886_v50  ;;  %5799 = vmatmul.mubr.bf16.vlgmr.msra.gmra.mrb[8].mxu1 %v4886_v50  ;;  %v7919_v45 = vld [vmem:[%s10432_s5 + $0x3ac] ss:$16 sps:$4 sm:$0xff]   ;;  %v7914_v46 = vld [vmem:[%s10432_s5 + $0x3a0] ss:$16 sps:$4 sm:$0xff]   ;;  %v7917_v47 = vld [vmem:[%s10432_s5 + $0x3a8] ss:$16 sps:$4 sm:$0xff]  }
 0x3ff   :  { %5724 = vmatpush1.bf16.msra.mxu0 %v7836_v54  ;;  %5810 = vmatpush1.bf16.msra.mxu1 %v7839_v55  ;;  %v7922_v48 = vld [vmem:[%s10432_s5 + $0x3c4] ss:$16 sps:$4 sm:$0xff]   ;;  %v7925_v49 = vld [vmem:[%s10432_s5 + $0x3cc] ss:$16 sps:$4 sm:$0xff]   ;;  %v7920_v50 = vld [vmem:[%s10432_s5 + $0x3c0] ss:$16 sps:$4 sm:$0xff]  }
 0x400   :  { %5755 = vmatprep.mubr.bf16.mxu0 %v4889_v53  ;;  %5841 = vmatprep.mubr.bf16.mxu1 %v4889_v53  ;;  %v7923_v52 = vld [vmem:[%s10432_s5 + $0x3c8] ss:$16 sps:$4 sm:$0xff]   ;;  %v7928_v53 = vld [vmem:[%s10432_s5 + $0x3e4] ss:$16 sps:$4 sm:$0xff]   ;;  %v7931_v54 = vld [vmem:[%s10432_s5 + $0x3ec] ss:$16 sps:$4 sm:$0xff]  }
 0x401   :  { %5725 = vmatprep.subr.bf16.mxu0 %v7844_v56  ;;  %5811 = vmatprep.subr.bf16.mxu1 %v7847_v57  ;;  %v7926_v55 = vld [vmem:[%s10432_s5 + $0x3e0] ss:$16 sps:$4 sm:$0xff]   ;;  %v7929_v56 = vld [vmem:[%s10432_s5 + $0x3e8] ss:$16 sps:$4 sm:$0xff]  }
 0x402   :  { %v5018_v57 = vld [vmem:[%s10435_s6] sm:$0xf] }
 0x403   :  { %5726 = vmatpush1.bf16.msra.mxu0 %v7842_v58  ;;  %5812 = vmatpush1.bf16.msra.mxu1 %v7845_v59  ;;  %v5023_v58 = vrot.slane %v5018_v57, %v9813_v31  ;;  %v5031_v59 = vrot.slane %v5018_v57, %v9815_v32 }
 0x404   :  { %5727 = vmatprep.subr.bf16.mxu0 %v7850_v60  ;;  %5813 = vmatprep.subr.bf16.mxu1 %v7853_v61  ;;  %v5027_v60 = vrot.slane %v5018_v57, %v9817_v39  ;;  %v5035_v61 = vrot.slane %v5018_v57, %v9819_v40 }
 0x407   :  { %5728 = vmatpush1.bf16.msra.mxu0 %v7848_v62  ;;  %5814 = vmatpush1.bf16.msra.mxu1 %v7851_v63 }
 0x408   :  { %5729 = vmatprep.subr.bf16.mxu0 %v7856_v0  ;;  %5815 = vmatprep.subr.bf16.mxu1 %v7859_v1 }
 0x40b   :  { %5730 = vmatpush1.bf16.msra.mxu0 %v7854_v2  ;;  %5816 = vmatpush1.bf16.msra.mxu1 %v7857_v3 }
 0x40c   :  { %5731 = vmatprep.subr.bf16.mxu0 %v7862_v4  ;;  %5817 = vmatprep.subr.bf16.mxu1 %v7865_v5 }
 0x40f   :  { %5732 = vmatpush1.bf16.msra.mxu0 %v7860_v6  ;;  %5818 = vmatpush1.bf16.msra.mxu1 %v7863_v7 }
 0x410   :  { %5733 = vmatprep.subr.bf16.mxu0 %v7868_v9  ;;  %5819 = vmatprep.subr.bf16.mxu1 %v7871_v10 }
 0x413   :  { %5734 = vmatpush1.bf16.msra.mxu0 %v7866_v11  ;;  %5820 = vmatpush1.bf16.msra.mxu1 %v7869_v12 }
 0x414   :  { %5735 = vmatprep.subr.bf16.mxu0 %v7874_v13  ;;  %5821 = vmatprep.subr.bf16.mxu1 %v7877_v16 }
 0x417   :  { %5736 = vmatpush1.bf16.msra.mxu0 %v7872_v17  ;;  %5822 = vmatpush1.bf16.msra.mxu1 %v7875_v20 }
 0x418   :  { %5737 = vmatprep.subr.bf16.mxu0 %v7880_v15  ;;  %5823 = vmatprep.subr.bf16.mxu1 %v7883_v22 }
 0x41b   :  { %5738 = vmatpush1.bf16.msra.mxu0 %v7878_v23  ;;  %5824 = vmatpush1.bf16.msra.mxu1 %v7881_v18 }
 0x41c   :  { %5739 = vmatprep.subr.bf16.mxu0 %v7886_v8  ;;  %5825 = vmatprep.subr.bf16.mxu1 %v7889_v25 }
 0x41f   :  { %5740 = vmatpush1.bf16.msra.mxu0 %v7884_v26  ;;  %5826 = vmatpush1.bf16.msra.mxu1 %v7887_v27 }
 0x420   :  { %5741 = vmatprep.subr.bf16.mxu0 %v7892_v28  ;;  %5827 = vmatprep.subr.bf16.mxu1 %v7895_v14 }
 0x423   :  { %5742 = vmatpush1.bf16.msra.mxu0 %v7890_v30  ;;  %5828 = vmatpush1.bf16.msra.mxu1 %v7893_v19 }
 0x424   :  { %5743 = vmatprep.subr.bf16.mxu0 %v7898_v24  ;;  %5829 = vmatprep.subr.bf16.mxu1 %v7901_v33 }
 0x427   :  { %5744 = vmatpush1.bf16.msra.mxu0 %v7896_v34  ;;  %5830 = vmatpush1.bf16.msra.mxu1 %v7899_v35 }
 0x428   :  { %5745 = vmatprep.subr.bf16.mxu0 %v7904_v36  ;;  %5831 = vmatprep.subr.bf16.mxu1 %v7907_v37 }
 0x42b   :  { %5746 = vmatpush1.bf16.msra.mxu0 %v7902_v38  ;;  %5832 = vmatpush1.bf16.msra.mxu1 %v7905_v21 }
 0x42c   :  { %5747 = vmatprep.subr.bf16.mxu0 %v7910_v29  ;;  %5833 = vmatprep.subr.bf16.mxu1 %v7913_v41 }
 0x42f   :  { %5748 = vmatpush1.bf16.msra.mxu0 %v7908_v42  ;;  %5834 = vmatpush1.bf16.msra.mxu1 %v7911_v43 }
 0x430   :  { %5749 = vmatprep.subr.bf16.mxu0 %v7916_v44  ;;  %5835 = vmatprep.subr.bf16.mxu1 %v7919_v45 }
 0x433   :  { %5750 = vmatpush1.bf16.msra.mxu0 %v7914_v46  ;;  %5836 = vmatpush1.bf16.msra.mxu1 %v7917_v47 }
 0x434   :  { %5751 = vmatprep.subr.bf16.mxu0 %v7922_v48  ;;  %5837 = vmatprep.subr.bf16.mxu1 %v7925_v49 }
 0x437   :  { %5752 = vmatpush1.bf16.msra.mxu0 %v7920_v50  ;;  %5838 = vmatpush1.bf16.msra.mxu1 %v7923_v52 }
 0x438   :  { %5753 = vmatprep.subr.bf16.mxu0 %v7928_v53  ;;  %5839 = vmatprep.subr.bf16.mxu1 %v7931_v54 }
 0x43b   :  { %5754 = vmatpush1.bf16.msra.mxu0 %v7926_v55  ;;  %5840 = vmatpush1.bf16.msra.mxu1 %v7929_v56 }
 0x43e   :  { %5756 = vmatmul.mubr.bf16.vlgmr.msra.gmra.mrb[8].mxu0 %v10220_v51  ;;  %5842 = vmatmul.mubr.bf16.vlgmr.msra.gmra.mrb[8].mxu1 %v10220_v51 }
 0x511   :  { %v5757_v62 = vpop.f32.mrb[8].mxu0  ;;  %v5843_v63 = vpop.f32.mrb[8].mxu1 }
 0x512   :  { %v6700_v0 = vadd.f32 %v5757_v62, %v5023_v58  ;;  %v6704_v1 = vadd.f32 %v5843_v63, %v5031_v59  ;;  %v5759_v2 = vpop.f32.mrb[9].mxu0  ;;  %v5845_v3 = vpop.f32.mrb[9].mxu1 }
 0x513   :  { %v6701_v4 = vadd.f32 %v5759_v2, %v5027_v60  ;;  %v6705_v51 = vadd.f32 %v5845_v3, %v5035_v61  ;;  %v5761_v5 = vpop.f32.mrb[10].mxu0  ;;  %v5847_v6 = vpop.f32.mrb[10].mxu1 }
 0x514   :  { %v5852_v7 = vmax.f32 %v6700_v0, 0.0  ;;  %v5854_v9 = vmax.f32 %v6704_v1, 0.0  ;;  %v6702_v10 = vadd.f32 %v5761_v5, %v5023_v58  ;;  %v6706_v31 = vadd.f32 %v5847_v6, %v5031_v59  ;;  %v5763_v11 = vpop.f32.mrb[11].mxu0  ;;  %v5849_v32 = vpop.f32.mrb[11].mxu1 }
 0x515   :  { %v5853_v12 = vmax.f32 %v6701_v4, 0.0  ;;  %v5855_v39 = vmax.f32 %v6705_v51, 0.0  ;;  %v6703_v13 = vadd.f32 %v5763_v11, %v5027_v60  ;;  %v6707_v40 = vadd.f32 %v5849_v32, %v5035_v61 }
 0x516   :  { %v5856_v16 = vmax.f32 %v6702_v10, 0.0  ;;  %v5858_v17 = vmax.f32 %v6706_v31, 0.0 }
 0x517   :  { %v6680_v20 = vpack.c.bf16 %v5853_v12, %v5852_v7  ;;  %v6681_v15 = vpack.c.bf16 %v5855_v39, %v5854_v9  ;;  %v5857_v22 = vmax.f32 %v6703_v13, 0.0  ;;  %v5859_v23 = vmax.f32 %v6707_v40, 0.0 }
 0x519   :  { %5884 = vst [vmem:[%s10436_s7] sm:$0xff] %v6680_v20  ;;  %5885 = vst [vmem:[%s10436_s7 + $0x8] sm:$0xff] %v6681_v15  ;;  %v6682_v18 = vpack.c.bf16 %v5857_v22, %v5856_v16  ;;  %v6683_v8 = vpack.c.bf16 %v5859_v23, %v5858_v17 }
 0x51b   :  { %5886 = vst [vmem:[%s10436_s7 + $0x10] sm:$0xff] %v6682_v18  ;;  %5887 = vst [vmem:[%s10436_s7 + $0x18] sm:$0xff] %v6683_v8 }

</bundles_post_ra>
